<compile_context>
chip_gen: v7x
topology: tpu7x:2x2x1
jax: 0.10.0
libtpu: 0.0.40
codegen_flags: <defaults>
</compile_context>

<pallas_src>
import jax
import jax.numpy as jnp
from jax import lax
from jax.experimental import pallas as pl
from jax.experimental.pallas import tpu as pltpu


# ---------------------------------------------------------------------------
# Kernel: one grid step = Nb samples, full STFEM pipeline, lane-dense (V, T*C)
# ---------------------------------------------------------------------------
def stfem_kernel(x_ref, asum_ref, wa_ref, ba_ref, wb_ref, bb_ref, wd_ref,
                 s1_ref, h1_ref, wt_ref, s2_ref, h2_ref, out_ref):
    nb, V, TC = x_ref.shape
    ns = asum_ref.shape[0]
    t_ic = wa_ref.shape[2]                    # = T * inter_c (= A1.size(-1))
    inv_n = 1.0 / float(t_ic)

    s1 = s1_ref[...]                          # (1, T*C) f32, BN1 scale (pre-tiled)
    h1 = h1_ref[...]                          # (1, T*C) f32, BN1 shift (+ conv_d biases)
    s2 = s2_ref[...]
    h2 = h2_ref[...]

    for n in range(nb):                       # static unroll over the sample block
        x_s = x_ref[n]                        # (V, T*C) f32, lane-dense
        xb = x_s.astype(jnp.bfloat16)         # bf16 MXU operand, f32 accumulation

        y_acc = jnp.zeros((V, TC), jnp.float32)
        for i in range(ns):                   # static unroll over the 3 subsets
            # conv_a / conv_b: ONE matmul each over all T frames
            # ((V, T*C) @ T-block-diag (T*C, T*inter_c)); biases added in f32.
            a2 = jnp.dot(xb, wa_ref[i],
                         preferred_element_type=jnp.float32) + ba_ref[i]
            b2 = jnp.dot(xb, wb_ref[i],
                         preferred_element_type=jnp.float32) + bb_ref[i]

            # attention logits in ONE (V, 128) @ (128, V) matmul, transposed
            # layout: logits_t[w, v] = sum_{t,i} b[t,w,i] * a[t,v,i]
            logits_t = lax.dot_general(
                b2.astype(jnp.bfloat16), a2.astype(jnp.bfloat16),
                (((1,), (1,)), ((), ())),
                preferred_element_type=jnp.float32) * inv_n       # (V, V)

            # softmax over source joints (lane axis here == torch dim=-2), f32;
            # divide goes to the EUP via approx reciprocal.
            m = jnp.max(logits_t, axis=-1, keepdims=True)
            p = jnp.exp(logits_t - m)
            denom = jnp.sum(p, axis=-1, keepdims=True)
            attn_t = p * pl.reciprocal(denom, approx=True) + asum_ref[i]

            # graph aggregation: ONE (V, V) @ (V, T*C) matmul
            z = jnp.dot(attn_t.astype(jnp.bfloat16), xb,
                        preferred_element_type=jnp.float32)        # (V, T*C)

            # conv_d: ONE matmul over all T frames (T-block-diag weight);
            # its bias is folded into the BN1 shift.
            y_acc = y_acc + jnp.dot(z.astype(jnp.bfloat16), wd_ref[i],
                                    preferred_element_type=jnp.float32)

        # BN1 (eval, folded) + identity gcn residual + ReLU     (pure VPU, f32)
        y = jnp.maximum(y_acc * s1 + h1 + x_s, 0.0)

        # unit_tcn: whole (kt x 1) temporal conv as ONE banded matmul
        # (V, T*C) @ (T*C, T*C); zero padding lives in the zero blocks.
        t_out = jnp.dot(y.astype(jnp.bfloat16), wt_ref[...],
                        preferred_element_type=jnp.float32)

        # BN2 (eval, tcn bias folded) + identity STFEM residual + ReLU
        out_ref[n] = jnp.maximum(t_out * s2 + h2 + x_s, 0.0).astype(out_ref.dtype)


# ---------------------------------------------------------------------------
# Wrapper-side weight / layout plumbing
# ---------------------------------------------------------------------------
def _time_block_diag(w_sio, t):
    """(ns, C_in, C_out) 1x1-conv weights -> (ns, T*C_in, T*C_out) block-diag."""
    ns, c_in, c_out = w_sio.shape
    eye = jnp.eye(t, dtype=w_sio.dtype)
    big = eye[None, :, None, :, None] * w_sio[:, None, :, None, :]
    return big.reshape(ns, t * c_in, t * c_out)


def _time_banded_conv(wt_kio, t):
    """(kt, C_in, C_out) taps -> (T*C_in, T*C_out) banded matrix implementing the
    zero-padded, stride-1, (kt x 1) temporal conv on the lane-dense layout."""
    kt, c_in, c_out = wt_kio.shape
    pad = (kt - 1) // 2
    dt = jnp.arange(t)[:, None] - jnp.arange(t)[None, :] + pad       # (T_in, T_out)
    valid = ((dt >= 0) & (dt < kt)).astype(wt_kio.dtype)
    taps = wt_kio[jnp.clip(dt, 0, kt - 1)] * valid[:, :, None, None]  # (T,T,C,C)
    return jnp.transpose(taps, (0, 2, 1, 3)).reshape(t * c_in, t * c_out)


def stfem_forward(x, A, PA, wa, ba, wb, bb, wd, bd,
                  gamma1, beta1, rmean1, rvar1,
                  wt, bt, gamma2, beta2, rmean2, rvar2,
                  eps=1e-5, block_n=2):
    """STFEM forward, eval-mode BN, in_channels == out_channels, stride == 1."""
    N, C, T, V = x.shape
    ns, inter_c = wa.shape[0], wa.shape[1]
    TC, TI = T * C, T * inter_c

    # sample-block size: amortize per-step overhead but keep >= 2 grid steps
    nb = max(1, min(block_n, N))
    if N >= 2:
        nb = min(nb, N // 2)
    while N % nb:
        nb -= 1

    # lane-dense activations: x_lane[n, v, t*C + c] = x[n, c, t, v]
    x_lane = jnp.transpose(x, (0, 3, 2, 1)).reshape(N, V, TC)
    a_sum_t = jnp.transpose(A + PA, (0, 2, 1))                 # (A + PA)^T per subset

    bf16 = jnp.bfloat16
    wa_big = _time_block_diag(jnp.transpose(wa, (0, 2, 1)), T).astype(bf16)
    wb_big = _time_block_diag(jnp.transpose(wb, (0, 2, 1)), T).astype(bf16)
    wd_big = _time_block_diag(jnp.transpose(wd, (0, 2, 1)), T).astype(bf16)
    wt_big = _time_banded_conv(jnp.transpose(wt, (2, 1, 0)), T).astype(bf16)
    ba_big = jnp.tile(ba, (1, T)).reshape(ns, 1, TI).astype(jnp.float32)
    bb_big = jnp.tile(bb, (1, T)).reshape(ns, 1, TI).astype(jnp.float32)

    # fold eval-mode BatchNorms + conv_d / tcn biases; pre-tile to lane layout
    s1 = gamma1 / jnp.sqrt(rvar1 + eps)
    h1 = beta1 + (jnp.sum(bd, axis=0) - rmean1) * s1
    s2 = gamma2 / jnp.sqrt(rvar2 + eps)
    h2 = beta2 + (bt - rmean2) * s2
    s1 = jnp.tile(s1, T).reshape(1, TC)
    h1 = jnp.tile(h1, T).reshape(1, TC)
    s2 = jnp.tile(s2, T).reshape(1, TC)
    h2 = jnp.tile(h2, T).reshape(1, TC)

    grid_spec = pltpu.PrefetchScalarGridSpec(
        num_scalar_prefetch=0,
        grid=(N // nb,),
        in_specs=[
            pl.BlockSpec((nb, V, TC), lambda g: (g, 0, 0)),       # x (lane-dense)
            pl.BlockSpec((ns, V, V), lambda g: (0, 0, 0)),        # (A + PA)^T
            pl.BlockSpec((ns, TC, TI), lambda g: (0, 0, 0)),      # conv_a block-diag W
            pl.BlockSpec((ns, 1, TI), lambda g: (0, 0, 0)),       # conv_a bias (tiled)
            pl.BlockSpec((ns, TC, TI), lambda g: (0, 0, 0)),      # conv_b block-diag W
            pl.BlockSpec((ns, 1, TI), lambda g: (0, 0, 0)),       # conv_b bias (tiled)
            pl.BlockSpec((ns, TC, TC), lambda g: (0, 0, 0)),      # conv_d block-diag W
            pl.BlockSpec((1, TC), lambda g: (0, 0)),              # BN1 scale (tiled)
            pl.BlockSpec((1, TC), lambda g: (0, 0)),              # BN1 shift (tiled)
            pl.BlockSpec((TC, TC), lambda g: (0, 0)),             # tcn banded W
            pl.BlockSpec((1, TC), lambda g: (0, 0)),              # BN2 scale (tiled)
            pl.BlockSpec((1, TC), lambda g: (0, 0)),              # BN2 shift (tiled)
        ],
        out_specs=pl.BlockSpec((nb, V, TC), lambda g: (g, 0, 0)),
    )

    y_lane = pl.pallas_call(
        stfem_kernel,
        out_shape=jax.ShapeDtypeStruct((N, V, TC), x.dtype),
        grid_spec=grid_spec,
        compiler_params=pltpu.CompilerParams(
            dimension_semantics=("parallel",),
            vmem_limit_bytes=32 * 1024 * 1024,
        ),
    )(x_lane, a_sum_t, wa_big, ba_big, wb_big, bb_big, wd_big,
      s1, h1, wt_big, s2, h2)

    return jnp.transpose(y_lane.reshape(N, V, T, C), (0, 3, 2, 1))   # (N, C, T, V)


# ---------------------------------------------------------------------------
# Pure-JAX reference (mirrors the PyTorch module, eval-mode BN)
# ---------------------------------------------------------------------------
def stfem_reference(x, A, PA, wa, ba, wb, bb, wd, bd,
                    gamma1, beta1, rmean1, rvar1,
                    wt, bt, gamma2, beta2, rmean2, rvar2, eps=1e-5):
    N, C, T, V = x.shape
    ns, ic = wa.shape[0], wa.shape[1]
    kt = wt.shape[2]
    pad = (kt - 1) // 2
    Asum = A + PA
    y = jnp.zeros((N, C, T, V), jnp.float32)
    for i in range(ns):
        a = jnp.einsum('nctv,ic->nitv', x, wa[i]) + ba[i][None, :, None, None]
        b = jnp.einsum('nctv,ic->nitv', x, wb[i]) + bb[i][None, :, None, None]
        A1 = a.transpose(0, 3, 1, 2).reshape(N, V, ic * T)
        A2 = b.reshape(N, ic * T, V)
        soft = jax.nn.softmax(jnp.matmul(A1, A2) / (ic * T), axis=-2)
        attn = soft + Asum[i][None]
        z_pre = jnp.matmul(x.reshape(N, C * T, V), attn).reshape(N, C, T, V)
        y = y + jnp.einsum('nctv,oc->notv', z_pre, wd[i]) + bd[i][None, :, None, None]
    y = ((y - rmean1[None, :, None, None]) / jnp.sqrt(rvar1[None, :, None, None] + eps)
         * gamma1[None, :, None, None] + beta1[None, :, None, None])
    y = jax.nn.relu(y + x)
    ypad = jnp.pad(y, ((0, 0), (0, 0), (pad, pad), (0, 0)))
    out = jnp.zeros((N, C, T, V), jnp.float32)
    for dt in range(kt):
        out = out + jnp.einsum('nctv,oc->notv', ypad[:, :, dt:dt + T, :], wt[:, :, dt])
    out = out + bt[None, :, None, None]
    out = ((out - rmean2[None, :, None, None]) / jnp.sqrt(rvar2[None, :, None, None] + eps)
           * gamma2[None, :, None, None] + beta2[None, :, None, None])
    return jax.nn.relu(out + x)


if __name__ == "__main__":
    key = jax.random.PRNGKey(0)
    # batch, channels (in == out -> identity residuals), frames, joints
    N, C, T, V = 4, 32, 16, 25
    num_subset, coff_embedding, kt = 3, 4, 9
    inter_c = C // coff_embedding                                 # 8

    ks = jax.random.split(key, 18)
    x = jax.random.normal(ks[0], (N, C, T, V), jnp.float32)

    A = jax.random.uniform(ks[1], (num_subset, V, V), jnp.float32, 0.0, 0.2)
    PA = jnp.full((num_subset, V, V), 1e-6, jnp.float32)

    wa = jax.random.normal(ks[2], (num_subset, inter_c, C), jnp.float32) * jnp.sqrt(2.0 / C)
    ba = jax.random.normal(ks[3], (num_subset, inter_c), jnp.float32) * 0.05
    wb = jax.random.normal(ks[4], (num_subset, inter_c, C), jnp.float32) * jnp.sqrt(2.0 / C)
    bb = jax.random.normal(ks[5], (num_subset, inter_c), jnp.float32) * 0.05
    wd = jax.random.normal(ks[6], (num_subset, C, C), jnp.float32) * jnp.sqrt(2.0 / (C * num_subset))
    bd = jax.random.normal(ks[7], (num_subset, C), jnp.float32) * 0.05

    gamma1 = jax.random.uniform(ks[8], (C,), jnp.float32, 0.5, 1.5)
    beta1 = jax.random.normal(ks[9], (C,), jnp.float32) * 0.05
    rmean1 = jax.random.normal(ks[10], (C,), jnp.float32) * 0.05
    rvar1 = jax.random.uniform(ks[11], (C,), jnp.float32, 0.5, 1.5)

    wt = jax.random.normal(ks[12], (C, C, kt), jnp.float32) * jnp.sqrt(2.0 / (C * kt))
    bt = jax.random.normal(ks[13], (C,), jnp.float32) * 0.05
    gamma2 = jax.random.uniform(ks[14], (C,), jnp.float32, 0.5, 1.5)
    beta2 = jax.random.normal(ks[15], (C,), jnp.float32) * 0.05
    rmean2 = jax.random.normal(ks[16], (C,), jnp.float32) * 0.05
    rvar2 = jax.random.uniform(ks[17], (C,), jnp.float32, 0.5, 1.5)

    args = (x, A, PA, wa, ba, wb, bb, wd, bd,
            gamma1, beta1, rmean1, rvar1,
            wt, bt, gamma2, beta2, rmean2, rvar2)

    out = jax.jit(stfem_forward)(*args)
    jax.block_until_ready(out)
    assert out.shape == (N, C, T, V), out.shape
    assert bool(jnp.all(jnp.isfinite(out)))

    # correctness vs. pure-JAX reference (relaxed: bf16 MXU operands)
    ref = stfem_reference(*args)
    err = float(jnp.max(jnp.abs(out - ref)))
    scale = float(jnp.max(jnp.abs(ref)))
    assert err <= 0.1 * scale + 1e-3, (err, scale)

    print("KERNEL_OK")
</pallas_src>

<mosaic_0001>
module attributes {stable_mosaic.version = 11 : i64} {
  func.func @stfem_kernel(%arg0: i32, %arg1: memref<2x25x512xf32, #tpu.memory_space<vmem>>, %arg2: memref<3x25x25xf32, #tpu.memory_space<vmem>>, %arg3: memref<3x512x128xbf16, #tpu.memory_space<vmem>>, %arg4: memref<3x1x128xf32, #tpu.memory_space<vmem>>, %arg5: memref<3x512x128xbf16, #tpu.memory_space<vmem>>, %arg6: memref<3x1x128xf32, #tpu.memory_space<vmem>>, %arg7: memref<3x512x512xbf16, #tpu.memory_space<vmem>>, %arg8: memref<1x512xf32, #tpu.memory_space<vmem>>, %arg9: memref<1x512xf32, #tpu.memory_space<vmem>>, %arg10: memref<512x512xbf16, #tpu.memory_space<vmem>>, %arg11: memref<1x512xf32, #tpu.memory_space<vmem>>, %arg12: memref<1x512xf32, #tpu.memory_space<vmem>>, %arg13: memref<2x25x512xf32, #tpu.memory_space<vmem>>) attributes {dimension_semantics = [#tpu.dimension_semantics<parallel>], iteration_bounds = array<i64: 2>, scalar_prefetch = 0 : i64, scratch_operands = 0 : i64, tpu.core_type = #tpu.core_type<tc>, window_params = [{transform_indices = @transform_0, window_bounds = array<i64: 2, 25, 512>}, {pipeline_mode = #tpu.pipeline_mode<synchronous>, transform_indices = @transform_1, window_bounds = array<i64: 3, 25, 25>}, {pipeline_mode = #tpu.pipeline_mode<synchronous>, transform_indices = @transform_2, window_bounds = array<i64: 3, 512, 128>}, {pipeline_mode = #tpu.pipeline_mode<synchronous>, transform_indices = @transform_3, window_bounds = array<i64: 3, 1, 128>}, {pipeline_mode = #tpu.pipeline_mode<synchronous>, transform_indices = @transform_4, window_bounds = array<i64: 3, 512, 128>}, {pipeline_mode = #tpu.pipeline_mode<synchronous>, transform_indices = @transform_5, window_bounds = array<i64: 3, 1, 128>}, {pipeline_mode = #tpu.pipeline_mode<synchronous>, transform_indices = @transform_6, window_bounds = array<i64: 3, 512, 512>}, {pipeline_mode = #tpu.pipeline_mode<synchronous>, transform_indices = @transform_7, window_bounds = array<i64: 1, 512>}, {pipeline_mode = #tpu.pipeline_mode<synchronous>, transform_indices = @transform_8, window_bounds = array<i64: 1, 512>}, {pipeline_mode = #tpu.pipeline_mode<synchronous>, transform_indices = @transform_9, window_bounds = array<i64: 512, 512>}, {pipeline_mode = #tpu.pipeline_mode<synchronous>, transform_indices = @transform_10, window_bounds = array<i64: 1, 512>}, {pipeline_mode = #tpu.pipeline_mode<synchronous>, transform_indices = @transform_11, window_bounds = array<i64: 1, 512>}, {transform_indices = @transform_12, window_bounds = array<i64: 2, 25, 512>}]} {
    %c0 = arith.constant 0 : index
    %c0_0 = arith.constant 0 : index
    %0 = vector.load %arg8[%c0, %c0_0] : memref<1x512xf32, #tpu.memory_space<vmem>>, vector<1x512xf32>
    %c0_1 = arith.constant 0 : index
    %c0_2 = arith.constant 0 : index
    %1 = vector.load %arg9[%c0_1, %c0_2] : memref<1x512xf32, #tpu.memory_space<vmem>>, vector<1x512xf32>
    %c0_3 = arith.constant 0 : index
    %c0_4 = arith.constant 0 : index
    %2 = vector.load %arg11[%c0_3, %c0_4] : memref<1x512xf32, #tpu.memory_space<vmem>>, vector<1x512xf32>
    %c0_5 = arith.constant 0 : index
    %c0_6 = arith.constant 0 : index
    %3 = vector.load %arg12[%c0_5, %c0_6] : memref<1x512xf32, #tpu.memory_space<vmem>>, vector<1x512xf32>
    %c0_7 = arith.constant 0 : index
    %c0_8 = arith.constant 0 : index
    %c0_9 = arith.constant 0 : index
    %4 = vector.load %arg1[%c0_7, %c0_8, %c0_9] : memref<2x25x512xf32, #tpu.memory_space<vmem>>, vector<1x25x512xf32>
    %5 = vector.shape_cast %4 : vector<1x25x512xf32> to vector<25x512xf32>
    %6 = arith.truncf %5 : vector<25x512xf32> to vector<25x512xbf16>
    %cst = arith.constant 0.000000e+00 : f32
    %7 = vector.broadcast %cst : f32 to vector<25x512xf32>
    %c0_10 = arith.constant 0 : index
    %c0_11 = arith.constant 0 : index
    %c0_12 = arith.constant 0 : index
    %8 = vector.load %arg3[%c0_10, %c0_11, %c0_12] : memref<3x512x128xbf16, #tpu.memory_space<vmem>>, vector<1x512x128xbf16>
    %9 = vector.shape_cast %8 : vector<1x512x128xbf16> to vector<512x128xbf16>
    %cst_13 = arith.constant dense<0.000000e+00> : vector<25x128xf32>
    %10 = tpu.matmul %6, %9, %cst_13 {dimension_numbers = #tpu.dot_dimension_numbers<[1], [0], [0], [1], [0, 0, 1, 1], [], []>} : vector<25x512xbf16>, vector<512x128xbf16>, vector<25x128xf32> -> vector<25x128xf32>
    %c0_14 = arith.constant 0 : index
    %c0_15 = arith.constant 0 : index
    %c0_16 = arith.constant 0 : index
    %11 = vector.load %arg4[%c0_14, %c0_15, %c0_16] : memref<3x1x128xf32, #tpu.memory_space<vmem>>, vector<1x1x128xf32>
    %12 = vector.shape_cast %11 : vector<1x1x128xf32> to vector<1x128xf32>
    %13 = vector.broadcast %12 : vector<1x128xf32> to vector<25x128xf32>
    %14 = arith.addf %10, %13 : vector<25x128xf32>
    %c0_17 = arith.constant 0 : index
    %c0_18 = arith.constant 0 : index
    %c0_19 = arith.constant 0 : index
    %15 = vector.load %arg5[%c0_17, %c0_18, %c0_19] : memref<3x512x128xbf16, #tpu.memory_space<vmem>>, vector<1x512x128xbf16>
    %16 = vector.shape_cast %15 : vector<1x512x128xbf16> to vector<512x128xbf16>
    %cst_20 = arith.constant dense<0.000000e+00> : vector<25x128xf32>
    %17 = tpu.matmul %6, %16, %cst_20 {dimension_numbers = #tpu.dot_dimension_numbers<[1], [0], [0], [1], [0, 0, 1, 1], [], []>} : vector<25x512xbf16>, vector<512x128xbf16>, vector<25x128xf32> -> vector<25x128xf32>
    %c0_21 = arith.constant 0 : index
    %c0_22 = arith.constant 0 : index
    %c0_23 = arith.constant 0 : index
    %18 = vector.load %arg6[%c0_21, %c0_22, %c0_23] : memref<3x1x128xf32, #tpu.memory_space<vmem>>, vector<1x1x128xf32>
    %19 = vector.shape_cast %18 : vector<1x1x128xf32> to vector<1x128xf32>
    %20 = vector.broadcast %19 : vector<1x128xf32> to vector<25x128xf32>
    %21 = arith.addf %17, %20 : vector<25x128xf32>
    %22 = arith.truncf %21 : vector<25x128xf32> to vector<25x128xbf16>
    %23 = arith.truncf %14 : vector<25x128xf32> to vector<25x128xbf16>
    %cst_24 = arith.constant dense<0.000000e+00> : vector<25x25xf32>
    %24 = tpu.matmul %22, %23, %cst_24 {dimension_numbers = #tpu.dot_dimension_numbers<[1], [1], [0], [0], [0, 0, 1, 0], [], []>} : vector<25x128xbf16>, vector<25x128xbf16>, vector<25x25xf32> -> vector<25x25xf32>
    %cst_25 = arith.constant 7.812500e-03 : f32
    %25 = vector.broadcast %cst_25 : f32 to vector<25x25xf32>
    %26 = arith.mulf %24, %25 : vector<25x25xf32>
    %cst_26 = arith.constant dense<0xFF800000> : vector<25xf32>
    %27 = vector.multi_reduction <maximumf>, %26, %cst_26 [1] : vector<25x25xf32> to vector<25xf32>
    %28 = vector.shape_cast %27 : vector<25xf32> to vector<25x1xf32>
    %29 = vector.broadcast %28 : vector<25x1xf32> to vector<25x25xf32>
    %30 = arith.subf %26, %29 : vector<25x25xf32>
    %31 = math.exp %30 : vector<25x25xf32>
    %cst_27 = arith.constant dense<0.000000e+00> : vector<25xf32>
    %32 = vector.multi_reduction <add>, %31, %cst_27 [1] : vector<25x25xf32> to vector<25xf32>
    %33 = vector.shape_cast %32 : vector<25xf32> to vector<25x1xf32>
    %34 = tpu.reciprocal %33 {approx = true} : vector<25x1xf32> -> vector<25x1xf32>
    %35 = vector.broadcast %34 : vector<25x1xf32> to vector<25x25xf32>
    %36 = arith.mulf %31, %35 : vector<25x25xf32>
    %c0_28 = arith.constant 0 : index
    %c0_29 = arith.constant 0 : index
    %c0_30 = arith.constant 0 : index
    %37 = vector.load %arg2[%c0_28, %c0_29, %c0_30] : memref<3x25x25xf32, #tpu.memory_space<vmem>>, vector<1x25x25xf32>
    %38 = vector.shape_cast %37 : vector<1x25x25xf32> to vector<25x25xf32>
    %39 = arith.addf %36, %38 : vector<25x25xf32>
    %40 = arith.truncf %39 : vector<25x25xf32> to vector<25x25xbf16>
    %cst_31 = arith.constant dense<0.000000e+00> : vector<25x512xf32>
    %41 = tpu.matmul %40, %6, %cst_31 {dimension_numbers = #tpu.dot_dimension_numbers<[1], [0], [0], [1], [0, 0, 1, 1], [], []>} : vector<25x25xbf16>, vector<25x512xbf16>, vector<25x512xf32> -> vector<25x512xf32>
    %42 = arith.truncf %41 : vector<25x512xf32> to vector<25x512xbf16>
    %c0_32 = arith.constant 0 : index
    %c0_33 = arith.constant 0 : index
    %c0_34 = arith.constant 0 : index
    %43 = vector.load %arg7[%c0_32, %c0_33, %c0_34] : memref<3x512x512xbf16, #tpu.memory_space<vmem>>, vector<1x512x512xbf16>
    %44 = vector.shape_cast %43 : vector<1x512x512xbf16> to vector<512x512xbf16>
    %cst_35 = arith.constant dense<0.000000e+00> : vector<25x512xf32>
    %45 = tpu.matmul %42, %44, %cst_35 {dimension_numbers = #tpu.dot_dimension_numbers<[1], [0], [0], [1], [0, 0, 1, 1], [], []>} : vector<25x512xbf16>, vector<512x512xbf16>, vector<25x512xf32> -> vector<25x512xf32>
    %46 = arith.addf %7, %45 : vector<25x512xf32>
    %c1 = arith.constant 1 : index
    %c0_36 = arith.constant 0 : index
    %c0_37 = arith.constant 0 : index
    %47 = vector.load %arg3[%c1, %c0_36, %c0_37] : memref<3x512x128xbf16, #tpu.memory_space<vmem>>, vector<1x512x128xbf16>
    %48 = vector.shape_cast %47 : vector<1x512x128xbf16> to vector<512x128xbf16>
    %cst_38 = arith.constant dense<0.000000e+00> : vector<25x128xf32>
    %49 = tpu.matmul %6, %48, %cst_38 {dimension_numbers = #tpu.dot_dimension_numbers<[1], [0], [0], [1], [0, 0, 1, 1], [], []>} : vector<25x512xbf16>, vector<512x128xbf16>, vector<25x128xf32> -> vector<25x128xf32>
    %c1_39 = arith.constant 1 : index
    %c0_40 = arith.constant 0 : index
    %c0_41 = arith.constant 0 : index
    %50 = vector.load %arg4[%c1_39, %c0_40, %c0_41] : memref<3x1x128xf32, #tpu.memory_space<vmem>>, vector<1x1x128xf32>
    %51 = vector.shape_cast %50 : vector<1x1x128xf32> to vector<1x128xf32>
    %52 = vector.broadcast %51 : vector<1x128xf32> to vector<25x128xf32>
    %53 = arith.addf %49, %52 : vector<25x128xf32>
    %c1_42 = arith.constant 1 : index
    %c0_43 = arith.constant 0 : index
    %c0_44 = arith.constant 0 : index
    %54 = vector.load %arg5[%c1_42, %c0_43, %c0_44] : memref<3x512x128xbf16, #tpu.memory_space<vmem>>, vector<1x512x128xbf16>
    %55 = vector.shape_cast %54 : vector<1x512x128xbf16> to vector<512x128xbf16>
    %cst_45 = arith.constant dense<0.000000e+00> : vector<25x128xf32>
    %56 = tpu.matmul %6, %55, %cst_45 {dimension_numbers = #tpu.dot_dimension_numbers<[1], [0], [0], [1], [0, 0, 1, 1], [], []>} : vector<25x512xbf16>, vector<512x128xbf16>, vector<25x128xf32> -> vector<25x128xf32>
    %c1_46 = arith.constant 1 : index
    %c0_47 = arith.constant 0 : index
    %c0_48 = arith.constant 0 : index
    %57 = vector.load %arg6[%c1_46, %c0_47, %c0_48] : memref<3x1x128xf32, #tpu.memory_space<vmem>>, vector<1x1x128xf32>
    %58 = vector.shape_cast %57 : vector<1x1x128xf32> to vector<1x128xf32>
    %59 = vector.broadcast %58 : vector<1x128xf32> to vector<25x128xf32>
    %60 = arith.addf %56, %59 : vector<25x128xf32>
    %61 = arith.truncf %60 : vector<25x128xf32> to vector<25x128xbf16>
    %62 = arith.truncf %53 : vector<25x128xf32> to vector<25x128xbf16>
    %cst_49 = arith.constant dense<0.000000e+00> : vector<25x25xf32>
    %63 = tpu.matmul %61, %62, %cst_49 {dimension_numbers = #tpu.dot_dimension_numbers<[1], [1], [0], [0], [0, 0, 1, 0], [], []>} : vector<25x128xbf16>, vector<25x128xbf16>, vector<25x25xf32> -> vector<25x25xf32>
    %cst_50 = arith.constant 7.812500e-03 : f32
    %64 = vector.broadcast %cst_50 : f32 to vector<25x25xf32>
    %65 = arith.mulf %63, %64 : vector<25x25xf32>
    %cst_51 = arith.constant dense<0xFF800000> : vector<25xf32>
    %66 = vector.multi_reduction <maximumf>, %65, %cst_51 [1] : vector<25x25xf32> to vector<25xf32>
    %67 = vector.shape_cast %66 : vector<25xf32> to vector<25x1xf32>
    %68 = vector.broadcast %67 : vector<25x1xf32> to vector<25x25xf32>
    %69 = arith.subf %65, %68 : vector<25x25xf32>
    %70 = math.exp %69 : vector<25x25xf32>
    %cst_52 = arith.constant dense<0.000000e+00> : vector<25xf32>
    %71 = vector.multi_reduction <add>, %70, %cst_52 [1] : vector<25x25xf32> to vector<25xf32>
    %72 = vector.shape_cast %71 : vector<25xf32> to vector<25x1xf32>
    %73 = tpu.reciprocal %72 {approx = true} : vector<25x1xf32> -> vector<25x1xf32>
    %74 = vector.broadcast %73 : vector<25x1xf32> to vector<25x25xf32>
    %75 = arith.mulf %70, %74 : vector<25x25xf32>
    %c1_53 = arith.constant 1 : index
    %c0_54 = arith.constant 0 : index
    %c0_55 = arith.constant 0 : index
    %76 = vector.load %arg2[%c1_53, %c0_54, %c0_55] : memref<3x25x25xf32, #tpu.memory_space<vmem>>, vector<1x25x25xf32>
    %77 = vector.shape_cast %76 : vector<1x25x25xf32> to vector<25x25xf32>
    %78 = arith.addf %75, %77 : vector<25x25xf32>
    %79 = arith.truncf %78 : vector<25x25xf32> to vector<25x25xbf16>
    %cst_56 = arith.constant dense<0.000000e+00> : vector<25x512xf32>
    %80 = tpu.matmul %79, %6, %cst_56 {dimension_numbers = #tpu.dot_dimension_numbers<[1], [0], [0], [1], [0, 0, 1, 1], [], []>} : vector<25x25xbf16>, vector<25x512xbf16>, vector<25x512xf32> -> vector<25x512xf32>
    %81 = arith.truncf %80 : vector<25x512xf32> to vector<25x512xbf16>
    %c1_57 = arith.constant 1 : index
    %c0_58 = arith.constant 0 : index
    %c0_59 = arith.constant 0 : index
    %82 = vector.load %arg7[%c1_57, %c0_58, %c0_59] : memref<3x512x512xbf16, #tpu.memory_space<vmem>>, vector<1x512x512xbf16>
    %83 = vector.shape_cast %82 : vector<1x512x512xbf16> to vector<512x512xbf16>
    %cst_60 = arith.constant dense<0.000000e+00> : vector<25x512xf32>
    %84 = tpu.matmul %81, %83, %cst_60 {dimension_numbers = #tpu.dot_dimension_numbers<[1], [0], [0], [1], [0, 0, 1, 1], [], []>} : vector<25x512xbf16>, vector<512x512xbf16>, vector<25x512xf32> -> vector<25x512xf32>
    %85 = arith.addf %46, %84 : vector<25x512xf32>
    %c2 = arith.constant 2 : index
    %c0_61 = arith.constant 0 : index
    %c0_62 = arith.constant 0 : index
    %86 = vector.load %arg3[%c2, %c0_61, %c0_62] : memref<3x512x128xbf16, #tpu.memory_space<vmem>>, vector<1x512x128xbf16>
    %87 = vector.shape_cast %86 : vector<1x512x128xbf16> to vector<512x128xbf16>
    %cst_63 = arith.constant dense<0.000000e+00> : vector<25x128xf32>
    %88 = tpu.matmul %6, %87, %cst_63 {dimension_numbers = #tpu.dot_dimension_numbers<[1], [0], [0], [1], [0, 0, 1, 1], [], []>} : vector<25x512xbf16>, vector<512x128xbf16>, vector<25x128xf32> -> vector<25x128xf32>
    %c2_64 = arith.constant 2 : index
    %c0_65 = arith.constant 0 : index
    %c0_66 = arith.constant 0 : index
    %89 = vector.load %arg4[%c2_64, %c0_65, %c0_66] : memref<3x1x128xf32, #tpu.memory_space<vmem>>, vector<1x1x128xf32>
    %90 = vector.shape_cast %89 : vector<1x1x128xf32> to vector<1x128xf32>
    %91 = vector.broadcast %90 : vector<1x128xf32> to vector<25x128xf32>
    %92 = arith.addf %88, %91 : vector<25x128xf32>
    %c2_67 = arith.constant 2 : index
    %c0_68 = arith.constant 0 : index
    %c0_69 = arith.constant 0 : index
    %93 = vector.load %arg5[%c2_67, %c0_68, %c0_69] : memref<3x512x128xbf16, #tpu.memory_space<vmem>>, vector<1x512x128xbf16>
    %94 = vector.shape_cast %93 : vector<1x512x128xbf16> to vector<512x128xbf16>
    %cst_70 = arith.constant dense<0.000000e+00> : vector<25x128xf32>
    %95 = tpu.matmul %6, %94, %cst_70 {dimension_numbers = #tpu.dot_dimension_numbers<[1], [0], [0], [1], [0, 0, 1, 1], [], []>} : vector<25x512xbf16>, vector<512x128xbf16>, vector<25x128xf32> -> vector<25x128xf32>
    %c2_71 = arith.constant 2 : index
    %c0_72 = arith.constant 0 : index
    %c0_73 = arith.constant 0 : index
    %96 = vector.load %arg6[%c2_71, %c0_72, %c0_73] : memref<3x1x128xf32, #tpu.memory_space<vmem>>, vector<1x1x128xf32>
    %97 = vector.shape_cast %96 : vector<1x1x128xf32> to vector<1x128xf32>
    %98 = vector.broadcast %97 : vector<1x128xf32> to vector<25x128xf32>
    %99 = arith.addf %95, %98 : vector<25x128xf32>
    %100 = arith.truncf %99 : vector<25x128xf32> to vector<25x128xbf16>
    %101 = arith.truncf %92 : vector<25x128xf32> to vector<25x128xbf16>
    %cst_74 = arith.constant dense<0.000000e+00> : vector<25x25xf32>
    %102 = tpu.matmul %100, %101, %cst_74 {dimension_numbers = #tpu.dot_dimension_numbers<[1], [1], [0], [0], [0, 0, 1, 0], [], []>} : vector<25x128xbf16>, vector<25x128xbf16>, vector<25x25xf32> -> vector<25x25xf32>
    %cst_75 = arith.constant 7.812500e-03 : f32
    %103 = vector.broadcast %cst_75 : f32 to vector<25x25xf32>
    %104 = arith.mulf %102, %103 : vector<25x25xf32>
    %cst_76 = arith.constant dense<0xFF800000> : vector<25xf32>
    %105 = vector.multi_reduction <maximumf>, %104, %cst_76 [1] : vector<25x25xf32> to vector<25xf32>
    %106 = vector.shape_cast %105 : vector<25xf32> to vector<25x1xf32>
    %107 = vector.broadcast %106 : vector<25x1xf32> to vector<25x25xf32>
    %108 = arith.subf %104, %107 : vector<25x25xf32>
    %109 = math.exp %108 : vector<25x25xf32>
    %cst_77 = arith.constant dense<0.000000e+00> : vector<25xf32>
    %110 = vector.multi_reduction <add>, %109, %cst_77 [1] : vector<25x25xf32> to vector<25xf32>
    %111 = vector.shape_cast %110 : vector<25xf32> to vector<25x1xf32>
    %112 = tpu.reciprocal %111 {approx = true} : vector<25x1xf32> -> vector<25x1xf32>
    %113 = vector.broadcast %112 : vector<25x1xf32> to vector<25x25xf32>
    %114 = arith.mulf %109, %113 : vector<25x25xf32>
    %c2_78 = arith.constant 2 : index
    %c0_79 = arith.constant 0 : index
    %c0_80 = arith.constant 0 : index
    %115 = vector.load %arg2[%c2_78, %c0_79, %c0_80] : memref<3x25x25xf32, #tpu.memory_space<vmem>>, vector<1x25x25xf32>
    %116 = vector.shape_cast %115 : vector<1x25x25xf32> to vector<25x25xf32>
    %117 = arith.addf %114, %116 : vector<25x25xf32>
    %118 = arith.truncf %117 : vector<25x25xf32> to vector<25x25xbf16>
    %cst_81 = arith.constant dense<0.000000e+00> : vector<25x512xf32>
    %119 = tpu.matmul %118, %6, %cst_81 {dimension_numbers = #tpu.dot_dimension_numbers<[1], [0], [0], [1], [0, 0, 1, 1], [], []>} : vector<25x25xbf16>, vector<25x512xbf16>, vector<25x512xf32> -> vector<25x512xf32>
    %120 = arith.truncf %119 : vector<25x512xf32> to vector<25x512xbf16>
    %c2_82 = arith.constant 2 : index
    %c0_83 = arith.constant 0 : index
    %c0_84 = arith.constant 0 : index
    %121 = vector.load %arg7[%c2_82, %c0_83, %c0_84] : memref<3x512x512xbf16, #tpu.memory_space<vmem>>, vector<1x512x512xbf16>
    %122 = vector.shape_cast %121 : vector<1x512x512xbf16> to vector<512x512xbf16>
    %cst_85 = arith.constant dense<0.000000e+00> : vector<25x512xf32>
    %123 = tpu.matmul %120, %122, %cst_85 {dimension_numbers = #tpu.dot_dimension_numbers<[1], [0], [0], [1], [0, 0, 1, 1], [], []>} : vector<25x512xbf16>, vector<512x512xbf16>, vector<25x512xf32> -> vector<25x512xf32>
    %124 = arith.addf %85, %123 : vector<25x512xf32>
    %125 = vector.broadcast %0 : vector<1x512xf32> to vector<25x512xf32>
    %126 = arith.mulf %124, %125 : vector<25x512xf32>
    %127 = vector.broadcast %1 : vector<1x512xf32> to vector<25x512xf32>
    %128 = arith.addf %126, %127 : vector<25x512xf32>
    %129 = arith.addf %128, %5 : vector<25x512xf32>
    %cst_86 = arith.constant 0.000000e+00 : f32
    %130 = vector.broadcast %cst_86 : f32 to vector<25x512xf32>
    %131 = arith.maximumf %129, %130 : vector<25x512xf32>
    %132 = arith.truncf %131 : vector<25x512xf32> to vector<25x512xbf16>
    %c0_87 = arith.constant 0 : index
    %c0_88 = arith.constant 0 : index
    %133 = vector.load %arg10[%c0_87, %c0_88] : memref<512x512xbf16, #tpu.memory_space<vmem>>, vector<512x512xbf16>
    %cst_89 = arith.constant dense<0.000000e+00> : vector<25x512xf32>
    %134 = tpu.matmul %132, %133, %cst_89 {dimension_numbers = #tpu.dot_dimension_numbers<[1], [0], [0], [1], [0, 0, 1, 1], [], []>} : vector<25x512xbf16>, vector<512x512xbf16>, vector<25x512xf32> -> vector<25x512xf32>
    %135 = vector.broadcast %2 : vector<1x512xf32> to vector<25x512xf32>
    %136 = arith.mulf %134, %135 : vector<25x512xf32>
    %137 = vector.broadcast %3 : vector<1x512xf32> to vector<25x512xf32>
    %138 = arith.addf %136, %137 : vector<25x512xf32>
    %139 = arith.addf %138, %5 : vector<25x512xf32>
    %cst_90 = arith.constant 0.000000e+00 : f32
    %140 = vector.broadcast %cst_90 : f32 to vector<25x512xf32>
    %141 = arith.maximumf %139, %140 : vector<25x512xf32>
    %c0_91 = arith.constant 0 : index
    %c0_92 = arith.constant 0 : index
    %c0_93 = arith.constant 0 : index
    %142 = vector.load %arg13[%c0_91, %c0_92, %c0_93] : memref<2x25x512xf32, #tpu.memory_space<vmem>>, vector<1x25x512xf32>
    %143 = vector.shape_cast %142 : vector<1x25x512xf32> to vector<25x512xf32>
    %144 = vector.shape_cast %141 : vector<25x512xf32> to vector<1x25x512xf32>
    tpu.vector_store %arg13[%c0_91, %c0_92, %c0_93], %144 {strides = array<i32>} : memref<2x25x512xf32, #tpu.memory_space<vmem>>, vector<1x25x512xf32>,
    %c1_94 = arith.constant 1 : index
    %c0_95 = arith.constant 0 : index
    %c0_96 = arith.constant 0 : index
    %145 = vector.load %arg1[%c1_94, %c0_95, %c0_96] : memref<2x25x512xf32, #tpu.memory_space<vmem>>, vector<1x25x512xf32>
    %146 = vector.shape_cast %145 : vector<1x25x512xf32> to vector<25x512xf32>
    %147 = arith.truncf %146 : vector<25x512xf32> to vector<25x512xbf16>
    %cst_97 = arith.constant 0.000000e+00 : f32
    %148 = vector.broadcast %cst_97 : f32 to vector<25x512xf32>
    %c0_98 = arith.constant 0 : index
    %c0_99 = arith.constant 0 : index
    %c0_100 = arith.constant 0 : index
    %149 = vector.load %arg3[%c0_98, %c0_99, %c0_100] : memref<3x512x128xbf16, #tpu.memory_space<vmem>>, vector<1x512x128xbf16>
    %150 = vector.shape_cast %149 : vector<1x512x128xbf16> to vector<512x128xbf16>
    %cst_101 = arith.constant dense<0.000000e+00> : vector<25x128xf32>
    %151 = tpu.matmul %147, %150, %cst_101 {dimension_numbers = #tpu.dot_dimension_numbers<[1], [0], [0], [1], [0, 0, 1, 1], [], []>} : vector<25x512xbf16>, vector<512x128xbf16>, vector<25x128xf32> -> vector<25x128xf32>
    %c0_102 = arith.constant 0 : index
    %c0_103 = arith.constant 0 : index
    %c0_104 = arith.constant 0 : index
    %152 = vector.load %arg4[%c0_102, %c0_103, %c0_104] : memref<3x1x128xf32, #tpu.memory_space<vmem>>, vector<1x1x128xf32>
    %153 = vector.shape_cast %152 : vector<1x1x128xf32> to vector<1x128xf32>
    %154 = vector.broadcast %153 : vector<1x128xf32> to vector<25x128xf32>
    %155 = arith.addf %151, %154 : vector<25x128xf32>
    %c0_105 = arith.constant 0 : index
    %c0_106 = arith.constant 0 : index
    %c0_107 = arith.constant 0 : index
    %156 = vector.load %arg5[%c0_105, %c0_106, %c0_107] : memref<3x512x128xbf16, #tpu.memory_space<vmem>>, vector<1x512x128xbf16>
    %157 = vector.shape_cast %156 : vector<1x512x128xbf16> to vector<512x128xbf16>
    %cst_108 = arith.constant dense<0.000000e+00> : vector<25x128xf32>
    %158 = tpu.matmul %147, %157, %cst_108 {dimension_numbers = #tpu.dot_dimension_numbers<[1], [0], [0], [1], [0, 0, 1, 1], [], []>} : vector<25x512xbf16>, vector<512x128xbf16>, vector<25x128xf32> -> vector<25x128xf32>
    %c0_109 = arith.constant 0 : index
    %c0_110 = arith.constant 0 : index
    %c0_111 = arith.constant 0 : index
    %159 = vector.load %arg6[%c0_109, %c0_110, %c0_111] : memref<3x1x128xf32, #tpu.memory_space<vmem>>, vector<1x1x128xf32>
    %160 = vector.shape_cast %159 : vector<1x1x128xf32> to vector<1x128xf32>
    %161 = vector.broadcast %160 : vector<1x128xf32> to vector<25x128xf32>
    %162 = arith.addf %158, %161 : vector<25x128xf32>
    %163 = arith.truncf %162 : vector<25x128xf32> to vector<25x128xbf16>
    %164 = arith.truncf %155 : vector<25x128xf32> to vector<25x128xbf16>
    %cst_112 = arith.constant dense<0.000000e+00> : vector<25x25xf32>
    %165 = tpu.matmul %163, %164, %cst_112 {dimension_numbers = #tpu.dot_dimension_numbers<[1], [1], [0], [0], [0, 0, 1, 0], [], []>} : vector<25x128xbf16>, vector<25x128xbf16>, vector<25x25xf32> -> vector<25x25xf32>
    %cst_113 = arith.constant 7.812500e-03 : f32
    %166 = vector.broadcast %cst_113 : f32 to vector<25x25xf32>
    %167 = arith.mulf %165, %166 : vector<25x25xf32>
    %cst_114 = arith.constant dense<0xFF800000> : vector<25xf32>
    %168 = vector.multi_reduction <maximumf>, %167, %cst_114 [1] : vector<25x25xf32> to vector<25xf32>
    %169 = vector.shape_cast %168 : vector<25xf32> to vector<25x1xf32>
    %170 = vector.broadcast %169 : vector<25x1xf32> to vector<25x25xf32>
    %171 = arith.subf %167, %170 : vector<25x25xf32>
    %172 = math.exp %171 : vector<25x25xf32>
    %cst_115 = arith.constant dense<0.000000e+00> : vector<25xf32>
    %173 = vector.multi_reduction <add>, %172, %cst_115 [1] : vector<25x25xf32> to vector<25xf32>
    %174 = vector.shape_cast %173 : vector<25xf32> to vector<25x1xf32>
    %175 = tpu.reciprocal %174 {approx = true} : vector<25x1xf32> -> vector<25x1xf32>
    %176 = vector.broadcast %175 : vector<25x1xf32> to vector<25x25xf32>
    %177 = arith.mulf %172, %176 : vector<25x25xf32>
    %c0_116 = arith.constant 0 : index
    %c0_117 = arith.constant 0 : index
    %c0_118 = arith.constant 0 : index
    %178 = vector.load %arg2[%c0_116, %c0_117, %c0_118] : memref<3x25x25xf32, #tpu.memory_space<vmem>>, vector<1x25x25xf32>
    %179 = vector.shape_cast %178 : vector<1x25x25xf32> to vector<25x25xf32>
    %180 = arith.addf %177, %179 : vector<25x25xf32>
    %181 = arith.truncf %180 : vector<25x25xf32> to vector<25x25xbf16>
    %cst_119 = arith.constant dense<0.000000e+00> : vector<25x512xf32>
    %182 = tpu.matmul %181, %147, %cst_119 {dimension_numbers = #tpu.dot_dimension_numbers<[1], [0], [0], [1], [0, 0, 1, 1], [], []>} : vector<25x25xbf16>, vector<25x512xbf16>, vector<25x512xf32> -> vector<25x512xf32>
    %183 = arith.truncf %182 : vector<25x512xf32> to vector<25x512xbf16>
    %c0_120 = arith.constant 0 : index
    %c0_121 = arith.constant 0 : index
    %c0_122 = arith.constant 0 : index
    %184 = vector.load %arg7[%c0_120, %c0_121, %c0_122] : memref<3x512x512xbf16, #tpu.memory_space<vmem>>, vector<1x512x512xbf16>
    %185 = vector.shape_cast %184 : vector<1x512x512xbf16> to vector<512x512xbf16>
    %cst_123 = arith.constant dense<0.000000e+00> : vector<25x512xf32>
    %186 = tpu.matmul %183, %185, %cst_123 {dimension_numbers = #tpu.dot_dimension_numbers<[1], [0], [0], [1], [0, 0, 1, 1], [], []>} : vector<25x512xbf16>, vector<512x512xbf16>, vector<25x512xf32> -> vector<25x512xf32>
    %187 = arith.addf %148, %186 : vector<25x512xf32>
    %c1_124 = arith.constant 1 : index
    %c0_125 = arith.constant 0 : index
    %c0_126 = arith.constant 0 : index
    %188 = vector.load %arg3[%c1_124, %c0_125, %c0_126] : memref<3x512x128xbf16, #tpu.memory_space<vmem>>, vector<1x512x128xbf16>
    %189 = vector.shape_cast %188 : vector<1x512x128xbf16> to vector<512x128xbf16>
    %cst_127 = arith.constant dense<0.000000e+00> : vector<25x128xf32>
    %190 = tpu.matmul %147, %189, %cst_127 {dimension_numbers = #tpu.dot_dimension_numbers<[1], [0], [0], [1], [0, 0, 1, 1], [], []>} : vector<25x512xbf16>, vector<512x128xbf16>, vector<25x128xf32> -> vector<25x128xf32>
    %c1_128 = arith.constant 1 : index
    %c0_129 = arith.constant 0 : index
    %c0_130 = arith.constant 0 : index
    %191 = vector.load %arg4[%c1_128, %c0_129, %c0_130] : memref<3x1x128xf32, #tpu.memory_space<vmem>>, vector<1x1x128xf32>
    %192 = vector.shape_cast %191 : vector<1x1x128xf32> to vector<1x128xf32>
    %193 = vector.broadcast %192 : vector<1x128xf32> to vector<25x128xf32>
    %194 = arith.addf %190, %193 : vector<25x128xf32>
    %c1_131 = arith.constant 1 : index
    %c0_132 = arith.constant 0 : index
    %c0_133 = arith.constant 0 : index
    %195 = vector.load %arg5[%c1_131, %c0_132, %c0_133] : memref<3x512x128xbf16, #tpu.memory_space<vmem>>, vector<1x512x128xbf16>
    %196 = vector.shape_cast %195 : vector<1x512x128xbf16> to vector<512x128xbf16>
    %cst_134 = arith.constant dense<0.000000e+00> : vector<25x128xf32>
    %197 = tpu.matmul %147, %196, %cst_134 {dimension_numbers = #tpu.dot_dimension_numbers<[1], [0], [0], [1], [0, 0, 1, 1], [], []>} : vector<25x512xbf16>, vector<512x128xbf16>, vector<25x128xf32> -> vector<25x128xf32>
    %c1_135 = arith.constant 1 : index
    %c0_136 = arith.constant 0 : index
    %c0_137 = arith.constant 0 : index
    %198 = vector.load %arg6[%c1_135, %c0_136, %c0_137] : memref<3x1x128xf32, #tpu.memory_space<vmem>>, vector<1x1x128xf32>
    %199 = vector.shape_cast %198 : vector<1x1x128xf32> to vector<1x128xf32>
    %200 = vector.broadcast %199 : vector<1x128xf32> to vector<25x128xf32>
    %201 = arith.addf %197, %200 : vector<25x128xf32>
    %202 = arith.truncf %201 : vector<25x128xf32> to vector<25x128xbf16>
    %203 = arith.truncf %194 : vector<25x128xf32> to vector<25x128xbf16>
    %cst_138 = arith.constant dense<0.000000e+00> : vector<25x25xf32>
    %204 = tpu.matmul %202, %203, %cst_138 {dimension_numbers = #tpu.dot_dimension_numbers<[1], [1], [0], [0], [0, 0, 1, 0], [], []>} : vector<25x128xbf16>, vector<25x128xbf16>, vector<25x25xf32> -> vector<25x25xf32>
    %cst_139 = arith.constant 7.812500e-03 : f32
    %205 = vector.broadcast %cst_139 : f32 to vector<25x25xf32>
    %206 = arith.mulf %204, %205 : vector<25x25xf32>
    %cst_140 = arith.constant dense<0xFF800000> : vector<25xf32>
    %207 = vector.multi_reduction <maximumf>, %206, %cst_140 [1] : vector<25x25xf32> to vector<25xf32>
    %208 = vector.shape_cast %207 : vector<25xf32> to vector<25x1xf32>
    %209 = vector.broadcast %208 : vector<25x1xf32> to vector<25x25xf32>
    %210 = arith.subf %206, %209 : vector<25x25xf32>
    %211 = math.exp %210 : vector<25x25xf32>
    %cst_141 = arith.constant dense<0.000000e+00> : vector<25xf32>
    %212 = vector.multi_reduction <add>, %211, %cst_141 [1] : vector<25x25xf32> to vector<25xf32>
    %213 = vector.shape_cast %212 : vector<25xf32> to vector<25x1xf32>
    %214 = tpu.reciprocal %213 {approx = true} : vector<25x1xf32> -> vector<25x1xf32>
    %215 = vector.broadcast %214 : vector<25x1xf32> to vector<25x25xf32>
    %216 = arith.mulf %211, %215 : vector<25x25xf32>
    %c1_142 = arith.constant 1 : index
    %c0_143 = arith.constant 0 : index
    %c0_144 = arith.constant 0 : index
    %217 = vector.load %arg2[%c1_142, %c0_143, %c0_144] : memref<3x25x25xf32, #tpu.memory_space<vmem>>, vector<1x25x25xf32>
    %218 = vector.shape_cast %217 : vector<1x25x25xf32> to vector<25x25xf32>
    %219 = arith.addf %216, %218 : vector<25x25xf32>
    %220 = arith.truncf %219 : vector<25x25xf32> to vector<25x25xbf16>
    %cst_145 = arith.constant dense<0.000000e+00> : vector<25x512xf32>
    %221 = tpu.matmul %220, %147, %cst_145 {dimension_numbers = #tpu.dot_dimension_numbers<[1], [0], [0], [1], [0, 0, 1, 1], [], []>} : vector<25x25xbf16>, vector<25x512xbf16>, vector<25x512xf32> -> vector<25x512xf32>
    %222 = arith.truncf %221 : vector<25x512xf32> to vector<25x512xbf16>
    %c1_146 = arith.constant 1 : index
    %c0_147 = arith.constant 0 : index
    %c0_148 = arith.constant 0 : index
    %223 = vector.load %arg7[%c1_146, %c0_147, %c0_148] : memref<3x512x512xbf16, #tpu.memory_space<vmem>>, vector<1x512x512xbf16>
    %224 = vector.shape_cast %223 : vector<1x512x512xbf16> to vector<512x512xbf16>
    %cst_149 = arith.constant dense<0.000000e+00> : vector<25x512xf32>
    %225 = tpu.matmul %222, %224, %cst_149 {dimension_numbers = #tpu.dot_dimension_numbers<[1], [0], [0], [1], [0, 0, 1, 1], [], []>} : vector<25x512xbf16>, vector<512x512xbf16>, vector<25x512xf32> -> vector<25x512xf32>
    %226 = arith.addf %187, %225 : vector<25x512xf32>
    %c2_150 = arith.constant 2 : index
    %c0_151 = arith.constant 0 : index
    %c0_152 = arith.constant 0 : index
    %227 = vector.load %arg3[%c2_150, %c0_151, %c0_152] : memref<3x512x128xbf16, #tpu.memory_space<vmem>>, vector<1x512x128xbf16>
    %228 = vector.shape_cast %227 : vector<1x512x128xbf16> to vector<512x128xbf16>
    %cst_153 = arith.constant dense<0.000000e+00> : vector<25x128xf32>
    %229 = tpu.matmul %147, %228, %cst_153 {dimension_numbers = #tpu.dot_dimension_numbers<[1], [0], [0], [1], [0, 0, 1, 1], [], []>} : vector<25x512xbf16>, vector<512x128xbf16>, vector<25x128xf32> -> vector<25x128xf32>
    %c2_154 = arith.constant 2 : index
    %c0_155 = arith.constant 0 : index
    %c0_156 = arith.constant 0 : index
    %230 = vector.load %arg4[%c2_154, %c0_155, %c0_156] : memref<3x1x128xf32, #tpu.memory_space<vmem>>, vector<1x1x128xf32>
    %231 = vector.shape_cast %230 : vector<1x1x128xf32> to vector<1x128xf32>
    %232 = vector.broadcast %231 : vector<1x128xf32> to vector<25x128xf32>
    %233 = arith.addf %229, %232 : vector<25x128xf32>
    %c2_157 = arith.constant 2 : index
    %c0_158 = arith.constant 0 : index
    %c0_159 = arith.constant 0 : index
    %234 = vector.load %arg5[%c2_157, %c0_158, %c0_159] : memref<3x512x128xbf16, #tpu.memory_space<vmem>>, vector<1x512x128xbf16>
    %235 = vector.shape_cast %234 : vector<1x512x128xbf16> to vector<512x128xbf16>
    %cst_160 = arith.constant dense<0.000000e+00> : vector<25x128xf32>
    %236 = tpu.matmul %147, %235, %cst_160 {dimension_numbers = #tpu.dot_dimension_numbers<[1], [0], [0], [1], [0, 0, 1, 1], [], []>} : vector<25x512xbf16>, vector<512x128xbf16>, vector<25x128xf32> -> vector<25x128xf32>
    %c2_161 = arith.constant 2 : index
    %c0_162 = arith.constant 0 : index
    %c0_163 = arith.constant 0 : index
    %237 = vector.load %arg6[%c2_161, %c0_162, %c0_163] : memref<3x1x128xf32, #tpu.memory_space<vmem>>, vector<1x1x128xf32>
    %238 = vector.shape_cast %237 : vector<1x1x128xf32> to vector<1x128xf32>
    %239 = vector.broadcast %238 : vector<1x128xf32> to vector<25x128xf32>
    %240 = arith.addf %236, %239 : vector<25x128xf32>
    %241 = arith.truncf %240 : vector<25x128xf32> to vector<25x128xbf16>
    %242 = arith.truncf %233 : vector<25x128xf32> to vector<25x128xbf16>
    %cst_164 = arith.constant dense<0.000000e+00> : vector<25x25xf32>
    %243 = tpu.matmul %241, %242, %cst_164 {dimension_numbers = #tpu.dot_dimension_numbers<[1], [1], [0], [0], [0, 0, 1, 0], [], []>} : vector<25x128xbf16>, vector<25x128xbf16>, vector<25x25xf32> -> vector<25x25xf32>
    %cst_165 = arith.constant 7.812500e-03 : f32
    %244 = vector.broadcast %cst_165 : f32 to vector<25x25xf32>
    %245 = arith.mulf %243, %244 : vector<25x25xf32>
    %cst_166 = arith.constant dense<0xFF800000> : vector<25xf32>
    %246 = vector.multi_reduction <maximumf>, %245, %cst_166 [1] : vector<25x25xf32> to vector<25xf32>
    %247 = vector.shape_cast %246 : vector<25xf32> to vector<25x1xf32>
    %248 = vector.broadcast %247 : vector<25x1xf32> to vector<25x25xf32>
    %249 = arith.subf %245, %248 : vector<25x25xf32>
    %250 = math.exp %249 : vector<25x25xf32>
    %cst_167 = arith.constant dense<0.000000e+00> : vector<25xf32>
    %251 = vector.multi_reduction <add>, %250, %cst_167 [1] : vector<25x25xf32> to vector<25xf32>
    %252 = vector.shape_cast %251 : vector<25xf32> to vector<25x1xf32>
    %253 = tpu.reciprocal %252 {approx = true} : vector<25x1xf32> -> vector<25x1xf32>
    %254 = vector.broadcast %253 : vector<25x1xf32> to vector<25x25xf32>
    %255 = arith.mulf %250, %254 : vector<25x25xf32>
    %c2_168 = arith.constant 2 : index
    %c0_169 = arith.constant 0 : index
    %c0_170 = arith.constant 0 : index
    %256 = vector.load %arg2[%c2_168, %c0_169, %c0_170] : memref<3x25x25xf32, #tpu.memory_space<vmem>>, vector<1x25x25xf32>
    %257 = vector.shape_cast %256 : vector<1x25x25xf32> to vector<25x25xf32>
    %258 = arith.addf %255, %257 : vector<25x25xf32>
    %259 = arith.truncf %258 : vector<25x25xf32> to vector<25x25xbf16>
    %cst_171 = arith.constant dense<0.000000e+00> : vector<25x512xf32>
    %260 = tpu.matmul %259, %147, %cst_171 {dimension_numbers = #tpu.dot_dimension_numbers<[1], [0], [0], [1], [0, 0, 1, 1], [], []>} : vector<25x25xbf16>, vector<25x512xbf16>, vector<25x512xf32> -> vector<25x512xf32>
    %261 = arith.truncf %260 : vector<25x512xf32> to vector<25x512xbf16>
    %c2_172 = arith.constant 2 : index
    %c0_173 = arith.constant 0 : index
    %c0_174 = arith.constant 0 : index
    %262 = vector.load %arg7[%c2_172, %c0_173, %c0_174] : memref<3x512x512xbf16, #tpu.memory_space<vmem>>, vector<1x512x512xbf16>
    %263 = vector.shape_cast %262 : vector<1x512x512xbf16> to vector<512x512xbf16>
    %cst_175 = arith.constant dense<0.000000e+00> : vector<25x512xf32>
    %264 = tpu.matmul %261, %263, %cst_175 {dimension_numbers = #tpu.dot_dimension_numbers<[1], [0], [0], [1], [0, 0, 1, 1], [], []>} : vector<25x512xbf16>, vector<512x512xbf16>, vector<25x512xf32> -> vector<25x512xf32>
    %265 = arith.addf %226, %264 : vector<25x512xf32>
    %266 = vector.broadcast %0 : vector<1x512xf32> to vector<25x512xf32>
    %267 = arith.mulf %265, %266 : vector<25x512xf32>
    %268 = vector.broadcast %1 : vector<1x512xf32> to vector<25x512xf32>
    %269 = arith.addf %267, %268 : vector<25x512xf32>
    %270 = arith.addf %269, %146 : vector<25x512xf32>
    %cst_176 = arith.constant 0.000000e+00 : f32
    %271 = vector.broadcast %cst_176 : f32 to vector<25x512xf32>
    %272 = arith.maximumf %270, %271 : vector<25x512xf32>
    %273 = arith.truncf %272 : vector<25x512xf32> to vector<25x512xbf16>
    %c0_177 = arith.constant 0 : index
    %c0_178 = arith.constant 0 : index
    %274 = vector.load %arg10[%c0_177, %c0_178] : memref<512x512xbf16, #tpu.memory_space<vmem>>, vector<512x512xbf16>
    %cst_179 = arith.constant dense<0.000000e+00> : vector<25x512xf32>
    %275 = tpu.matmul %273, %274, %cst_179 {dimension_numbers = #tpu.dot_dimension_numbers<[1], [0], [0], [1], [0, 0, 1, 1], [], []>} : vector<25x512xbf16>, vector<512x512xbf16>, vector<25x512xf32> -> vector<25x512xf32>
    %276 = vector.broadcast %2 : vector<1x512xf32> to vector<25x512xf32>
    %277 = arith.mulf %275, %276 : vector<25x512xf32>
    %278 = vector.broadcast %3 : vector<1x512xf32> to vector<25x512xf32>
    %279 = arith.addf %277, %278 : vector<25x512xf32>
    %280 = arith.addf %279, %146 : vector<25x512xf32>
    %cst_180 = arith.constant 0.000000e+00 : f32
    %281 = vector.broadcast %cst_180 : f32 to vector<25x512xf32>
    %282 = arith.maximumf %280, %281 : vector<25x512xf32>
    %c1_181 = arith.constant 1 : index
    %c0_182 = arith.constant 0 : index
    %c0_183 = arith.constant 0 : index
    %283 = vector.load %arg13[%c1_181, %c0_182, %c0_183] : memref<2x25x512xf32, #tpu.memory_space<vmem>>, vector<1x25x512xf32>
    %284 = vector.shape_cast %283 : vector<1x25x512xf32> to vector<25x512xf32>
    %285 = vector.shape_cast %282 : vector<25x512xf32> to vector<1x25x512xf32>
    tpu.vector_store %arg13[%c1_181, %c0_182, %c0_183], %285 {strides = array<i32>} : memref<2x25x512xf32, #tpu.memory_space<vmem>>, vector<1x25x512xf32>,
    return
  }
  func.func @transform_0(%arg0: i32) -> (i32, i32, i32) {
    %c0_i32 = arith.constant 0 : i32
    %c0_i32_0 = arith.constant 0 : i32
    %c0_i32_1 = arith.constant 0 : i32
    return %arg0, %c0_i32, %c0_i32_0 : i32, i32, i32
  }
  func.func @transform_1(%arg0: i32) -> (i32, i32, i32) {
    %c0_i32 = arith.constant 0 : i32
    %c0_i32_0 = arith.constant 0 : i32
    %c0_i32_1 = arith.constant 0 : i32
    %c0_i32_2 = arith.constant 0 : i32
    return %c0_i32, %c0_i32_0, %c0_i32_1 : i32, i32, i32
  }
  func.func @transform_2(%arg0: i32) -> (i32, i32, i32) {
    %c0_i32 = arith.constant 0 : i32
    %c0_i32_0 = arith.constant 0 : i32
    %c0_i32_1 = arith.constant 0 : i32
    %c0_i32_2 = arith.constant 0 : i32
    return %c0_i32, %c0_i32_0, %c0_i32_1 : i32, i32, i32
  }
  func.func @transform_3(%arg0: i32) -> (i32, i32, i32) {
    %c0_i32 = arith.constant 0 : i32
    %c0_i32_0 = arith.constant 0 : i32
    %c0_i32_1 = arith.constant 0 : i32
    %c0_i32_2 = arith.constant 0 : i32
    return %c0_i32, %c0_i32_0, %c0_i32_1 : i32, i32, i32
  }
  func.func @transform_4(%arg0: i32) -> (i32, i32, i32) {
    %c0_i32 = arith.constant 0 : i32
    %c0_i32_0 = arith.constant 0 : i32
    %c0_i32_1 = arith.constant 0 : i32
    %c0_i32_2 = arith.constant 0 : i32
    return %c0_i32, %c0_i32_0, %c0_i32_1 : i32, i32, i32
  }
  func.func @transform_5(%arg0: i32) -> (i32, i32, i32) {
    %c0_i32 = arith.constant 0 : i32
    %c0_i32_0 = arith.constant 0 : i32
    %c0_i32_1 = arith.constant 0 : i32
    %c0_i32_2 = arith.constant 0 : i32
    return %c0_i32, %c0_i32_0, %c0_i32_1 : i32, i32, i32
  }
  func.func @transform_6(%arg0: i32) -> (i32, i32, i32) {
    %c0_i32 = arith.constant 0 : i32
    %c0_i32_0 = arith.constant 0 : i32
    %c0_i32_1 = arith.constant 0 : i32
    %c0_i32_2 = arith.constant 0 : i32
    return %c0_i32, %c0_i32_0, %c0_i32_1 : i32, i32, i32
  }
  func.func @transform_7(%arg0: i32) -> (i32, i32) {
    %c0_i32 = arith.constant 0 : i32
    %c0_i32_0 = arith.constant 0 : i32
    %c0_i32_1 = arith.constant 0 : i32
    return %c0_i32, %c0_i32_0 : i32, i32
  }
  func.func @transform_8(%arg0: i32) -> (i32, i32) {
    %c0_i32 = arith.constant 0 : i32
    %c0_i32_0 = arith.constant 0 : i32
    %c0_i32_1 = arith.constant 0 : i32
    return %c0_i32, %c0_i32_0 : i32, i32
  }
  func.func @transform_9(%arg0: i32) -> (i32, i32) {
    %c0_i32 = arith.constant 0 : i32
    %c0_i32_0 = arith.constant 0 : i32
    %c0_i32_1 = arith.constant 0 : i32
    return %c0_i32, %c0_i32_0 : i32, i32
  }
  func.func @transform_10(%arg0: i32) -> (i32, i32) {
    %c0_i32 = arith.constant 0 : i32
    %c0_i32_0 = arith.constant 0 : i32
    %c0_i32_1 = arith.constant 0 : i32
    return %c0_i32, %c0_i32_0 : i32, i32
  }
  func.func @transform_11(%arg0: i32) -> (i32, i32) {
    %c0_i32 = arith.constant 0 : i32
    %c0_i32_0 = arith.constant 0 : i32
    %c0_i32_1 = arith.constant 0 : i32
    return %c0_i32, %c0_i32_0 : i32, i32
  }
  func.func @transform_12(%arg0: i32) -> (i32, i32, i32) {
    %c0_i32 = arith.constant 0 : i32
    %c0_i32_0 = arith.constant 0 : i32
    %c0_i32_1 = arith.constant 0 : i32
    return %arg0, %c0_i32, %c0_i32_0 : i32, i32, i32
  }
}

</mosaic_0001>

<bundles_post_ra>
// kernel: tile.43
= control target key start
LH: loop header
LB: loop body
LE: loop exit
PB: predicated region body
PF: predicated region fallthrough
CT: control target
= control target key end

     0   :  { %s28_s0 = inlined_call_operand.vmem [shape: f32[32], index: 0, kind: input, shape index: {}]   ;;  %s29_s1 = inlined_call_operand.vmem [shape: f32[16,32], index: 1, kind: output, shape index: {}]  }
   0x1   :  { %v4_v0 = vld [vmem:[%s28_s0] ss:$0 sm:$0xff] }
   0x2   :  { %5 = vst [vmem:[%s29_s1] sm:$0xff] %v4_v0  ;;  %8 = vst [vmem:[%s29_s1 + $0x8] sm:$0xff] %v4_v0 }

// kernel: tile.44
= control target key start
LH: loop header
LB: loop body
LE: loop exit
PB: predicated region body
PF: predicated region fallthrough
CT: control target
= control target key end

     0   :  { %s57_s8 = smov 96   ;;  %vm3_vm0 = vcmask 261120   ;;  %s59_s15 = smov 64   ;;  %vm9_vm1 = vcmask 1048320   ;;  %vm15_vm2 = vcmask 785920   ;;  %vm21_vm3 = vcmask 523520   ;;  %s94_s0 = inlined_call_operand.vmem [shape: f32[16,32], index: 0, kind: input, shape index: {}]   ;;  %s95_s1 = inlined_call_operand.vmem [shape: f32[1,512], index: 1, kind: output, shape index: {}]  }
   0x1   :  { %v48_v0 = vld [vmem:[%s94_s0 + $0x3] ss:$4 sm:$0xf]   ;;  %v49_v1 = vld [vmem:[%s94_s0 + $0x2] ss:$4 sm:$0xf]  }
   0x2   :  { %7 = vrot.lane.b32.xlu0 %v48_v0, %s57_s8  ;;  %v50_v2 = vld [vmem:[%s94_s0 + $0x1] ss:$4 sm:$0xf]   ;;  %v2_v3 = vld [vmem:[%s94_s0] ss:$4 sm:$0xf]  }
   0x3   :  { %s58_s0 = smov 32   ;;  %4 = vst.msk [vmem:[#allocation0] ss:$8 sm:$0xf] %vm3_vm0, %v2_v3  }
   0x4   :  { %19 = vrot.lane.b32.xlu1 %v50_v2, %s58_s0 }
   0x6   :  { %13 = vrot.lane.b32.xlu0 %v49_v1, %s59_s15 }
  0x74   :  { %v8_v4 = vpop.permute.xlu0 %7  }
  0x75   :  { %10 = vst.msk [vmem:[#allocation0] ss:$8 sm:$0xf] %vm9_vm1, %v8_v4  }
  0x76   :  { %v20_v5 = vpop.permute.xlu1 %19  }
  0x78   :  { %v14_v6 = vpop.permute.xlu0 %13  }
  0x79   :  { %16 = vst.msk [vmem:[#allocation0] ss:$8 sm:$0xf] %vm15_vm2, %v14_v6  }
  0x7a   :  { %22 = vst.msk [vmem:[#allocation0] ss:$8 sm:$0xf] %vm21_vm3, %v20_v5  }
  0x81   :  { %v26_v7 = vld [vmem:[#allocation0] sm:$0x1]  ;;  %v30_v8 = vld [vmem:[#allocation0 + $0x8] sm:$0x1]  ;;  %v35_v9 = vld [vmem:[#allocation0 + $0x10] sm:$0x1] }
  0x82   :  { %28 = vst [vmem:[%s95_s1] sm:$0x1] %v26_v7  ;;  %51 = vst [vmem:[%s95_s1 + $0x1] sm:$0x1] %v30_v8  ;;  %v41_v10 = vld [vmem:[#allocation0 + $0x18] sm:$0x1] }
  0x83   :  { %52 = vst [vmem:[%s95_s1 + $0x2] sm:$0x1] %v35_v9  ;;  %53 = vst [vmem:[%s95_s1 + $0x3] sm:$0x1] %v41_v10 }

// kernel: stfem_forward.1
= control target key start
LH: loop header
LB: loop body
LE: loop exit
PB: predicated region body
PF: predicated region fallthrough
CT: control target
= control target key end

     0   :  { %s20163_s21 = smov 0   ;;  %s25399_s0 = inlined_call_operand.vmem [shape: f32[4,25,512], index: 0, kind: input, shape index: {}]   ;;  %s25400_s1 = inlined_call_operand.vmem [shape: f32[3,25,25], index: 1, kind: input, shape index: {}]   ;;  %s25401_s2 = inlined_call_operand.vmem [shape: bf16[3,512,128], index: 2, kind: input, shape index: {}]   ;;  %s25402_s3 = inlined_call_operand.vmem [shape: f32[3,1,128], index: 3, kind: input, shape index: {}]   ;;  %s25403_s4 = inlined_call_operand.vmem [shape: bf16[3,512,128], index: 4, kind: input, shape index: {}]   ;;  %s25404_s5 = inlined_call_operand.vmem [shape: f32[3,1,128], index: 5, kind: input, shape index: {}]   ;;  %s25405_s6 = inlined_call_operand.vmem [shape: bf16[3,512,512], index: 6, kind: input, shape index: {}]   ;;  %s25406_s7 = inlined_call_operand.vmem [shape: f32[1,512], index: 7, kind: input, shape index: {}]   ;;  %s25407_s8 = inlined_call_operand.vmem [shape: f32[1,512], index: 8, kind: input, shape index: {}]   ;;  %s25408_s9 = inlined_call_operand.vmem [shape: bf16[512,512], index: 9, kind: input, shape index: {}]   ;;  %s25409_s10 = inlined_call_operand.vmem [shape: f32[1,512], index: 10, kind: input, shape index: {}]   ;;  %s25410_s11 = inlined_call_operand.vmem [shape: f32[1,512], index: 11, kind: input, shape index: {}]   ;;  %s25411_s12 = inlined_call_operand.vmem [shape: f32[4,25,512], index: 12, kind: output, shape index: {}]  }
   0x1 LB: > { %s14555_s22 = sadd.s32 4294967295, %s20094_s21   ;;  %p14559_p0 = scmp.ge.s32.totalorder %s20094_s21, 1  ;;  %s20094_s21 = sphi %s20163_s21, %s22_s21  }
   0x2   : > { %p364_p1 = scmp.lt.s32.totalorder %s20094_s21, 3 }
   0x4   : > { %p365_p2 = pnand %p14559_p0, %p364_p1 }
   0x5   : > { %v18040_v0 = vld [vmem:[%s25401_s2 + $0x40] sm:$0xff] (!%p365_p2)   ;;  %v18044_v4 = vld [vmem:[%s25401_s2 + $0x48] sm:$0xff] (!%p365_p2)   ;;  %v18048_v8 = vld [vmem:[%s25401_s2 + $0x50] sm:$0xff] (!%p365_p2)   ;;  %s14560_s23 = sshll.u32 (!%p365_p2), %s14555_s22, 1  ;;  %vm1230_vm0 = vcmask (!%p365_p2), 203776   ;;  %vm1240_vm1 = vcmask (!%p365_p2), 196608  }
   0x6   : > { %368 = sbr.rel (%p365_p2) target bundleno = 7199 (0x1c1f), region = 68  ;;  %v18041_v1 = vld [vmem:[%s25401_s2 + $0xc0] sm:$0xff] (!%p365_p2)   ;;  %17094 = vmatprep.subr.bf16.mxu0 (!%p365_p2), %v18040_v0  ;;  %v18045_v5 = vld [vmem:[%s25401_s2 + $0xc8] sm:$0xff] (!%p365_p2)   ;;  %v18049_v9 = vld [vmem:[%s25401_s2 + $0xd0] sm:$0xff] (!%p365_p2)   ;;  %p409_p3 = scmp.lt.s32.totalorder (!%p365_p2), %s14560_s23, 3  ;;  %vm1292_vm2 = vcmask (!%p365_p2), 1043456  }
   0x7   : > { %v18042_v2 = vld [vmem:[%s25401_s2] sm:$0xff] (!%p365_p2)   ;;  %17122 = vmatprep.subr.bf16.mxu1 (!%p365_p2), %v18041_v1  ;;  %v18046_v6 = vld [vmem:[%s25401_s2 + $0x8] sm:$0xff] (!%p365_p2)   ;;  %v18050_v10 = vld [vmem:[%s25401_s2 + $0x10] sm:$0xff] (!%p365_p2)   ;;  %vm1293_vm3 = vcmask (!%p365_p2), 1044480  }
   0x8   : > { %v18043_v3 = vld [vmem:[%s25401_s2 + $0x80] sm:$0xff] (!%p365_p2)   ;;  %17095 = vmatpush3.bf16.msra.mxu0 (!%p365_p2), %v18042_v2  ;;  %v18047_v7 = vld [vmem:[%s25401_s2 + $0x88] sm:$0xff] (!%p365_p2)   ;;  %v18051_v11 = vld [vmem:[%s25401_s2 + $0x90] sm:$0xff] (!%p365_p2)  }
   0x9   : > { %17123 = vmatpush3.bf16.msra.mxu1 (!%p365_p2), %v18043_v3  ;;  %17096 = vmatprep.subr.bf16.mxu0 (!%p365_p2), %v18044_v4  ;;  %v18052_v12 = vld [vmem:[%s25401_s2 + $0x58] sm:$0xff] (!%p365_p2)   ;;  %v18056_v16 = vld [vmem:[%s25401_s2 + $0x60] sm:$0xff] (!%p365_p2)   ;;  %v18060_v20 = vld [vmem:[%s25401_s2 + $0x68] sm:$0xff] (!%p365_p2)  }
   0xa   : > { %17124 = vmatprep.subr.bf16.mxu1 (!%p365_p2), %v18045_v5  ;;  %v18053_v13 = vld [vmem:[%s25401_s2 + $0xd8] sm:$0xff] (!%p365_p2)   ;;  %v18057_v17 = vld [vmem:[%s25401_s2 + $0xe0] sm:$0xff] (!%p365_p2)   ;;  %v18061_v21 = vld [vmem:[%s25401_s2 + $0xe8] sm:$0xff] (!%p365_p2)  }
   0xb   : > { %v18054_v14 = vld [vmem:[%s25401_s2 + $0x18] sm:$0xff] (!%p365_p2)   ;;  %v18058_v18 = vld [vmem:[%s25401_s2 + $0x20] sm:$0xff] (!%p365_p2)   ;;  %v18062_v22 = vld [vmem:[%s25401_s2 + $0x28] sm:$0xff] (!%p365_p2)  }
   0xc   : > { %17097 = vmatpush3.bf16.msra.mxu0 (!%p365_p2), %v18046_v6  ;;  %v18055_v15 = vld [vmem:[%s25401_s2 + $0x98] sm:$0xff] (!%p365_p2)   ;;  %v18059_v19 = vld [vmem:[%s25401_s2 + $0xa0] sm:$0xff] (!%p365_p2)   ;;  %v18063_v23 = vld [vmem:[%s25401_s2 + $0xa8] sm:$0xff] (!%p365_p2)  }
   0xd   : > { %17125 = vmatpush3.bf16.msra.mxu1 %v18047_v7  ;;  %17098 = vmatprep.subr.bf16.mxu0 %v18048_v8  ;;  %s25413_s23 = smov (!%p409_p3, %s14560_s23), 3  ;;  %v18064_v24 = vld [vmem:[%s25401_s2 + $0x70] sm:$0xff]   ;;  %v18068_v28 = vld [vmem:[%s25401_s2 + $0x78] sm:$0xff]   ;;  %v18072_v44 = vld [vmem:[%s25403_s4 + $0x40] sm:$0xff]  }
   0xe   : > { %17126 = vmatprep.subr.bf16.mxu1 %v18049_v9  ;;  %v18065_v25 = vld [vmem:[%s25401_s2 + $0xf0] sm:$0xff]   ;;  %s17092_s30 = sshll.u32 %s25413_s23, 7  ;;  %v18069_v29 = vld [vmem:[%s25401_s2 + $0xf8] sm:$0xff]   ;;  %v18073_v45 = vld [vmem:[%s25403_s4 + $0xc0] sm:$0xff]  }
   0xf   : > { %v18066_v26 = vld [vmem:[%s25401_s2 + $0x30] sm:$0xff]   ;;  %s20271_s20 = scalar_lea.vmem %s25399_s0, %s17092_s30  ;;  %v18070_v30 = vld [vmem:[%s25401_s2 + $0x38] sm:$0xff]   ;;  %v18074_v46 = vld [vmem:[%s25403_s4] sm:$0xff]   ;;  %s23021_s16 = scalar_lea.vmem %s25411_s12, %s17092_s30 }
  0x10   : > { %17099 = vmatpush3.bf16.msra.mxu0 %v18050_v10  ;;  %v18067_v27 = vld [vmem:[%s25401_s2 + $0xb0] sm:$0xff]   ;;  %v18071_v31 = vld [vmem:[%s25401_s2 + $0xb8] sm:$0xff]   ;;  %v428_v32 = vld [vmem:[%s20271_s20 + $0x8] sm:$0xff] }
  0x11   : > { %17127 = vmatpush3.bf16.msra.mxu1 %v18051_v11  ;;  %17100 = vmatprep.subr.bf16.mxu0 %v18052_v12  ;;  %v432_v33 = vld [vmem:[%s20271_s20 + $0x28] sm:$0xff]  ;;  %v430_v34 = vld [vmem:[%s20271_s20 + $0x18] sm:$0xff]  ;;  %v427_v37 = vld [vmem:[%s20271_s20] sm:$0xff] }
  0x12   : > { %17128 = vmatprep.subr.bf16.mxu1 %v18053_v13  ;;  %v20282_v35 = vpack.c.bf16 %v432_v33, %v428_v32  ;;  %v434_v36 = vld [vmem:[%s20271_s20 + $0x38] sm:$0xff]  ;;  %v431_v38 = vld [vmem:[%s20271_s20 + $0x20] sm:$0xff]  ;;  %v429_v41 = vld [vmem:[%s20271_s20 + $0x10] sm:$0xff] }
  0x13   : > { %v20287_v39 = vpack.c.bf16 %v434_v36, %v430_v34  ;;  %v20289_v40 = vpack.c.bf16 %v431_v38, %v427_v37  ;;  %v433_v42 = vld [vmem:[%s20271_s20 + $0x30] sm:$0xff]  ;;  %v18075_v47 = vld [vmem:[%s25403_s4 + $0x80] sm:$0xff]   ;;  %v18076_v48 = vld [vmem:[%s25403_s4 + $0x48] sm:$0xff]  }
  0x14   : > { %17101 = vmatpush3.bf16.msra.mxu0 %v18054_v14  ;;  %746 = vmatprep.mubr.bf16.mxu0 %v20282_v35  ;;  %v20294_v43 = vpack.c.bf16 %v433_v42, %v429_v41  ;;  %v18077_v49 = vld [vmem:[%s25403_s4 + $0xc8] sm:$0xff]   ;;  %v18080_v52 = vld [vmem:[%s25403_s4 + $0x50] sm:$0xff]   ;;  %v18084_v56 = vld [vmem:[%s25403_s4 + $0x58] sm:$0xff]  }
  0x15   : > { %17129 = vmatpush3.bf16.msra.mxu1 %v18055_v15  ;;  %17102 = vmatprep.subr.bf16.mxu0 %v18056_v16  ;;  %v18078_v50 = vld [vmem:[%s25403_s4 + $0x8] sm:$0xff]   ;;  %v18081_v53 = vld [vmem:[%s25403_s4 + $0xd0] sm:$0xff]   ;;  %v18085_v57 = vld [vmem:[%s25403_s4 + $0xd8] sm:$0xff]  }
  0x16   : > { %17130 = vmatprep.subr.bf16.mxu1 %v18057_v17  ;;  %795 = vmatprep.mubr.bf16.mxu1 %v20287_v39  ;;  %v18079_v51 = vld [vmem:[%s25403_s4 + $0x88] sm:$0xff]   ;;  %v18082_v54 = vld [vmem:[%s25403_s4 + $0x10] sm:$0xff]   ;;  %v18086_v58 = vld [vmem:[%s25403_s4 + $0x18] sm:$0xff]  }
  0x17   : > { %v18083_v55 = vld [vmem:[%s25403_s4 + $0x90] sm:$0xff]   ;;  %v18087_v59 = vld [vmem:[%s25403_s4 + $0x98] sm:$0xff]   ;;  %v18088_v60 = vld [vmem:[%s25403_s4 + $0x60] sm:$0xff]  }
  0x18   : > { %17103 = vmatpush3.bf16.msra.mxu0 %v18058_v18  ;;  %v18089_v61 = vld [vmem:[%s25403_s4 + $0xe0] sm:$0xff]   ;;  %v436_v0 = vld [vmem:[%s20271_s20 + $0x48] sm:$0xff]  ;;  %v438_v8 = vld [vmem:[%s20271_s20 + $0x58] sm:$0xff] }
  0x19   : > { %17131 = vmatpush3.bf16.msra.mxu1 %v18059_v19  ;;  %17104 = vmatprep.subr.bf16.mxu0 %v18060_v20  ;;  %v18090_v62 = vld [vmem:[%s25403_s4 + $0x20] sm:$0xff]   ;;  %v440_v1 = vld [vmem:[%s20271_s20 + $0x68] sm:$0x1]  ;;  %v442_v9 = vld [vmem:[%s20271_s20 + $0x78] sm:$0x1] }
  0x1a   : > { %17132 = vmatprep.subr.bf16.mxu1 %v18061_v21  ;;  %v18091_v63 = vld [vmem:[%s25403_s4 + $0xa0] sm:$0xff]   ;;  %v20363_v4 = vpack.c.bf16 %v440_v1, %v436_v0  ;;  %v18092_v6 = vld [vmem:[%s25403_s4 + $0x68] sm:$0xff]   ;;  %v20377_v10 = vpack.c.bf16 %v442_v9, %v438_v8  ;;  %v437_v13 = vld [vmem:[%s20271_s20 + $0x50] sm:$0xff] }
  0x1b   : > { %v435_v2 = vld [vmem:[%s20271_s20 + $0x40] sm:$0xff]  ;;  %v18093_v7 = vld [vmem:[%s25403_s4 + $0xe8] sm:$0xff]   ;;  %v441_v14 = vld [vmem:[%s20271_s20 + $0x70] sm:$0x1] }
  0x1c   : > { %17105 = vmatpush3.bf16.msra.mxu0 %v18062_v22  ;;  %v439_v3 = vld [vmem:[%s20271_s20 + $0x60] sm:$0x1]  ;;  %v18094_v11 = vld [vmem:[%s25403_s4 + $0x28] sm:$0xff]   ;;  %v20389_v15 = vpack.c.bf16 %v441_v14, %v437_v13  ;;  %v18096_v16 = vld [vmem:[%s25403_s4 + $0x70] sm:$0xff]  }
  0x1d   : > { %17133 = vmatpush3.bf16.msra.mxu1 %v18063_v23  ;;  %17106 = vmatprep.subr.bf16.mxu0 %v18064_v24  ;;  %v20365_v5 = vpack.c.bf16 %v439_v3, %v435_v2  ;;  %v18095_v12 = vld [vmem:[%s25403_s4 + $0xa8] sm:$0xff]   ;;  %v18097_v17 = vld [vmem:[%s25403_s4 + $0xf0] sm:$0xff]   ;;  %v18100_v20 = vld [vmem:[%s25403_s4 + $0x78] sm:$0xff]  }
  0x1e   : > { %17134 = vmatprep.subr.bf16.mxu1 %v18065_v25  ;;  %v18098_v18 = vld [vmem:[%s25403_s4 + $0x30] sm:$0xff]   ;;  %v18101_v21 = vld [vmem:[%s25403_s4 + $0xf8] sm:$0xff]   ;;  %v14566_v24 = vld [vmem:[%s25402_s3] ss:$0 sm:$0xff] }
  0x1f   : > { %v18099_v19 = vld [vmem:[%s25403_s4 + $0xb0] sm:$0xff]   ;;  %v18102_v22 = vld [vmem:[%s25403_s4 + $0x38] sm:$0xff]  }
  0x20   : > { %17107 = vmatpush3.bf16.msra.mxu0 %v18066_v26  ;;  %v18103_v23 = vld [vmem:[%s25403_s4 + $0xb8] sm:$0xff]  }
  0x21   : > { %17135 = vmatpush3.bf16.msra.mxu1 %v18067_v27  ;;  %17108 = vmatprep.subr.bf16.mxu0 %v18068_v28 }
  0x22   : > { %17136 = vmatprep.subr.bf16.mxu1 %v18069_v29 }
  0x24   : > { %17109 = vmatpush3.bf16.msra.mxu0 %v18070_v30 }
  0x25   : > { %17137 = vmatpush3.bf16.msra.mxu1 %v18071_v31  ;;  %17150 = vmatprep.subr.bf16.mxu0 %v18072_v44 }
  0x26   : > { %17178 = vmatprep.subr.bf16.mxu1 %v18073_v45 }
  0x27   : > { %747 = vmatmul.mubr.bf16.vlgmr.msra.gmra.mrb[0].mxu0 %v20289_v40 }
  0x28   : > { %796 = vmatmul.mubr.bf16.vlgmr.msra.gmra.mrb[0].mxu1 %v20294_v43  ;;  %17151 = vmatpush3.bf16.msra.mxu0 %v18074_v46 }
  0x29   : > { %17179 = vmatpush3.bf16.msra.mxu1 %v18075_v47  ;;  %17152 = vmatprep.subr.bf16.mxu0 %v18076_v48 }
  0x2a   : > { %17180 = vmatprep.subr.bf16.mxu1 %v18077_v49  ;;  %754 = vmatprep.mubr.bf16.mxu0 %v20363_v4 }
  0x2b   : > { %803 = vmatprep.mubr.bf16.mxu1 %v20377_v10 }
  0x2c   : > { %17153 = vmatpush3.bf16.msra.mxu0 %v18078_v50 }
  0x2d   : > { %17181 = vmatpush3.bf16.msra.mxu1 %v18079_v51  ;;  %17154 = vmatprep.subr.bf16.mxu0 %v18080_v52 }
  0x2e   : > { %17182 = vmatprep.subr.bf16.mxu1 %v18081_v53 }
  0x2f   : > { %755 = vmatmul.mubr.bf16.gmra.mrb[4].mxu0 %v20365_v5 }
  0x30   : > { %17155 = vmatpush3.bf16.msra.mxu0 %v18082_v54  ;;  %1107 = vmatprep.mubr.bf16.mxu0 %v20282_v35 }
  0x31   : > { %17183 = vmatpush3.bf16.msra.mxu1 %v18083_v55  ;;  %17156 = vmatprep.subr.bf16.mxu0 %v18084_v56 }
  0x32   : > { %17184 = vmatprep.subr.bf16.mxu1 %v18085_v57  ;;  %804 = vmatmul.mubr.bf16.gmra.mrb[4].mxu1 %v20389_v15 }
  0x33   : > { %1156 = vmatprep.mubr.bf16.mxu1 %v20287_v39 }
  0x34   : > { %17157 = vmatpush3.bf16.msra.mxu0 %v18086_v58 }
  0x35   : > { %17185 = vmatpush3.bf16.msra.mxu1 %v18087_v59  ;;  %17158 = vmatprep.subr.bf16.mxu0 %v18088_v60 }
  0x36   : > { %17186 = vmatprep.subr.bf16.mxu1 %v18089_v61 }
  0x38   : > { %17159 = vmatpush3.bf16.msra.mxu0 %v18090_v62 }
  0x39   : > { %17187 = vmatpush3.bf16.msra.mxu1 %v18091_v63  ;;  %17160 = vmatprep.subr.bf16.mxu0 %v18092_v6  ;;  %v14599_v63 = vld [vmem:[%s25404_s5] ss:$0 sm:$0xff] }
  0x3a   : > { %17188 = vmatprep.subr.bf16.mxu1 %v18093_v7 }
  0x3c   : > { %17161 = vmatpush3.bf16.msra.mxu0 %v18094_v11 }
  0x3d   : > { %17189 = vmatpush3.bf16.msra.mxu1 %v18095_v12  ;;  %17162 = vmatprep.subr.bf16.mxu0 %v18096_v16 }
  0x3e   : > { %17190 = vmatprep.subr.bf16.mxu1 %v18097_v17 }
  0x40   : > { %17163 = vmatpush3.bf16.msra.mxu0 %v18098_v18 }
  0x41   : > { %17191 = vmatpush3.bf16.msra.mxu1 %v18099_v19  ;;  %17164 = vmatprep.subr.bf16.mxu0 %v18100_v20 }
  0x42   : > { %17192 = vmatprep.subr.bf16.mxu1 %v18101_v21 }
  0x44   : > { %17165 = vmatpush3.bf16.msra.mxu0 %v18102_v22 }
  0x45   : > { %17193 = vmatpush3.bf16.msra.mxu1 %v18103_v23 }
  0x46   : > { %1308 = vmatprep.subr.bf16.mxu1 %v20282_v35 }
  0x47   : > { %1108 = vmatmul.mubr.bf16.vlgmr.msra.gmra.mrb[8].mxu0 %v20289_v40 }
  0x48   : > { %1157 = vmatmul.mubr.bf16.vlgmr.msra.gmra.mrb[8].mxu1 %v20294_v43  ;;  %1115 = vmatprep.mubr.bf16.mxu0 %v20363_v4 }
  0x49   : > { %1164 = vmatprep.mubr.bf16.mxu1 %v20377_v10  ;;  %1309 = vmatpush1.bf16.msra.mxu1 %v20289_v40 }
  0x4f   : > { %1116 = vmatmul.mubr.bf16.gmra.mrb[12].mxu0 %v20365_v5 }
  0x50   : > { %1165 = vmatmul.mubr.bf16.gmra.mrb[12].mxu1 %v20389_v15 }
  0xfa   : > { %v17110_v25 = vpop.f32.mrb[0].mxu0 }
  0xfb   : > { %v17138_v26 = vpop.f32.mrb[0].mxu1  ;;  %v17111_v27 = vpop.f32.mrb[1].mxu0 }
  0xfc   : > { %v17112_v28 = vadd.f32 %v17111_v27, %v17110_v25  ;;  %v17139_v29 = vpop.f32.mrb[1].mxu1  ;;  %v17113_v30 = vpop.f32.mrb[2].mxu0 }
  0xfd   : > { %v17140_v31 = vadd.f32 %v17139_v29, %v17138_v26  ;;  %v17141_v32 = vpop.f32.mrb[2].mxu1  ;;  %v17114_v33 = vpop.f32.mrb[3].mxu0 }
  0xfe   : > { %v749_v34 = vadd.f32 %v17112_v28, %v14566_v24  ;;  %v17115_v36 = vadd.f32 %v17114_v33, %v17113_v30  ;;  %v17142_v37 = vpop.f32.mrb[3].mxu1 }
  0xff   : > { %v17143_v38 = vadd.f32 %v17142_v37, %v17141_v32 }
 0x100   : > { %v798_v41 = vadd.f32 %v17140_v31, %v749_v34  ;;  %v752_v42 = vadd.f32 %v17115_v36, %v14566_v24 }
 0x102   : > { %v801_v44 = vadd.f32 %v17143_v38, %v752_v42  ;;  %v17116_v46 = vpop.f32.mrb[4].mxu0 }
 0x103   : > { %v17117_v47 = vpop.f32.mrb[5].mxu0 }
 0x104   : > { %v1175_v45 = vpack.c.bf16 %v801_v44, %v798_v41  ;;  %v17118_v48 = vadd.f32 %v17117_v47, %v17116_v46  ;;  %v17119_v49 = vpop.f32.mrb[6].mxu0 }
 0x105   : > { %v17120_v50 = vpop.f32.mrb[7].mxu0  ;;  %v17144_v53 = vpop.f32.mrb[4].mxu1 }
 0x106   : > { %17790 = vmatprep.subr.bf16.mxu0 %v1175_v45  ;;  %v17121_v51 = vadd.f32 %v17120_v50, %v17119_v49  ;;  %v757_v52 = vadd.f32 %v17118_v48, %v14566_v24  ;;  %v17145_v54 = vpop.f32.mrb[5].mxu1 }
 0x107   : > { %17791 = vmatpush3.bf16.xpose.msra.mxu0 %v1175_v45  ;;  %v17146_v56 = vadd.f32 %v17145_v54, %v17144_v53  ;;  %v17147_v57 = vpop.f32.mrb[6].mxu1 }
 0x108   : > { %v760_v55 = vadd.f32 %v17121_v51, %v14566_v24  ;;  %v17148_v58 = vpop.f32.mrb[7].mxu1 }
 0x109   : > { %v806_v59 = vadd.f32 %v17146_v56, %v757_v52  ;;  %v17149_v60 = vadd.f32 %v17148_v58, %v17147_v57 }
 0x10b   : > { %v809_v61 = vadd.f32 %v17149_v60, %v760_v55 }
 0x10d   : > { %v1176_v62 = vpack.c.bf16 %v809_v61, %v806_v59 }
 0x10f   : > { %17792 = vmatprep.subr.bf16.mxu0 %v1176_v62 }
 0x110   : > { %17793 = vmatpush3.bf16.xpose.msra.mxu0 %v1176_v62 }
 0x111   : > { %1361 = vmatprep.subr.bf16.mxu0 %v20287_v39 }
 0x11a   : > { %v17166_v0 = vpop.f32.mrb[8].mxu0 }
 0x11b   : > { %v17194_v1 = vpop.f32.mrb[8].mxu1  ;;  %v17167_v2 = vpop.f32.mrb[9].mxu0 }
 0x11c   : > { %v17168_v3 = vadd.f32 %v17167_v2, %v17166_v0  ;;  %v17195_v6 = vpop.f32.mrb[9].mxu1  ;;  %v17169_v7 = vpop.f32.mrb[10].mxu0 }
 0x11d   : > { %v17196_v8 = vadd.f32 %v17195_v6, %v17194_v1  ;;  %v17197_v9 = vpop.f32.mrb[10].mxu1  ;;  %v17170_v11 = vpop.f32.mrb[11].mxu0 }
 0x11e   : > { %v1110_v12 = vadd.f32 %v17168_v3, %v14599_v63  ;;  %v17171_v13 = vadd.f32 %v17170_v11, %v17169_v7  ;;  %v17198_v14 = vpop.f32.mrb[11].mxu1 }
 0x11f   : > { %v17199_v16 = vadd.f32 %v17198_v14, %v17197_v9 }
 0x120   : > { %v1159_v17 = vadd.f32 %v17196_v8, %v1110_v12  ;;  %v1113_v18 = vadd.f32 %v17171_v13, %v14599_v63  ;;  %v20096_v13 = vmov 65535  }
 0x121   : > { %v1294_v14 = vsel %vm1292_vm2, 4294967295, %v20096_v13  ;;  %v18130_v13 = vld [vmem:[%s25401_s2 + $0x130] sm:$0xff]  }
 0x122   : > { %v1162_v19 = vadd.f32 %v17199_v16, %v1113_v18  ;;  %v17172_v20 = vpop.f32.mrb[12].mxu0  ;;  %v20441_v16 = vsel %vm1293_vm3, %v1294_v14, 0  ;;  %v18131_v14 = vld [vmem:[%s25401_s2 + $0x1b0] sm:$0xff]  }
 0x123   : > { %v17200_v21 = vpop.f32.mrb[12].mxu1  ;;  %v17173_v22 = vpop.f32.mrb[13].mxu0  ;;  %v20449_v18 = vand.u32 %v20441_v16, %v20377_v10 }
 0x124   : > { %v17174_v23 = vadd.f32 %v17173_v22, %v17172_v20  ;;  %v17201_v24 = vpop.f32.mrb[13].mxu1  ;;  %v17175_v25 = vpop.f32.mrb[14].mxu0  ;;  %v1173_v26 = vpack.c.bf16 %v1162_v19, %v1159_v17  ;;  %v20445_v17 = vand.u32 %v20441_v16, %v20363_v4  ;;  %v20453_v19 = vand.u32 %v20441_v16, %v20365_v5  ;;  %v18105_v22 = vld [vmem:[%s25401_s2 + $0x1c0] sm:$0xff]  }
 0x125   : > { %v17202_v27 = vadd.f32 %v17201_v24, %v17200_v21  ;;  %v17203_v28 = vpop.f32.mrb[14].mxu1  ;;  %v17176_v29 = vpop.f32.mrb[15].mxu0  ;;  %v20457_v20 = vand.u32 %v20441_v16, %v20389_v15  ;;  %v18104_v21 = vld [vmem:[%s25401_s2 + $0x140] sm:$0xff]  }
 0x126   : > { %v1118_v30 = vadd.f32 %v17174_v23, %v14599_v63  ;;  %v17177_v31 = vadd.f32 %v17176_v29, %v17175_v25  ;;  %v17204_v32 = vpop.f32.mrb[15].mxu1  ;;  %17794 = vmatprep.mubr.bf16.mxu0 %v1173_v26  ;;  %1310 = vmatprep.subr.bf16.mxu1 %v20445_v17  ;;  %v20097_v23 = vmov 0  }
 0x127   : > { %v17205_v33 = vadd.f32 %v17204_v32, %v17203_v28  ;;  %1311 = vmatpush1.bf16.msra.mxu1 %v20453_v19  ;;  %1340 = vmatprep.mubr.bf16.mxu1 %v20097_v23  ;;  %v1277_v32 = vld [vmem:[%s25400_s1 + $0x8] sm:$0xff] }
 0x128   : > { %v1167_v34 = vadd.f32 %v17202_v27, %v1118_v30  ;;  %v1121_v36 = vadd.f32 %v17177_v31, %v14599_v63  ;;  %17210 = vmatprep.subr.bf16.mxu1 %v18104_v21  ;;  %v1276_v31 = vld [vmem:[%s25400_s1] sm:$0xff]  ;;  %v18132_v21 = vld [vmem:[%s25401_s2 + $0x178] sm:$0xff]  }
 0x12a   : > { %v1170_v37 = vadd.f32 %v17205_v33, %v1121_v36 }
 0x12c   : > { %v1174_v38 = vpack.c.bf16 %v1170_v37, %v1167_v34 }
 0x12e   : > { %17795 = vmatmul.mubr.bf16.vlgmr.msra.gmra.mrb[16].mxu0 %v1174_v38 }
 0x12f   : > { %1362 = vmatpush1.bf16.msra.mxu0 %v20294_v43  ;;  %1393 = vmatprep.mubr.bf16.mxu0 %v20097_v23 }
 0x130   : > { %1363 = vmatprep.subr.bf16.mxu0 %v20449_v18 }
 0x133   : > { %1364 = vmatpush1.bf16.msra.mxu0 %v20457_v20 }
 0x134   : > { %17238 = vmatprep.subr.bf16.mxu0 %v18105_v22  ;;  %v18133_v22 = vld [vmem:[%s25401_s2 + $0x1f8] sm:$0xff]  }
 0x201   : > { %v17796_v41 = vpop.f32.mrb[16].mxu0 }
 0x202   : > { %v1228_v42 = vmul.f32 0.0078125, %v17796_v41  ;;  %v1211_v44 = vpop.f32.mrb[17].mxu0  ;;  %v18106_v41 = vld [vmem:[%s25401_s2 + $0x100] sm:$0xff]  }
 0x203   : > { %v1226_v45 = vmul.f32 0.0078125, %v1211_v44  ;;  %v17797_v46 = vpop.f32.mrb[18].mxu0 }
 0x204   : > { %v1229_v47 = vmul.f32 0.0078125, %v17797_v46  ;;  %v1214_v48 = vpop.f32.mrb[19].mxu0  ;;  %v1237_v49 = vsel %vm1230_vm0, %v1228_v42, -inf  ;;  %v18109_v46 = vld [vmem:[%s25401_s2 + $0x1c8] sm:$0xff]  }
 0x205   : > { %v1227_v50 = vmul.f32 0.0078125, %v1214_v48  ;;  %1238 = vmax.xlane.f32.xlu1 %v1237_v49  ;;  %v1231_v51 = vsel %vm1230_vm0, %v1226_v45, -inf  ;;  %v1279_v48 = vld [vmem:[%s25400_s1 + $0x18] sm:$0x1] }
 0x206   : > { %1232 = vmax.xlane.f32.xlu0 %v1231_v51  ;;  %v1241_v52 = vsel %vm1240_vm1, %v1229_v47, -inf  ;;  %v18111_v51 = vld [vmem:[%s25401_s2 + $0x188] sm:$0xff]  }
 0x207   : > { %v1234_v53 = vsel %vm1230_vm0, %v1227_v50, -inf }
 0x209   : > { %1242 = vmax.xlane.f32.xlu1 %v1241_v52  ;;  %v1278_v52 = vld [vmem:[%s25400_s1 + $0x10] sm:$0xff] }
 0x20a   : > { %1235 = vmax.xlane.f32.xlu0 %v1234_v53  ;;  %v18112_v53 = vld [vmem:[%s25401_s2 + $0x150] sm:$0xff]  }
 0x292   : > { %v1239_v54 = vpop.xlane.xlu1 %1238 }
 0x293   : > { %v1246_v55 = vsub.f32 %v1228_v42, %v1239_v54  ;;  %v1233_v56 = vpop.xlane.xlu0 %1232  ;;  %v18107_v42 = vld [vmem:[%s25401_s2 + $0x180] sm:$0xff]   ;;  %v18113_v54 = vld [vmem:[%s25401_s2 + $0x1d0] sm:$0xff]  }
 0x294   : > { %v1244_v57 = vsub.f32 %v1226_v45, %v1233_v56  ;;  %v18108_v45 = vld [vmem:[%s25401_s2 + $0x148] sm:$0xff]  }
 0x295   : > { %v1252_v58 = vmul.f32 1.442695, %v1246_v55 }
 0x296   : > { %v1248_v59 = vmul.f32 1.442695, %v1244_v57  ;;  %v1243_v60 = vpop.xlane.xlu1 %1242  ;;  %v18114_v57 = vld [vmem:[%s25401_s2 + $0x110] sm:$0xff]  }
 0x297   : > { %v1247_v61 = vsub.f32 %v1229_v47, %v1243_v60  ;;  %v1236_v62 = vpop.xlane.xlu0 %1235  ;;  %v18116_v60 = vld [vmem:[%s25401_s2 + $0x158] sm:$0xff]  }
 0x298   : > { %19960 = vpow2.f32 %v1248_v59  ;;  %v1245_v63 = vsub.f32 %v1227_v50, %v1236_v62  ;;  %v18110_v50 = vld [vmem:[%s25401_s2 + $0x108] sm:$0xff]   ;;  %v18118_v62 = vld [vmem:[%s25401_s2 + $0x118] sm:$0xff]  }
 0x299   : > { %19962 = vpow2.f32 %v1252_v58  ;;  %v1254_v0 = vmul.f32 1.442695, %v1247_v61  ;;  %v18115_v58 = vld [vmem:[%s25401_s2 + $0x190] sm:$0xff]   ;;  %v18117_v61 = vld [vmem:[%s25401_s2 + $0x1d8] sm:$0xff]  }
 0x29a   : > { %v1250_v1 = vmul.f32 1.442695, %v1245_v63  ;;  %v18119_v63 = vld [vmem:[%s25401_s2 + $0x198] sm:$0xff]  }
 0x29c   : > { %19964 = vpow2.f32 %v1250_v1  ;;  %v18121_v1 = vld [vmem:[%s25401_s2 + $0x1e0] sm:$0xff]  }
 0x29d   : > { %19966 = vpow2.f32 %v1254_v0  ;;  %v18120_v0 = vld [vmem:[%s25401_s2 + $0x160] sm:$0xff]  }
 0x2a2   : > { %v19961_v2 = vpop.eup %19960 }
 0x2a3   : > { %v1256_v3 = vsel %vm1230_vm0, %v19961_v2, 0.0  ;;  %v19963_v6 = vpop.eup %19962 }
 0x2a4   : > { %1257 = vadd.xlane.f32.xlu0 %v1256_v3  ;;  %v1262_v8 = vsel %vm1230_vm0, %v19963_v6, 0.0  ;;  %v18123_v3 = vld [vmem:[%s25401_s2 + $0x1a0] sm:$0xff]  }
 0x2a6   : > { %v19965_v7 = vpop.eup %19964 }
 0x2a7   : > { %v1259_v9 = vsel %vm1230_vm0, %v19965_v7, 0.0  ;;  %v19967_v11 = vpop.eup %19966 }
 0x2a8   : > { %1263 = vadd.xlane.f32.xlu0 %v1262_v8  ;;  %1260 = vadd.xlane.f32.xlu1 %v1259_v9  ;;  %v1265_v12 = vsel %vm1240_vm1, %v19967_v11, 0.0  ;;  %v18126_v8 = vld [vmem:[%s25401_s2 + $0x128] sm:$0xff]  }
 0x2a9   : > { %v18127_v9 = vld [vmem:[%s25401_s2 + $0x1a8] sm:$0xff]  }
 0x2ac   : > { %1266 = vadd.xlane.f32.xlu1 %v1265_v12  ;;  %v18129_v12 = vld [vmem:[%s25401_s2 + $0x1f0] sm:$0xff]  }
 0x331   : > { %v1258_v24 = vpop.xlane.xlu0 %1257 }
 0x332   : > { %19968 = vrcp.f32 %v1258_v24  ;;  %v18134_v24 = vld [vmem:[%s25401_s2 + $0x138] sm:$0xff]  }
 0x335   : > { %v1261_v25 = vpop.xlane.xlu1 %1260  ;;  %v1264_v26 = vpop.xlane.xlu0 %1263 }
 0x336   : > { %19970 = vrcp.f32 %v1261_v25  ;;  %v18135_v25 = vld [vmem:[%s25401_s2 + $0x1b8] sm:$0xff]  }
 0x337   : > { %19972 = vrcp.f32 %v1264_v26  ;;  %v18136_v26 = vld [vmem:[%s25403_s4 + $0x140] sm:$0xff]  }
 0x339   : > { %v1267_v27 = vpop.xlane.xlu1 %1266 }
 0x33a   : > { %19974 = vrcp.f32 %v1267_v27  ;;  %v18137_v27 = vld [vmem:[%s25403_s4 + $0x1c0] sm:$0xff]  }
 0x33c   : > { %v19969_v28 = vpop.eup %19968 }
 0x33d   : > { %v1272_v29 = vmul.f32 %v19969_v28, %v19961_v2  ;;  %v18122_v2 = vld [vmem:[%s25401_s2 + $0x120] sm:$0xff]  }
 0x33e   : > { %v18138_v28 = vld [vmem:[%s25403_s4 + $0x100] sm:$0xff]  }
 0x33f   : > { %v1280_v36 = vadd.f32 %v1276_v31, %v1272_v29  ;;  %v18139_v29 = vld [vmem:[%s25403_s4 + $0x180] sm:$0xff]   ;;  %v18141_v31 = vld [vmem:[%s25403_s4 + $0x1c8] sm:$0xff]  }
 0x340   : > { %v19971_v30 = vpop.eup %19970 }
 0x341   : > { %v1273_v33 = vmul.f32 %v19971_v30, %v19965_v7  ;;  %v19973_v34 = vpop.eup %19972  ;;  %v18125_v7 = vld [vmem:[%s25401_s2 + $0x1e8] sm:$0xff]  }
 0x342   : > { %v1274_v49 = vmul.f32 %v19973_v34, %v19963_v6  ;;  %v18124_v6 = vld [vmem:[%s25401_s2 + $0x168] sm:$0xff]   ;;  %v18144_v34 = vld [vmem:[%s25403_s4 + $0x150] sm:$0xff]  }
 0x343   : > { %v1281_v37 = vadd.f32 %v1277_v32, %v1273_v33  ;;  %v18140_v30 = vld [vmem:[%s25403_s4 + $0x148] sm:$0xff]  }
 0x344   : > { %v19975_v38 = vpop.eup %19974  ;;  %v1282_v56 = vadd.f32 %v1278_v52, %v1274_v49  ;;  %v18142_v32 = vld [vmem:[%s25403_s4 + $0x108] sm:$0xff]   ;;  %v18155_v49 = vld [vmem:[%s25403_s4 + $0x1a0] sm:$0xff]  }
 0x345   : > { %v1284_v44 = vpack.c.bf16 %v1281_v37, %v1280_v36  ;;  %v1275_v47 = vmul.f32 %v19975_v38, %v19967_v11  ;;  %v18128_v11 = vld [vmem:[%s25401_s2 + $0x170] sm:$0xff]   ;;  %v18143_v33 = vld [vmem:[%s25403_s4 + $0x188] sm:$0xff]  }
 0x346   : > { %v18145_v36 = vld [vmem:[%s25403_s4 + $0x1d0] sm:$0xff]   ;;  %v18158_v52 = vld [vmem:[%s25403_s4 + $0x128] sm:$0xff]  }
 0x347   : > { %14632 = vmatmul.mubr.msk.bf16.vlgmr.msra.gmra.mrb[16].mxu1 %vm1230_vm0, %v1284_v44  ;;  %14634 = vmatmul.mubr.msk.bf16.vlgmr.msra.gmra.mrb[20].mxu0 %vm1230_vm0, %v1284_v44  ;;  %v1283_v55 = vadd.f32 %v1279_v48, %v1275_v47  ;;  %v18146_v37 = vld [vmem:[%s25403_s4 + $0x110] sm:$0xff]   ;;  %v18150_v44 = vld [vmem:[%s25403_s4 + $0x118] sm:$0xff]   ;;  %v18153_v47 = vld [vmem:[%s25403_s4 + $0x1e0] sm:$0xff]  }
 0x348   : > { %17211 = vmatpush3.bf16.msra.mxu1 %v18106_v41  ;;  %17239 = vmatpush3.bf16.msra.mxu0 %v18107_v42  ;;  %v18147_v38 = vld [vmem:[%s25403_s4 + $0x190] sm:$0xff]   ;;  %v18148_v41 = vld [vmem:[%s25403_s4 + $0x158] sm:$0xff]   ;;  %v18154_v48 = vld [vmem:[%s25403_s4 + $0x120] sm:$0xff]  }
 0x349   : > { %17212 = vmatprep.subr.bf16.mxu1 %v18108_v45  ;;  %17240 = vmatprep.subr.bf16.mxu0 %v18109_v46  ;;  %v1285_v59 = vpack.c.bf16 %v1283_v55, %v1282_v56  ;;  %v18149_v42 = vld [vmem:[%s25403_s4 + $0x1d8] sm:$0xff]   ;;  %v18152_v46 = vld [vmem:[%s25403_s4 + $0x160] sm:$0xff]   ;;  %v18161_v55 = vld [vmem:[%s25403_s4 + $0x1f0] sm:$0xff]  }
 0x34a   : > { %1350 = vmatprep.mubr.bf16.mxu1 %v20097_v23  ;;  %1403 = vmatprep.mubr.bf16.mxu0 %v20097_v23  ;;  %v18151_v45 = vld [vmem:[%s25403_s4 + $0x198] sm:$0xff]   ;;  %v18162_v56 = vld [vmem:[%s25403_s4 + $0x130] sm:$0xff]  }
 0x34c   : > { %17213 = vmatpush3.bf16.msra.mxu1 %v18110_v50  ;;  %17241 = vmatpush3.bf16.msra.mxu0 %v18111_v51  ;;  %v18156_v50 = vld [vmem:[%s25403_s4 + $0x168] sm:$0xff]  }
 0x34d   : > { %17214 = vmatprep.subr.bf16.mxu1 %v18112_v53  ;;  %17242 = vmatprep.subr.bf16.mxu0 %v18113_v54  ;;  %v18157_v51 = vld [vmem:[%s25403_s4 + $0x1e8] sm:$0xff]   ;;  %v18160_v54 = vld [vmem:[%s25403_s4 + $0x170] sm:$0xff]  }
 0x34e   : > { %v18159_v53 = vld [vmem:[%s25403_s4 + $0x1a8] sm:$0xff]  }
 0x34f   : > { %14633 = vmatmul.mubr.msk.bf16.gmra.mrb[20].mxu1 %vm1230_vm0, %v1285_v59  ;;  %14635 = vmatmul.mubr.msk.bf16.gmra.mrb[24].mxu0 %vm1230_vm0, %v1285_v59  ;;  %v18165_v59 = vld [vmem:[%s25403_s4 + $0x1f8] sm:$0xff]  }
 0x350   : > { %17215 = vmatpush3.bf16.msra.mxu1 %v18114_v57  ;;  %17243 = vmatpush3.bf16.msra.mxu0 %v18115_v58  ;;  %v18163_v57 = vld [vmem:[%s25403_s4 + $0x1b0] sm:$0xff]   ;;  %v18164_v58 = vld [vmem:[%s25403_s4 + $0x178] sm:$0xff]  }
 0x351   : > { %17216 = vmatprep.subr.bf16.mxu1 %v18116_v60  ;;  %17244 = vmatprep.subr.bf16.mxu0 %v18117_v61  ;;  %v18166_v60 = vld [vmem:[%s25403_s4 + $0x138] sm:$0xff]  }
 0x352   : > { %1847 = vmatprep.mubr.bf16.mxu1 %v20282_v35  ;;  %1896 = vmatprep.mubr.bf16.mxu0 %v20287_v39  ;;  %v18167_v61 = vld [vmem:[%s25403_s4 + $0x1b8] sm:$0xff]  }
 0x354   : > { %17217 = vmatpush3.bf16.msra.mxu1 %v18118_v62  ;;  %17245 = vmatpush3.bf16.msra.mxu0 %v18119_v63 }
 0x355   : > { %17218 = vmatprep.subr.bf16.mxu1 %v18120_v0  ;;  %17246 = vmatprep.subr.bf16.mxu0 %v18121_v1 }
 0x358   : > { %17219 = vmatpush3.bf16.msra.mxu1 %v18122_v2  ;;  %17247 = vmatpush3.bf16.msra.mxu0 %v18123_v3 }
 0x359   : > { %17220 = vmatprep.subr.bf16.mxu1 %v18124_v6  ;;  %17248 = vmatprep.subr.bf16.mxu0 %v18125_v7 }
 0x35c   : > { %17221 = vmatpush3.bf16.msra.mxu1 %v18126_v8  ;;  %17249 = vmatpush3.bf16.msra.mxu0 %v18127_v9 }
 0x35d   : > { %17222 = vmatprep.subr.bf16.mxu1 %v18128_v11  ;;  %17250 = vmatprep.subr.bf16.mxu0 %v18129_v12 }
 0x360   : > { %17223 = vmatpush3.bf16.msra.mxu1 %v18130_v13  ;;  %17251 = vmatpush3.bf16.msra.mxu0 %v18131_v14 }
 0x361   : > { %17224 = vmatprep.subr.bf16.mxu1 %v18132_v21  ;;  %17252 = vmatprep.subr.bf16.mxu0 %v18133_v22 }
 0x364   : > { %17225 = vmatpush3.bf16.msra.mxu1 %v18134_v24  ;;  %17253 = vmatpush3.bf16.msra.mxu0 %v18135_v25 }
 0x365   : > { %17266 = vmatprep.subr.bf16.mxu1 %v18136_v26  ;;  %17294 = vmatprep.subr.bf16.mxu0 %v18137_v27 }
 0x367   : > { %1848 = vmatmul.mubr.bf16.vlgmr.msra.gmra.mrb[24].mxu1 %v20289_v40  ;;  %1897 = vmatmul.mubr.bf16.vlgmr.msra.gmra.mrb[28].mxu0 %v20294_v43 }
 0x368   : > { %17267 = vmatpush3.bf16.msra.mxu1 %v18138_v28  ;;  %17295 = vmatpush3.bf16.msra.mxu0 %v18139_v29 }
 0x369   : > { %17268 = vmatprep.subr.bf16.mxu1 %v18140_v30  ;;  %17296 = vmatprep.subr.bf16.mxu0 %v18141_v31 }
 0x36a   : > { %1855 = vmatprep.mubr.bf16.mxu1 %v20363_v4  ;;  %1904 = vmatprep.mubr.bf16.mxu0 %v20377_v10 }
 0x36c   : > { %17269 = vmatpush3.bf16.msra.mxu1 %v18142_v32  ;;  %17297 = vmatpush3.bf16.msra.mxu0 %v18143_v33 }
 0x36d   : > { %17270 = vmatprep.subr.bf16.mxu1 %v18144_v34  ;;  %17298 = vmatprep.subr.bf16.mxu0 %v18145_v36  ;;  %v14701_v34 = vld [vmem:[%s25402_s3 + $0x1] ss:$0 sm:$0xff] }
 0x36f   : > { %1856 = vmatmul.mubr.bf16.gmra.mrb[28].mxu1 %v20365_v5  ;;  %1905 = vmatmul.mubr.bf16.gmra.mrb[32].mxu0 %v20389_v15 }
 0x370   : > { %17271 = vmatpush3.bf16.msra.mxu1 %v18146_v37  ;;  %17299 = vmatpush3.bf16.msra.mxu0 %v18147_v38 }
 0x371   : > { %17272 = vmatprep.subr.bf16.mxu1 %v18148_v41  ;;  %17300 = vmatprep.subr.bf16.mxu0 %v18149_v42 }
 0x372   : > { %2210 = vmatprep.mubr.bf16.mxu1 %v20282_v35  ;;  %2259 = vmatprep.mubr.bf16.mxu0 %v20287_v39 }
 0x374   : > { %17273 = vmatpush3.bf16.msra.mxu1 %v18150_v44  ;;  %17301 = vmatpush3.bf16.msra.mxu0 %v18151_v45 }
 0x375   : > { %17274 = vmatprep.subr.bf16.mxu1 %v18152_v46  ;;  %17302 = vmatprep.subr.bf16.mxu0 %v18153_v47 }
 0x378   : > { %17275 = vmatpush3.bf16.msra.mxu1 %v18154_v48  ;;  %17303 = vmatpush3.bf16.msra.mxu0 %v18155_v49 }
 0x379   : > { %17276 = vmatprep.subr.bf16.mxu1 %v18156_v50  ;;  %17304 = vmatprep.subr.bf16.mxu0 %v18157_v51 }
 0x37c   : > { %17277 = vmatpush3.bf16.msra.mxu1 %v18158_v52  ;;  %17305 = vmatpush3.bf16.msra.mxu0 %v18159_v53 }
 0x37d   : > { %17278 = vmatprep.subr.bf16.mxu1 %v18160_v54  ;;  %17306 = vmatprep.subr.bf16.mxu0 %v18161_v55 }
 0x380   : > { %17279 = vmatpush3.bf16.msra.mxu1 %v18162_v56  ;;  %17307 = vmatpush3.bf16.msra.mxu0 %v18163_v57 }
 0x381   : > { %17280 = vmatprep.subr.bf16.mxu1 %v18164_v58  ;;  %17308 = vmatprep.subr.bf16.mxu0 %v18165_v59 }
 0x384   : > { %17281 = vmatpush3.bf16.msra.mxu1 %v18166_v60  ;;  %17309 = vmatpush3.bf16.msra.mxu0 %v18167_v61 }
 0x385   : > { %2394 = vmatprep.subr.bf16.mxu0 %v20282_v35 }
 0x387   : > { %2211 = vmatmul.mubr.bf16.vlgmr.msra.gmra.mrb[32].mxu1 %v20289_v40  ;;  %2260 = vmatmul.mubr.bf16.vlgmr.msra.gmra.mrb[36].mxu0 %v20294_v43 }
 0x388   : > { %2218 = vmatprep.mubr.bf16.mxu1 %v20363_v4  ;;  %2267 = vmatprep.mubr.bf16.mxu0 %v20377_v10 }
 0x389   : > { %2395 = vmatpush1.bf16.msra.mxu0 %v20289_v40 }
 0x38a   : > { %2396 = vmatprep.subr.bf16.mxu0 %v20445_v17 }
 0x38d   : > { %2397 = vmatpush1.bf16.msra.mxu0 %v20453_v19 }
 0x38f   : > { %2219 = vmatmul.mubr.bf16.gmra.mrb[36].mxu1 %v20365_v5  ;;  %2268 = vmatmul.mubr.bf16.gmra.mrb[40].mxu0 %v20389_v15 }
 0x390   : > { %2426 = vmatprep.mubr.bf16.mxu0 %v20097_v23 }
 0x41a   : > { %v1342_v62 = vpop.f32.mrb[16].mxu1  ;;  %v1395_v63 = vpop.f32.mrb[20].mxu0 }
 0x41b   : > { %v1344_v0 = vpop.f32.mrb[17].mxu1  ;;  %v1397_v1 = vpop.f32.mrb[21].mxu0 }
 0x41c   : > { %v1346_v2 = vpop.f32.mrb[18].mxu1  ;;  %v1399_v3 = vpop.f32.mrb[22].mxu0 }
 0x41d   : > { %v20696_v6 = vpack.c.bf16 %v1346_v2, %v1342_v62  ;;  %v20698_v7 = vpack.c.bf16 %v1399_v3, %v1395_v63  ;;  %v1348_v8 = vpop.f32.mrb[19].mxu1  ;;  %v1401_v9 = vpop.f32.mrb[23].mxu0 }
 0x41e   : > { %v20700_v11 = vpack.c.bf16 %v1348_v8, %v1344_v0  ;;  %v20702_v12 = vpack.c.bf16 %v1401_v9, %v1397_v1 }
 0x422   : > { %v1352_v13 = vpop.f32.mrb[20].mxu1  ;;  %v1405_v14 = vpop.f32.mrb[24].mxu0 }
 0x423   : > { %v1354_v21 = vpop.f32.mrb[21].mxu1  ;;  %v1407_v22 = vpop.f32.mrb[25].mxu0 }
 0x424   : > { %v1356_v24 = vpop.f32.mrb[22].mxu1  ;;  %v1409_v25 = vpop.f32.mrb[26].mxu0 }
 0x425   : > { %v20704_v26 = vpack.c.bf16 %v1356_v24, %v1352_v13  ;;  %v20706_v27 = vpack.c.bf16 %v1409_v25, %v1405_v14  ;;  %v1358_v28 = vpop.f32.mrb[23].mxu1  ;;  %v1411_v29 = vpop.f32.mrb[27].mxu0 }
 0x426   : > { %v20708_v30 = vpack.c.bf16 %v1358_v28, %v1354_v21  ;;  %v20710_v31 = vpack.c.bf16 %v1411_v29, %v1407_v22  ;;  %v14799_v22 = vld [vmem:[%s25404_s5 + $0x1] ss:$0 sm:$0xff] }
 0x43a   : > { %v17226_v32 = vpop.f32.mrb[24].mxu1  ;;  %v17254_v33 = vpop.f32.mrb[28].mxu0 }
 0x43b   : > { %v17227_v36 = vpop.f32.mrb[25].mxu1  ;;  %v17255_v37 = vpop.f32.mrb[29].mxu0 }
 0x43c   : > { %v17228_v38 = vadd.f32 %v17227_v36, %v17226_v32  ;;  %v17256_v41 = vadd.f32 %v17255_v37, %v17254_v33  ;;  %v17229_v42 = vpop.f32.mrb[26].mxu1  ;;  %v17257_v44 = vpop.f32.mrb[30].mxu0 }
 0x43d   : > { %v17230_v45 = vpop.f32.mrb[27].mxu1  ;;  %v17258_v46 = vpop.f32.mrb[31].mxu0 }
 0x43e   : > { %v1850_v47 = vadd.f32 %v17228_v38, %v14701_v34  ;;  %v17231_v48 = vadd.f32 %v17230_v45, %v17229_v42  ;;  %v17259_v49 = vadd.f32 %v17258_v46, %v17257_v44 }
 0x440   : > { %v1899_v50 = vadd.f32 %v17256_v41, %v1850_v47  ;;  %v1853_v51 = vadd.f32 %v17231_v48, %v14701_v34 }
 0x442   : > { %v1902_v52 = vadd.f32 %v17259_v49, %v1853_v51  ;;  %v17232_v53 = vpop.f32.mrb[28].mxu1  ;;  %v17260_v54 = vpop.f32.mrb[32].mxu0 }
 0x443   : > { %v17233_v55 = vpop.f32.mrb[29].mxu1  ;;  %v17261_v56 = vpop.f32.mrb[33].mxu0 }
 0x444   : > { %v2278_v57 = vpack.c.bf16 %v1902_v52, %v1899_v50  ;;  %v17234_v58 = vadd.f32 %v17233_v55, %v17232_v53  ;;  %v17235_v59 = vpop.f32.mrb[30].mxu1  ;;  %v17262_v60 = vadd.f32 %v17261_v56, %v17260_v54  ;;  %v17263_v61 = vpop.f32.mrb[34].mxu0 }
 0x445   : > { %v17236_v62 = vpop.f32.mrb[31].mxu1  ;;  %v17264_v63 = vpop.f32.mrb[35].mxu0 }
 0x446   : > { %17798 = vmatprep.subr.bf16.mxu1 %v2278_v57  ;;  %v1858_v0 = vadd.f32 %v17234_v58, %v14701_v34  ;;  %v17237_v1 = vadd.f32 %v17236_v62, %v17235_v59  ;;  %v17265_v2 = vadd.f32 %v17264_v63, %v17263_v61 }
 0x447   : > { %17799 = vmatpush3.bf16.xpose.msra.mxu1 %v2278_v57 }
 0x448   : > { %v1861_v3 = vadd.f32 %v17237_v1, %v14701_v34  ;;  %v1907_v8 = vadd.f32 %v17262_v60, %v1858_v0 }
 0x44a   : > { %v1910_v9 = vadd.f32 %v17265_v2, %v1861_v3 }
 0x44c   : > { %v2279_v13 = vpack.c.bf16 %v1910_v9, %v1907_v8 }
 0x44e   : > { %17800 = vmatprep.subr.bf16.mxu1 %v2279_v13 }
 0x44f   : > { %17801 = vmatpush3.bf16.xpose.msra.mxu1 %v2279_v13 }
 0x450   : > { %2447 = vmatprep.subr.bf16.mxu1 %v20287_v39 }
 0x45a   : > { %v17282_v14 = vpop.f32.mrb[32].mxu1  ;;  %v17310_v21 = vpop.f32.mrb[36].mxu0 }
 0x45b   : > { %v17283_v24 = vpop.f32.mrb[33].mxu1  ;;  %v17311_v25 = vpop.f32.mrb[37].mxu0 }
 0x45c   : > { %v17284_v28 = vadd.f32 %v17283_v24, %v17282_v14  ;;  %v17312_v29 = vadd.f32 %v17311_v25, %v17310_v21  ;;  %v17285_v32 = vpop.f32.mrb[34].mxu1  ;;  %v17313_v33 = vpop.f32.mrb[38].mxu0 }
 0x45d   : > { %v17286_v34 = vpop.f32.mrb[35].mxu1  ;;  %v17314_v36 = vpop.f32.mrb[39].mxu0 }
 0x45e   : > { %v2213_v37 = vadd.f32 %v17284_v28, %v14799_v22  ;;  %v17287_v38 = vadd.f32 %v17286_v34, %v17285_v32  ;;  %v17315_v41 = vadd.f32 %v17314_v36, %v17313_v33 }
 0x460   : > { %v2262_v42 = vadd.f32 %v17312_v29, %v2213_v37  ;;  %v2216_v44 = vadd.f32 %v17287_v38, %v14799_v22 }
 0x462   : > { %v2265_v45 = vadd.f32 %v17315_v41, %v2216_v44  ;;  %v17288_v46 = vpop.f32.mrb[36].mxu1  ;;  %v17316_v47 = vpop.f32.mrb[40].mxu0 }
 0x463   : > { %v17289_v48 = vpop.f32.mrb[37].mxu1  ;;  %v17317_v49 = vpop.f32.mrb[41].mxu0 }
 0x464   : > { %v17290_v50 = vadd.f32 %v17289_v48, %v17288_v46  ;;  %v17318_v51 = vadd.f32 %v17317_v49, %v17316_v47  ;;  %v17291_v52 = vpop.f32.mrb[38].mxu1  ;;  %v17319_v53 = vpop.f32.mrb[42].mxu0  ;;  %v2276_v54 = vpack.c.bf16 %v2265_v45, %v2262_v42 }
 0x465   : > { %v17292_v55 = vpop.f32.mrb[39].mxu1  ;;  %v17320_v56 = vpop.f32.mrb[43].mxu0 }
 0x466   : > { %v2221_v57 = vadd.f32 %v17290_v50, %v14799_v22  ;;  %v17293_v58 = vadd.f32 %v17292_v55, %v17291_v52  ;;  %v17321_v59 = vadd.f32 %v17320_v56, %v17319_v53  ;;  %17802 = vmatprep.mubr.bf16.mxu1 %v2276_v54  ;;  %v18170_v54 = vld [vmem:[%s25405_s6 + $0x404] ss:$16 sps:$4 sm:$0xff]   ;;  %v18173_v55 = vld [vmem:[%s25405_s6 + $0x40c] ss:$16 sps:$4 sm:$0xff]  }
 0x467   : > { %3277 = vmatprep.subr.bf16.mxu0 %v18170_v54  ;;  %v18200_v54 = vld [vmem:[%s25405_s6 + $0x4a4] ss:$16 sps:$4 sm:$0xff]  }
 0x468   : > { %v2270_v60 = vadd.f32 %v17318_v51, %v2221_v57  ;;  %v2224_v61 = vadd.f32 %v17293_v58, %v14799_v22 }
 0x46a   : > { %v2273_v62 = vadd.f32 %v17321_v59, %v2224_v61 }
 0x46c   : > { %v2277_v63 = vpack.c.bf16 %v2273_v62, %v2270_v60 }
 0x46e   : > { %17803 = vmatmul.mubr.bf16.vlgmr.msra.gmra.mrb[40].mxu1 %v2277_v63  ;;  %v14832_v63 = vld [vmem:[%s25400_s1 + $0x20] sm:$0xff] }
 0x46f   : > { %2448 = vmatpush1.bf16.msra.mxu1 %v20294_v43  ;;  %2479 = vmatprep.mubr.bf16.mxu1 %v20097_v23 }
 0x470   : > { %2449 = vmatprep.subr.bf16.mxu1 %v20449_v18 }
 0x473   : > { %2450 = vmatpush1.bf16.msra.mxu1 %v20457_v20 }
 0x474   : > { %3383 = vmatprep.subr.bf16.mxu1 %v18173_v55  ;;  %v18203_v55 = vld [vmem:[%s25405_s6 + $0x4ac] ss:$16 sps:$4 sm:$0xff]  }
 0x541   : > { %v17804_v0 = vpop.f32.mrb[40].mxu1 }
 0x542   : > { %v2314_v1 = vpop.f32.mrb[41].mxu1  ;;  %v2331_v9 = vmul.f32 0.0078125, %v17804_v0  ;;  %v14833_v0 = vld [vmem:[%s25400_s1 + $0x28] sm:$0xff] }
 0x543   : > { %v2329_v2 = vmul.f32 0.0078125, %v2314_v1  ;;  %v17805_v3 = vpop.f32.mrb[42].mxu1 }
 0x544   : > { %v2317_v8 = vpop.f32.mrb[43].mxu1  ;;  %v2332_v21 = vmul.f32 0.0078125, %v17805_v3  ;;  %v2339_v24 = vsel %vm1230_vm0, %v2331_v9, -inf }
 0x545   : > { %v2330_v13 = vmul.f32 0.0078125, %v2317_v8  ;;  %v2333_v14 = vsel %vm1230_vm0, %v2329_v2, -inf }
 0x546   : > { %2334 = vmax.xlane.f32.xlu0 %v2333_v14  ;;  %v2342_v25 = vsel %vm1240_vm1, %v2332_v21, -inf }
 0x547   : > { %v2336_v22 = vsel %vm1230_vm0, %v2330_v13, -inf }
 0x548   : > { %2337 = vmax.xlane.f32.xlu1 %v2336_v22  ;;  %v18171_v22 = vld [vmem:[%s25405_s6 + $0x408] ss:$16 sps:$4 sm:$0xff]  }
 0x54a   : > { %2340 = vmax.xlane.f32.xlu0 %v2339_v24  ;;  %v14835_v24 = vld [vmem:[%s25400_s1 + $0x38] sm:$0x1] }
 0x54c   : > { %2343 = vmax.xlane.f32.xlu1 %v2342_v25  ;;  %v18176_v25 = vld [vmem:[%s25405_s6 + $0x424] ss:$16 sps:$4 sm:$0xff]  }
 0x5d3   : > { %v2335_v28 = vpop.xlane.xlu0 %2334 }
 0x5d4   : > { %v2345_v29 = vsub.f32 %v2329_v2, %v2335_v28  ;;  %v18179_v28 = vld [vmem:[%s25405_s6 + $0x42c] ss:$16 sps:$4 sm:$0xff]  }
 0x5d5   : > { %v2338_v32 = vpop.xlane.xlu1 %2337 }
 0x5d6   : > { %v2349_v33 = vmul.f32 1.442695, %v2345_v29  ;;  %v2346_v34 = vsub.f32 %v2330_v13, %v2338_v32  ;;  %v14834_v32 = vld [vmem:[%s25400_s1 + $0x30] sm:$0xff] }
 0x5d7   : > { %v2341_v36 = vpop.xlane.xlu0 %2340 }
 0x5d8   : > { %19976 = vpow2.f32 %v2349_v33  ;;  %v2351_v37 = vmul.f32 1.442695, %v2346_v34  ;;  %v2347_v38 = vsub.f32 %v2331_v9, %v2341_v36  ;;  %v18174_v34 = vld [vmem:[%s25405_s6 + $0x420] ss:$16 sps:$4 sm:$0xff]   ;;  %v18177_v36 = vld [vmem:[%s25405_s6 + $0x428] ss:$16 sps:$4 sm:$0xff]  }
 0x5d9   : > { %v2344_v41 = vpop.xlane.xlu1 %2343 }
 0x5da   : > { %19978 = vpow2.f32 %v2351_v37  ;;  %v2353_v42 = vmul.f32 1.442695, %v2347_v38  ;;  %v2348_v44 = vsub.f32 %v2332_v21, %v2344_v41  ;;  %v18168_v21 = vld [vmem:[%s25405_s6 + $0x400] ss:$16 sps:$4 sm:$0xff]   ;;  %v18182_v37 = vld [vmem:[%s25405_s6 + $0x444] ss:$16 sps:$4 sm:$0xff]  }
 0x5db   : > { %v18185_v38 = vld [vmem:[%s25405_s6 + $0x44c] ss:$16 sps:$4 sm:$0xff]  }
 0x5dc   : > { %19980 = vpow2.f32 %v2353_v42  ;;  %v2355_v45 = vmul.f32 1.442695, %v2348_v44  ;;  %v18180_v44 = vld [vmem:[%s25405_s6 + $0x440] ss:$16 sps:$4 sm:$0xff]  }
 0x5de   : > { %19982 = vpow2.f32 %v2355_v45  ;;  %v18183_v45 = vld [vmem:[%s25405_s6 + $0x448] ss:$16 sps:$4 sm:$0xff]  }
 0x5e2   : > { %v19977_v46 = vpop.eup %19976 }
 0x5e3   : > { %v2357_v47 = vsel %vm1230_vm0, %v19977_v46, 0.0 }
 0x5e4   : > { %v19979_v48 = vpop.eup %19978  ;;  %2358 = vadd.xlane.f32.xlu0 %v2357_v47  ;;  %v18191_v47 = vld [vmem:[%s25405_s6 + $0x46c] ss:$16 sps:$4 sm:$0xff]  }
 0x5e5   : > { %v2360_v49 = vsel %vm1230_vm0, %v19979_v48, 0.0 }
 0x5e6   : > { %v19981_v50 = vpop.eup %19980  ;;  %2361 = vadd.xlane.f32.xlu1 %v2360_v49  ;;  %v18189_v49 = vld [vmem:[%s25405_s6 + $0x468] ss:$16 sps:$4 sm:$0xff]  }
 0x5e7   : > { %v2363_v51 = vsel %vm1230_vm0, %v19981_v50, 0.0 }
 0x5e8   : > { %v19983_v52 = vpop.eup %19982  ;;  %2364 = vadd.xlane.f32.xlu0 %v2363_v51  ;;  %v18197_v51 = vld [vmem:[%s25405_s6 + $0x48c] ss:$16 sps:$4 sm:$0xff]  }
 0x5e9   : > { %v2366_v53 = vsel %vm1240_vm1, %v19983_v52, 0.0 }
 0x5ea   : > { %2367 = vadd.xlane.f32.xlu1 %v2366_v53  ;;  %v18195_v53 = vld [vmem:[%s25405_s6 + $0x488] ss:$16 sps:$4 sm:$0xff]  }
 0x671   : > { %v2359_v56 = vpop.xlane.xlu0 %2358 }
 0x672   : > { %19984 = vrcp.f32 %v2359_v56  ;;  %v18198_v56 = vld [vmem:[%s25405_s6 + $0x4a0] ss:$16 sps:$4 sm:$0xff]  }
 0x673   : > { %v2362_v57 = vpop.xlane.xlu1 %2361 }
 0x674   : > { %19986 = vrcp.f32 %v2362_v57  ;;  %v18201_v57 = vld [vmem:[%s25405_s6 + $0x4a8] ss:$16 sps:$4 sm:$0xff]  }
 0x675   : > { %v2365_v58 = vpop.xlane.xlu0 %2364 }
 0x676   : > { %19988 = vrcp.f32 %v2365_v58  ;;  %v18206_v58 = vld [vmem:[%s25405_s6 + $0x4c4] ss:$16 sps:$4 sm:$0xff]  }
 0x677   : > { %v2368_v59 = vpop.xlane.xlu1 %2367 }
 0x678   : > { %19990 = vrcp.f32 %v2368_v59  ;;  %v18209_v59 = vld [vmem:[%s25405_s6 + $0x4cc] ss:$16 sps:$4 sm:$0xff]  }
 0x67c   : > { %v19985_v60 = vpop.eup %19984 }
 0x67d   : > { %v2373_v61 = vmul.f32 %v19985_v60, %v19977_v46  ;;  %v18188_v46 = vld [vmem:[%s25405_s6 + $0x464] ss:$16 sps:$4 sm:$0xff]   ;;  %v18204_v60 = vld [vmem:[%s25405_s6 + $0x4c0] ss:$16 sps:$4 sm:$0xff]  }
 0x67e   : > { %v19987_v62 = vpop.eup %19986 }
 0x67f   : > { %v2374_v1 = vmul.f32 %v19987_v62, %v19979_v48  ;;  %v2382_v3 = vadd.f32 %v14832_v63, %v2373_v61  ;;  %v18186_v48 = vld [vmem:[%s25405_s6 + $0x460] ss:$16 sps:$4 sm:$0xff]   ;;  %v18207_v61 = vld [vmem:[%s25405_s6 + $0x4c8] ss:$16 sps:$4 sm:$0xff]   ;;  %v18212_v62 = vld [vmem:[%s25405_s6 + $0x4e4] ss:$16 sps:$4 sm:$0xff]  }
 0x680   : > { %v19989_v2 = vpop.eup %19988  ;;  %v18215_v63 = vld [vmem:[%s25405_s6 + $0x4ec] ss:$16 sps:$4 sm:$0xff]  }
 0x681   : > { %v2383_v8 = vadd.f32 %v14833_v0, %v2374_v1  ;;  %v2375_v29 = vmul.f32 %v19989_v2, %v19981_v50  ;;  %v18194_v50 = vld [vmem:[%s25405_s6 + $0x484] ss:$16 sps:$4 sm:$0xff]   ;;  %v18210_v0 = vld [vmem:[%s25405_s6 + $0x4e0] ss:$16 sps:$4 sm:$0xff]   ;;  %v18213_v1 = vld [vmem:[%s25405_s6 + $0x4e8] ss:$16 sps:$4 sm:$0xff]  }
 0x682   : > { %v19991_v9 = vpop.eup %19990  ;;  %v18218_v2 = vld [vmem:[%s25405_s6 + $0x504] ss:$16 sps:$4 sm:$0xff]  }
 0x683   : > { %v2386_v13 = vpack.c.bf16 %v2383_v8, %v2382_v3  ;;  %v2376_v14 = vmul.f32 %v19991_v9, %v19983_v52  ;;  %v2384_v41 = vadd.f32 %v14834_v32, %v2375_v29  ;;  %v18192_v52 = vld [vmem:[%s25405_s6 + $0x480] ss:$16 sps:$4 sm:$0xff]   ;;  %v18221_v3 = vld [vmem:[%s25405_s6 + $0x50c] ss:$16 sps:$4 sm:$0xff]   ;;  %v18219_v9 = vld [vmem:[%s25405_s6 + $0x508] ss:$16 sps:$4 sm:$0xff]  }
 0x684   : > { %v18216_v8 = vld [vmem:[%s25405_s6 + $0x500] ss:$16 sps:$4 sm:$0xff]   ;;  %v18231_v29 = vld [vmem:[%s25405_s6 + $0x548] ss:$16 sps:$4 sm:$0xff]   ;;  %v18236_v32 = vld [vmem:[%s25405_s6 + $0x564] ss:$16 sps:$4 sm:$0xff]  }
 0x685   : > { %14836 = vmatmul.mubr.msk.bf16.vlgmr.msra.gmra.mrb[44].mxu0 %vm1230_vm0, %v2386_v13  ;;  %14838 = vmatmul.mubr.msk.bf16.vlgmr.msra.gmra.mrb[44].mxu1 %vm1230_vm0, %v2386_v13  ;;  %v2385_v33 = vadd.f32 %v14835_v24, %v2376_v14  ;;  %v18224_v13 = vld [vmem:[%s25405_s6 + $0x524] ss:$16 sps:$4 sm:$0xff]   ;;  %v18227_v14 = vld [vmem:[%s25405_s6 + $0x52c] ss:$16 sps:$4 sm:$0xff]  }
 0x686   : > { %2436 = vmatprep.mubr.bf16.mxu0 %v20097_v23  ;;  %2489 = vmatprep.mubr.bf16.mxu1 %v20097_v23  ;;  %v18230_v24 = vld [vmem:[%s25405_s6 + $0x544] ss:$16 sps:$4 sm:$0xff]  }
 0x687   : > { %3278 = vmatpush1.bf16.msra.mxu0 %v18168_v21  ;;  %3384 = vmatpush1.bf16.msra.mxu1 %v18171_v22  ;;  %v2387_v42 = vpack.c.bf16 %v2385_v33, %v2384_v41  ;;  %v18222_v21 = vld [vmem:[%s25405_s6 + $0x520] ss:$16 sps:$4 sm:$0xff]   ;;  %v18225_v22 = vld [vmem:[%s25405_s6 + $0x528] ss:$16 sps:$4 sm:$0xff]   ;;  %v18239_v33 = vld [vmem:[%s25405_s6 + $0x56c] ss:$16 sps:$4 sm:$0xff]  }
 0x688   : > { %3279 = vmatprep.subr.bf16.mxu0 %v18176_v25  ;;  %3385 = vmatprep.subr.bf16.mxu1 %v18179_v28  ;;  %v18233_v25 = vld [vmem:[%s25405_s6 + $0x54c] ss:$16 sps:$4 sm:$0xff]   ;;  %v18228_v28 = vld [vmem:[%s25405_s6 + $0x540] ss:$16 sps:$4 sm:$0xff]  }
 0x689   : > { %v18240_v41 = vld [vmem:[%s25405_s6 + $0x580] ss:$16 sps:$4 sm:$0xff]  }
 0x68b   : > { %3280 = vmatpush1.bf16.msra.mxu0 %v18174_v34  ;;  %3386 = vmatpush1.bf16.msra.mxu1 %v18177_v36  ;;  %v18234_v34 = vld [vmem:[%s25405_s6 + $0x560] ss:$16 sps:$4 sm:$0xff]   ;;  %v18237_v36 = vld [vmem:[%s25405_s6 + $0x568] ss:$16 sps:$4 sm:$0xff]  }
 0x68c   : > { %3281 = vmatprep.subr.bf16.mxu0 %v18182_v37  ;;  %3387 = vmatprep.subr.bf16.mxu1 %v18185_v38  ;;  %v18242_v37 = vld [vmem:[%s25405_s6 + $0x584] ss:$16 sps:$4 sm:$0xff]   ;;  %v18245_v38 = vld [vmem:[%s25405_s6 + $0x58c] ss:$16 sps:$4 sm:$0xff]  }
 0x68d   : > { %14837 = vmatmul.mubr.msk.bf16.gmra.mrb[48].mxu0 %vm1230_vm0, %v2387_v42  ;;  %14839 = vmatmul.mubr.msk.bf16.gmra.mrb[48].mxu1 %vm1230_vm0, %v2387_v42  ;;  %v18243_v42 = vld [vmem:[%s25405_s6 + $0x588] ss:$16 sps:$4 sm:$0xff]  }
 0x68f   : > { %3282 = vmatpush1.bf16.msra.mxu0 %v18180_v44  ;;  %3388 = vmatpush1.bf16.msra.mxu1 %v18183_v45  ;;  %v18248_v44 = vld [vmem:[%s25405_s6 + $0x5a4] ss:$16 sps:$4 sm:$0xff]   ;;  %v18251_v45 = vld [vmem:[%s25405_s6 + $0x5ac] ss:$16 sps:$4 sm:$0xff]  }
 0x690   : > { %3283 = vmatprep.subr.bf16.mxu0 %v18188_v46  ;;  %3389 = vmatprep.subr.bf16.mxu1 %v18191_v47  ;;  %v18246_v46 = vld [vmem:[%s25405_s6 + $0x5a0] ss:$16 sps:$4 sm:$0xff]   ;;  %v18249_v47 = vld [vmem:[%s25405_s6 + $0x5a8] ss:$16 sps:$4 sm:$0xff]  }
 0x693   : > { %3284 = vmatpush1.bf16.msra.mxu0 %v18186_v48  ;;  %3390 = vmatpush1.bf16.msra.mxu1 %v18189_v49  ;;  %v18254_v48 = vld [vmem:[%s25405_s6 + $0x5c4] ss:$16 sps:$4 sm:$0xff]   ;;  %v18257_v49 = vld [vmem:[%s25405_s6 + $0x5cc] ss:$16 sps:$4 sm:$0xff]  }
 0x694   : > { %3285 = vmatprep.subr.bf16.mxu0 %v18194_v50  ;;  %3391 = vmatprep.subr.bf16.mxu1 %v18197_v51  ;;  %v18252_v50 = vld [vmem:[%s25405_s6 + $0x5c0] ss:$16 sps:$4 sm:$0xff]   ;;  %v18255_v51 = vld [vmem:[%s25405_s6 + $0x5c8] ss:$16 sps:$4 sm:$0xff]  }
 0x697   : > { %3286 = vmatpush1.bf16.msra.mxu0 %v18192_v52  ;;  %3392 = vmatpush1.bf16.msra.mxu1 %v18195_v53  ;;  %v18260_v52 = vld [vmem:[%s25405_s6 + $0x5e4] ss:$16 sps:$4 sm:$0xff]   ;;  %v18263_v53 = vld [vmem:[%s25405_s6 + $0x5ec] ss:$16 sps:$4 sm:$0xff]  }
 0x698   : > { %3287 = vmatprep.subr.bf16.mxu0 %v18200_v54  ;;  %3393 = vmatprep.subr.bf16.mxu1 %v18203_v55  ;;  %v18258_v54 = vld [vmem:[%s25405_s6 + $0x5e0] ss:$16 sps:$4 sm:$0xff]   ;;  %v18261_v55 = vld [vmem:[%s25405_s6 + $0x5e8] ss:$16 sps:$4 sm:$0xff]  }
 0x69b   : > { %3288 = vmatpush1.bf16.msra.mxu0 %v18198_v56  ;;  %3394 = vmatpush1.bf16.msra.mxu1 %v18201_v57  ;;  %v18266_v56 = vld [vmem:[%s25405_s6 + $0x604] ss:$16 sps:$4 sm:$0xff]   ;;  %v18269_v57 = vld [vmem:[%s25405_s6 + $0x60c] ss:$16 sps:$4 sm:$0xff]  }
 0x69c   : > { %3289 = vmatprep.subr.bf16.mxu0 %v18206_v58  ;;  %3395 = vmatprep.subr.bf16.mxu1 %v18209_v59 }
 0x69f   : > { %3290 = vmatpush1.bf16.msra.mxu0 %v18204_v60  ;;  %3396 = vmatpush1.bf16.msra.mxu1 %v18207_v61 }
 0x6a0   : > { %3291 = vmatprep.subr.bf16.mxu0 %v18212_v62  ;;  %3397 = vmatprep.subr.bf16.mxu1 %v18215_v63 }
 0x6a3   : > { %3292 = vmatpush1.bf16.msra.mxu0 %v18210_v0  ;;  %3398 = vmatpush1.bf16.msra.mxu1 %v18213_v1 }
 0x6a4   : > { %3293 = vmatprep.subr.bf16.mxu0 %v18218_v2  ;;  %3399 = vmatprep.subr.bf16.mxu1 %v18221_v3 }
 0x6a7   : > { %3294 = vmatpush1.bf16.msra.mxu0 %v18216_v8  ;;  %3400 = vmatpush1.bf16.msra.mxu1 %v18219_v9 }
 0x6a8   : > { %3295 = vmatprep.subr.bf16.mxu0 %v18224_v13  ;;  %3401 = vmatprep.subr.bf16.mxu1 %v18227_v14  ;;  %v18264_v13 = vld [vmem:[%s25405_s6 + $0x600] ss:$16 sps:$4 sm:$0xff]   ;;  %v18267_v14 = vld [vmem:[%s25405_s6 + $0x608] ss:$16 sps:$4 sm:$0xff]  }
 0x6ab   : > { %3296 = vmatpush1.bf16.msra.mxu0 %v18222_v21  ;;  %3402 = vmatpush1.bf16.msra.mxu1 %v18225_v22  ;;  %v18272_v21 = vld [vmem:[%s25405_s6 + $0x624] ss:$16 sps:$4 sm:$0xff]   ;;  %v18275_v22 = vld [vmem:[%s25405_s6 + $0x62c] ss:$16 sps:$4 sm:$0xff]  }
 0x6ac   : > { %3297 = vmatprep.subr.bf16.mxu0 %v18230_v24  ;;  %3403 = vmatprep.subr.bf16.mxu1 %v18233_v25 }
 0x6af   : > { %3298 = vmatpush1.bf16.msra.mxu0 %v18228_v28  ;;  %3404 = vmatpush1.bf16.msra.mxu1 %v18231_v29  ;;  %v18270_v28 = vld [vmem:[%s25405_s6 + $0x620] ss:$16 sps:$4 sm:$0xff]   ;;  %v18273_v29 = vld [vmem:[%s25405_s6 + $0x628] ss:$16 sps:$4 sm:$0xff]  }
 0x6b0   : > { %3299 = vmatprep.subr.bf16.mxu0 %v18236_v32  ;;  %3405 = vmatprep.subr.bf16.mxu1 %v18239_v33 }
 0x6b3   : > { %3300 = vmatpush1.bf16.msra.mxu0 %v18234_v34  ;;  %3406 = vmatpush1.bf16.msra.mxu1 %v18237_v36  ;;  %v18278_v34 = vld [vmem:[%s25405_s6 + $0x644] ss:$16 sps:$4 sm:$0xff]   ;;  %v18281_v36 = vld [vmem:[%s25405_s6 + $0x64c] ss:$16 sps:$4 sm:$0xff]  }
 0x6b4   : > { %3301 = vmatprep.subr.bf16.mxu0 %v18242_v37  ;;  %3407 = vmatprep.subr.bf16.mxu1 %v18245_v38 }
 0x6b7   : > { %3302 = vmatpush1.bf16.msra.mxu0 %v18240_v41  ;;  %3408 = vmatpush1.bf16.msra.mxu1 %v18243_v42 }
 0x6b8   : > { %3303 = vmatprep.subr.bf16.mxu0 %v18248_v44  ;;  %3409 = vmatprep.subr.bf16.mxu1 %v18251_v45 }
 0x6bb   : > { %3304 = vmatpush1.bf16.msra.mxu0 %v18246_v46  ;;  %3410 = vmatpush1.bf16.msra.mxu1 %v18249_v47 }
 0x6bc   : > { %3305 = vmatprep.subr.bf16.mxu0 %v18254_v48  ;;  %3411 = vmatprep.subr.bf16.mxu1 %v18257_v49  ;;  %v18276_v48 = vld [vmem:[%s25405_s6 + $0x640] ss:$16 sps:$4 sm:$0xff]   ;;  %v18279_v49 = vld [vmem:[%s25405_s6 + $0x648] ss:$16 sps:$4 sm:$0xff]  }
 0x6bf   : > { %3306 = vmatpush1.bf16.msra.mxu0 %v18252_v50  ;;  %3412 = vmatpush1.bf16.msra.mxu1 %v18255_v51  ;;  %v18284_v50 = vld [vmem:[%s25405_s6 + $0x664] ss:$16 sps:$4 sm:$0xff]   ;;  %v18287_v51 = vld [vmem:[%s25405_s6 + $0x66c] ss:$16 sps:$4 sm:$0xff]  }
 0x6c0   : > { %3307 = vmatprep.subr.bf16.mxu0 %v18260_v52  ;;  %3413 = vmatprep.subr.bf16.mxu1 %v18263_v53  ;;  %v18282_v52 = vld [vmem:[%s25405_s6 + $0x660] ss:$16 sps:$4 sm:$0xff]   ;;  %v18285_v53 = vld [vmem:[%s25405_s6 + $0x668] ss:$16 sps:$4 sm:$0xff]  }
 0x6c3   : > { %3308 = vmatpush1.bf16.msra.mxu0 %v18258_v54  ;;  %3414 = vmatpush1.bf16.msra.mxu1 %v18261_v55  ;;  %v18290_v54 = vld [vmem:[%s25405_s6 + $0x684] ss:$16 sps:$4 sm:$0xff]   ;;  %v18293_v55 = vld [vmem:[%s25405_s6 + $0x68c] ss:$16 sps:$4 sm:$0xff]  }
 0x6c4   : > { %3330 = vmatprep.subr.bf16.mxu0 %v18266_v56  ;;  %3436 = vmatprep.subr.bf16.mxu1 %v18269_v57  ;;  %v18288_v56 = vld [vmem:[%s25405_s6 + $0x680] ss:$16 sps:$4 sm:$0xff]   ;;  %v18291_v57 = vld [vmem:[%s25405_s6 + $0x688] ss:$16 sps:$4 sm:$0xff]  }
 0x758   : > { %v2428_v58 = vpop.f32.mrb[44].mxu0  ;;  %v2481_v59 = vpop.f32.mrb[44].mxu1 }
 0x759   : > { %v2430_v60 = vpop.f32.mrb[45].mxu0  ;;  %v2483_v61 = vpop.f32.mrb[45].mxu1 }
 0x75a   : > { %v2432_v62 = vpop.f32.mrb[46].mxu0  ;;  %v2485_v63 = vpop.f32.mrb[46].mxu1 }
 0x75b   : > { %v2500_v0 = vpack.c.bf16 %v2432_v62, %v2428_v58  ;;  %v20947_v1 = vpack.c.bf16 %v2485_v63, %v2481_v59  ;;  %v2434_v2 = vpop.f32.mrb[47].mxu0  ;;  %v2487_v3 = vpop.f32.mrb[47].mxu1  ;;  %v18296_v58 = vld [vmem:[%s25405_s6 + $0x6a4] ss:$16 sps:$4 sm:$0xff]   ;;  %v18299_v59 = vld [vmem:[%s25405_s6 + $0x6ac] ss:$16 sps:$4 sm:$0xff]  }
 0x75c   : > { %v2501_v8 = vpack.c.bf16 %v2434_v2, %v2430_v60  ;;  %v2503_v9 = vpack.c.bf16 %v2487_v3, %v2483_v61  ;;  %v18294_v60 = vld [vmem:[%s25405_s6 + $0x6a0] ss:$16 sps:$4 sm:$0xff]   ;;  %v18297_v61 = vld [vmem:[%s25405_s6 + $0x6a8] ss:$16 sps:$4 sm:$0xff]   ;;  %v18302_v62 = vld [vmem:[%s25405_s6 + $0x6c4] ss:$16 sps:$4 sm:$0xff]  }
 0x75d   : > { %v18305_v63 = vld [vmem:[%s25405_s6 + $0x6cc] ss:$16 sps:$4 sm:$0xff]   ;;  %v18303_v2 = vld [vmem:[%s25405_s6 + $0x6c8] ss:$16 sps:$4 sm:$0xff]   ;;  %v18308_v3 = vld [vmem:[%s25405_s6 + $0x6e4] ss:$16 sps:$4 sm:$0xff]  }
 0x75e   : > { %3309 = vmatprep.mubr.bf16.mxu0 %v2501_v8  ;;  %3415 = vmatprep.mubr.bf16.mxu1 %v2501_v8  ;;  %v18311_v8 = vld [vmem:[%s25405_s6 + $0x6ec] ss:$16 sps:$4 sm:$0xff]  }
 0x75f   : > { %3310 = vmatmul.mubr.bf16.vlgmr.msra.gmra.mrb[52].mxu0 %v2500_v0  ;;  %3416 = vmatmul.mubr.bf16.vlgmr.msra.gmra.mrb[52].mxu1 %v2500_v0  ;;  %v18300_v0 = vld [vmem:[%s25405_s6 + $0x6c0] ss:$16 sps:$4 sm:$0xff]  }
 0x760   : > { %3331 = vmatpush1.bf16.msra.mxu0 %v18264_v13  ;;  %3437 = vmatpush1.bf16.msra.mxu1 %v18267_v14  ;;  %v2438_v24 = vpop.f32.mrb[48].mxu0  ;;  %v2491_v25 = vpop.f32.mrb[48].mxu1  ;;  %v18309_v13 = vld [vmem:[%s25405_s6 + $0x6e8] ss:$16 sps:$4 sm:$0xff]   ;;  %v18314_v14 = vld [vmem:[%s25405_s6 + $0x704] ss:$16 sps:$4 sm:$0xff]  }
 0x761   : > { %v2440_v32 = vpop.f32.mrb[49].mxu0  ;;  %v2493_v33 = vpop.f32.mrb[49].mxu1  ;;  %3332 = vmatprep.subr.bf16.mxu0 %v18272_v21  ;;  %3438 = vmatprep.subr.bf16.mxu1 %v18275_v22  ;;  %v18317_v21 = vld [vmem:[%s25405_s6 + $0x70c] ss:$16 sps:$4 sm:$0xff]   ;;  %v18312_v22 = vld [vmem:[%s25405_s6 + $0x700] ss:$16 sps:$4 sm:$0xff]  }
 0x762   : > { %v2442_v37 = vpop.f32.mrb[50].mxu0  ;;  %v2495_v38 = vpop.f32.mrb[50].mxu1 }
 0x763   : > { %v2504_v41 = vpack.c.bf16 %v2442_v37, %v2438_v24  ;;  %v20973_v42 = vpack.c.bf16 %v2495_v38, %v2491_v25  ;;  %v2444_v44 = vpop.f32.mrb[51].mxu0  ;;  %v2497_v45 = vpop.f32.mrb[51].mxu1  ;;  %v18315_v24 = vld [vmem:[%s25405_s6 + $0x708] ss:$16 sps:$4 sm:$0xff]   ;;  %v18320_v25 = vld [vmem:[%s25405_s6 + $0x724] ss:$16 sps:$4 sm:$0xff]  }
 0x764   : > { %v2505_v46 = vpack.c.bf16 %v2444_v44, %v2440_v32  ;;  %v20975_v47 = vpack.c.bf16 %v2497_v45, %v2493_v33  ;;  %3333 = vmatpush1.bf16.msra.mxu0 %v18270_v28  ;;  %3439 = vmatpush1.bf16.msra.mxu1 %v18273_v29  ;;  %v18323_v28 = vld [vmem:[%s25405_s6 + $0x72c] ss:$16 sps:$4 sm:$0xff]   ;;  %v18318_v29 = vld [vmem:[%s25405_s6 + $0x720] ss:$16 sps:$4 sm:$0xff]   ;;  %v18321_v32 = vld [vmem:[%s25405_s6 + $0x728] ss:$16 sps:$4 sm:$0xff]  }
 0x765   : > { %3334 = vmatprep.subr.bf16.mxu0 %v18278_v34  ;;  %3440 = vmatprep.subr.bf16.mxu1 %v18281_v36  ;;  %v18326_v33 = vld [vmem:[%s25405_s6 + $0x744] ss:$16 sps:$4 sm:$0xff]   ;;  %v18329_v34 = vld [vmem:[%s25405_s6 + $0x74c] ss:$16 sps:$4 sm:$0xff]   ;;  %v18324_v36 = vld [vmem:[%s25405_s6 + $0x740] ss:$16 sps:$4 sm:$0xff]  }
 0x766   : > { %3319 = vmatprep.mubr.bf16.mxu0 %v2505_v46  ;;  %3425 = vmatprep.mubr.bf16.mxu1 %v2505_v46  ;;  %v18327_v37 = vld [vmem:[%s25405_s6 + $0x748] ss:$16 sps:$4 sm:$0xff]   ;;  %v18332_v38 = vld [vmem:[%s25405_s6 + $0x764] ss:$16 sps:$4 sm:$0xff]   ;;  %v18330_v44 = vld [vmem:[%s25405_s6 + $0x760] ss:$16 sps:$4 sm:$0xff]  }
 0x767   : > { %3320 = vmatmul.mubr.bf16.gmra.mrb[56].mxu0 %v2504_v41  ;;  %3426 = vmatmul.mubr.bf16.gmra.mrb[56].mxu1 %v2504_v41  ;;  %v18335_v41 = vld [vmem:[%s25405_s6 + $0x76c] ss:$16 sps:$4 sm:$0xff]   ;;  %v18333_v45 = vld [vmem:[%s25405_s6 + $0x768] ss:$16 sps:$4 sm:$0xff]   ;;  %v18338_v46 = vld [vmem:[%s25405_s6 + $0x784] ss:$16 sps:$4 sm:$0xff]  }
 0x768   : > { %3335 = vmatpush1.bf16.msra.mxu0 %v18276_v48  ;;  %3441 = vmatpush1.bf16.msra.mxu1 %v18279_v49  ;;  %v18341_v48 = vld [vmem:[%s25405_s6 + $0x78c] ss:$16 sps:$4 sm:$0xff]   ;;  %v18336_v49 = vld [vmem:[%s25405_s6 + $0x780] ss:$16 sps:$4 sm:$0xff]  }
 0x769   : > { %3362 = vmatprep.mubr.bf16.mxu0 %v2503_v9  ;;  %3468 = vmatprep.mubr.bf16.mxu1 %v2503_v9  ;;  %v18306_v9 = vld [vmem:[%s25405_s6 + $0x6e0] ss:$16 sps:$4 sm:$0xff]  }
 0x76a   : > { %3336 = vmatprep.subr.bf16.mxu0 %v18284_v50  ;;  %3442 = vmatprep.subr.bf16.mxu1 %v18287_v51  ;;  %v18339_v50 = vld [vmem:[%s25405_s6 + $0x788] ss:$16 sps:$4 sm:$0xff]   ;;  %v18344_v51 = vld [vmem:[%s25405_s6 + $0x7a4] ss:$16 sps:$4 sm:$0xff]  }
 0x76c   : > { %3337 = vmatpush1.bf16.msra.mxu0 %v18282_v52  ;;  %3443 = vmatpush1.bf16.msra.mxu1 %v18285_v53  ;;  %v18347_v52 = vld [vmem:[%s25405_s6 + $0x7ac] ss:$16 sps:$4 sm:$0xff]   ;;  %v18342_v53 = vld [vmem:[%s25405_s6 + $0x7a0] ss:$16 sps:$4 sm:$0xff]  }
 0x76d   : > { %3338 = vmatprep.subr.bf16.mxu0 %v18290_v54  ;;  %3444 = vmatprep.subr.bf16.mxu1 %v18293_v55  ;;  %v18345_v54 = vld [vmem:[%s25405_s6 + $0x7a8] ss:$16 sps:$4 sm:$0xff]   ;;  %v18350_v55 = vld [vmem:[%s25405_s6 + $0x7c4] ss:$16 sps:$4 sm:$0xff]  }
 0x770   : > { %3339 = vmatpush1.bf16.msra.mxu0 %v18288_v56  ;;  %3445 = vmatpush1.bf16.msra.mxu1 %v18291_v57  ;;  %v18353_v56 = vld [vmem:[%s25405_s6 + $0x7cc] ss:$16 sps:$4 sm:$0xff]   ;;  %v18348_v57 = vld [vmem:[%s25405_s6 + $0x7c0] ss:$16 sps:$4 sm:$0xff]  }
 0x771   : > { %3340 = vmatprep.subr.bf16.mxu0 %v18296_v58  ;;  %3446 = vmatprep.subr.bf16.mxu1 %v18299_v59  ;;  %v18351_v58 = vld [vmem:[%s25405_s6 + $0x7c8] ss:$16 sps:$4 sm:$0xff]   ;;  %v18356_v59 = vld [vmem:[%s25405_s6 + $0x7e4] ss:$16 sps:$4 sm:$0xff]  }
 0x774   : > { %3341 = vmatpush1.bf16.msra.mxu0 %v18294_v60  ;;  %3447 = vmatpush1.bf16.msra.mxu1 %v18297_v61  ;;  %v18359_v60 = vld [vmem:[%s25405_s6 + $0x7ec] ss:$16 sps:$4 sm:$0xff]   ;;  %v18354_v61 = vld [vmem:[%s25405_s6 + $0x7e0] ss:$16 sps:$4 sm:$0xff]  }
 0x775   : > { %3342 = vmatprep.subr.bf16.mxu0 %v18302_v62  ;;  %3448 = vmatprep.subr.bf16.mxu1 %v18305_v63  ;;  %v18357_v62 = vld [vmem:[%s25405_s6 + $0x7e8] ss:$16 sps:$4 sm:$0xff]   ;;  %v18362_v63 = vld [vmem:[%s25405_s6 + $0x4] ss:$16 sps:$4 sm:$0xff]  }
 0x778   : > { %3343 = vmatpush1.bf16.msra.mxu0 %v18300_v0  ;;  %3449 = vmatpush1.bf16.msra.mxu1 %v18303_v2  ;;  %v18365_v0 = vld [vmem:[%s25405_s6 + $0xc] ss:$16 sps:$4 sm:$0xff]   ;;  %v18360_v2 = vld [vmem:[%s25405_s6] ss:$16 sps:$4 sm:$0xff]  }
 0x779   : > { %3344 = vmatprep.subr.bf16.mxu0 %v18308_v3  ;;  %3450 = vmatprep.subr.bf16.mxu1 %v18311_v8  ;;  %v18363_v3 = vld [vmem:[%s25405_s6 + $0x8] ss:$16 sps:$4 sm:$0xff]   ;;  %v18368_v8 = vld [vmem:[%s25405_s6 + $0x24] ss:$16 sps:$4 sm:$0xff]  }
 0x77c   : > { %3345 = vmatpush1.bf16.msra.mxu0 %v18306_v9  ;;  %3451 = vmatpush1.bf16.msra.mxu1 %v18309_v13  ;;  %v18371_v9 = vld [vmem:[%s25405_s6 + $0x2c] ss:$16 sps:$4 sm:$0xff]   ;;  %v18366_v13 = vld [vmem:[%s25405_s6 + $0x20] ss:$16 sps:$4 sm:$0xff]  }
 0x77d   : > { %3346 = vmatprep.subr.bf16.mxu0 %v18314_v14  ;;  %3452 = vmatprep.subr.bf16.mxu1 %v18317_v21  ;;  %v18369_v14 = vld [vmem:[%s25405_s6 + $0x28] ss:$16 sps:$4 sm:$0xff]   ;;  %v18372_v21 = vld [vmem:[%s25405_s6 + $0x40] ss:$16 sps:$4 sm:$0xff]  }
 0x780   : > { %3347 = vmatpush1.bf16.msra.mxu0 %v18312_v22  ;;  %3453 = vmatpush1.bf16.msra.mxu1 %v18315_v24  ;;  %v18375_v22 = vld [vmem:[%s25405_s6 + $0x48] ss:$16 sps:$4 sm:$0xff]   ;;  %v18380_v24 = vld [vmem:[%s25405_s6 + $0x64] ss:$16 sps:$4 sm:$0xff]  }
 0x781   : > { %3348 = vmatprep.subr.bf16.mxu0 %v18320_v25  ;;  %3454 = vmatprep.subr.bf16.mxu1 %v18323_v28  ;;  %v18383_v25 = vld [vmem:[%s25405_s6 + $0x6c] ss:$16 sps:$4 sm:$0xff]   ;;  %v18378_v28 = vld [vmem:[%s25405_s6 + $0x60] ss:$16 sps:$4 sm:$0xff]  }
 0x784   : > { %3349 = vmatpush1.bf16.msra.mxu0 %v18318_v29  ;;  %3455 = vmatpush1.bf16.msra.mxu1 %v18321_v32  ;;  %v18381_v29 = vld [vmem:[%s25405_s6 + $0x68] ss:$16 sps:$4 sm:$0xff]   ;;  %v18384_v32 = vld [vmem:[%s25405_s6 + $0x80] ss:$16 sps:$4 sm:$0xff]  }
 0x785   : > { %3350 = vmatprep.subr.bf16.mxu0 %v18326_v33  ;;  %3456 = vmatprep.subr.bf16.mxu1 %v18329_v34  ;;  %v18387_v33 = vld [vmem:[%s25405_s6 + $0x88] ss:$16 sps:$4 sm:$0xff]   ;;  %v18392_v34 = vld [vmem:[%s25405_s6 + $0xa4] ss:$16 sps:$4 sm:$0xff]  }
 0x788   : > { %3351 = vmatpush1.bf16.msra.mxu0 %v18324_v36  ;;  %3457 = vmatpush1.bf16.msra.mxu1 %v18327_v37  ;;  %v18395_v36 = vld [vmem:[%s25405_s6 + $0xac] ss:$16 sps:$4 sm:$0xff]   ;;  %v18390_v37 = vld [vmem:[%s25405_s6 + $0xa0] ss:$16 sps:$4 sm:$0xff]  }
 0x789   : > { %3352 = vmatprep.subr.bf16.mxu0 %v18332_v38  ;;  %3458 = vmatprep.subr.bf16.mxu1 %v18335_v41  ;;  %v18393_v38 = vld [vmem:[%s25405_s6 + $0xa8] ss:$16 sps:$4 sm:$0xff]   ;;  %v18398_v41 = vld [vmem:[%s25405_s6 + $0xc4] ss:$16 sps:$4 sm:$0xff]  }
 0x78c   : > { %3353 = vmatpush1.bf16.msra.mxu0 %v18330_v44  ;;  %3459 = vmatpush1.bf16.msra.mxu1 %v18333_v45  ;;  %v18401_v44 = vld [vmem:[%s25405_s6 + $0xcc] ss:$16 sps:$4 sm:$0xff]   ;;  %v18396_v45 = vld [vmem:[%s25405_s6 + $0xc0] ss:$16 sps:$4 sm:$0xff]  }
 0x78d   : > { %3354 = vmatprep.subr.bf16.mxu0 %v18338_v46  ;;  %3460 = vmatprep.subr.bf16.mxu1 %v18341_v48  ;;  %v18399_v46 = vld [vmem:[%s25405_s6 + $0xc8] ss:$16 sps:$4 sm:$0xff]   ;;  %v18404_v48 = vld [vmem:[%s25405_s6 + $0xe4] ss:$16 sps:$4 sm:$0xff]  }
 0x790   : > { %3355 = vmatpush1.bf16.msra.mxu0 %v18336_v49  ;;  %3461 = vmatpush1.bf16.msra.mxu1 %v18339_v50  ;;  %v18407_v49 = vld [vmem:[%s25405_s6 + $0xec] ss:$16 sps:$4 sm:$0xff]   ;;  %v18402_v50 = vld [vmem:[%s25405_s6 + $0xe0] ss:$16 sps:$4 sm:$0xff]  }
 0x791   : > { %3356 = vmatprep.subr.bf16.mxu0 %v18344_v51  ;;  %3462 = vmatprep.subr.bf16.mxu1 %v18347_v52  ;;  %v18405_v51 = vld [vmem:[%s25405_s6 + $0xe8] ss:$16 sps:$4 sm:$0xff]   ;;  %v18410_v52 = vld [vmem:[%s25405_s6 + $0x104] ss:$16 sps:$4 sm:$0xff]  }
 0x794   : > { %3357 = vmatpush1.bf16.msra.mxu0 %v18342_v53  ;;  %3463 = vmatpush1.bf16.msra.mxu1 %v18345_v54  ;;  %v18413_v53 = vld [vmem:[%s25405_s6 + $0x10c] ss:$16 sps:$4 sm:$0xff]   ;;  %v18408_v54 = vld [vmem:[%s25405_s6 + $0x100] ss:$16 sps:$4 sm:$0xff]  }
 0x795   : > { %3358 = vmatprep.subr.bf16.mxu0 %v18350_v55  ;;  %3464 = vmatprep.subr.bf16.mxu1 %v18353_v56  ;;  %v18411_v55 = vld [vmem:[%s25405_s6 + $0x108] ss:$16 sps:$4 sm:$0xff]   ;;  %v18416_v56 = vld [vmem:[%s25405_s6 + $0x124] ss:$16 sps:$4 sm:$0xff]  }
 0x798   : > { %3359 = vmatpush1.bf16.msra.mxu0 %v18348_v57  ;;  %3465 = vmatpush1.bf16.msra.mxu1 %v18351_v58  ;;  %v18419_v57 = vld [vmem:[%s25405_s6 + $0x12c] ss:$16 sps:$4 sm:$0xff]   ;;  %v18414_v58 = vld [vmem:[%s25405_s6 + $0x120] ss:$16 sps:$4 sm:$0xff]  }
 0x799   : > { %3360 = vmatprep.subr.bf16.mxu0 %v18356_v59  ;;  %3466 = vmatprep.subr.bf16.mxu1 %v18359_v60  ;;  %v18417_v59 = vld [vmem:[%s25405_s6 + $0x128] ss:$16 sps:$4 sm:$0xff]   ;;  %v18422_v60 = vld [vmem:[%s25405_s6 + $0x144] ss:$16 sps:$4 sm:$0xff]  }
 0x79c   : > { %3361 = vmatpush1.bf16.msra.mxu0 %v18354_v61  ;;  %3467 = vmatpush1.bf16.msra.mxu1 %v18357_v62  ;;  %v18425_v61 = vld [vmem:[%s25405_s6 + $0x14c] ss:$16 sps:$4 sm:$0xff]   ;;  %v18420_v62 = vld [vmem:[%s25405_s6 + $0x140] ss:$16 sps:$4 sm:$0xff]  }
 0x79d   : > { %4129 = vmatprep.subr.bf16.mxu0 %v18362_v63  ;;  %4235 = vmatprep.subr.bf16.mxu1 %v18365_v0  ;;  %v18423_v63 = vld [vmem:[%s25405_s6 + $0x148] ss:$16 sps:$4 sm:$0xff]   ;;  %v18428_v0 = vld [vmem:[%s25405_s6 + $0x164] ss:$16 sps:$4 sm:$0xff]  }
 0x79f   : > { %3363 = vmatmul.mubr.bf16.vlgmr.msra.gmra.mrb[52].mxu0 %v20947_v1  ;;  %3469 = vmatmul.mubr.bf16.vlgmr.msra.gmra.mrb[52].mxu1 %v20947_v1  ;;  %v18374_v1 = vld [vmem:[%s25405_s6 + $0x44] ss:$16 sps:$4 sm:$0xff]  }
 0x7a0   : > { %3372 = vmatprep.mubr.bf16.mxu0 %v20975_v47  ;;  %3478 = vmatprep.mubr.bf16.mxu1 %v20975_v47  ;;  %v18377_v47 = vld [vmem:[%s25405_s6 + $0x4c] ss:$16 sps:$4 sm:$0xff]  }
 0x7a1   : > { %4130 = vmatpush1.bf16.msra.mxu0 %v18360_v2  ;;  %4236 = vmatpush1.bf16.msra.mxu1 %v18363_v3  ;;  %v18431_v2 = vld [vmem:[%s25405_s6 + $0x16c] ss:$16 sps:$4 sm:$0xff]   ;;  %v18426_v3 = vld [vmem:[%s25405_s6 + $0x160] ss:$16 sps:$4 sm:$0xff]  }
 0x7a2   : > { %4131 = vmatprep.subr.bf16.mxu0 %v18368_v8  ;;  %4237 = vmatprep.subr.bf16.mxu1 %v18371_v9  ;;  %v18429_v8 = vld [vmem:[%s25405_s6 + $0x168] ss:$16 sps:$4 sm:$0xff]   ;;  %v18434_v9 = vld [vmem:[%s25405_s6 + $0x184] ss:$16 sps:$4 sm:$0xff]  }
 0x7a5   : > { %4132 = vmatpush1.bf16.msra.mxu0 %v18366_v13  ;;  %4238 = vmatpush1.bf16.msra.mxu1 %v18369_v14  ;;  %v18437_v13 = vld [vmem:[%s25405_s6 + $0x18c] ss:$16 sps:$4 sm:$0xff]   ;;  %v18432_v14 = vld [vmem:[%s25405_s6 + $0x180] ss:$16 sps:$4 sm:$0xff]  }
 0x7a6   : > { %4133 = vmatprep.subr.bf16.mxu0 %v18374_v1  ;;  %4239 = vmatprep.subr.bf16.mxu1 %v18377_v47  ;;  %v18435_v1 = vld [vmem:[%s25405_s6 + $0x188] ss:$16 sps:$4 sm:$0xff]   ;;  %v18440_v47 = vld [vmem:[%s25405_s6 + $0x1a4] ss:$16 sps:$4 sm:$0xff]  }
 0x7a7   : > { %3373 = vmatmul.mubr.bf16.gmra.mrb[56].mxu0 %v20973_v42  ;;  %3479 = vmatmul.mubr.bf16.gmra.mrb[56].mxu1 %v20973_v42  ;;  %v18386_v42 = vld [vmem:[%s25405_s6 + $0x84] ss:$16 sps:$4 sm:$0xff]  }
 0x7a8   : > { %4161 = vmatprep.mubr.bf16.mxu0 %v20700_v11  ;;  %4267 = vmatprep.mubr.bf16.mxu1 %v20700_v11  ;;  %v18389_v11 = vld [vmem:[%s25405_s6 + $0x8c] ss:$16 sps:$4 sm:$0xff]  }
 0x7a9   : > { %4134 = vmatpush1.bf16.msra.mxu0 %v18372_v21  ;;  %4240 = vmatpush1.bf16.msra.mxu1 %v18375_v22  ;;  %v18443_v21 = vld [vmem:[%s25405_s6 + $0x1ac] ss:$16 sps:$4 sm:$0xff]   ;;  %v18438_v22 = vld [vmem:[%s25405_s6 + $0x1a0] ss:$16 sps:$4 sm:$0xff]  }
 0x7aa   : > { %4135 = vmatprep.subr.bf16.mxu0 %v18380_v24  ;;  %4241 = vmatprep.subr.bf16.mxu1 %v18383_v25  ;;  %v18441_v24 = vld [vmem:[%s25405_s6 + $0x1a8] ss:$16 sps:$4 sm:$0xff]   ;;  %v18446_v25 = vld [vmem:[%s25405_s6 + $0x1c4] ss:$16 sps:$4 sm:$0xff]  }
 0x7ad   : > { %4136 = vmatpush1.bf16.msra.mxu0 %v18378_v28  ;;  %4242 = vmatpush1.bf16.msra.mxu1 %v18381_v29  ;;  %v18449_v28 = vld [vmem:[%s25405_s6 + $0x1cc] ss:$16 sps:$4 sm:$0xff]   ;;  %v18444_v29 = vld [vmem:[%s25405_s6 + $0x1c0] ss:$16 sps:$4 sm:$0xff]  }
 0x7ae   : > { %4137 = vmatprep.subr.bf16.mxu0 %v18386_v42  ;;  %4243 = vmatprep.subr.bf16.mxu1 %v18389_v11  ;;  %v18447_v42 = vld [vmem:[%s25405_s6 + $0x1c8] ss:$16 sps:$4 sm:$0xff]   ;;  %v18452_v11 = vld [vmem:[%s25405_s6 + $0x1e4] ss:$16 sps:$4 sm:$0xff]  }
 0x7b1   : > { %4138 = vmatpush1.bf16.msra.mxu0 %v18384_v32  ;;  %4244 = vmatpush1.bf16.msra.mxu1 %v18387_v33  ;;  %v18455_v32 = vld [vmem:[%s25405_s6 + $0x1ec] ss:$16 sps:$4 sm:$0xff]   ;;  %v18450_v33 = vld [vmem:[%s25405_s6 + $0x1e0] ss:$16 sps:$4 sm:$0xff]  }
 0x7b2   : > { %4139 = vmatprep.subr.bf16.mxu0 %v18392_v34  ;;  %4245 = vmatprep.subr.bf16.mxu1 %v18395_v36  ;;  %v18453_v34 = vld [vmem:[%s25405_s6 + $0x1e8] ss:$16 sps:$4 sm:$0xff]   ;;  %v18458_v36 = vld [vmem:[%s25405_s6 + $0x204] ss:$16 sps:$4 sm:$0xff]  }
 0x7b5   : > { %4140 = vmatpush1.bf16.msra.mxu0 %v18390_v37  ;;  %4246 = vmatpush1.bf16.msra.mxu1 %v18393_v38  ;;  %v18461_v37 = vld [vmem:[%s25405_s6 + $0x20c] ss:$16 sps:$4 sm:$0xff]   ;;  %v18456_v38 = vld [vmem:[%s25405_s6 + $0x200] ss:$16 sps:$4 sm:$0xff]  }
 0x7b6   : > { %4141 = vmatprep.subr.bf16.mxu0 %v18398_v41  ;;  %4247 = vmatprep.subr.bf16.mxu1 %v18401_v44  ;;  %v18459_v41 = vld [vmem:[%s25405_s6 + $0x208] ss:$16 sps:$4 sm:$0xff]   ;;  %v18464_v44 = vld [vmem:[%s25405_s6 + $0x224] ss:$16 sps:$4 sm:$0xff]  }
 0x7b9   : > { %4142 = vmatpush1.bf16.msra.mxu0 %v18396_v45  ;;  %4248 = vmatpush1.bf16.msra.mxu1 %v18399_v46  ;;  %v18467_v45 = vld [vmem:[%s25405_s6 + $0x22c] ss:$16 sps:$4 sm:$0xff]   ;;  %v18462_v46 = vld [vmem:[%s25405_s6 + $0x220] ss:$16 sps:$4 sm:$0xff]  }
 0x7ba   : > { %4143 = vmatprep.subr.bf16.mxu0 %v18404_v48  ;;  %4249 = vmatprep.subr.bf16.mxu1 %v18407_v49  ;;  %v18465_v48 = vld [vmem:[%s25405_s6 + $0x228] ss:$16 sps:$4 sm:$0xff]   ;;  %v18470_v49 = vld [vmem:[%s25405_s6 + $0x244] ss:$16 sps:$4 sm:$0xff]  }
 0x7bd   : > { %4144 = vmatpush1.bf16.msra.mxu0 %v18402_v50  ;;  %4250 = vmatpush1.bf16.msra.mxu1 %v18405_v51  ;;  %v18471_v50 = vld [vmem:[%s25405_s6 + $0x248] ss:$16 sps:$4 sm:$0xff]   ;;  %v18476_v51 = vld [vmem:[%s25405_s6 + $0x264] ss:$16 sps:$4 sm:$0xff]  }
 0x7be   : > { %4145 = vmatprep.subr.bf16.mxu0 %v18410_v52  ;;  %4251 = vmatprep.subr.bf16.mxu1 %v18413_v53  ;;  %v18479_v52 = vld [vmem:[%s25405_s6 + $0x26c] ss:$16 sps:$4 sm:$0xff]   ;;  %v18474_v53 = vld [vmem:[%s25405_s6 + $0x260] ss:$16 sps:$4 sm:$0xff]  }
 0x7c1   : > { %4146 = vmatpush1.bf16.msra.mxu0 %v18408_v54  ;;  %4252 = vmatpush1.bf16.msra.mxu1 %v18411_v55  ;;  %v18477_v54 = vld [vmem:[%s25405_s6 + $0x268] ss:$16 sps:$4 sm:$0xff]   ;;  %v18482_v55 = vld [vmem:[%s25405_s6 + $0x284] ss:$16 sps:$4 sm:$0xff]  }
 0x7c2   : > { %4147 = vmatprep.subr.bf16.mxu0 %v18416_v56  ;;  %4253 = vmatprep.subr.bf16.mxu1 %v18419_v57  ;;  %v18480_v56 = vld [vmem:[%s25405_s6 + $0x280] ss:$16 sps:$4 sm:$0xff]   ;;  %v18488_v57 = vld [vmem:[%s25405_s6 + $0x2a4] ss:$16 sps:$4 sm:$0xff]  }
 0x7c5   : > { %4148 = vmatpush1.bf16.msra.mxu0 %v18414_v58  ;;  %4254 = vmatpush1.bf16.msra.mxu1 %v18417_v59  ;;  %v18491_v58 = vld [vmem:[%s25405_s6 + $0x2ac] ss:$16 sps:$4 sm:$0xff]   ;;  %v18486_v59 = vld [vmem:[%s25405_s6 + $0x2a0] ss:$16 sps:$4 sm:$0xff]  }
 0x7c6   : > { %4149 = vmatprep.subr.bf16.mxu0 %v18422_v60  ;;  %4255 = vmatprep.subr.bf16.mxu1 %v18425_v61  ;;  %v18489_v60 = vld [vmem:[%s25405_s6 + $0x2a8] ss:$16 sps:$4 sm:$0xff]   ;;  %v18494_v61 = vld [vmem:[%s25405_s6 + $0x2c4] ss:$16 sps:$4 sm:$0xff]  }
 0x7c9   : > { %4150 = vmatpush1.bf16.msra.mxu0 %v18420_v62  ;;  %4256 = vmatpush1.bf16.msra.mxu1 %v18423_v63  ;;  %v18497_v62 = vld [vmem:[%s25405_s6 + $0x2cc] ss:$16 sps:$4 sm:$0xff]   ;;  %v18492_v63 = vld [vmem:[%s25405_s6 + $0x2c0] ss:$16 sps:$4 sm:$0xff]  }
 0x7ca   : > { %4151 = vmatprep.subr.bf16.mxu0 %v18428_v0  ;;  %4257 = vmatprep.subr.bf16.mxu1 %v18431_v2  ;;  %v18495_v0 = vld [vmem:[%s25405_s6 + $0x2c8] ss:$16 sps:$4 sm:$0xff]   ;;  %v18500_v2 = vld [vmem:[%s25405_s6 + $0x2e4] ss:$16 sps:$4 sm:$0xff]  }
 0x7cd   : > { %4152 = vmatpush1.bf16.msra.mxu0 %v18426_v3  ;;  %4258 = vmatpush1.bf16.msra.mxu1 %v18429_v8  ;;  %v18503_v3 = vld [vmem:[%s25405_s6 + $0x2ec] ss:$16 sps:$4 sm:$0xff]   ;;  %v18498_v8 = vld [vmem:[%s25405_s6 + $0x2e0] ss:$16 sps:$4 sm:$0xff]  }
 0x7ce   : > { %4153 = vmatprep.subr.bf16.mxu0 %v18434_v9  ;;  %4259 = vmatprep.subr.bf16.mxu1 %v18437_v13  ;;  %v18501_v9 = vld [vmem:[%s25405_s6 + $0x2e8] ss:$16 sps:$4 sm:$0xff]   ;;  %v18506_v13 = vld [vmem:[%s25405_s6 + $0x304] ss:$16 sps:$4 sm:$0xff]  }
 0x7d1   : > { %4154 = vmatpush1.bf16.msra.mxu0 %v18432_v14  ;;  %4260 = vmatpush1.bf16.msra.mxu1 %v18435_v1  ;;  %v18509_v14 = vld [vmem:[%s25405_s6 + $0x30c] ss:$16 sps:$4 sm:$0xff]   ;;  %v18504_v1 = vld [vmem:[%s25405_s6 + $0x300] ss:$16 sps:$4 sm:$0xff]  }
 0x7d2   : > { %4155 = vmatprep.subr.bf16.mxu0 %v18440_v47  ;;  %4261 = vmatprep.subr.bf16.mxu1 %v18443_v21  ;;  %v18507_v47 = vld [vmem:[%s25405_s6 + $0x308] ss:$16 sps:$4 sm:$0xff]   ;;  %v18512_v21 = vld [vmem:[%s25405_s6 + $0x324] ss:$16 sps:$4 sm:$0xff]  }
 0x7d5   : > { %4156 = vmatpush1.bf16.msra.mxu0 %v18438_v22  ;;  %4262 = vmatpush1.bf16.msra.mxu1 %v18441_v24  ;;  %v18515_v22 = vld [vmem:[%s25405_s6 + $0x32c] ss:$16 sps:$4 sm:$0xff]   ;;  %v18510_v24 = vld [vmem:[%s25405_s6 + $0x320] ss:$16 sps:$4 sm:$0xff]  }
 0x7d6   : > { %4157 = vmatprep.subr.bf16.mxu0 %v18446_v25  ;;  %4263 = vmatprep.subr.bf16.mxu1 %v18449_v28  ;;  %v18513_v25 = vld [vmem:[%s25405_s6 + $0x328] ss:$16 sps:$4 sm:$0xff]   ;;  %v18518_v28 = vld [vmem:[%s25405_s6 + $0x344] ss:$16 sps:$4 sm:$0xff]  }
 0x7d9   : > { %4158 = vmatpush1.bf16.msra.mxu0 %v18444_v29  ;;  %4264 = vmatpush1.bf16.msra.mxu1 %v18447_v42  ;;  %v18521_v29 = vld [vmem:[%s25405_s6 + $0x34c] ss:$16 sps:$4 sm:$0xff]   ;;  %v18516_v42 = vld [vmem:[%s25405_s6 + $0x340] ss:$16 sps:$4 sm:$0xff]  }
 0x7da   : > { %4159 = vmatprep.subr.bf16.mxu0 %v18452_v11  ;;  %4265 = vmatprep.subr.bf16.mxu1 %v18455_v32  ;;  %v18519_v11 = vld [vmem:[%s25405_s6 + $0x348] ss:$16 sps:$4 sm:$0xff]   ;;  %v18524_v32 = vld [vmem:[%s25405_s6 + $0x364] ss:$16 sps:$4 sm:$0xff]  }
 0x7dd   : > { %4160 = vmatpush1.bf16.msra.mxu0 %v18450_v33  ;;  %4266 = vmatpush1.bf16.msra.mxu1 %v18453_v34  ;;  %v18527_v33 = vld [vmem:[%s25405_s6 + $0x36c] ss:$16 sps:$4 sm:$0xff]   ;;  %v18522_v34 = vld [vmem:[%s25405_s6 + $0x360] ss:$16 sps:$4 sm:$0xff]  }
 0x7de   : > { %4182 = vmatprep.subr.bf16.mxu0 %v18458_v36  ;;  %4288 = vmatprep.subr.bf16.mxu1 %v18461_v37  ;;  %v18525_v36 = vld [vmem:[%s25405_s6 + $0x368] ss:$16 sps:$4 sm:$0xff]   ;;  %v18530_v37 = vld [vmem:[%s25405_s6 + $0x384] ss:$16 sps:$4 sm:$0xff]  }
 0x7e0   : > { %4162 = vmatmul.mubr.bf16.vlgmr.msra.gmra.mrb[52].mxu0 %v20696_v6  ;;  %4268 = vmatmul.mubr.bf16.vlgmr.msra.gmra.mrb[52].mxu1 %v20696_v6  ;;  %v18473_v6 = vld [vmem:[%s25405_s6 + $0x24c] ss:$16 sps:$4 sm:$0xff]  }
 0x7e1   : > { %4171 = vmatprep.mubr.bf16.mxu0 %v20708_v30  ;;  %4183 = vmatpush1.bf16.msra.mxu0 %v18456_v38  ;;  %v18533_v38 = vld [vmem:[%s25405_s6 + $0x38c] ss:$16 sps:$4 sm:$0xff]  }
 0x7e2   : > { %4277 = vmatprep.mubr.bf16.mxu1 %v20708_v30  ;;  %4289 = vmatpush1.bf16.msra.mxu1 %v18459_v41  ;;  %v18468_v30 = vld [vmem:[%s25405_s6 + $0x240] ss:$16 sps:$4 sm:$0xff]  }
 0x7e3   : > { %4184 = vmatprep.subr.bf16.mxu0 %v18464_v44  ;;  %4290 = vmatprep.subr.bf16.mxu1 %v18467_v45  ;;  %v18528_v41 = vld [vmem:[%s25405_s6 + $0x380] ss:$16 sps:$4 sm:$0xff]   ;;  %v18531_v44 = vld [vmem:[%s25405_s6 + $0x388] ss:$16 sps:$4 sm:$0xff]   ;;  %v18536_v45 = vld [vmem:[%s25405_s6 + $0x3a4] ss:$16 sps:$4 sm:$0xff]  }
 0x7e5   : > { %4185 = vmatpush1.bf16.msra.mxu0 %v18462_v46  ;;  %v18539_v46 = vld [vmem:[%s25405_s6 + $0x3ac] ss:$16 sps:$4 sm:$0xff]  }
 0x7e6   : > { %4291 = vmatpush1.bf16.msra.mxu1 %v18465_v48  ;;  %4186 = vmatprep.subr.bf16.mxu0 %v18470_v49  ;;  %v18534_v48 = vld [vmem:[%s25405_s6 + $0x3a0] ss:$16 sps:$4 sm:$0xff]   ;;  %v18537_v49 = vld [vmem:[%s25405_s6 + $0x3a8] ss:$16 sps:$4 sm:$0xff]  }
 0x7e7   : > { %4292 = vmatprep.subr.bf16.mxu1 %v18473_v6  ;;  %v18542_v6 = vld [vmem:[%s25405_s6 + $0x3c4] ss:$16 sps:$4 sm:$0xff]  }
 0x7e8   : > { %4172 = vmatmul.mubr.bf16.gmra.mrb[56].mxu0 %v20704_v26  ;;  %4278 = vmatmul.mubr.bf16.gmra.mrb[56].mxu1 %v20704_v26  ;;  %v18485_v26 = vld [vmem:[%s25405_s6 + $0x28c] ss:$16 sps:$4 sm:$0xff]  }
 0x7e9   : > { %4187 = vmatpush1.bf16.msra.mxu0 %v18468_v30  ;;  %4214 = vmatprep.mubr.bf16.mxu0 %v20702_v12  ;;  %v18545_v30 = vld [vmem:[%s25405_s6 + $0x3cc] ss:$16 sps:$4 sm:$0xff]  }
 0x7ea   : > { %4293 = vmatpush1.bf16.msra.mxu1 %v18471_v50  ;;  %4320 = vmatprep.mubr.bf16.mxu1 %v20702_v12  ;;  %v18483_v12 = vld [vmem:[%s25405_s6 + $0x288] ss:$16 sps:$4 sm:$0xff]   ;;  %v18540_v50 = vld [vmem:[%s25405_s6 + $0x3c0] ss:$16 sps:$4 sm:$0xff]  }
 0x7eb   : > { %4188 = vmatprep.subr.bf16.mxu0 %v18476_v51  ;;  %4294 = vmatprep.subr.bf16.mxu1 %v18479_v52  ;;  %v18543_v51 = vld [vmem:[%s25405_s6 + $0x3c8] ss:$16 sps:$4 sm:$0xff]   ;;  %v18548_v52 = vld [vmem:[%s25405_s6 + $0x3e4] ss:$16 sps:$4 sm:$0xff]  }
 0x7ed   : > { %4189 = vmatpush1.bf16.msra.mxu0 %v18474_v53  ;;  %v18551_v53 = vld [vmem:[%s25405_s6 + $0x3ec] ss:$16 sps:$4 sm:$0xff]  }
 0x7ee   : > { %4295 = vmatpush1.bf16.msra.mxu1 %v18477_v54  ;;  %4190 = vmatprep.subr.bf16.mxu0 %v18482_v55  ;;  %v18546_v54 = vld [vmem:[%s25405_s6 + $0x3e0] ss:$16 sps:$4 sm:$0xff]   ;;  %v18549_v55 = vld [vmem:[%s25405_s6 + $0x3e8] ss:$16 sps:$4 sm:$0xff]  }
 0x7ef   : > { %4296 = vmatprep.subr.bf16.mxu1 %v18485_v26  ;;  %v18552_v26 = vld [vmem:[%s25401_s2 + $0x240] sm:$0xff]  }
 0x7f1   : > { %4191 = vmatpush1.bf16.msra.mxu0 %v18480_v56  ;;  %v18553_v56 = vld [vmem:[%s25401_s2 + $0x2c0] sm:$0xff]  }
 0x7f2   : > { %4297 = vmatpush1.bf16.msra.mxu1 %v18483_v12  ;;  %4192 = vmatprep.subr.bf16.mxu0 %v18488_v57  ;;  %v18554_v12 = vld [vmem:[%s25401_s2 + $0x200] sm:$0xff]  }
 0x7f3   : > { %4298 = vmatprep.subr.bf16.mxu1 %v18491_v58  ;;  %v18555_v57 = vld [vmem:[%s25401_s2 + $0x280] sm:$0xff]   ;;  %v18556_v58 = vld [vmem:[%s25401_s2 + $0x248] sm:$0xff]  }
 0x7f5   : > { %4193 = vmatpush1.bf16.msra.mxu0 %v18486_v59  ;;  %v18557_v59 = vld [vmem:[%s25401_s2 + $0x2c8] sm:$0xff]  }
 0x7f6   : > { %4299 = vmatpush1.bf16.msra.mxu1 %v18489_v60  ;;  %4194 = vmatprep.subr.bf16.mxu0 %v18494_v61  ;;  %v18558_v60 = vld [vmem:[%s25401_s2 + $0x208] sm:$0xff]  }
 0x7f7   : > { %4300 = vmatprep.subr.bf16.mxu1 %v18497_v62  ;;  %v18559_v61 = vld [vmem:[%s25401_s2 + $0x288] sm:$0xff]   ;;  %v18560_v62 = vld [vmem:[%s25401_s2 + $0x250] sm:$0xff]  }
 0x7f9   : > { %4195 = vmatpush1.bf16.msra.mxu0 %v18492_v63  ;;  %v18563_v63 = vld [vmem:[%s25401_s2 + $0x290] sm:$0xff]  }
 0x7fa   : > { %4301 = vmatpush1.bf16.msra.mxu1 %v18495_v0  ;;  %4196 = vmatprep.subr.bf16.mxu0 %v18500_v2  ;;  %v18564_v0 = vld [vmem:[%s25401_s2 + $0x258] sm:$0xff]  }
 0x7fb   : > { %4302 = vmatprep.subr.bf16.mxu1 %v18503_v3  ;;  %v18565_v2 = vld [vmem:[%s25401_s2 + $0x2d8] sm:$0xff]  }
 0x7fc   : > { %v18566_v3 = vld [vmem:[%s25401_s2 + $0x218] sm:$0xff]  }
 0x7fd   : > { %4197 = vmatpush1.bf16.msra.mxu0 %v18498_v8  ;;  %v18567_v8 = vld [vmem:[%s25401_s2 + $0x298] sm:$0xff]  }
 0x7fe   : > { %4303 = vmatpush1.bf16.msra.mxu1 %v18501_v9  ;;  %4198 = vmatprep.subr.bf16.mxu0 %v18506_v13  ;;  %v18568_v9 = vld [vmem:[%s25401_s2 + $0x260] sm:$0xff]  }
 0x7ff   : > { %4304 = vmatprep.subr.bf16.mxu1 %v18509_v14  ;;  %v18570_v13 = vld [vmem:[%s25401_s2 + $0x220] sm:$0xff]  }
 0x800   : > { %v18571_v14 = vld [vmem:[%s25401_s2 + $0x2a0] sm:$0xff]  }
 0x801   : > { %4199 = vmatpush1.bf16.msra.mxu0 %v18504_v1  ;;  %v18572_v1 = vld [vmem:[%s25401_s2 + $0x268] sm:$0xff]  }
 0x802   : > { %4305 = vmatpush1.bf16.msra.mxu1 %v18507_v47  ;;  %4200 = vmatprep.subr.bf16.mxu0 %v18512_v21  ;;  %v18573_v47 = vld [vmem:[%s25401_s2 + $0x2e8] sm:$0xff]  }
 0x803   : > { %4306 = vmatprep.subr.bf16.mxu1 %v18515_v22  ;;  %v18574_v21 = vld [vmem:[%s25401_s2 + $0x228] sm:$0xff]  }
 0x804   : > { %v18575_v22 = vld [vmem:[%s25401_s2 + $0x2a8] sm:$0xff]  }
 0x805   : > { %4201 = vmatpush1.bf16.msra.mxu0 %v18510_v24  ;;  %v18576_v24 = vld [vmem:[%s25401_s2 + $0x270] sm:$0xff]  }
 0x806   : > { %4307 = vmatpush1.bf16.msra.mxu1 %v18513_v25  ;;  %4202 = vmatprep.subr.bf16.mxu0 %v18518_v28  ;;  %v18577_v25 = vld [vmem:[%s25401_s2 + $0x2f0] sm:$0xff]  }
 0x807   : > { %4308 = vmatprep.subr.bf16.mxu1 %v18521_v29  ;;  %v18578_v28 = vld [vmem:[%s25401_s2 + $0x230] sm:$0xff]  }
 0x808   : > { %v18579_v29 = vld [vmem:[%s25401_s2 + $0x2b0] sm:$0xff]  }
 0x809   : > { %4203 = vmatpush1.bf16.msra.mxu0 %v18516_v42  ;;  %v18580_v42 = vld [vmem:[%s25401_s2 + $0x278] sm:$0xff]  }
 0x80a   : > { %4309 = vmatpush1.bf16.msra.mxu1 %v18519_v11  ;;  %4204 = vmatprep.subr.bf16.mxu0 %v18524_v32  ;;  %v18581_v11 = vld [vmem:[%s25401_s2 + $0x2f8] sm:$0xff]  }
 0x80b   : > { %4310 = vmatprep.subr.bf16.mxu1 %v18527_v33  ;;  %v18582_v32 = vld [vmem:[%s25401_s2 + $0x238] sm:$0xff]  }
 0x80c   : > { %v18583_v33 = vld [vmem:[%s25401_s2 + $0x2b8] sm:$0xff]  }
 0x80d   : > { %4205 = vmatpush1.bf16.msra.mxu0 %v18522_v34  ;;  %v18584_v34 = vld [vmem:[%s25403_s4 + $0x240] sm:$0xff]  }
 0x80e   : > { %4311 = vmatpush1.bf16.msra.mxu1 %v18525_v36  ;;  %4206 = vmatprep.subr.bf16.mxu0 %v18530_v37  ;;  %v18585_v36 = vld [vmem:[%s25403_s4 + $0x2c0] sm:$0xff]  }
 0x80f   : > { %4312 = vmatprep.subr.bf16.mxu1 %v18533_v38  ;;  %v18586_v37 = vld [vmem:[%s25403_s4 + $0x200] sm:$0xff]  }
 0x810   : > { %v18587_v38 = vld [vmem:[%s25403_s4 + $0x280] sm:$0xff]  }
 0x811   : > { %4207 = vmatpush1.bf16.msra.mxu0 %v18528_v41  ;;  %v18588_v41 = vld [vmem:[%s25403_s4 + $0x248] sm:$0xff]  }
 0x812   : > { %4313 = vmatpush1.bf16.msra.mxu1 %v18531_v44  ;;  %4208 = vmatprep.subr.bf16.mxu0 %v18536_v45  ;;  %v18589_v44 = vld [vmem:[%s25403_s4 + $0x2c8] sm:$0xff]  }
 0x813   : > { %4314 = vmatprep.subr.bf16.mxu1 %v18539_v46  ;;  %v18590_v45 = vld [vmem:[%s25403_s4 + $0x208] sm:$0xff]  }
 0x814   : > { %v18591_v46 = vld [vmem:[%s25403_s4 + $0x288] sm:$0xff]  }
 0x815   : > { %4209 = vmatpush1.bf16.msra.mxu0 %v18534_v48  ;;  %v18592_v48 = vld [vmem:[%s25403_s4 + $0x250] sm:$0xff]  }
 0x816   : > { %4315 = vmatpush1.bf16.msra.mxu1 %v18537_v49  ;;  %4210 = vmatprep.subr.bf16.mxu0 %v18542_v6  ;;  %v18593_v49 = vld [vmem:[%s25403_s4 + $0x2d0] sm:$0xff]  }
 0x817   : > { %4316 = vmatprep.subr.bf16.mxu1 %v18545_v30  ;;  %v18594_v6 = vld [vmem:[%s25403_s4 + $0x210] sm:$0xff]  }
 0x818   : > { %v18595_v30 = vld [vmem:[%s25403_s4 + $0x290] sm:$0xff]  }
 0x819   : > { %4211 = vmatpush1.bf16.msra.mxu0 %v18540_v50  ;;  %v18596_v50 = vld [vmem:[%s25403_s4 + $0x258] sm:$0xff]  }
 0x81a   : > { %4317 = vmatpush1.bf16.msra.mxu1 %v18543_v51  ;;  %4212 = vmatprep.subr.bf16.mxu0 %v18548_v52  ;;  %v18597_v51 = vld [vmem:[%s25403_s4 + $0x2d8] sm:$0xff]  }
 0x81b   : > { %4318 = vmatprep.subr.bf16.mxu1 %v18551_v53  ;;  %v18598_v52 = vld [vmem:[%s25403_s4 + $0x218] sm:$0xff]  }
 0x81c   : > { %v18599_v53 = vld [vmem:[%s25403_s4 + $0x298] sm:$0xff]  }
 0x81d   : > { %4213 = vmatpush1.bf16.msra.mxu0 %v18546_v54  ;;  %v18600_v54 = vld [vmem:[%s25403_s4 + $0x260] sm:$0xff]  }
 0x81e   : > { %4319 = vmatpush1.bf16.msra.mxu1 %v18549_v55  ;;  %17326 = vmatprep.subr.bf16.mxu0 %v18552_v26  ;;  %v18601_v55 = vld [vmem:[%s25403_s4 + $0x2e0] sm:$0xff]  }
 0x81f   : > { %17354 = vmatprep.subr.bf16.mxu1 %v18553_v56  ;;  %v18602_v26 = vld [vmem:[%s25403_s4 + $0x220] sm:$0xff]  }
 0x820   : > { %4215 = vmatmul.mubr.bf16.vlgmr.msra.gmra.mrb[52].mxu0 %v20698_v7  ;;  %v18603_v56 = vld [vmem:[%s25403_s4 + $0x2a0] sm:$0xff]  }
 0x821   : > { %4321 = vmatmul.mubr.bf16.vlgmr.msra.gmra.mrb[52].mxu1 %v20698_v7  ;;  %4224 = vmatprep.mubr.bf16.mxu0 %v20710_v31  ;;  %v18561_v7 = vld [vmem:[%s25401_s2 + $0x2d0] sm:$0xff]  }
 0x822   : > { %4330 = vmatprep.mubr.bf16.mxu1 %v20710_v31  ;;  %17327 = vmatpush3.bf16.msra.mxu0 %v18554_v12  ;;  %v18562_v31 = vld [vmem:[%s25401_s2 + $0x210] sm:$0xff]   ;;  %v18604_v12 = vld [vmem:[%s25403_s4 + $0x268] sm:$0xff]  }
 0x823   : > { %17355 = vmatpush3.bf16.msra.mxu1 %v18555_v57  ;;  %17328 = vmatprep.subr.bf16.mxu0 %v18556_v58  ;;  %v18605_v57 = vld [vmem:[%s25403_s4 + $0x2e8] sm:$0xff]  }
 0x824   : > { %17356 = vmatprep.subr.bf16.mxu1 %v18557_v59  ;;  %v18606_v58 = vld [vmem:[%s25403_s4 + $0x228] sm:$0xff]  }
 0x825   : > { %v18607_v59 = vld [vmem:[%s25403_s4 + $0x2a8] sm:$0xff]  }
 0x826   : > { %17329 = vmatpush3.bf16.msra.mxu0 %v18558_v60  ;;  %v18608_v60 = vld [vmem:[%s25403_s4 + $0x270] sm:$0xff]  }
 0x827   : > { %17357 = vmatpush3.bf16.msra.mxu1 %v18559_v61  ;;  %17330 = vmatprep.subr.bf16.mxu0 %v18560_v62  ;;  %v18609_v61 = vld [vmem:[%s25403_s4 + $0x2f0] sm:$0xff]  }
 0x828   : > { %4225 = vmatmul.mubr.bf16.gmra.mrb[56].mxu0 %v20706_v27  ;;  %17358 = vmatprep.subr.bf16.mxu1 %v18561_v7  ;;  %v18610_v62 = vld [vmem:[%s25403_s4 + $0x230] sm:$0xff]  }
 0x829   : > { %4331 = vmatmul.mubr.bf16.gmra.mrb[56].mxu1 %v20706_v27  ;;  %4638 = vmatprep.mubr.bf16.mxu0 %v20282_v35  ;;  %v18569_v27 = vld [vmem:[%s25401_s2 + $0x2e0] sm:$0xff]   ;;  %v18611_v7 = vld [vmem:[%s25403_s4 + $0x2b0] sm:$0xff]  }
 0x82a   : > { %17331 = vmatpush3.bf16.msra.mxu0 %v18562_v31  ;;  %4687 = vmatprep.mubr.bf16.mxu1 %v20287_v39  ;;  %v18612_v31 = vld [vmem:[%s25403_s4 + $0x278] sm:$0xff]  }
 0x82b   : > { %17359 = vmatpush3.bf16.msra.mxu1 %v18563_v63  ;;  %17332 = vmatprep.subr.bf16.mxu0 %v18564_v0  ;;  %v18613_v63 = vld [vmem:[%s25403_s4 + $0x2f8] sm:$0xff]  }
 0x82c   : > { %17360 = vmatprep.subr.bf16.mxu1 %v18565_v2  ;;  %v18614_v0 = vld [vmem:[%s25403_s4 + $0x238] sm:$0xff]  }
 0x82d   : > { %v18615_v2 = vld [vmem:[%s25403_s4 + $0x2b8] sm:$0xff]  }
 0x82e   : > { %17333 = vmatpush3.bf16.msra.mxu0 %v18566_v3 }
 0x82f   : > { %17361 = vmatpush3.bf16.msra.mxu1 %v18567_v8  ;;  %17334 = vmatprep.subr.bf16.mxu0 %v18568_v9 }
 0x830   : > { %17362 = vmatprep.subr.bf16.mxu1 %v18569_v27 }
 0x832   : > { %17335 = vmatpush3.bf16.msra.mxu0 %v18570_v13 }
 0x833   : > { %17363 = vmatpush3.bf16.msra.mxu1 %v18571_v14  ;;  %17336 = vmatprep.subr.bf16.mxu0 %v18572_v1 }
 0x834   : > { %17364 = vmatprep.subr.bf16.mxu1 %v18573_v47 }
 0x836   : > { %17337 = vmatpush3.bf16.msra.mxu0 %v18574_v21 }
 0x837   : > { %17365 = vmatpush3.bf16.msra.mxu1 %v18575_v22  ;;  %17338 = vmatprep.subr.bf16.mxu0 %v18576_v24 }
 0x838   : > { %17366 = vmatprep.subr.bf16.mxu1 %v18577_v25 }
 0x83a   : > { %17339 = vmatpush3.bf16.msra.mxu0 %v18578_v28 }
 0x83b   : > { %17367 = vmatpush3.bf16.msra.mxu1 %v18579_v29  ;;  %17340 = vmatprep.subr.bf16.mxu0 %v18580_v42 }
 0x83c   : > { %17368 = vmatprep.subr.bf16.mxu1 %v18581_v11 }
 0x83e   : > { %17341 = vmatpush3.bf16.msra.mxu0 %v18582_v32 }
 0x83f   : > { %17369 = vmatpush3.bf16.msra.mxu1 %v18583_v33  ;;  %17382 = vmatprep.subr.bf16.mxu0 %v18584_v34 }
 0x840   : > { %17410 = vmatprep.subr.bf16.mxu1 %v18585_v36 }
 0x841   : > { %4639 = vmatmul.mubr.bf16.vlgmr.msra.gmra.mrb[60].mxu0 %v20289_v40 }
 0x842   : > { %4688 = vmatmul.mubr.bf16.vlgmr.msra.gmra.mrb[60].mxu1 %v20294_v43  ;;  %17383 = vmatpush3.bf16.msra.mxu0 %v18586_v37 }
 0x843   : > { %17411 = vmatpush3.bf16.msra.mxu1 %v18587_v38  ;;  %17384 = vmatprep.subr.bf16.mxu0 %v18588_v41 }
 0x844   : > { %17412 = vmatprep.subr.bf16.mxu1 %v18589_v44  ;;  %4646 = vmatprep.mubr.bf16.mxu0 %v20363_v4 }
 0x845   : > { %4695 = vmatprep.mubr.bf16.mxu1 %v20377_v10 }
 0x846   : > { %17385 = vmatpush3.bf16.msra.mxu0 %v18590_v45 }
 0x847   : > { %17413 = vmatpush3.bf16.msra.mxu1 %v18591_v46  ;;  %17386 = vmatprep.subr.bf16.mxu0 %v18592_v48 }
 0x848   : > { %17414 = vmatprep.subr.bf16.mxu1 %v18593_v49 }
 0x849   : > { %4647 = vmatmul.mubr.bf16.gmra.mrb[64].mxu0 %v20365_v5 }
 0x84a   : > { %17387 = vmatpush3.bf16.msra.mxu0 %v18594_v6  ;;  %4696 = vmatmul.mubr.bf16.gmra.mrb[64].mxu1 %v20389_v15 }
 0x84b   : > { %17415 = vmatpush3.bf16.msra.mxu1 %v18595_v30  ;;  %17388 = vmatprep.subr.bf16.mxu0 %v18596_v50  ;;  %v15387_v30 = vld [vmem:[%s25404_s5 + $0x2] ss:$0 sm:$0xff] }
 0x84c   : > { %17416 = vmatprep.subr.bf16.mxu1 %v18597_v51  ;;  %5001 = vmatprep.mubr.bf16.mxu0 %v20282_v35 }
 0x84d   : > { %5050 = vmatprep.mubr.bf16.mxu1 %v20287_v39 }
 0x84e   : > { %17389 = vmatpush3.bf16.msra.mxu0 %v18598_v52 }
 0x84f   : > { %17417 = vmatpush3.bf16.msra.mxu1 %v18599_v53  ;;  %17390 = vmatprep.subr.bf16.mxu0 %v18600_v54 }
 0x850   : > { %17418 = vmatprep.subr.bf16.mxu1 %v18601_v55 }
 0x852   : > { %17391 = vmatpush3.bf16.msra.mxu0 %v18602_v26 }
 0x853   : > { %17419 = vmatpush3.bf16.msra.mxu1 %v18603_v56  ;;  %17392 = vmatprep.subr.bf16.mxu0 %v18604_v12 }
 0x854   : > { %17420 = vmatprep.subr.bf16.mxu1 %v18605_v57 }
 0x856   : > { %17393 = vmatpush3.bf16.msra.mxu0 %v18606_v58 }
 0x857   : > { %17421 = vmatpush3.bf16.msra.mxu1 %v18607_v59  ;;  %17394 = vmatprep.subr.bf16.mxu0 %v18608_v60 }
 0x858   : > { %17422 = vmatprep.subr.bf16.mxu1 %v18609_v61 }
 0x85a   : > { %17395 = vmatpush3.bf16.msra.mxu0 %v18610_v62 }
 0x85b   : > { %17423 = vmatpush3.bf16.msra.mxu1 %v18611_v7  ;;  %17396 = vmatprep.subr.bf16.mxu0 %v18612_v31 }
 0x85c   : > { %17424 = vmatprep.subr.bf16.mxu1 %v18613_v63 }
 0x85e   : > { %17397 = vmatpush3.bf16.msra.mxu0 %v18614_v0 }
 0x85f   : > { %17425 = vmatpush3.bf16.msra.mxu1 %v18615_v2 }
 0x860   : > { %5185 = vmatprep.subr.bf16.mxu1 %v20282_v35 }
 0x861   : > { %5002 = vmatmul.mubr.bf16.vlgmr.msra.gmra.mrb[68].mxu0 %v20289_v40 }
 0x862   : > { %5051 = vmatmul.mubr.bf16.vlgmr.msra.gmra.mrb[68].mxu1 %v20294_v43  ;;  %5009 = vmatprep.mubr.bf16.mxu0 %v20363_v4  ;;  %v15289_v4 = vld [vmem:[%s25402_s3 + $0x2] ss:$0 sm:$0xff] }
 0x863   : > { %5058 = vmatprep.mubr.bf16.mxu1 %v20377_v10  ;;  %5186 = vmatpush1.bf16.msra.mxu1 %v20289_v40 }
 0x864   : > { %5187 = vmatprep.subr.bf16.mxu1 %v20445_v17 }
 0x867   : > { %5188 = vmatpush1.bf16.msra.mxu1 %v20453_v19 }
 0x869   : > { %5010 = vmatmul.mubr.bf16.gmra.mrb[72].mxu0 %v20365_v5 }
 0x86a   : > { %5059 = vmatmul.mubr.bf16.gmra.mrb[72].mxu1 %v20389_v15 }
 0x86b   : > { %5217 = vmatprep.mubr.bf16.mxu1 %v20097_v23 }
 0x914   : > { %v17342_v35 = vpop.f32.mrb[60].mxu0 }
 0x915   : > { %v17370_v3 = vpop.f32.mrb[60].mxu1  ;;  %v17343_v8 = vpop.f32.mrb[61].mxu0 }
 0x916   : > { %v17344_v10 = vadd.f32 %v17343_v8, %v17342_v35  ;;  %v17371_v9 = vpop.f32.mrb[61].mxu1  ;;  %v17345_v40 = vpop.f32.mrb[62].mxu0 }
 0x917   : > { %v17372_v27 = vadd.f32 %v17371_v9, %v17370_v3  ;;  %v17373_v17 = vpop.f32.mrb[62].mxu1  ;;  %v17346_v13 = vpop.f32.mrb[63].mxu0 }
 0x918   : > { %v4641_v19 = vadd.f32 %v17344_v10, %v15289_v4  ;;  %v17347_v14 = vadd.f32 %v17346_v13, %v17345_v40  ;;  %v17374_v5 = vpop.f32.mrb[63].mxu1 }
 0x919   : > { %v17375_v1 = vadd.f32 %v17374_v5, %v17373_v17 }
 0x91a   : > { %v4690_v15 = vadd.f32 %v17372_v27, %v4641_v19  ;;  %v4644_v47 = vadd.f32 %v17347_v14, %v15289_v4 }
 0x91c   : > { %v4693_v21 = vadd.f32 %v17375_v1, %v4644_v47  ;;  %v17348_v22 = vpop.f32.mrb[64].mxu0 }
 0x91d   : > { %v17349_v24 = vpop.f32.mrb[65].mxu0  ;;  %v17376_v25 = vpop.f32.mrb[64].mxu1 }
 0x91e   : > { %v5069_v28 = vpack.c.bf16 %v4693_v21, %v4690_v15  ;;  %v17350_v29 = vadd.f32 %v17349_v24, %v17348_v22  ;;  %v17351_v42 = vpop.f32.mrb[66].mxu0  ;;  %v17377_v11 = vpop.f32.mrb[65].mxu1 }
 0x91f   : > { %v17352_v32 = vpop.f32.mrb[67].mxu0  ;;  %v17378_v33 = vadd.f32 %v17377_v11, %v17376_v25  ;;  %v17379_v34 = vpop.f32.mrb[66].mxu1 }
 0x920   : > { %17806 = vmatprep.subr.bf16.mxu0 %v5069_v28  ;;  %v4649_v36 = vadd.f32 %v17350_v29, %v15289_v4  ;;  %v17353_v37 = vadd.f32 %v17352_v32, %v17351_v42  ;;  %v17380_v38 = vpop.f32.mrb[67].mxu1 }
 0x921   : > { %17807 = vmatpush3.bf16.xpose.msra.mxu0 %v5069_v28  ;;  %v17381_v41 = vadd.f32 %v17380_v38, %v17379_v34 }
 0x922   : > { %v4652_v44 = vadd.f32 %v17353_v37, %v15289_v4  ;;  %v4698_v45 = vadd.f32 %v17378_v33, %v4649_v36 }
 0x924   : > { %v4701_v46 = vadd.f32 %v17381_v41, %v4652_v44 }
 0x926   : > { %v5070_v48 = vpack.c.bf16 %v4701_v46, %v4698_v45 }
 0x928   : > { %17808 = vmatprep.subr.bf16.mxu0 %v5070_v48 }
 0x929   : > { %17809 = vmatpush3.bf16.xpose.msra.mxu0 %v5070_v48 }
 0x92a   : > { %5238 = vmatprep.subr.bf16.mxu0 %v20287_v39 }
 0x934   : > { %v17398_v49 = vpop.f32.mrb[68].mxu0 }
 0x935   : > { %v17426_v6 = vpop.f32.mrb[68].mxu1  ;;  %v17399_v50 = vpop.f32.mrb[69].mxu0 }
 0x936   : > { %v17400_v51 = vadd.f32 %v17399_v50, %v17398_v49  ;;  %v17427_v52 = vpop.f32.mrb[69].mxu1  ;;  %v17401_v53 = vpop.f32.mrb[70].mxu0 }
 0x937   : > { %v17428_v54 = vadd.f32 %v17427_v52, %v17426_v6  ;;  %v17429_v55 = vpop.f32.mrb[70].mxu1  ;;  %v17402_v26 = vpop.f32.mrb[71].mxu0  ;;  %v18618_v52 = vld [vmem:[%s25405_s6 + $0x804] ss:$16 sps:$4 sm:$0xff]  }
 0x938   : > { %v5004_v56 = vadd.f32 %v17400_v51, %v15387_v30  ;;  %v17403_v12 = vadd.f32 %v17402_v26, %v17401_v53  ;;  %v17430_v57 = vpop.f32.mrb[71].mxu1  ;;  %v18621_v53 = vld [vmem:[%s25405_s6 + $0x80c] ss:$16 sps:$4 sm:$0xff]  }
 0x939   : > { %v17431_v58 = vadd.f32 %v17430_v57, %v17429_v55  ;;  %6174 = vmatprep.subr.bf16.mxu1 %v18621_v53  ;;  %v18681_v53 = vld [vmem:[%s25405_s6 + $0x94c] ss:$16 sps:$4 sm:$0xff]  }
 0x93a   : > { %v5053_v59 = vadd.f32 %v17428_v54, %v5004_v56  ;;  %v5007_v60 = vadd.f32 %v17403_v12, %v15387_v30 }
 0x93c   : > { %v5056_v39 = vadd.f32 %v17431_v58, %v5007_v60  ;;  %v17404_v61 = vpop.f32.mrb[72].mxu0  ;;  %v15421_v60 = vld [vmem:[%s25400_s1 + $0x48] sm:$0xff] }
 0x93d   : > { %v17432_v62 = vpop.f32.mrb[72].mxu1  ;;  %v17405_v7 = vpop.f32.mrb[73].mxu0 }
 0x93e   : > { %v17406_v31 = vadd.f32 %v17405_v7, %v17404_v61  ;;  %v17433_v63 = vpop.f32.mrb[73].mxu1  ;;  %v17407_v0 = vpop.f32.mrb[74].mxu0  ;;  %v5067_v2 = vpack.c.bf16 %v5056_v39, %v5053_v59  ;;  %v15420_v59 = vld [vmem:[%s25400_s1 + $0x40] sm:$0xff] }
 0x93f   : > { %v17434_v35 = vadd.f32 %v17433_v63, %v17432_v62  ;;  %v17435_v3 = vpop.f32.mrb[74].mxu1  ;;  %v17408_v4 = vpop.f32.mrb[75].mxu0 }
 0x940   : > { %v5012_v8 = vadd.f32 %v17406_v31, %v15387_v30  ;;  %v17409_v10 = vadd.f32 %v17408_v4, %v17407_v0  ;;  %v17436_v9 = vpop.f32.mrb[75].mxu1  ;;  %17810 = vmatprep.mubr.bf16.mxu0 %v5067_v2  ;;  %v18616_v2 = vld [vmem:[%s25405_s6 + $0x800] ss:$16 sps:$4 sm:$0xff]   ;;  %v18624_v4 = vld [vmem:[%s25405_s6 + $0x824] ss:$16 sps:$4 sm:$0xff]  }
 0x941   : > { %v17437_v40 = vadd.f32 %v17436_v9, %v17435_v3  ;;  %v15423_v3 = vld [vmem:[%s25400_s1 + $0x58] sm:$0x1]  ;;  %v15422_v9 = vld [vmem:[%s25400_s1 + $0x50] sm:$0xff] }
 0x942   : > { %v5061_v27 = vadd.f32 %v17434_v35, %v5012_v8  ;;  %v5015_v17 = vadd.f32 %v17409_v10, %v15387_v30  ;;  %v18619_v35 = vld [vmem:[%s25405_s6 + $0x808] ss:$16 sps:$4 sm:$0xff]   ;;  %v18627_v8 = vld [vmem:[%s25405_s6 + $0x82c] ss:$16 sps:$4 sm:$0xff]  }
 0x944   : > { %v5064_v13 = vadd.f32 %v17437_v40, %v5015_v17  ;;  %v18625_v17 = vld [vmem:[%s25405_s6 + $0x828] ss:$16 sps:$4 sm:$0xff]  }
 0x946   : > { %v5068_v19 = vpack.c.bf16 %v5064_v13, %v5061_v27  ;;  %v18622_v27 = vld [vmem:[%s25405_s6 + $0x820] ss:$16 sps:$4 sm:$0xff]   ;;  %v18630_v13 = vld [vmem:[%s25405_s6 + $0x844] ss:$16 sps:$4 sm:$0xff]  }
 0x948   : > { %17811 = vmatmul.mubr.bf16.vlgmr.msra.gmra.mrb[76].mxu0 %v5068_v19  ;;  %v18633_v19 = vld [vmem:[%s25405_s6 + $0x84c] ss:$16 sps:$4 sm:$0xff]  }
 0x949   : > { %5239 = vmatpush1.bf16.msra.mxu0 %v20294_v43  ;;  %5270 = vmatprep.mubr.bf16.mxu0 %v20097_v23 }
 0x94a   : > { %5240 = vmatprep.subr.bf16.mxu0 %v20449_v18 }
 0x94d   : > { %5241 = vmatpush1.bf16.msra.mxu0 %v20457_v20 }
 0x94e   : > { %6068 = vmatprep.subr.bf16.mxu0 %v18618_v52  ;;  %v18678_v52 = vld [vmem:[%s25405_s6 + $0x944] ss:$16 sps:$4 sm:$0xff]  }
 0xa1b   : > { %v17812_v14 = vpop.f32.mrb[76].mxu0 }
 0xa1c   : > { %v5105_v5 = vpop.f32.mrb[77].mxu0  ;;  %v5122_v21 = vmul.f32 0.0078125, %v17812_v14 }
 0xa1d   : > { %v5120_v1 = vmul.f32 0.0078125, %v5105_v5  ;;  %v17813_v15 = vpop.f32.mrb[78].mxu0 }
 0xa1e   : > { %v5108_v47 = vpop.f32.mrb[79].mxu0  ;;  %v5123_v25 = vmul.f32 0.0078125, %v17813_v15  ;;  %v5130_v43 = vsel %vm1230_vm0, %v5122_v21, -inf  ;;  %v18631_v15 = vld [vmem:[%s25405_s6 + $0x848] ss:$16 sps:$4 sm:$0xff]  }
 0xa1f   : > { %v5121_v22 = vmul.f32 0.0078125, %v5108_v47  ;;  %v5124_v24 = vsel %vm1230_vm0, %v5120_v1, -inf  ;;  %v18636_v47 = vld [vmem:[%s25405_s6 + $0x864] ss:$16 sps:$4 sm:$0xff]  }
 0xa20   : > { %5125 = vmax.xlane.f32.xlu0 %v5124_v24  ;;  %v5133_v18 = vsel %vm1240_vm1, %v5123_v25, -inf  ;;  %v18637_v24 = vld [vmem:[%s25405_s6 + $0x868] ss:$16 sps:$4 sm:$0xff]  }
 0xa21   : > { %v5127_v28 = vsel %vm1230_vm0, %v5121_v22, -inf }
 0xa22   : > { %5128 = vmax.xlane.f32.xlu1 %v5127_v28  ;;  %v18645_v28 = vld [vmem:[%s25405_s6 + $0x88c] ss:$16 sps:$4 sm:$0xff]  }
 0xa24   : > { %5131 = vmax.xlane.f32.xlu0 %v5130_v43  ;;  %v18640_v43 = vld [vmem:[%s25405_s6 + $0x880] ss:$16 sps:$4 sm:$0xff]  }
 0xa26   : > { %5134 = vmax.xlane.f32.xlu1 %v5133_v18  ;;  %v18643_v18 = vld [vmem:[%s25405_s6 + $0x888] ss:$16 sps:$4 sm:$0xff]  }
 0xaad   : > { %v5126_v20 = vpop.xlane.xlu0 %5125 }
 0xaae   : > { %v5136_v29 = vsub.f32 %v5120_v1, %v5126_v20  ;;  %v18628_v1 = vld [vmem:[%s25405_s6 + $0x840] ss:$16 sps:$4 sm:$0xff]   ;;  %v18648_v20 = vld [vmem:[%s25405_s6 + $0x8a4] ss:$16 sps:$4 sm:$0xff]  }
 0xaaf   : > { %v5129_v42 = vpop.xlane.xlu1 %5128 }
 0xab0   : > { %v5140_v11 = vmul.f32 1.442695, %v5136_v29  ;;  %v5137_v32 = vsub.f32 %v5121_v22, %v5129_v42  ;;  %v18634_v22 = vld [vmem:[%s25405_s6 + $0x860] ss:$16 sps:$4 sm:$0xff]   ;;  %v18651_v29 = vld [vmem:[%s25405_s6 + $0x8ac] ss:$16 sps:$4 sm:$0xff]  }
 0xab1   : > { %v5132_v33 = vpop.xlane.xlu0 %5131  ;;  %v18646_v42 = vld [vmem:[%s25405_s6 + $0x8a0] ss:$16 sps:$4 sm:$0xff]  }
 0xab2   : > { %19992 = vpow2.f32 %v5140_v11  ;;  %v5142_v34 = vmul.f32 1.442695, %v5137_v32  ;;  %v5138_v36 = vsub.f32 %v5122_v21, %v5132_v33  ;;  %v18639_v21 = vld [vmem:[%s25405_s6 + $0x86c] ss:$16 sps:$4 sm:$0xff]   ;;  %v18649_v11 = vld [vmem:[%s25405_s6 + $0x8a8] ss:$16 sps:$4 sm:$0xff]  }
 0xab3   : > { %v5135_v37 = vpop.xlane.xlu1 %5134  ;;  %v18654_v32 = vld [vmem:[%s25405_s6 + $0x8c4] ss:$16 sps:$4 sm:$0xff]   ;;  %v18657_v33 = vld [vmem:[%s25405_s6 + $0x8cc] ss:$16 sps:$4 sm:$0xff]  }
 0xab4   : > { %19994 = vpow2.f32 %v5142_v34  ;;  %v5144_v38 = vmul.f32 1.442695, %v5138_v36  ;;  %v5139_v41 = vsub.f32 %v5123_v25, %v5135_v37  ;;  %v18642_v25 = vld [vmem:[%s25405_s6 + $0x884] ss:$16 sps:$4 sm:$0xff]   ;;  %v18652_v34 = vld [vmem:[%s25405_s6 + $0x8c0] ss:$16 sps:$4 sm:$0xff]  }
 0xab5   : > { %v18655_v36 = vld [vmem:[%s25405_s6 + $0x8c8] ss:$16 sps:$4 sm:$0xff]   ;;  %v18660_v37 = vld [vmem:[%s25405_s6 + $0x8e4] ss:$16 sps:$4 sm:$0xff]  }
 0xab6   : > { %19996 = vpow2.f32 %v5144_v38  ;;  %v5146_v44 = vmul.f32 1.442695, %v5139_v41  ;;  %v18663_v38 = vld [vmem:[%s25405_s6 + $0x8ec] ss:$16 sps:$4 sm:$0xff]   ;;  %v18658_v41 = vld [vmem:[%s25405_s6 + $0x8e0] ss:$16 sps:$4 sm:$0xff]  }
 0xab8   : > { %19998 = vpow2.f32 %v5146_v44  ;;  %v18661_v44 = vld [vmem:[%s25405_s6 + $0x8e8] ss:$16 sps:$4 sm:$0xff]  }
 0xabc   : > { %v19993_v45 = vpop.eup %19992 }
 0xabd   : > { %v5148_v46 = vsel %vm1230_vm0, %v19993_v45, 0.0 }
 0xabe   : > { %v19995_v48 = vpop.eup %19994  ;;  %5149 = vadd.xlane.f32.xlu0 %v5148_v46  ;;  %v18669_v46 = vld [vmem:[%s25405_s6 + $0x90c] ss:$16 sps:$4 sm:$0xff]  }
 0xabf   : > { %v5151_v49 = vsel %vm1230_vm0, %v19995_v48, 0.0 }
 0xac0   : > { %v19997_v6 = vpop.eup %19996  ;;  %5152 = vadd.xlane.f32.xlu1 %v5151_v49  ;;  %v18667_v49 = vld [vmem:[%s25405_s6 + $0x908] ss:$16 sps:$4 sm:$0xff]  }
 0xac1   : > { %v5154_v30 = vsel %vm1230_vm0, %v19997_v6, 0.0 }
 0xac2   : > { %v19999_v50 = vpop.eup %19998  ;;  %5155 = vadd.xlane.f32.xlu0 %v5154_v30  ;;  %v18675_v30 = vld [vmem:[%s25405_s6 + $0x92c] ss:$16 sps:$4 sm:$0xff]  }
 0xac3   : > { %v5157_v51 = vsel %vm1240_vm1, %v19999_v50, 0.0 }
 0xac4   : > { %5158 = vadd.xlane.f32.xlu1 %v5157_v51  ;;  %v18673_v51 = vld [vmem:[%s25405_s6 + $0x928] ss:$16 sps:$4 sm:$0xff]  }
 0xb4b   : > { %v5150_v54 = vpop.xlane.xlu0 %5149 }
 0xb4c   : > { %20000 = vrcp.f32 %v5150_v54  ;;  %v18676_v54 = vld [vmem:[%s25405_s6 + $0x940] ss:$16 sps:$4 sm:$0xff]  }
 0xb4d   : > { %v5153_v55 = vpop.xlane.xlu1 %5152 }
 0xb4e   : > { %20002 = vrcp.f32 %v5153_v55  ;;  %v18679_v55 = vld [vmem:[%s25405_s6 + $0x948] ss:$16 sps:$4 sm:$0xff]  }
 0xb4f   : > { %v5156_v26 = vpop.xlane.xlu0 %5155 }
 0xb50   : > { %20004 = vrcp.f32 %v5156_v26  ;;  %v18684_v26 = vld [vmem:[%s25405_s6 + $0x964] ss:$16 sps:$4 sm:$0xff]  }
 0xb51   : > { %v5159_v56 = vpop.xlane.xlu1 %5158 }
 0xb52   : > { %20006 = vrcp.f32 %v5159_v56  ;;  %v18687_v56 = vld [vmem:[%s25405_s6 + $0x96c] ss:$16 sps:$4 sm:$0xff]  }
 0xb56   : > { %v20001_v12 = vpop.eup %20000 }
 0xb57   : > { %v5164_v57 = vmul.f32 %v20001_v12, %v19993_v45  ;;  %v18666_v45 = vld [vmem:[%s25405_s6 + $0x904] ss:$16 sps:$4 sm:$0xff]   ;;  %v18682_v12 = vld [vmem:[%s25405_s6 + $0x960] ss:$16 sps:$4 sm:$0xff]  }
 0xb58   : > { %v20003_v58 = vpop.eup %20002 }
 0xb59   : > { %v5165_v39 = vmul.f32 %v20003_v58, %v19995_v48  ;;  %v5173_v62 = vadd.f32 %v15420_v59, %v5164_v57  ;;  %v18664_v48 = vld [vmem:[%s25405_s6 + $0x900] ss:$16 sps:$4 sm:$0xff]   ;;  %v18685_v57 = vld [vmem:[%s25405_s6 + $0x968] ss:$16 sps:$4 sm:$0xff]   ;;  %v18690_v58 = vld [vmem:[%s25405_s6 + $0x984] ss:$16 sps:$4 sm:$0xff]  }
 0xb5a   : > { %v20005_v61 = vpop.eup %20004  ;;  %v18693_v59 = vld [vmem:[%s25405_s6 + $0x98c] ss:$16 sps:$4 sm:$0xff]  }
 0xb5b   : > { %v5174_v7 = vadd.f32 %v15421_v60, %v5165_v39  ;;  %v5166_v10 = vmul.f32 %v20005_v61, %v19997_v6  ;;  %v18672_v6 = vld [vmem:[%s25405_s6 + $0x924] ss:$16 sps:$4 sm:$0xff]   ;;  %v18688_v60 = vld [vmem:[%s25405_s6 + $0x980] ss:$16 sps:$4 sm:$0xff]   ;;  %v18691_v39 = vld [vmem:[%s25405_s6 + $0x988] ss:$16 sps:$4 sm:$0xff]  }
 0xb5c   : > { %v20007_v31 = vpop.eup %20006  ;;  %v18696_v61 = vld [vmem:[%s25405_s6 + $0x9a4] ss:$16 sps:$4 sm:$0xff]  }
 0xb5d   : > { %v5177_v63 = vpack.c.bf16 %v5174_v7, %v5173_v62  ;;  %v5167_v0 = vmul.f32 %v20007_v31, %v19999_v50  ;;  %v5175_v14 = vadd.f32 %v15422_v9, %v5166_v10  ;;  %v18670_v50 = vld [vmem:[%s25405_s6 + $0x920] ss:$16 sps:$4 sm:$0xff]   ;;  %v18699_v62 = vld [vmem:[%s25405_s6 + $0x9ac] ss:$16 sps:$4 sm:$0xff]   ;;  %v18697_v31 = vld [vmem:[%s25405_s6 + $0x9a8] ss:$16 sps:$4 sm:$0xff]  }
 0xb5e   : > { %v18694_v7 = vld [vmem:[%s25405_s6 + $0x9a0] ss:$16 sps:$4 sm:$0xff]   ;;  %v18709_v10 = vld [vmem:[%s25405_s6 + $0x9e8] ss:$16 sps:$4 sm:$0xff]   ;;  %v18714_v9 = vld [vmem:[%s25405_s6 + $0xa04] ss:$16 sps:$4 sm:$0xff]  }
 0xb5f   : > { %15424 = vmatmul.mubr.msk.bf16.vlgmr.msra.gmra.mrb[76].mxu1 %vm1230_vm0, %v5177_v63  ;;  %15426 = vmatmul.mubr.msk.bf16.vlgmr.msra.gmra.mrb[80].mxu0 %vm1230_vm0, %v5177_v63  ;;  %v5176_v40 = vadd.f32 %v15423_v3, %v5167_v0  ;;  %v18702_v63 = vld [vmem:[%s25405_s6 + $0x9c4] ss:$16 sps:$4 sm:$0xff]   ;;  %v18705_v0 = vld [vmem:[%s25405_s6 + $0x9cc] ss:$16 sps:$4 sm:$0xff]  }
 0xb60   : > { %5227 = vmatprep.mubr.bf16.mxu1 %v20097_v23  ;;  %5280 = vmatprep.mubr.bf16.mxu0 %v20097_v23  ;;  %v18708_v3 = vld [vmem:[%s25405_s6 + $0x9e4] ss:$16 sps:$4 sm:$0xff]  }
 0xb61   : > { %6069 = vmatpush1.bf16.msra.mxu0 %v18616_v2  ;;  %6175 = vmatpush1.bf16.msra.mxu1 %v18619_v35  ;;  %v5178_v5 = vpack.c.bf16 %v5176_v40, %v5175_v14  ;;  %v18700_v2 = vld [vmem:[%s25405_s6 + $0x9c0] ss:$16 sps:$4 sm:$0xff]   ;;  %v18703_v35 = vld [vmem:[%s25405_s6 + $0x9c8] ss:$16 sps:$4 sm:$0xff]   ;;  %v18717_v40 = vld [vmem:[%s25405_s6 + $0xa0c] ss:$16 sps:$4 sm:$0xff]  }
 0xb62   : > { %6070 = vmatprep.subr.bf16.mxu0 %v18624_v4  ;;  %6176 = vmatprep.subr.bf16.mxu1 %v18627_v8  ;;  %v18711_v4 = vld [vmem:[%s25405_s6 + $0x9ec] ss:$16 sps:$4 sm:$0xff]   ;;  %v18706_v8 = vld [vmem:[%s25405_s6 + $0x9e0] ss:$16 sps:$4 sm:$0xff]  }
 0xb65   : > { %6071 = vmatpush1.bf16.msra.mxu0 %v18622_v27  ;;  %6177 = vmatpush1.bf16.msra.mxu1 %v18625_v17 }
 0xb66   : > { %6072 = vmatprep.subr.bf16.mxu0 %v18630_v13  ;;  %6178 = vmatprep.subr.bf16.mxu1 %v18633_v19 }
 0xb67   : > { %15425 = vmatmul.mubr.msk.bf16.gmra.mrb[80].mxu1 %vm1230_vm0, %v5178_v5  ;;  %15427 = vmatmul.mubr.msk.bf16.gmra.mrb[84].mxu0 %vm1230_vm0, %v5178_v5 }
 0xb69   : > { %6073 = vmatpush1.bf16.msra.mxu0 %v18628_v1  ;;  %6179 = vmatpush1.bf16.msra.mxu1 %v18631_v15 }
 0xb6a   : > { %6074 = vmatprep.subr.bf16.mxu0 %v18636_v47  ;;  %6180 = vmatprep.subr.bf16.mxu1 %v18639_v21 }
 0xb6d   : > { %6075 = vmatpush1.bf16.msra.mxu0 %v18634_v22  ;;  %6181 = vmatpush1.bf16.msra.mxu1 %v18637_v24 }
 0xb6e   : > { %6076 = vmatprep.subr.bf16.mxu0 %v18642_v25  ;;  %6182 = vmatprep.subr.bf16.mxu1 %v18645_v28  ;;  %v18712_v25 = vld [vmem:[%s25405_s6 + $0xa00] ss:$16 sps:$4 sm:$0xff]   ;;  %v18715_v28 = vld [vmem:[%s25405_s6 + $0xa08] ss:$16 sps:$4 sm:$0xff]  }
 0xb71   : > { %6077 = vmatpush1.bf16.msra.mxu0 %v18640_v43  ;;  %6183 = vmatpush1.bf16.msra.mxu1 %v18643_v18  ;;  %v18720_v43 = vld [vmem:[%s25405_s6 + $0xa24] ss:$16 sps:$4 sm:$0xff]   ;;  %v18723_v18 = vld [vmem:[%s25405_s6 + $0xa2c] ss:$16 sps:$4 sm:$0xff]  }
 0xb72   : > { %6078 = vmatprep.subr.bf16.mxu0 %v18648_v20  ;;  %6184 = vmatprep.subr.bf16.mxu1 %v18651_v29 }
 0xb75   : > { %6079 = vmatpush1.bf16.msra.mxu0 %v18646_v42  ;;  %6185 = vmatpush1.bf16.msra.mxu1 %v18649_v11  ;;  %v18718_v42 = vld [vmem:[%s25405_s6 + $0xa20] ss:$16 sps:$4 sm:$0xff]   ;;  %v18721_v11 = vld [vmem:[%s25405_s6 + $0xa28] ss:$16 sps:$4 sm:$0xff]  }
 0xb76   : > { %6080 = vmatprep.subr.bf16.mxu0 %v18654_v32  ;;  %6186 = vmatprep.subr.bf16.mxu1 %v18657_v33 }
 0xb79   : > { %6081 = vmatpush1.bf16.msra.mxu0 %v18652_v34  ;;  %6187 = vmatpush1.bf16.msra.mxu1 %v18655_v36  ;;  %v18726_v34 = vld [vmem:[%s25405_s6 + $0xa44] ss:$16 sps:$4 sm:$0xff]   ;;  %v18729_v36 = vld [vmem:[%s25405_s6 + $0xa4c] ss:$16 sps:$4 sm:$0xff]  }
 0xb7a   : > { %6082 = vmatprep.subr.bf16.mxu0 %v18660_v37  ;;  %6188 = vmatprep.subr.bf16.mxu1 %v18663_v38 }
 0xb7d   : > { %6083 = vmatpush1.bf16.msra.mxu0 %v18658_v41  ;;  %6189 = vmatpush1.bf16.msra.mxu1 %v18661_v44 }
 0xb7e   : > { %6084 = vmatprep.subr.bf16.mxu0 %v18666_v45  ;;  %6190 = vmatprep.subr.bf16.mxu1 %v18669_v46 }
 0xb81   : > { %6085 = vmatpush1.bf16.msra.mxu0 %v18664_v48  ;;  %6191 = vmatpush1.bf16.msra.mxu1 %v18667_v49 }
 0xb82   : > { %6086 = vmatprep.subr.bf16.mxu0 %v18672_v6  ;;  %6192 = vmatprep.subr.bf16.mxu1 %v18675_v30  ;;  %v18724_v6 = vld [vmem:[%s25405_s6 + $0xa40] ss:$16 sps:$4 sm:$0xff]   ;;  %v18727_v30 = vld [vmem:[%s25405_s6 + $0xa48] ss:$16 sps:$4 sm:$0xff]  }
 0xb85   : > { %6087 = vmatpush1.bf16.msra.mxu0 %v18670_v50  ;;  %6193 = vmatpush1.bf16.msra.mxu1 %v18673_v51  ;;  %v18732_v50 = vld [vmem:[%s25405_s6 + $0xa64] ss:$16 sps:$4 sm:$0xff]   ;;  %v18735_v51 = vld [vmem:[%s25405_s6 + $0xa6c] ss:$16 sps:$4 sm:$0xff]  }
 0xb86   : > { %6088 = vmatprep.subr.bf16.mxu0 %v18678_v52  ;;  %6194 = vmatprep.subr.bf16.mxu1 %v18681_v53  ;;  %v18730_v52 = vld [vmem:[%s25405_s6 + $0xa60] ss:$16 sps:$4 sm:$0xff]   ;;  %v18733_v53 = vld [vmem:[%s25405_s6 + $0xa68] ss:$16 sps:$4 sm:$0xff]  }
 0xb89   : > { %6089 = vmatpush1.bf16.msra.mxu0 %v18676_v54  ;;  %6195 = vmatpush1.bf16.msra.mxu1 %v18679_v55  ;;  %v18738_v54 = vld [vmem:[%s25405_s6 + $0xa84] ss:$16 sps:$4 sm:$0xff]   ;;  %v18741_v55 = vld [vmem:[%s25405_s6 + $0xa8c] ss:$16 sps:$4 sm:$0xff]  }
 0xb8a   : > { %6090 = vmatprep.subr.bf16.mxu0 %v18684_v26  ;;  %6196 = vmatprep.subr.bf16.mxu1 %v18687_v56  ;;  %v18736_v26 = vld [vmem:[%s25405_s6 + $0xa80] ss:$16 sps:$4 sm:$0xff]   ;;  %v18739_v56 = vld [vmem:[%s25405_s6 + $0xa88] ss:$16 sps:$4 sm:$0xff]  }
 0xb8d   : > { %6091 = vmatpush1.bf16.msra.mxu0 %v18682_v12  ;;  %6197 = vmatpush1.bf16.msra.mxu1 %v18685_v57  ;;  %v18744_v12 = vld [vmem:[%s25405_s6 + $0xaa4] ss:$16 sps:$4 sm:$0xff]   ;;  %v18747_v57 = vld [vmem:[%s25405_s6 + $0xaac] ss:$16 sps:$4 sm:$0xff]  }
 0xb8e   : > { %6092 = vmatprep.subr.bf16.mxu0 %v18690_v58  ;;  %6198 = vmatprep.subr.bf16.mxu1 %v18693_v59  ;;  %v18742_v58 = vld [vmem:[%s25405_s6 + $0xaa0] ss:$16 sps:$4 sm:$0xff]   ;;  %v18745_v59 = vld [vmem:[%s25405_s6 + $0xaa8] ss:$16 sps:$4 sm:$0xff]  }
 0xb91   : > { %6093 = vmatpush1.bf16.msra.mxu0 %v18688_v60  ;;  %6199 = vmatpush1.bf16.msra.mxu1 %v18691_v39  ;;  %v18750_v60 = vld [vmem:[%s25405_s6 + $0xac4] ss:$16 sps:$4 sm:$0xff]   ;;  %v18753_v39 = vld [vmem:[%s25405_s6 + $0xacc] ss:$16 sps:$4 sm:$0xff]  }
 0xb92   : > { %6094 = vmatprep.subr.bf16.mxu0 %v18696_v61  ;;  %6200 = vmatprep.subr.bf16.mxu1 %v18699_v62  ;;  %v18748_v61 = vld [vmem:[%s25405_s6 + $0xac0] ss:$16 sps:$4 sm:$0xff]   ;;  %v18751_v62 = vld [vmem:[%s25405_s6 + $0xac8] ss:$16 sps:$4 sm:$0xff]  }
 0xb95   : > { %6095 = vmatpush1.bf16.msra.mxu0 %v18694_v7  ;;  %6201 = vmatpush1.bf16.msra.mxu1 %v18697_v31  ;;  %v18756_v7 = vld [vmem:[%s25405_s6 + $0xae4] ss:$16 sps:$4 sm:$0xff]   ;;  %v18759_v31 = vld [vmem:[%s25405_s6 + $0xaec] ss:$16 sps:$4 sm:$0xff]  }
 0xb96   : > { %6096 = vmatprep.subr.bf16.mxu0 %v18702_v63  ;;  %6202 = vmatprep.subr.bf16.mxu1 %v18705_v0  ;;  %v18754_v63 = vld [vmem:[%s25405_s6 + $0xae0] ss:$16 sps:$4 sm:$0xff]   ;;  %v18757_v0 = vld [vmem:[%s25405_s6 + $0xae8] ss:$16 sps:$4 sm:$0xff]  }
 0xb99   : > { %6097 = vmatpush1.bf16.msra.mxu0 %v18700_v2  ;;  %6203 = vmatpush1.bf16.msra.mxu1 %v18703_v35  ;;  %v18762_v2 = vld [vmem:[%s25405_s6 + $0xb04] ss:$16 sps:$4 sm:$0xff]   ;;  %v18765_v35 = vld [vmem:[%s25405_s6 + $0xb0c] ss:$16 sps:$4 sm:$0xff]  }
 0xb9a   : > { %6098 = vmatprep.subr.bf16.mxu0 %v18708_v3  ;;  %6204 = vmatprep.subr.bf16.mxu1 %v18711_v4  ;;  %v18760_v3 = vld [vmem:[%s25405_s6 + $0xb00] ss:$16 sps:$4 sm:$0xff]   ;;  %v18763_v4 = vld [vmem:[%s25405_s6 + $0xb08] ss:$16 sps:$4 sm:$0xff]  }
 0xb9d   : > { %6099 = vmatpush1.bf16.msra.mxu0 %v18706_v8  ;;  %6205 = vmatpush1.bf16.msra.mxu1 %v18709_v10  ;;  %v18768_v8 = vld [vmem:[%s25405_s6 + $0xb24] ss:$16 sps:$4 sm:$0xff]   ;;  %v18771_v10 = vld [vmem:[%s25405_s6 + $0xb2c] ss:$16 sps:$4 sm:$0xff]  }
 0xb9e   : > { %6121 = vmatprep.subr.bf16.mxu0 %v18714_v9  ;;  %6227 = vmatprep.subr.bf16.mxu1 %v18717_v40  ;;  %v18766_v9 = vld [vmem:[%s25405_s6 + $0xb20] ss:$16 sps:$4 sm:$0xff]   ;;  %v18769_v40 = vld [vmem:[%s25405_s6 + $0xb28] ss:$16 sps:$4 sm:$0xff]  }
 0xc32   : > { %v5219_v27 = vpop.f32.mrb[76].mxu1  ;;  %v5272_v17 = vpop.f32.mrb[80].mxu0 }
 0xc33   : > { %v5221_v13 = vpop.f32.mrb[77].mxu1  ;;  %v5274_v19 = vpop.f32.mrb[81].mxu0 }
 0xc34   : > { %v5223_v14 = vpop.f32.mrb[78].mxu1  ;;  %v5276_v5 = vpop.f32.mrb[82].mxu0 }
 0xc35   : > { %v5291_v1 = vpack.c.bf16 %v5223_v14, %v5219_v27  ;;  %v21993_v15 = vpack.c.bf16 %v5276_v5, %v5272_v17  ;;  %v5225_v47 = vpop.f32.mrb[79].mxu1  ;;  %v5278_v21 = vpop.f32.mrb[83].mxu0  ;;  %v18774_v27 = vld [vmem:[%s25405_s6 + $0xb44] ss:$16 sps:$4 sm:$0xff]   ;;  %v18777_v17 = vld [vmem:[%s25405_s6 + $0xb4c] ss:$16 sps:$4 sm:$0xff]  }
 0xc36   : > { %v5292_v22 = vpack.c.bf16 %v5225_v47, %v5221_v13  ;;  %v5294_v24 = vpack.c.bf16 %v5278_v21, %v5274_v19  ;;  %v18772_v13 = vld [vmem:[%s25405_s6 + $0xb40] ss:$16 sps:$4 sm:$0xff]   ;;  %v18775_v19 = vld [vmem:[%s25405_s6 + $0xb48] ss:$16 sps:$4 sm:$0xff]   ;;  %v18780_v14 = vld [vmem:[%s25405_s6 + $0xb64] ss:$16 sps:$4 sm:$0xff]  }
 0xc37   : > { %v18783_v5 = vld [vmem:[%s25405_s6 + $0xb6c] ss:$16 sps:$4 sm:$0xff]   ;;  %v18781_v47 = vld [vmem:[%s25405_s6 + $0xb68] ss:$16 sps:$4 sm:$0xff]   ;;  %v18786_v21 = vld [vmem:[%s25405_s6 + $0xb84] ss:$16 sps:$4 sm:$0xff]  }
 0xc38   : > { %6100 = vmatprep.mubr.bf16.mxu0 %v5292_v22  ;;  %6206 = vmatprep.mubr.bf16.mxu1 %v5292_v22  ;;  %v18789_v22 = vld [vmem:[%s25405_s6 + $0xb8c] ss:$16 sps:$4 sm:$0xff]  }
 0xc39   : > { %6101 = vmatmul.mubr.bf16.vlgmr.msra.gmra.mrb[52].mxu0 %v5291_v1  ;;  %6207 = vmatmul.mubr.bf16.vlgmr.msra.gmra.mrb[52].mxu1 %v5291_v1  ;;  %v18778_v1 = vld [vmem:[%s25405_s6 + $0xb60] ss:$16 sps:$4 sm:$0xff]  }
 0xc3a   : > { %6122 = vmatpush1.bf16.msra.mxu0 %v18712_v25  ;;  %6228 = vmatpush1.bf16.msra.mxu1 %v18715_v28  ;;  %v5229_v20 = vpop.f32.mrb[80].mxu1  ;;  %v5282_v29 = vpop.f32.mrb[84].mxu0  ;;  %v18787_v25 = vld [vmem:[%s25405_s6 + $0xb88] ss:$16 sps:$4 sm:$0xff]   ;;  %v18792_v28 = vld [vmem:[%s25405_s6 + $0xba4] ss:$16 sps:$4 sm:$0xff]  }
 0xc3b   : > { %v5231_v32 = vpop.f32.mrb[81].mxu1  ;;  %v5284_v33 = vpop.f32.mrb[85].mxu0  ;;  %6123 = vmatprep.subr.bf16.mxu0 %v18720_v43  ;;  %6229 = vmatprep.subr.bf16.mxu1 %v18723_v18  ;;  %v18795_v43 = vld [vmem:[%s25405_s6 + $0xbac] ss:$16 sps:$4 sm:$0xff]   ;;  %v18790_v18 = vld [vmem:[%s25405_s6 + $0xba0] ss:$16 sps:$4 sm:$0xff]  }
 0xc3c   : > { %v5233_v37 = vpop.f32.mrb[82].mxu1  ;;  %v5286_v38 = vpop.f32.mrb[86].mxu0 }
 0xc3d   : > { %v5295_v41 = vpack.c.bf16 %v5233_v37, %v5229_v20  ;;  %v22019_v44 = vpack.c.bf16 %v5286_v38, %v5282_v29  ;;  %v5235_v45 = vpop.f32.mrb[83].mxu1  ;;  %v5288_v46 = vpop.f32.mrb[87].mxu0  ;;  %v18793_v20 = vld [vmem:[%s25405_s6 + $0xba8] ss:$16 sps:$4 sm:$0xff]   ;;  %v18798_v29 = vld [vmem:[%s25405_s6 + $0xbc4] ss:$16 sps:$4 sm:$0xff]  }
 0xc3e   : > { %v5296_v48 = vpack.c.bf16 %v5235_v45, %v5231_v32  ;;  %v22021_v49 = vpack.c.bf16 %v5288_v46, %v5284_v33  ;;  %6124 = vmatpush1.bf16.msra.mxu0 %v18718_v42  ;;  %6230 = vmatpush1.bf16.msra.mxu1 %v18721_v11  ;;  %v18801_v42 = vld [vmem:[%s25405_s6 + $0xbcc] ss:$16 sps:$4 sm:$0xff]   ;;  %v18796_v11 = vld [vmem:[%s25405_s6 + $0xbc0] ss:$16 sps:$4 sm:$0xff]   ;;  %v18799_v32 = vld [vmem:[%s25405_s6 + $0xbc8] ss:$16 sps:$4 sm:$0xff]  }
 0xc3f   : > { %6125 = vmatprep.subr.bf16.mxu0 %v18726_v34  ;;  %6231 = vmatprep.subr.bf16.mxu1 %v18729_v36  ;;  %v18804_v33 = vld [vmem:[%s25405_s6 + $0xbe4] ss:$16 sps:$4 sm:$0xff]   ;;  %v18807_v34 = vld [vmem:[%s25405_s6 + $0xbec] ss:$16 sps:$4 sm:$0xff]   ;;  %v18802_v36 = vld [vmem:[%s25405_s6 + $0xbe0] ss:$16 sps:$4 sm:$0xff]  }
 0xc40   : > { %6110 = vmatprep.mubr.bf16.mxu0 %v5296_v48  ;;  %6216 = vmatprep.mubr.bf16.mxu1 %v5296_v48  ;;  %v18805_v37 = vld [vmem:[%s25405_s6 + $0xbe8] ss:$16 sps:$4 sm:$0xff]   ;;  %v18810_v38 = vld [vmem:[%s25408_s9 + $0x4] ss:$16 sps:$4 sm:$0xff]   ;;  %v18808_v45 = vld [vmem:[%s25408_s9] ss:$16 sps:$4 sm:$0xff]  }
 0xc41   : > { %6111 = vmatmul.mubr.bf16.gmra.mrb[56].mxu0 %v5295_v41  ;;  %6217 = vmatmul.mubr.bf16.gmra.mrb[56].mxu1 %v5295_v41  ;;  %v18813_v41 = vld [vmem:[%s25408_s9 + $0xc] ss:$16 sps:$4 sm:$0xff]   ;;  %v18811_v46 = vld [vmem:[%s25408_s9 + $0x8] ss:$16 sps:$4 sm:$0xff]   ;;  %v18816_v48 = vld [vmem:[%s25408_s9 + $0x24] ss:$16 sps:$4 sm:$0xff]  }
 0xc42   : > { %6126 = vmatpush1.bf16.msra.mxu0 %v18724_v6  ;;  %6232 = vmatpush1.bf16.msra.mxu1 %v18727_v30  ;;  %v18819_v6 = vld [vmem:[%s25408_s9 + $0x2c] ss:$16 sps:$4 sm:$0xff]   ;;  %v18814_v30 = vld [vmem:[%s25408_s9 + $0x20] ss:$16 sps:$4 sm:$0xff]  }
 0xc43   : > { %6153 = vmatprep.mubr.bf16.mxu0 %v5294_v24  ;;  %6259 = vmatprep.mubr.bf16.mxu1 %v5294_v24  ;;  %v18784_v24 = vld [vmem:[%s25405_s6 + $0xb80] ss:$16 sps:$4 sm:$0xff]  }
 0xc44   : > { %6127 = vmatprep.subr.bf16.mxu0 %v18732_v50  ;;  %6233 = vmatprep.subr.bf16.mxu1 %v18735_v51  ;;  %v18817_v50 = vld [vmem:[%s25408_s9 + $0x28] ss:$16 sps:$4 sm:$0xff]   ;;  %v18820_v51 = vld [vmem:[%s25408_s9 + $0x40] ss:$16 sps:$4 sm:$0xff]  }
 0xc46   : > { %6128 = vmatpush1.bf16.msra.mxu0 %v18730_v52  ;;  %6234 = vmatpush1.bf16.msra.mxu1 %v18733_v53  ;;  %v18823_v52 = vld [vmem:[%s25408_s9 + $0x48] ss:$16 sps:$4 sm:$0xff]   ;;  %v18828_v53 = vld [vmem:[%s25408_s9 + $0x64] ss:$16 sps:$4 sm:$0xff]  }
 0xc47   : > { %6129 = vmatprep.subr.bf16.mxu0 %v18738_v54  ;;  %6235 = vmatprep.subr.bf16.mxu1 %v18741_v55  ;;  %v18831_v54 = vld [vmem:[%s25408_s9 + $0x6c] ss:$16 sps:$4 sm:$0xff]   ;;  %v18826_v55 = vld [vmem:[%s25408_s9 + $0x60] ss:$16 sps:$4 sm:$0xff]  }
 0xc4a   : > { %6130 = vmatpush1.bf16.msra.mxu0 %v18736_v26  ;;  %6236 = vmatpush1.bf16.msra.mxu1 %v18739_v56  ;;  %v18829_v26 = vld [vmem:[%s25408_s9 + $0x68] ss:$16 sps:$4 sm:$0xff]   ;;  %v18834_v56 = vld [vmem:[%s25408_s9 + $0x84] ss:$16 sps:$4 sm:$0xff]  }
 0xc4b   : > { %6131 = vmatprep.subr.bf16.mxu0 %v18744_v12  ;;  %6237 = vmatprep.subr.bf16.mxu1 %v18747_v57  ;;  %v18832_v12 = vld [vmem:[%s25408_s9 + $0x80] ss:$16 sps:$4 sm:$0xff]   ;;  %v18835_v57 = vld [vmem:[%s25408_s9 + $0x88] ss:$16 sps:$4 sm:$0xff]  }
 0xc4e   : > { %6132 = vmatpush1.bf16.msra.mxu0 %v18742_v58  ;;  %6238 = vmatpush1.bf16.msra.mxu1 %v18745_v59  ;;  %v18840_v58 = vld [vmem:[%s25408_s9 + $0xa4] ss:$16 sps:$4 sm:$0xff]   ;;  %v18843_v59 = vld [vmem:[%s25408_s9 + $0xac] ss:$16 sps:$4 sm:$0xff]  }
 0xc4f   : > { %6133 = vmatprep.subr.bf16.mxu0 %v18750_v60  ;;  %6239 = vmatprep.subr.bf16.mxu1 %v18753_v39  ;;  %v18838_v60 = vld [vmem:[%s25408_s9 + $0xa0] ss:$16 sps:$4 sm:$0xff]   ;;  %v18841_v39 = vld [vmem:[%s25408_s9 + $0xa8] ss:$16 sps:$4 sm:$0xff]  }
 0xc52   : > { %6134 = vmatpush1.bf16.msra.mxu0 %v18748_v61  ;;  %6240 = vmatpush1.bf16.msra.mxu1 %v18751_v62  ;;  %v18846_v61 = vld [vmem:[%s25408_s9 + $0xc4] ss:$16 sps:$4 sm:$0xff]   ;;  %v18849_v62 = vld [vmem:[%s25408_s9 + $0xcc] ss:$16 sps:$4 sm:$0xff]  }
 0xc53   : > { %6135 = vmatprep.subr.bf16.mxu0 %v18756_v7  ;;  %6241 = vmatprep.subr.bf16.mxu1 %v18759_v31  ;;  %v18844_v7 = vld [vmem:[%s25408_s9 + $0xc0] ss:$16 sps:$4 sm:$0xff]   ;;  %v18847_v31 = vld [vmem:[%s25408_s9 + $0xc8] ss:$16 sps:$4 sm:$0xff]  }
 0xc56   : > { %6136 = vmatpush1.bf16.msra.mxu0 %v18754_v63  ;;  %6242 = vmatpush1.bf16.msra.mxu1 %v18757_v0  ;;  %v18852_v63 = vld [vmem:[%s25408_s9 + $0xe4] ss:$16 sps:$4 sm:$0xff]   ;;  %v18855_v0 = vld [vmem:[%s25408_s9 + $0xec] ss:$16 sps:$4 sm:$0xff]  }
 0xc57   : > { %6137 = vmatprep.subr.bf16.mxu0 %v18762_v2  ;;  %6243 = vmatprep.subr.bf16.mxu1 %v18765_v35  ;;  %v18850_v2 = vld [vmem:[%s25408_s9 + $0xe0] ss:$16 sps:$4 sm:$0xff]   ;;  %v18853_v35 = vld [vmem:[%s25408_s9 + $0xe8] ss:$16 sps:$4 sm:$0xff]  }
 0xc5a   : > { %6138 = vmatpush1.bf16.msra.mxu0 %v18760_v3  ;;  %6244 = vmatpush1.bf16.msra.mxu1 %v18763_v4  ;;  %v18858_v3 = vld [vmem:[%s25408_s9 + $0x104] ss:$16 sps:$4 sm:$0xff]   ;;  %v18861_v4 = vld [vmem:[%s25408_s9 + $0x10c] ss:$16 sps:$4 sm:$0xff]  }
 0xc5b   : > { %6139 = vmatprep.subr.bf16.mxu0 %v18768_v8  ;;  %6245 = vmatprep.subr.bf16.mxu1 %v18771_v10  ;;  %v18856_v8 = vld [vmem:[%s25408_s9 + $0x100] ss:$16 sps:$4 sm:$0xff]   ;;  %v18859_v10 = vld [vmem:[%s25408_s9 + $0x108] ss:$16 sps:$4 sm:$0xff]  }
 0xc5e   : > { %6140 = vmatpush1.bf16.msra.mxu0 %v18766_v9  ;;  %6246 = vmatpush1.bf16.msra.mxu1 %v18769_v40  ;;  %v18864_v9 = vld [vmem:[%s25408_s9 + $0x124] ss:$16 sps:$4 sm:$0xff]   ;;  %v18867_v40 = vld [vmem:[%s25408_s9 + $0x12c] ss:$16 sps:$4 sm:$0xff]  }
 0xc5f   : > { %6141 = vmatprep.subr.bf16.mxu0 %v18774_v27  ;;  %6247 = vmatprep.subr.bf16.mxu1 %v18777_v17  ;;  %v18862_v27 = vld [vmem:[%s25408_s9 + $0x120] ss:$16 sps:$4 sm:$0xff]   ;;  %v18865_v17 = vld [vmem:[%s25408_s9 + $0x128] ss:$16 sps:$4 sm:$0xff]  }
 0xc62   : > { %6142 = vmatpush1.bf16.msra.mxu0 %v18772_v13  ;;  %6248 = vmatpush1.bf16.msra.mxu1 %v18775_v19  ;;  %v18870_v13 = vld [vmem:[%s25408_s9 + $0x144] ss:$16 sps:$4 sm:$0xff]   ;;  %v18873_v19 = vld [vmem:[%s25408_s9 + $0x14c] ss:$16 sps:$4 sm:$0xff]  }
 0xc63   : > { %6143 = vmatprep.subr.bf16.mxu0 %v18780_v14  ;;  %6249 = vmatprep.subr.bf16.mxu1 %v18783_v5  ;;  %v18868_v14 = vld [vmem:[%s25408_s9 + $0x140] ss:$16 sps:$4 sm:$0xff]   ;;  %v18871_v5 = vld [vmem:[%s25408_s9 + $0x148] ss:$16 sps:$4 sm:$0xff]  }
 0xc66   : > { %6144 = vmatpush1.bf16.msra.mxu0 %v18778_v1  ;;  %6250 = vmatpush1.bf16.msra.mxu1 %v18781_v47  ;;  %v18876_v1 = vld [vmem:[%s25408_s9 + $0x164] ss:$16 sps:$4 sm:$0xff]   ;;  %v18879_v47 = vld [vmem:[%s25408_s9 + $0x16c] ss:$16 sps:$4 sm:$0xff]  }
 0xc67   : > { %6145 = vmatprep.subr.bf16.mxu0 %v18786_v21  ;;  %6251 = vmatprep.subr.bf16.mxu1 %v18789_v22  ;;  %v18874_v21 = vld [vmem:[%s25408_s9 + $0x160] ss:$16 sps:$4 sm:$0xff]   ;;  %v18877_v22 = vld [vmem:[%s25408_s9 + $0x168] ss:$16 sps:$4 sm:$0xff]  }
 0xc6a   : > { %6146 = vmatpush1.bf16.msra.mxu0 %v18784_v24  ;;  %6252 = vmatpush1.bf16.msra.mxu1 %v18787_v25  ;;  %v18882_v24 = vld [vmem:[%s25408_s9 + $0x184] ss:$16 sps:$4 sm:$0xff]   ;;  %v18885_v25 = vld [vmem:[%s25408_s9 + $0x18c] ss:$16 sps:$4 sm:$0xff]  }
 0xc6b   : > { %6147 = vmatprep.subr.bf16.mxu0 %v18792_v28  ;;  %6253 = vmatprep.subr.bf16.mxu1 %v18795_v43  ;;  %v18880_v28 = vld [vmem:[%s25408_s9 + $0x180] ss:$16 sps:$4 sm:$0xff]   ;;  %v18883_v43 = vld [vmem:[%s25408_s9 + $0x188] ss:$16 sps:$4 sm:$0xff]  }
 0xc6e   : > { %6148 = vmatpush1.bf16.msra.mxu0 %v18790_v18  ;;  %6254 = vmatpush1.bf16.msra.mxu1 %v18793_v20  ;;  %v18888_v18 = vld [vmem:[%s25408_s9 + $0x1a4] ss:$16 sps:$4 sm:$0xff]   ;;  %v18891_v20 = vld [vmem:[%s25408_s9 + $0x1ac] ss:$16 sps:$4 sm:$0xff]  }
 0xc6f   : > { %6149 = vmatprep.subr.bf16.mxu0 %v18798_v29  ;;  %6255 = vmatprep.subr.bf16.mxu1 %v18801_v42  ;;  %v18886_v29 = vld [vmem:[%s25408_s9 + $0x1a0] ss:$16 sps:$4 sm:$0xff]   ;;  %v18889_v42 = vld [vmem:[%s25408_s9 + $0x1a8] ss:$16 sps:$4 sm:$0xff]  }
 0xc72   : > { %6150 = vmatpush1.bf16.msra.mxu0 %v18796_v11  ;;  %6256 = vmatpush1.bf16.msra.mxu1 %v18799_v32  ;;  %v18894_v11 = vld [vmem:[%s25408_s9 + $0x1c4] ss:$16 sps:$4 sm:$0xff]   ;;  %v18897_v32 = vld [vmem:[%s25408_s9 + $0x1cc] ss:$16 sps:$4 sm:$0xff]  }
 0xc73   : > { %6151 = vmatprep.subr.bf16.mxu0 %v18804_v33  ;;  %6257 = vmatprep.subr.bf16.mxu1 %v18807_v34  ;;  %v18892_v33 = vld [vmem:[%s25408_s9 + $0x1c0] ss:$16 sps:$4 sm:$0xff]   ;;  %v18895_v34 = vld [vmem:[%s25408_s9 + $0x1c8] ss:$16 sps:$4 sm:$0xff]  }
 0xc76   : > { %6152 = vmatpush1.bf16.msra.mxu0 %v18802_v36  ;;  %6258 = vmatpush1.bf16.msra.mxu1 %v18805_v37  ;;  %v18900_v36 = vld [vmem:[%s25408_s9 + $0x1e4] ss:$16 sps:$4 sm:$0xff]   ;;  %v18903_v37 = vld [vmem:[%s25408_s9 + $0x1ec] ss:$16 sps:$4 sm:$0xff]  }
 0xc77   : > { %7178 = vmatprep.subr.bf16.mxu1 %v18810_v38  ;;  %7284 = vmatprep.subr.bf16.mxu0 %v18813_v41  ;;  %v18898_v38 = vld [vmem:[%s25408_s9 + $0x1e0] ss:$16 sps:$4 sm:$0xff]   ;;  %v18901_v41 = vld [vmem:[%s25408_s9 + $0x1e8] ss:$16 sps:$4 sm:$0xff]  }
 0xc79   : > { %6154 = vmatmul.mubr.bf16.vlgmr.msra.gmra.mrb[52].mxu0 %v21993_v15  ;;  %6260 = vmatmul.mubr.bf16.vlgmr.msra.gmra.mrb[52].mxu1 %v21993_v15  ;;  %v18822_v15 = vld [vmem:[%s25408_s9 + $0x44] ss:$16 sps:$4 sm:$0xff]  }
 0xc7a   : > { %6163 = vmatprep.mubr.bf16.mxu0 %v22021_v49  ;;  %6269 = vmatprep.mubr.bf16.mxu1 %v22021_v49  ;;  %v18825_v49 = vld [vmem:[%s25408_s9 + $0x4c] ss:$16 sps:$4 sm:$0xff]  }
 0xc7b   : > { %7179 = vmatpush1.bf16.msra.mxu1 %v18808_v45  ;;  %7285 = vmatpush1.bf16.msra.mxu0 %v18811_v46  ;;  %v18906_v45 = vld [vmem:[%s25408_s9 + $0x204] ss:$16 sps:$4 sm:$0xff]   ;;  %v18909_v46 = vld [vmem:[%s25408_s9 + $0x20c] ss:$16 sps:$4 sm:$0xff]  }
 0xc7c   : > { %7180 = vmatprep.subr.bf16.mxu1 %v18816_v48  ;;  %7286 = vmatprep.subr.bf16.mxu0 %v18819_v6  ;;  %v6297_v48 = vlaneseq }
 0xc7e   : > { %v6298_v6 = vshrl.u32 %v6297_v48, 7 }
 0xc7f   : > { %7181 = vmatpush1.bf16.msra.mxu1 %v18814_v30  ;;  %7287 = vmatpush1.bf16.msra.mxu0 %v18817_v50 }
 0xc80   : > { %7182 = vmatprep.subr.bf16.mxu1 %v18822_v15  ;;  %7288 = vmatprep.subr.bf16.mxu0 %v18825_v49  ;;  %v22389_v30 = vsub.s32 0, %v6298_v6  ;;  %v22391_v50 = vsub.s32 2, %v6298_v6  ;;  %v423_v15 = vld [vmem:[%s25406_s7] sm:$0xf]  ;;  %v22396_v49 = vsub.s32 1, %v6298_v6 }
 0xc81   : > { %6164 = vmatmul.mubr.bf16.gmra.mrb[56].mxu0 %v22019_v44  ;;  %6270 = vmatmul.mubr.bf16.gmra.mrb[56].mxu1 %v22019_v44  ;;  %v18837_v44 = vld [vmem:[%s25408_s9 + $0x8c] ss:$16 sps:$4 sm:$0xff]  }
 0xc83   : > { %7183 = vmatpush1.bf16.msra.mxu1 %v18820_v51  ;;  %7289 = vmatpush1.bf16.msra.mxu0 %v18823_v52  ;;  %v22398_v51 = vsub.s32 3, %v6298_v6  ;;  %v424_v52 = vld [vmem:[%s25407_s8] sm:$0xf] }
 0xc84   : > { %7184 = vmatprep.subr.bf16.mxu1 %v18828_v53  ;;  %7290 = vmatprep.subr.bf16.mxu0 %v18831_v54  ;;  %v22404_v53 = vrot.slane %v423_v15, %v22389_v30  ;;  %v22407_v54 = vrot.slane %v423_v15, %v22391_v50 }
 0xc87   : > { %7185 = vmatpush1.bf16.msra.mxu1 %v18826_v55  ;;  %7291 = vmatpush1.bf16.msra.mxu0 %v18829_v26  ;;  %v22410_v55 = vrot.slane %v423_v15, %v22396_v49  ;;  %v22413_v26 = vrot.slane %v423_v15, %v22398_v51 }
 0xc88   : > { %7186 = vmatprep.subr.bf16.mxu1 %v18834_v56  ;;  %7292 = vmatprep.subr.bf16.mxu0 %v18837_v44  ;;  %v22416_v56 = vrot.slane %v424_v52, %v22389_v30  ;;  %v22419_v44 = vrot.slane %v424_v52, %v22391_v50 }
 0xc8b   : > { %7187 = vmatpush1.bf16.msra.mxu1 %v18832_v12  ;;  %7293 = vmatpush1.bf16.msra.mxu0 %v18835_v57 }
 0xc8c   : > { %7188 = vmatprep.subr.bf16.mxu1 %v18840_v58  ;;  %7294 = vmatprep.subr.bf16.mxu0 %v18843_v59  ;;  %v22422_v58 = vrot.slane %v424_v52, %v22396_v49  ;;  %v22425_v59 = vrot.slane %v424_v52, %v22398_v51 }
 0xc8f   : > { %7189 = vmatpush1.bf16.msra.mxu1 %v18838_v60  ;;  %7295 = vmatpush1.bf16.msra.mxu0 %v18841_v39 }
 0xc90   : > { %7190 = vmatprep.subr.bf16.mxu1 %v18846_v61  ;;  %7296 = vmatprep.subr.bf16.mxu0 %v18849_v62 }
 0xc93   : > { %7191 = vmatpush1.bf16.msra.mxu1 %v18844_v7  ;;  %7297 = vmatpush1.bf16.msra.mxu0 %v18847_v31 }
 0xc94   : > { %7192 = vmatprep.subr.bf16.mxu1 %v18852_v63  ;;  %7298 = vmatprep.subr.bf16.mxu0 %v18855_v0 }
 0xc97   : > { %7193 = vmatpush1.bf16.msra.mxu1 %v18850_v2  ;;  %7299 = vmatpush1.bf16.msra.mxu0 %v18853_v35 }
 0xc98   : > { %7194 = vmatprep.subr.bf16.mxu1 %v18858_v3  ;;  %7300 = vmatprep.subr.bf16.mxu0 %v18861_v4 }
 0xc9b   : > { %7195 = vmatpush1.bf16.msra.mxu1 %v18856_v8  ;;  %7301 = vmatpush1.bf16.msra.mxu0 %v18859_v10 }
 0xc9c   : > { %7196 = vmatprep.subr.bf16.mxu1 %v18864_v9  ;;  %7302 = vmatprep.subr.bf16.mxu0 %v18867_v40 }
 0xc9f   : > { %7197 = vmatpush1.bf16.msra.mxu1 %v18862_v27  ;;  %7303 = vmatpush1.bf16.msra.mxu0 %v18865_v17 }
 0xca0   : > { %7198 = vmatprep.subr.bf16.mxu1 %v18870_v13  ;;  %7304 = vmatprep.subr.bf16.mxu0 %v18873_v19  ;;  %v22440_v13 = vld [vmem:[%s20271_s20] sm:$0xff] }
 0xca3   : > { %7199 = vmatpush1.bf16.msra.mxu1 %v18868_v14  ;;  %7305 = vmatpush1.bf16.msra.mxu0 %v18871_v5  ;;  %v22444_v14 = vld [vmem:[%s20271_s20 + $0x10] sm:$0xff] }
 0xca4   : > { %7200 = vmatprep.subr.bf16.mxu1 %v18876_v1  ;;  %7306 = vmatprep.subr.bf16.mxu0 %v18879_v47 }
 0xca7   : > { %7201 = vmatpush1.bf16.msra.mxu1 %v18874_v21  ;;  %7307 = vmatpush1.bf16.msra.mxu0 %v18877_v22  ;;  %v22450_v21 = vld [vmem:[%s20271_s20 + $0x8] sm:$0xff] }
 0xca8   : > { %7202 = vmatprep.subr.bf16.mxu1 %v18882_v24  ;;  %7308 = vmatprep.subr.bf16.mxu0 %v18885_v25  ;;  %v22456_v24 = vld [vmem:[%s20271_s20 + $0x18] sm:$0xff] }
 0xcab   : > { %7203 = vmatpush1.bf16.msra.mxu1 %v18880_v28  ;;  %7309 = vmatpush1.bf16.msra.mxu0 %v18883_v43 }
 0xcac   : > { %7204 = vmatprep.subr.bf16.mxu1 %v18888_v18  ;;  %7310 = vmatprep.subr.bf16.mxu0 %v18891_v20  ;;  %v22464_v18 = vld [vmem:[%s20271_s20 + $0x20] sm:$0xff] }
 0xcaf   : > { %7205 = vmatpush1.bf16.msra.mxu1 %v18886_v29  ;;  %7311 = vmatpush1.bf16.msra.mxu0 %v18889_v42  ;;  %v22468_v29 = vld [vmem:[%s20271_s20 + $0x30] sm:$0xff] }
 0xcb0   : > { %7206 = vmatprep.subr.bf16.mxu1 %v18894_v11  ;;  %7312 = vmatprep.subr.bf16.mxu0 %v18897_v32 }
 0xcb3   : > { %7207 = vmatpush1.bf16.msra.mxu1 %v18892_v33  ;;  %7313 = vmatpush1.bf16.msra.mxu0 %v18895_v34  ;;  %v22472_v33 = vld [vmem:[%s20271_s20 + $0x28] sm:$0xff] }
 0xcb4   : > { %7208 = vmatprep.subr.bf16.mxu1 %v18900_v36  ;;  %7314 = vmatprep.subr.bf16.mxu0 %v18903_v37  ;;  %v22476_v36 = vld [vmem:[%s20271_s20 + $0x38] sm:$0xff] }
 0xcb7   : > { %7209 = vmatpush1.bf16.msra.mxu1 %v18898_v38  ;;  %7315 = vmatpush1.bf16.msra.mxu0 %v18901_v41 }
 0xcb8   : > { %7231 = vmatprep.subr.bf16.mxu1 %v18906_v45  ;;  %7337 = vmatprep.subr.bf16.mxu0 %v18909_v46 }
 0xd4c   : > { %v6155_v12 = vpop.f32.mrb[52].mxu0  ;;  %v6261_v57 = vpop.f32.mrb[52].mxu1 }
 0xd4d   : > { %v6317_v60 = vmul.f32 %v22404_v53, %v6155_v12  ;;  %v6319_v39 = vmul.f32 %v22407_v54, %v6261_v57  ;;  %v6157_v61 = vpop.f32.mrb[53].mxu0  ;;  %v6263_v62 = vpop.f32.mrb[53].mxu1 }
 0xd4e   : > { %v6318_v7 = vmul.f32 %v22410_v55, %v6157_v61  ;;  %v6320_v31 = vmul.f32 %v22413_v26, %v6263_v62  ;;  %v6159_v63 = vpop.f32.mrb[54].mxu0  ;;  %v6265_v0 = vpop.f32.mrb[54].mxu1 }
 0xd4f   : > { %v6354_v2 = vadd.f32 %v22416_v56, %v6317_v60  ;;  %v6356_v35 = vadd.f32 %v22419_v44, %v6319_v39  ;;  %v6321_v3 = vmul.f32 %v22404_v53, %v6159_v63  ;;  %v6323_v4 = vmul.f32 %v22407_v54, %v6265_v0  ;;  %v6161_v8 = vpop.f32.mrb[55].mxu0  ;;  %v6267_v10 = vpop.f32.mrb[55].mxu1 }
 0xd50   : > { %v6355_v9 = vadd.f32 %v22422_v58, %v6318_v7  ;;  %v6357_v40 = vadd.f32 %v22425_v59, %v6320_v31  ;;  %v6322_v27 = vmul.f32 %v22410_v55, %v6161_v8  ;;  %v6324_v17 = vmul.f32 %v22413_v26, %v6267_v10 }
 0xd51   : > { %v6370_v19 = vadd.f32 %v22440_v13, %v6354_v2  ;;  %v6372_v5 = vadd.f32 %v22444_v14, %v6356_v35  ;;  %v6358_v1 = vadd.f32 %v22416_v56, %v6321_v3  ;;  %v6360_v47 = vadd.f32 %v22419_v44, %v6323_v4 }
 0xd52   : > { %v22453_v22 = vadd.f32 %v22450_v21, %v6355_v9  ;;  %v22459_v25 = vadd.f32 %v22456_v24, %v6357_v40  ;;  %v6359_v28 = vadd.f32 %v22422_v58, %v6322_v27  ;;  %v6361_v43 = vadd.f32 %v22425_v59, %v6324_v17 }
 0xd53   : > { %v6374_v20 = vadd.f32 %v22464_v18, %v6358_v1  ;;  %v6376_v42 = vadd.f32 %v22468_v29, %v6360_v47  ;;  %v6386_v11 = vmax.f32 %v6370_v19, 0.0  ;;  %v6388_v32 = vmax.f32 %v6372_v5, 0.0  ;;  %v22496_v19 = vld [vmem:[%s20271_s20 + $0x40] sm:$0xff]  ;;  %v22500_v1 = vld [vmem:[%s20271_s20 + $0x50] sm:$0xff] }
 0xd54   : > { %v6375_v34 = vadd.f32 %v22472_v33, %v6359_v28  ;;  %v6377_v37 = vadd.f32 %v22476_v36, %v6361_v43  ;;  %v6165_v38 = vpop.f32.mrb[56].mxu0  ;;  %v6271_v41 = vpop.f32.mrb[56].mxu1  ;;  %v6387_v12 = vmax.f32 %v22453_v22, 0.0  ;;  %v6389_v57 = vmax.f32 %v22459_v25, 0.0  ;;  %v22506_v28 = vld [vmem:[%s20271_s20 + $0x48] sm:$0xff] }
 0xd55   : > { %v6390_v45 = vmax.f32 %v6374_v20, 0.0  ;;  %v6392_v46 = vmax.f32 %v6376_v42, 0.0  ;;  %v6325_v48 = vmul.f32 %v22404_v53, %v6165_v38  ;;  %v6327_v6 = vmul.f32 %v22407_v54, %v6271_v41  ;;  %v6167_v15 = vpop.f32.mrb[57].mxu0  ;;  %v6273_v52 = vpop.f32.mrb[57].mxu1  ;;  %v22510_v20 = vld [vmem:[%s20271_s20 + $0x58] sm:$0xff] }
 0xd56   : > { %v6326_v60 = vmul.f32 %v22410_v55, %v6167_v15  ;;  %v6328_v39 = vmul.f32 %v22413_v26, %v6273_v52  ;;  %v6169_v61 = vpop.f32.mrb[58].mxu0  ;;  %v6275_v62 = vpop.f32.mrb[58].mxu1  ;;  %v6391_v9 = vmax.f32 %v6375_v34, 0.0  ;;  %v6393_v40 = vmax.f32 %v6377_v37, 0.0  ;;  %v22516_v34 = vld [vmem:[%s20271_s20 + $0x60] sm:$0x1] }
 0xd57   : > { %v6402_v7 = vpack.c.bf16 %v6390_v45, %v6386_v11  ;;  %v22485_v31 = vpack.c.bf16 %v6392_v46, %v6388_v32  ;;  %v6362_v63 = vadd.f32 %v22416_v56, %v6325_v48  ;;  %v6364_v0 = vadd.f32 %v22419_v44, %v6327_v6  ;;  %v6171_v2 = vpop.f32.mrb[59].mxu0  ;;  %v6277_v35 = vpop.f32.mrb[59].mxu1  ;;  %v22520_v38 = vld [vmem:[%s20271_s20 + $0x70] sm:$0x1]  ;;  %v22524_v45 = vld [vmem:[%s20271_s20 + $0x68] sm:$0x1] }
 0xd58   : > { %v6363_v3 = vadd.f32 %v22422_v58, %v6326_v60  ;;  %v6365_v4 = vadd.f32 %v22425_v59, %v6328_v39  ;;  %v6329_v8 = vmul.f32 %v22404_v53, %v6169_v61  ;;  %v6331_v10 = vmul.f32 %v22407_v54, %v6275_v62  ;;  %v22528_v48 = vld [vmem:[%s20271_s20 + $0x78] sm:$0x1]  ;;  %v18904_v52 = vld [vmem:[%s25408_s9 + $0x200] ss:$16 sps:$4 sm:$0xff]   ;;  %v18912_v39 = vld [vmem:[%s25408_s9 + $0x224] ss:$16 sps:$4 sm:$0xff]  }
 0xd59   : > { %v6330_v27 = vmul.f32 %v22410_v55, %v6171_v2  ;;  %v6332_v17 = vmul.f32 %v22413_v26, %v6277_v35  ;;  %v6378_v5 = vadd.f32 %v22496_v19, %v6362_v63  ;;  %v6380_v47 = vadd.f32 %v22500_v1, %v6364_v0  ;;  %v18907_v60 = vld [vmem:[%s25408_s9 + $0x208] ss:$16 sps:$4 sm:$0xff]  }
 0xd5a   : > { %v6366_v22 = vadd.f32 %v22416_v56, %v6329_v8  ;;  %v6368_v25 = vadd.f32 %v22419_v44, %v6331_v10  ;;  %v6379_v43 = vadd.f32 %v22506_v28, %v6363_v3  ;;  %v6381_v42 = vadd.f32 %v22510_v20, %v6365_v4 }
 0xd5b   : > { %v6367_v11 = vadd.f32 %v22422_v58, %v6330_v27  ;;  %v6369_v32 = vadd.f32 %v22425_v59, %v6332_v17  ;;  %v6403_v15 = vpack.c.bf16 %v6391_v9, %v6387_v12  ;;  %v6405_v61 = vpack.c.bf16 %v6393_v40, %v6389_v57  ;;  %v18915_v12 = vld [vmem:[%s25408_s9 + $0x22c] ss:$16 sps:$4 sm:$0xff]   ;;  %v18910_v57 = vld [vmem:[%s25408_s9 + $0x220] ss:$16 sps:$4 sm:$0xff]   ;;  %v18913_v40 = vld [vmem:[%s25408_s9 + $0x228] ss:$16 sps:$4 sm:$0xff]  }
 0xd5c   : > { %v6382_v37 = vadd.f32 %v22516_v34, %v6366_v22  ;;  %v6384_v41 = vadd.f32 %v22520_v38, %v6368_v25  ;;  %v6394_v62 = vmax.f32 %v6378_v5, 0.0  ;;  %v6396_v63 = vmax.f32 %v6380_v47, 0.0  ;;  %v18921_v5 = vld [vmem:[%s25408_s9 + $0x24c] ss:$16 sps:$4 sm:$0xff]   ;;  %v18916_v47 = vld [vmem:[%s25408_s9 + $0x240] ss:$16 sps:$4 sm:$0xff]  }
 0xd5d   : > { %v6383_v46 = vadd.f32 %v22524_v45, %v6367_v11  ;;  %v6385_v6 = vadd.f32 %v22528_v48, %v6369_v32  ;;  %v6395_v35 = vmax.f32 %v6379_v43, 0.0  ;;  %v6397_v3 = vmax.f32 %v6381_v42, 0.0  ;;  %7210 = vmatprep.mubr.bf16.mxu1 %v6403_v15  ;;  %7316 = vmatprep.mubr.bf16.mxu0 %v6403_v15  ;;  %v18919_v22 = vld [vmem:[%s25408_s9 + $0x248] ss:$16 sps:$4 sm:$0xff]   ;;  %v18924_v25 = vld [vmem:[%s25408_s9 + $0x264] ss:$16 sps:$4 sm:$0xff]  }
 0xd5e   : > { %v6398_v0 = vmax.f32 %v6382_v37, 0.0  ;;  %v6400_v2 = vmax.f32 %v6384_v41, 0.0  ;;  %7211 = vmatmul.mubr.bf16.vlgmr.msra.gmra.mrb[84].mxu1 %v6402_v7  ;;  %7317 = vmatmul.mubr.bf16.vlgmr.msra.gmra.mrb[88].mxu0 %v6402_v7  ;;  %v18918_v7 = vld [vmem:[%s25408_s9 + $0x244] ss:$16 sps:$4 sm:$0xff]   ;;  %v18927_v43 = vld [vmem:[%s25408_s9 + $0x26c] ss:$16 sps:$4 sm:$0xff]  }
 0xd5f   : > { %v6399_v4 = vmax.f32 %v6383_v46, 0.0  ;;  %v6401_v8 = vmax.f32 %v6385_v6, 0.0  ;;  %7232 = vmatpush1.bf16.msra.mxu1 %v18904_v52  ;;  %7338 = vmatpush1.bf16.msra.mxu0 %v18907_v60  ;;  %v18922_v42 = vld [vmem:[%s25408_s9 + $0x260] ss:$16 sps:$4 sm:$0xff]   ;;  %v18925_v11 = vld [vmem:[%s25408_s9 + $0x268] ss:$16 sps:$4 sm:$0xff]  }
 0xd60   : > { %v6406_v10 = vpack.c.bf16 %v6398_v0, %v6394_v62  ;;  %v22543_v9 = vpack.c.bf16 %v6400_v2, %v6396_v63  ;;  %7233 = vmatprep.subr.bf16.mxu1 %v18912_v39  ;;  %7339 = vmatprep.subr.bf16.mxu0 %v18915_v12  ;;  %v18930_v32 = vld [vmem:[%s25408_s9 + $0x284] ss:$16 sps:$4 sm:$0xff]   ;;  %v18933_v37 = vld [vmem:[%s25408_s9 + $0x28c] ss:$16 sps:$4 sm:$0xff]   ;;  %v18928_v41 = vld [vmem:[%s25408_s9 + $0x280] ss:$16 sps:$4 sm:$0xff]  }
 0xd61   : > { %v6407_v27 = vpack.c.bf16 %v6399_v4, %v6395_v35  ;;  %v22551_v17 = vpack.c.bf16 %v6401_v8, %v6397_v3  ;;  %v18931_v46 = vld [vmem:[%s25408_s9 + $0x288] ss:$16 sps:$4 sm:$0xff]   ;;  %v18936_v6 = vld [vmem:[%s25408_s9 + $0x2a4] ss:$16 sps:$4 sm:$0xff]   ;;  %v18939_v15 = vld [vmem:[%s25408_s9 + $0x2ac] ss:$16 sps:$4 sm:$0xff]  }
 0xd62   : > { %v18934_v52 = vld [vmem:[%s25408_s9 + $0x2a0] ss:$16 sps:$4 sm:$0xff]   ;;  %v18937_v60 = vld [vmem:[%s25408_s9 + $0x2a8] ss:$16 sps:$4 sm:$0xff]   ;;  %v18942_v39 = vld [vmem:[%s25408_s9 + $0x2c4] ss:$16 sps:$4 sm:$0xff]  }
 0xd63   : > { %7220 = vmatprep.mubr.bf16.mxu1 %v6407_v27  ;;  %7326 = vmatprep.mubr.bf16.mxu0 %v6407_v27  ;;  %v18940_v62 = vld [vmem:[%s25408_s9 + $0x2c0] ss:$16 sps:$4 sm:$0xff]   ;;  %v18943_v63 = vld [vmem:[%s25408_s9 + $0x2c8] ss:$16 sps:$4 sm:$0xff]   ;;  %v18948_v0 = vld [vmem:[%s25408_s9 + $0x2e4] ss:$16 sps:$4 sm:$0xff]  }
 0xd64   : > { %7234 = vmatpush1.bf16.msra.mxu1 %v18910_v57  ;;  %7340 = vmatpush1.bf16.msra.mxu0 %v18913_v40  ;;  %v18951_v2 = vld [vmem:[%s25408_s9 + $0x2ec] ss:$16 sps:$4 sm:$0xff]   ;;  %v18946_v12 = vld [vmem:[%s25408_s9 + $0x2e0] ss:$16 sps:$4 sm:$0xff]   ;;  %v18949_v35 = vld [vmem:[%s25408_s9 + $0x2e8] ss:$16 sps:$4 sm:$0xff]  }
 0xd65   : > { %7235 = vmatprep.subr.bf16.mxu1 %v18918_v7  ;;  %7341 = vmatprep.subr.bf16.mxu0 %v18921_v5  ;;  %v18954_v3 = vld [vmem:[%s25408_s9 + $0x304] ss:$16 sps:$4 sm:$0xff]   ;;  %v18957_v4 = vld [vmem:[%s25408_s9 + $0x30c] ss:$16 sps:$4 sm:$0xff]   ;;  %v18952_v8 = vld [vmem:[%s25408_s9 + $0x300] ss:$16 sps:$4 sm:$0xff]  }
 0xd66   : > { %7221 = vmatmul.mubr.bf16.gmra.mrb[88].mxu1 %v6406_v10  ;;  %7327 = vmatmul.mubr.bf16.gmra.mrb[92].mxu0 %v6406_v10  ;;  %v18955_v10 = vld [vmem:[%s25408_s9 + $0x308] ss:$16 sps:$4 sm:$0xff]   ;;  %v18960_v57 = vld [vmem:[%s25408_s9 + $0x324] ss:$16 sps:$4 sm:$0xff]   ;;  %v18963_v40 = vld [vmem:[%s25408_s9 + $0x32c] ss:$16 sps:$4 sm:$0xff]  }
 0xd67   : > { %7263 = vmatprep.mubr.bf16.mxu1 %v6405_v61  ;;  %7369 = vmatprep.mubr.bf16.mxu0 %v6405_v61  ;;  %v18945_v61 = vld [vmem:[%s25408_s9 + $0x2cc] ss:$16 sps:$4 sm:$0xff]   ;;  %v18958_v27 = vld [vmem:[%s25408_s9 + $0x320] ss:$16 sps:$4 sm:$0xff]   ;;  %v18961_v7 = vld [vmem:[%s25408_s9 + $0x328] ss:$16 sps:$4 sm:$0xff]  }
 0xd68   : > { %7236 = vmatpush1.bf16.msra.mxu1 %v18916_v47  ;;  %7342 = vmatpush1.bf16.msra.mxu0 %v18919_v22  ;;  %v18966_v5 = vld [vmem:[%s25408_s9 + $0x344] ss:$16 sps:$4 sm:$0xff]   ;;  %v18969_v47 = vld [vmem:[%s25408_s9 + $0x34c] ss:$16 sps:$4 sm:$0xff]   ;;  %v18964_v22 = vld [vmem:[%s25408_s9 + $0x340] ss:$16 sps:$4 sm:$0xff]  }
 0xd69   : > { %7237 = vmatprep.subr.bf16.mxu1 %v18924_v25  ;;  %7343 = vmatprep.subr.bf16.mxu0 %v18927_v43  ;;  %v18967_v25 = vld [vmem:[%s25408_s9 + $0x348] ss:$16 sps:$4 sm:$0xff]   ;;  %v18972_v43 = vld [vmem:[%s25408_s9 + $0x364] ss:$16 sps:$4 sm:$0xff]  }
 0xd6c   : > { %7238 = vmatpush1.bf16.msra.mxu1 %v18922_v42  ;;  %7344 = vmatpush1.bf16.msra.mxu0 %v18925_v11  ;;  %v18975_v42 = vld [vmem:[%s25408_s9 + $0x36c] ss:$16 sps:$4 sm:$0xff]   ;;  %v18970_v11 = vld [vmem:[%s25408_s9 + $0x360] ss:$16 sps:$4 sm:$0xff]  }
 0xd6d   : > { %7239 = vmatprep.subr.bf16.mxu1 %v18930_v32  ;;  %7345 = vmatprep.subr.bf16.mxu0 %v18933_v37  ;;  %v18973_v32 = vld [vmem:[%s25408_s9 + $0x368] ss:$16 sps:$4 sm:$0xff]   ;;  %v18978_v37 = vld [vmem:[%s25408_s9 + $0x384] ss:$16 sps:$4 sm:$0xff]  }
 0xd70   : > { %7240 = vmatpush1.bf16.msra.mxu1 %v18928_v41  ;;  %7346 = vmatpush1.bf16.msra.mxu0 %v18931_v46  ;;  %v18981_v41 = vld [vmem:[%s25408_s9 + $0x38c] ss:$16 sps:$4 sm:$0xff]   ;;  %v18976_v46 = vld [vmem:[%s25408_s9 + $0x380] ss:$16 sps:$4 sm:$0xff]  }
 0xd71   : > { %7241 = vmatprep.subr.bf16.mxu1 %v18936_v6  ;;  %7347 = vmatprep.subr.bf16.mxu0 %v18939_v15  ;;  %v18979_v6 = vld [vmem:[%s25408_s9 + $0x388] ss:$16 sps:$4 sm:$0xff]   ;;  %v18984_v15 = vld [vmem:[%s25408_s9 + $0x3a4] ss:$16 sps:$4 sm:$0xff]  }
 0xd74   : > { %7242 = vmatpush1.bf16.msra.mxu1 %v18934_v52  ;;  %7348 = vmatpush1.bf16.msra.mxu0 %v18937_v60  ;;  %v18987_v52 = vld [vmem:[%s25408_s9 + $0x3ac] ss:$16 sps:$4 sm:$0xff]   ;;  %v18982_v60 = vld [vmem:[%s25408_s9 + $0x3a0] ss:$16 sps:$4 sm:$0xff]  }
 0xd75   : > { %7243 = vmatprep.subr.bf16.mxu1 %v18942_v39  ;;  %7349 = vmatprep.subr.bf16.mxu0 %v18945_v61  ;;  %v18985_v39 = vld [vmem:[%s25408_s9 + $0x3a8] ss:$16 sps:$4 sm:$0xff]   ;;  %v18990_v61 = vld [vmem:[%s25408_s9 + $0x3c4] ss:$16 sps:$4 sm:$0xff]  }
 0xd78   : > { %7244 = vmatpush1.bf16.msra.mxu1 %v18940_v62  ;;  %7350 = vmatpush1.bf16.msra.mxu0 %v18943_v63  ;;  %v18993_v62 = vld [vmem:[%s25408_s9 + $0x3cc] ss:$16 sps:$4 sm:$0xff]   ;;  %v18988_v63 = vld [vmem:[%s25408_s9 + $0x3c0] ss:$16 sps:$4 sm:$0xff]  }
 0xd79   : > { %7245 = vmatprep.subr.bf16.mxu1 %v18948_v0  ;;  %7351 = vmatprep.subr.bf16.mxu0 %v18951_v2  ;;  %v18991_v0 = vld [vmem:[%s25408_s9 + $0x3c8] ss:$16 sps:$4 sm:$0xff]   ;;  %v18996_v2 = vld [vmem:[%s25408_s9 + $0x3e4] ss:$16 sps:$4 sm:$0xff]  }
 0xd7c   : > { %7246 = vmatpush1.bf16.msra.mxu1 %v18946_v12  ;;  %7352 = vmatpush1.bf16.msra.mxu0 %v18949_v35  ;;  %v18999_v12 = vld [vmem:[%s25408_s9 + $0x3ec] ss:$16 sps:$4 sm:$0xff]   ;;  %v18994_v35 = vld [vmem:[%s25408_s9 + $0x3e0] ss:$16 sps:$4 sm:$0xff]  }
 0xd7d   : > { %7247 = vmatprep.subr.bf16.mxu1 %v18954_v3  ;;  %7353 = vmatprep.subr.bf16.mxu0 %v18957_v4  ;;  %v18997_v3 = vld [vmem:[%s25408_s9 + $0x3e8] ss:$16 sps:$4 sm:$0xff]   ;;  %v19000_v4 = vld [vmem:[%s25401_s2 + $0x40] sm:$0xff]  }
 0xd80   : > { %7248 = vmatpush1.bf16.msra.mxu1 %v18952_v8  ;;  %7354 = vmatpush1.bf16.msra.mxu0 %v18955_v10  ;;  %v19001_v8 = vld [vmem:[%s25401_s2 + $0xc0] sm:$0xff]  }
 0xd81   : > { %7249 = vmatprep.subr.bf16.mxu1 %v18960_v57  ;;  %7355 = vmatprep.subr.bf16.mxu0 %v18963_v40  ;;  %v19002_v10 = vld [vmem:[%s25401_s2] sm:$0xff]   ;;  %v19004_v40 = vld [vmem:[%s25401_s2 + $0x48] sm:$0xff]  }
 0xd82   : > { %v19003_v57 = vld [vmem:[%s25401_s2 + $0x80] sm:$0xff]  }
 0xd84   : > { %7250 = vmatpush1.bf16.msra.mxu1 %v18958_v27  ;;  %7356 = vmatpush1.bf16.msra.mxu0 %v18961_v7  ;;  %v19005_v27 = vld [vmem:[%s25401_s2 + $0xc8] sm:$0xff]  }
 0xd85   : > { %7251 = vmatprep.subr.bf16.mxu1 %v18966_v5  ;;  %7357 = vmatprep.subr.bf16.mxu0 %v18969_v47  ;;  %v19006_v7 = vld [vmem:[%s25401_s2 + $0x8] sm:$0xff]  }
 0xd86   : > { %v19007_v5 = vld [vmem:[%s25401_s2 + $0x88] sm:$0xff]  }
 0xd87   : > { %v15813_v47 = vld [vmem:[%s20271_s20 + $0x88] sm:$0xff] }
 0xd88   : > { %7252 = vmatpush1.bf16.msra.mxu1 %v18964_v22  ;;  %7358 = vmatpush1.bf16.msra.mxu0 %v18967_v25  ;;  %v15817_v22 = vld [vmem:[%s20271_s20 + $0xa8] sm:$0xff]  ;;  %v15815_v25 = vld [vmem:[%s20271_s20 + $0x98] sm:$0xff] }
 0xd89   : > { %7253 = vmatprep.subr.bf16.mxu1 %v18972_v43  ;;  %7359 = vmatprep.subr.bf16.mxu0 %v18975_v42  ;;  %v15819_v43 = vld [vmem:[%s20271_s20 + $0xb8] sm:$0xff]  ;;  %v22759_v42 = vpack.c.bf16 %v15817_v22, %v15813_v47  ;;  %v19032_v47 = vld [vmem:[%s25403_s4 + $0x40] sm:$0xff]  }
 0xd8a   : > { %v19033_v22 = vld [vmem:[%s25403_s4 + $0xc0] sm:$0xff]  }
 0xd8c   : > { %7254 = vmatpush1.bf16.msra.mxu1 %v18970_v11  ;;  %7360 = vmatpush1.bf16.msra.mxu0 %v18973_v32  ;;  %v22761_v11 = vpack.c.bf16 %v15819_v43, %v15815_v25  ;;  %v19010_v32 = vld [vmem:[%s25401_s2 + $0x10] sm:$0xff]   ;;  %v15821_v25 = vld [vmem:[%s20271_s20 + $0xc8] sm:$0xff] }
 0xd8d   : > { %7255 = vmatprep.subr.bf16.mxu1 %v18978_v37  ;;  %7361 = vmatprep.subr.bf16.mxu0 %v18981_v41  ;;  %v19011_v37 = vld [vmem:[%s25401_s2 + $0x90] sm:$0xff]   ;;  %v19012_v41 = vld [vmem:[%s25401_s2 + $0x58] sm:$0xff]  }
 0xd90   : > { %7256 = vmatpush1.bf16.msra.mxu1 %v18976_v46  ;;  %7362 = vmatpush1.bf16.msra.mxu0 %v18979_v6  ;;  %v19013_v46 = vld [vmem:[%s25401_s2 + $0xd8] sm:$0xff]  }
 0xd91   : > { %7257 = vmatprep.subr.bf16.mxu1 %v18984_v15  ;;  %7363 = vmatprep.subr.bf16.mxu0 %v18987_v52  ;;  %v19014_v6 = vld [vmem:[%s25401_s2 + $0x18] sm:$0xff]   ;;  %v19017_v52 = vld [vmem:[%s25401_s2 + $0xe0] sm:$0xff]  }
 0xd92   : > { %v19015_v15 = vld [vmem:[%s25401_s2 + $0x98] sm:$0xff]  }
 0xd94   : > { %7258 = vmatpush1.bf16.msra.mxu1 %v18982_v60  ;;  %7364 = vmatpush1.bf16.msra.mxu0 %v18985_v39  ;;  %v19018_v60 = vld [vmem:[%s25401_s2 + $0x20] sm:$0xff]  }
 0xd95   : > { %7259 = vmatprep.subr.bf16.mxu1 %v18990_v61  ;;  %7365 = vmatprep.subr.bf16.mxu0 %v18993_v62  ;;  %v19019_v39 = vld [vmem:[%s25401_s2 + $0xa0] sm:$0xff]   ;;  %v19020_v61 = vld [vmem:[%s25401_s2 + $0x68] sm:$0xff]  }
 0xd96   : > { %v19021_v62 = vld [vmem:[%s25401_s2 + $0xe8] sm:$0xff]  }
 0xd98   : > { %7260 = vmatpush1.bf16.msra.mxu1 %v18988_v63  ;;  %7366 = vmatpush1.bf16.msra.mxu0 %v18991_v0  ;;  %v19022_v63 = vld [vmem:[%s25401_s2 + $0x28] sm:$0xff]  }
 0xd99   : > { %7261 = vmatprep.subr.bf16.mxu1 %v18996_v2  ;;  %7367 = vmatprep.subr.bf16.mxu0 %v18999_v12  ;;  %v19023_v0 = vld [vmem:[%s25401_s2 + $0xa8] sm:$0xff]   ;;  %v19024_v2 = vld [vmem:[%s25401_s2 + $0x70] sm:$0xff]  }
 0xd9a   : > { %v19025_v12 = vld [vmem:[%s25401_s2 + $0xf0] sm:$0xff]  }
 0xd9c   : > { %7262 = vmatpush1.bf16.msra.mxu1 %v18994_v35  ;;  %7368 = vmatpush1.bf16.msra.mxu0 %v18997_v3  ;;  %v19026_v35 = vld [vmem:[%s25401_s2 + $0x30] sm:$0xff]  }
 0xd9d   : > { %17442 = vmatprep.subr.bf16.mxu1 %v19000_v4  ;;  %17470 = vmatprep.subr.bf16.mxu0 %v19001_v8  ;;  %v19027_v3 = vld [vmem:[%s25401_s2 + $0xb0] sm:$0xff]   ;;  %v19028_v4 = vld [vmem:[%s25401_s2 + $0x78] sm:$0xff]  }
 0xd9e   : > { %v19029_v8 = vld [vmem:[%s25401_s2 + $0xf8] sm:$0xff]  }
 0xd9f   : > { %7264 = vmatmul.mubr.bf16.vlgmr.msra.gmra.mrb[84].mxu1 %v22485_v31  ;;  %7370 = vmatmul.mubr.bf16.vlgmr.msra.gmra.mrb[88].mxu0 %v22485_v31  ;;  %v19008_v31 = vld [vmem:[%s25401_s2 + $0x50] sm:$0xff]  }
 0xda0   : > { %7273 = vmatprep.mubr.bf16.mxu1 %v22551_v17  ;;  %7379 = vmatprep.mubr.bf16.mxu0 %v22551_v17  ;;  %v19009_v17 = vld [vmem:[%s25401_s2 + $0xd0] sm:$0xff]  }
 0xda1   : > { %17443 = vmatpush3.bf16.msra.mxu1 %v19002_v10  ;;  %17471 = vmatpush3.bf16.msra.mxu0 %v19003_v57  ;;  %v19030_v10 = vld [vmem:[%s25401_s2 + $0x38] sm:$0xff]  }
 0xda2   : > { %17444 = vmatprep.subr.bf16.mxu1 %v19004_v40  ;;  %17472 = vmatprep.subr.bf16.mxu0 %v19005_v27  ;;  %v19031_v57 = vld [vmem:[%s25401_s2 + $0xb8] sm:$0xff]   ;;  %v15812_v40 = vld [vmem:[%s20271_s20 + $0x80] sm:$0xff] }
 0xda3   : > { %v15816_v27 = vld [vmem:[%s20271_s20 + $0xa0] sm:$0xff] }
 0xda4   : > { %v22844_v43 = vpack.c.bf16 %v15816_v27, %v15812_v40  ;;  %v19046_v40 = vld [vmem:[%s25403_s4 + $0x18] sm:$0xff]  }
 0xda5   : > { %17445 = vmatpush3.bf16.msra.mxu1 %v19006_v7  ;;  %17473 = vmatpush3.bf16.msra.mxu0 %v19007_v5  ;;  %v15814_v7 = vld [vmem:[%s20271_s20 + $0x90] sm:$0xff]  ;;  %v19047_v27 = vld [vmem:[%s25403_s4 + $0x98] sm:$0xff]  }
 0xda6   : > { %17446 = vmatprep.subr.bf16.mxu1 %v19008_v31  ;;  %17474 = vmatprep.subr.bf16.mxu0 %v19009_v17  ;;  %v15818_v5 = vld [vmem:[%s20271_s20 + $0xb0] sm:$0xff]  ;;  %v15825_v17 = vld [vmem:[%s20271_s20 + $0xe8] sm:$0x1] }
 0xda7   : > { %7274 = vmatmul.mubr.bf16.gmra.mrb[88].mxu1 %v22543_v9  ;;  %7380 = vmatmul.mubr.bf16.gmra.mrb[92].mxu0 %v22543_v9  ;;  %v19016_v9 = vld [vmem:[%s25401_s2 + $0x60] sm:$0xff]   ;;  %v22846_v31 = vpack.c.bf16 %v15818_v5, %v15814_v7 }
 0xda8   : > { %7832 = vmatprep.mubr.bf16.mxu1 %v22759_v42  ;;  %7881 = vmatprep.mubr.bf16.mxu0 %v22761_v11  ;;  %v19048_v7 = vld [vmem:[%s25403_s4 + $0x60] sm:$0xff]  }
 0xda9   : > { %17447 = vmatpush3.bf16.msra.mxu1 %v19010_v32  ;;  %17475 = vmatpush3.bf16.msra.mxu0 %v19011_v37  ;;  %v15823_v32 = vld [vmem:[%s20271_s20 + $0xd8] sm:$0xff]  ;;  %v19049_v5 = vld [vmem:[%s25403_s4 + $0xe0] sm:$0xff]  }
 0xdaa   : > { %17448 = vmatprep.subr.bf16.mxu1 %v19012_v41  ;;  %17476 = vmatprep.subr.bf16.mxu0 %v19013_v46  ;;  %v15827_v37 = vld [vmem:[%s20271_s20 + $0xf8] sm:$0x1]  ;;  %v19034_v41 = vld [vmem:[%s25403_s4] sm:$0xff]  }
 0xdab   : > { %v19035_v46 = vld [vmem:[%s25403_s4 + $0x80] sm:$0xff]  }
 0xdad   : > { %17449 = vmatpush3.bf16.msra.mxu1 %v19014_v6  ;;  %17477 = vmatpush3.bf16.msra.mxu0 %v19015_v15  ;;  %v19036_v6 = vld [vmem:[%s25403_s4 + $0x48] sm:$0xff]  }
 0xdae   : > { %17450 = vmatprep.subr.bf16.mxu1 %v19016_v9  ;;  %17478 = vmatprep.subr.bf16.mxu0 %v19017_v52  ;;  %v19037_v15 = vld [vmem:[%s25403_s4 + $0xc8] sm:$0xff]   ;;  %v22863_v9 = vpack.c.bf16 %v15825_v17, %v15821_v25  ;;  %v22865_v52 = vpack.c.bf16 %v15827_v37, %v15823_v32 }
 0xdaf   : > { %v19052_v25 = vld [vmem:[%s25403_s4 + $0x68] sm:$0xff]  }
 0xdb0   : > { %v19053_v17 = vld [vmem:[%s25403_s4 + $0xe8] sm:$0xff]  }
 0xdb1   : > { %17451 = vmatpush3.bf16.msra.mxu1 %v19018_v60  ;;  %17479 = vmatpush3.bf16.msra.mxu0 %v19019_v39  ;;  %v19038_v60 = vld [vmem:[%s25403_s4 + $0x8] sm:$0xff]  }
 0xdb2   : > { %17452 = vmatprep.subr.bf16.mxu1 %v19020_v61  ;;  %17480 = vmatprep.subr.bf16.mxu0 %v19021_v62  ;;  %v19039_v39 = vld [vmem:[%s25403_s4 + $0x88] sm:$0xff]   ;;  %v15820_v61 = vld [vmem:[%s20271_s20 + $0xc0] sm:$0xff] }
 0xdb3   : > { %v15824_v62 = vld [vmem:[%s20271_s20 + $0xe0] sm:$0x1]  ;;  %v19054_v32 = vld [vmem:[%s25403_s4 + $0x28] sm:$0xff]  }
 0xdb4   : > { %v19055_v37 = vld [vmem:[%s25403_s4 + $0xa8] sm:$0xff]  }
 0xdb5   : > { %17453 = vmatpush3.bf16.msra.mxu1 %v19022_v63  ;;  %17481 = vmatpush3.bf16.msra.mxu0 %v19023_v0  ;;  %v15822_v63 = vld [vmem:[%s20271_s20 + $0xd0] sm:$0xff] }
 0xdb6   : > { %17454 = vmatprep.subr.bf16.mxu1 %v19024_v2  ;;  %17482 = vmatprep.subr.bf16.mxu0 %v19025_v12  ;;  %v15826_v0 = vld [vmem:[%s20271_s20 + $0xf0] sm:$0x1] }
 0xdb7   : > { %v19040_v2 = vld [vmem:[%s25403_s4 + $0x50] sm:$0xff]  }
 0xdb8   : > { %v19041_v12 = vld [vmem:[%s25403_s4 + $0xd0] sm:$0xff]  }
 0xdb9   : > { %17455 = vmatpush3.bf16.msra.mxu1 %v19026_v35  ;;  %17483 = vmatpush3.bf16.msra.mxu0 %v19027_v3  ;;  %v22887_v35 = vpack.c.bf16 %v15824_v62, %v15820_v61  ;;  %v22889_v3 = vpack.c.bf16 %v15826_v0, %v15822_v63  ;;  %v19062_v61 = vld [vmem:[%s25403_s4 + $0x38] sm:$0xff]   ;;  %v425_v63 = vld [vmem:[%s25409_s10] sm:$0xf] }
 0xdba   : > { %17456 = vmatprep.subr.bf16.mxu1 %v19028_v4  ;;  %17484 = vmatprep.subr.bf16.mxu0 %v19029_v8  ;;  %v19042_v4 = vld [vmem:[%s25403_s4 + $0x10] sm:$0xff]   ;;  %v19063_v62 = vld [vmem:[%s25403_s4 + $0xb8] sm:$0xff]   ;;  %v426_v0 = vld [vmem:[%s25410_s11] sm:$0xf] }
 0xdbb   : > { %v19043_v8 = vld [vmem:[%s25403_s4 + $0x90] sm:$0xff]  }
 0xdbd   : > { %17457 = vmatpush3.bf16.msra.mxu1 %v19030_v10  ;;  %17485 = vmatpush3.bf16.msra.mxu0 %v19031_v57  ;;  %v19044_v10 = vld [vmem:[%s25403_s4 + $0x58] sm:$0xff]  }
 0xdbe   : > { %17498 = vmatprep.subr.bf16.mxu1 %v19032_v47  ;;  %17526 = vmatprep.subr.bf16.mxu0 %v19033_v22  ;;  %v19045_v57 = vld [vmem:[%s25403_s4 + $0xd8] sm:$0xff]   ;;  %v19050_v47 = vld [vmem:[%s25403_s4 + $0x20] sm:$0xff]  }
 0xdbf   : > { %v19051_v22 = vld [vmem:[%s25403_s4 + $0xa0] sm:$0xff]  }
 0xdc0   : > { %7833 = vmatmul.mubr.bf16.vlgmr.msra.gmra.mrb[92].mxu1 %v22844_v43  ;;  %7882 = vmatmul.mubr.bf16.vlgmr.msra.gmra.mrb[96].mxu0 %v22846_v31 }
 0xdc1   : > { %17499 = vmatpush3.bf16.msra.mxu1 %v19034_v41  ;;  %17527 = vmatpush3.bf16.msra.mxu0 %v19035_v46  ;;  %v19056_v41 = vld [vmem:[%s25403_s4 + $0x70] sm:$0xff]  }
 0xdc2   : > { %17500 = vmatprep.subr.bf16.mxu1 %v19036_v6  ;;  %17528 = vmatprep.subr.bf16.mxu0 %v19037_v15  ;;  %v19057_v46 = vld [vmem:[%s25403_s4 + $0xf0] sm:$0xff]  }
 0xdc3   : > { %7840 = vmatprep.mubr.bf16.mxu1 %v22863_v9  ;;  %7889 = vmatprep.mubr.bf16.mxu0 %v22865_v52  ;;  %v19058_v6 = vld [vmem:[%s25403_s4 + $0x30] sm:$0xff]  }
 0xdc4   : > { %v19059_v15 = vld [vmem:[%s25403_s4 + $0xb0] sm:$0xff]  }
 0xdc5   : > { %17501 = vmatpush3.bf16.msra.mxu1 %v19038_v60  ;;  %17529 = vmatpush3.bf16.msra.mxu0 %v19039_v39  ;;  %v19060_v60 = vld [vmem:[%s25403_s4 + $0x78] sm:$0xff]  }
 0xdc6   : > { %17502 = vmatprep.subr.bf16.mxu1 %v19040_v2  ;;  %17530 = vmatprep.subr.bf16.mxu0 %v19041_v12  ;;  %v19061_v39 = vld [vmem:[%s25403_s4 + $0xf8] sm:$0xff]   ;;  %v22977_v2 = vrot.slane %v425_v63, %v22389_v30  ;;  %v22980_v12 = vrot.slane %v425_v63, %v22391_v50 }
 0xdc8   : > { %7841 = vmatmul.mubr.bf16.gmra.mrb[96].mxu1 %v22887_v35  ;;  %7890 = vmatmul.mubr.bf16.gmra.mrb[100].mxu0 %v22889_v3 }
 0xdc9   : > { %17503 = vmatpush3.bf16.msra.mxu1 %v19042_v4  ;;  %17531 = vmatpush3.bf16.msra.mxu0 %v19043_v8  ;;  %v22983_v4 = vrot.slane %v425_v63, %v22396_v49  ;;  %v22986_v8 = vrot.slane %v425_v63, %v22398_v51 }
 0xdca   : > { %17504 = vmatprep.subr.bf16.mxu1 %v19044_v10  ;;  %17532 = vmatprep.subr.bf16.mxu0 %v19045_v57  ;;  %v22989_v10 = vrot.slane %v426_v0, %v22389_v30  ;;  %v22992_v57 = vrot.slane %v426_v0, %v22391_v50 }
 0xdcb   : > { %8193 = vmatprep.mubr.bf16.mxu1 %v22759_v42  ;;  %8242 = vmatprep.mubr.bf16.mxu0 %v22761_v11 }
 0xdcd   : > { %17505 = vmatpush3.bf16.msra.mxu1 %v19046_v40  ;;  %17533 = vmatpush3.bf16.msra.mxu0 %v19047_v27 }
 0xdce   : > { %17506 = vmatprep.subr.bf16.mxu1 %v19048_v7  ;;  %17534 = vmatprep.subr.bf16.mxu0 %v19049_v5  ;;  %v22995_v7 = vrot.slane %v426_v0, %v22396_v49  ;;  %v22998_v5 = vrot.slane %v426_v0, %v22398_v51 }
 0xdd1   : > { %17507 = vmatpush3.bf16.msra.mxu1 %v19050_v47  ;;  %17535 = vmatpush3.bf16.msra.mxu0 %v19051_v22 }
 0xdd2   : > { %17508 = vmatprep.subr.bf16.mxu1 %v19052_v25  ;;  %17536 = vmatprep.subr.bf16.mxu0 %v19053_v17 }
 0xdd5   : > { %17509 = vmatpush3.bf16.msra.mxu1 %v19054_v32  ;;  %17537 = vmatpush3.bf16.msra.mxu0 %v19055_v37 }
 0xdd6   : > { %17510 = vmatprep.subr.bf16.mxu1 %v19056_v41  ;;  %17538 = vmatprep.subr.bf16.mxu0 %v19057_v46 }
 0xdd9   : > { %17511 = vmatpush3.bf16.msra.mxu1 %v19058_v6  ;;  %17539 = vmatpush3.bf16.msra.mxu0 %v19059_v15 }
 0xdda   : > { %17512 = vmatprep.subr.bf16.mxu1 %v19060_v60  ;;  %17540 = vmatprep.subr.bf16.mxu0 %v19061_v39 }
 0xddd   : > { %17513 = vmatpush3.bf16.msra.mxu1 %v19062_v61  ;;  %17541 = vmatpush3.bf16.msra.mxu0 %v19063_v62 }
 0xdde   : > { %8388 = vmatprep.subr.bf16.mxu0 %v22759_v42 }
 0xde0   : > { %8194 = vmatmul.mubr.bf16.vlgmr.msra.gmra.mrb[100].mxu1 %v22844_v43  ;;  %8243 = vmatmul.mubr.bf16.vlgmr.msra.gmra.mrb[104].mxu0 %v22846_v31 }
 0xde1   : > { %8201 = vmatprep.mubr.bf16.mxu1 %v22863_v9  ;;  %8250 = vmatprep.mubr.bf16.mxu0 %v22865_v52 }
 0xde2   : > { %8389 = vmatpush1.bf16.msra.mxu0 %v22844_v43 }
 0xde8   : > { %8202 = vmatmul.mubr.bf16.gmra.mrb[104].mxu1 %v22887_v35  ;;  %8251 = vmatmul.mubr.bf16.gmra.mrb[108].mxu0 %v22889_v3 }
 0xde9   : > { %8420 = vmatprep.mubr.bf16.mxu0 %v20097_v23 }
 0xe72   : > { %v7265_v40 = vpop.f32.mrb[84].mxu1  ;;  %v7371_v27 = vpop.f32.mrb[88].mxu0 }
 0xe73   : > { %v7411_v47 = vmul.f32 %v22977_v2, %v7265_v40  ;;  %v7413_v22 = vmul.f32 %v22980_v12, %v7371_v27  ;;  %v7267_v25 = vpop.f32.mrb[85].mxu1  ;;  %v7373_v17 = vpop.f32.mrb[89].mxu0 }
 0xe74   : > { %v7412_v30 = vmul.f32 %v22983_v4, %v7267_v25  ;;  %v7414_v32 = vmul.f32 %v22986_v8, %v7373_v17  ;;  %v7269_v50 = vpop.f32.mrb[86].mxu1  ;;  %v7375_v37 = vpop.f32.mrb[90].mxu0 }
 0xe75   : > { %v7448_v41 = vadd.f32 %v22989_v10, %v7411_v47  ;;  %v7450_v49 = vadd.f32 %v22992_v57, %v7413_v22  ;;  %v7415_v51 = vmul.f32 %v22977_v2, %v7269_v50  ;;  %v7417_v46 = vmul.f32 %v22980_v12, %v7375_v37  ;;  %v7271_v6 = vpop.f32.mrb[87].mxu1  ;;  %v7377_v15 = vpop.f32.mrb[91].mxu0 }
 0xe76   : > { %v7449_v60 = vadd.f32 %v22995_v7, %v7412_v30  ;;  %v7451_v39 = vadd.f32 %v22998_v5, %v7414_v32  ;;  %v7416_v61 = vmul.f32 %v22983_v4, %v7271_v6  ;;  %v7418_v62 = vmul.f32 %v22986_v8, %v7377_v15 }
 0xe77   : > { %v7464_v63 = vadd.f32 %v22440_v13, %v7448_v41  ;;  %v7466_v0 = vadd.f32 %v22444_v14, %v7450_v49  ;;  %v7452_v40 = vadd.f32 %v22989_v10, %v7415_v51  ;;  %v7454_v27 = vadd.f32 %v22992_v57, %v7417_v46 }
 0xe78   : > { %v7465_v47 = vadd.f32 %v22450_v21, %v7449_v60  ;;  %v7467_v22 = vadd.f32 %v22456_v24, %v7451_v39  ;;  %v7453_v13 = vadd.f32 %v22995_v7, %v7416_v61  ;;  %v7455_v14 = vadd.f32 %v22998_v5, %v7418_v62 }
 0xe79   : > { %v7480_v25 = vmax.f32 %v7464_v63, 0.0  ;;  %v7482_v17 = vmax.f32 %v7466_v0, 0.0  ;;  %v7468_v30 = vadd.f32 %v22464_v18, %v7452_v40  ;;  %v7470_v32 = vadd.f32 %v22468_v29, %v7454_v27 }
 0xe7a   : > { %v7481_v50 = vmax.f32 %v7465_v47, 0.0  ;;  %v7483_v37 = vmax.f32 %v7467_v22, 0.0  ;;  %v7469_v41 = vadd.f32 %v22472_v33, %v7453_v13  ;;  %v7471_v21 = vadd.f32 %v22476_v36, %v7455_v14  ;;  %v7275_v49 = vpop.f32.mrb[88].mxu1  ;;  %v7381_v24 = vpop.f32.mrb[92].mxu0 }
 0xe7b   : > { %7496 = vst [vmem:[%s23021_s16] sm:$0xff] %v7480_v25  ;;  %7498 = vst [vmem:[%s23021_s16 + $0x10] sm:$0xff] %v7482_v17  ;;  %v7484_v51 = vmax.f32 %v7468_v30, 0.0  ;;  %v7486_v46 = vmax.f32 %v7470_v32, 0.0  ;;  %v7419_v18 = vmul.f32 %v22977_v2, %v7275_v49  ;;  %v7421_v6 = vmul.f32 %v22980_v12, %v7381_v24  ;;  %v7277_v29 = vpop.f32.mrb[89].mxu1  ;;  %v7383_v15 = vpop.f32.mrb[93].mxu0 }
 0xe7c   : > { %7497 = vst [vmem:[%s23021_s16 + $0x8] sm:$0xff] %v7481_v50  ;;  %7499 = vst [vmem:[%s23021_s16 + $0x18] sm:$0xff] %v7483_v37  ;;  %v7485_v33 = vmax.f32 %v7469_v41, 0.0  ;;  %v7487_v36 = vmax.f32 %v7471_v21, 0.0  ;;  %v7420_v60 = vmul.f32 %v22983_v4, %v7277_v29  ;;  %v7422_v39 = vmul.f32 %v22986_v8, %v7383_v15  ;;  %v7279_v61 = vpop.f32.mrb[90].mxu1  ;;  %v7385_v62 = vpop.f32.mrb[94].mxu0 }
 0xe7d   : > { %7500 = vst [vmem:[%s23021_s16 + $0x20] sm:$0xff] %v7484_v51  ;;  %7502 = vst [vmem:[%s23021_s16 + $0x30] sm:$0xff] %v7486_v46  ;;  %v7456_v63 = vadd.f32 %v22989_v10, %v7419_v18  ;;  %v7458_v0 = vadd.f32 %v22992_v57, %v7421_v6  ;;  %v7423_v40 = vmul.f32 %v22977_v2, %v7279_v61  ;;  %v7281_v47 = vpop.f32.mrb[91].mxu1  ;;  %v7387_v22 = vpop.f32.mrb[95].mxu0 }
 0xe7e   : > { %v7425_v27 = vmul.f32 %v22980_v12, %v7385_v62  ;;  %7501 = vst [vmem:[%s23021_s16 + $0x28] sm:$0xff] %v7485_v33  ;;  %7503 = vst [vmem:[%s23021_s16 + $0x38] sm:$0xff] %v7487_v36  ;;  %v7457_v13 = vadd.f32 %v22995_v7, %v7420_v60  ;;  %v7459_v14 = vadd.f32 %v22998_v5, %v7422_v39 }
 0xe7f   : > { %v7424_v25 = vmul.f32 %v22983_v4, %v7281_v47  ;;  %v7426_v17 = vmul.f32 %v22986_v8, %v7387_v22  ;;  %v7472_v30 = vadd.f32 %v22496_v19, %v7456_v63  ;;  %v7474_v32 = vadd.f32 %v22500_v1, %v7458_v0 }
 0xe80   : > { %v7460_v50 = vadd.f32 %v22989_v10, %v7423_v40  ;;  %v7462_v37 = vadd.f32 %v22992_v57, %v7425_v27  ;;  %v7473_v41 = vadd.f32 %v22506_v28, %v7457_v13  ;;  %v7475_v21 = vadd.f32 %v22510_v20, %v7459_v14 }
 0xe81   : > { %v7461_v49 = vadd.f32 %v22995_v7, %v7424_v25  ;;  %v7463_v24 = vadd.f32 %v22998_v5, %v7426_v17  ;;  %v7488_v51 = vmax.f32 %v7472_v30, 0.0  ;;  %v7490_v19 = vmax.f32 %v7474_v32, 0.0 }
 0xe82   : > { %v7476_v1 = vadd.f32 %v22516_v34, %v7460_v50  ;;  %v7478_v46 = vadd.f32 %v22520_v38, %v7462_v37  ;;  %v7489_v18 = vmax.f32 %v7473_v41, 0.0  ;;  %v7491_v28 = vmax.f32 %v7475_v21, 0.0 }
 0xe83   : > { %v7477_v6 = vadd.f32 %v22524_v45, %v7461_v49  ;;  %v7479_v20 = vadd.f32 %v22528_v48, %v7463_v24  ;;  %7504 = vst [vmem:[%s23021_s16 + $0x40] sm:$0xff] %v7488_v51  ;;  %7506 = vst [vmem:[%s23021_s16 + $0x50] sm:$0xff] %v7490_v19  ;;  %v15828_v45 = vld [vmem:[%s25402_s3] ss:$0 sm:$0xff] }
 0xe84   : > { %v7492_v29 = vmax.f32 %v7476_v1, 0.0  ;;  %v7494_v15 = vmax.f32 %v7478_v46, 0.0  ;;  %7505 = vst [vmem:[%s23021_s16 + $0x48] sm:$0xff] %v7489_v18  ;;  %7507 = vst [vmem:[%s23021_s16 + $0x58] sm:$0xff] %v7491_v28 }
 0xe85   : > { %v7493_v33 = vmax.f32 %v7477_v6, 0.0  ;;  %v7495_v36 = vmax.f32 %v7479_v20, 0.0 }
 0xe86   : > { %7508 = vst [vmem:[%s23021_s16 + $0x60] sm:$0x1] %v7492_v29  ;;  %7510 = vst [vmem:[%s23021_s16 + $0x70] sm:$0x1] %v7494_v15 }
 0xe87   : > { %7509 = vst [vmem:[%s23021_s16 + $0x68] sm:$0x1] %v7493_v33  ;;  %7511 = vst [vmem:[%s23021_s16 + $0x78] sm:$0x1] %v7495_v36  ;;  %v15861_v36 = vld [vmem:[%s25404_s5] ss:$0 sm:$0xff] }
 0xe93   : > { %v17458_v34 = vpop.f32.mrb[92].mxu1  ;;  %v17486_v38 = vpop.f32.mrb[96].mxu0 }
 0xe94   : > { %v17459_v60 = vpop.f32.mrb[93].mxu1  ;;  %v17487_v48 = vpop.f32.mrb[97].mxu0 }
 0xe95   : > { %v17460_v39 = vadd.f32 %v17459_v60, %v17458_v34  ;;  %v17488_v61 = vadd.f32 %v17487_v48, %v17486_v38  ;;  %v17461_v62 = vpop.f32.mrb[94].mxu1  ;;  %v17489_v63 = vpop.f32.mrb[98].mxu0 }
 0xe96   : > { %v17462_v0 = vpop.f32.mrb[95].mxu1  ;;  %v17490_v40 = vpop.f32.mrb[99].mxu0 }
 0xe97   : > { %v7835_v27 = vadd.f32 %v17460_v39, %v15828_v45  ;;  %v17463_v47 = vadd.f32 %v17462_v0, %v17461_v62  ;;  %v17491_v22 = vadd.f32 %v17490_v40, %v17489_v63 }
 0xe99   : > { %v7884_v13 = vadd.f32 %v17488_v61, %v7835_v27  ;;  %v7838_v14 = vadd.f32 %v17463_v47, %v15828_v45 }
 0xe9b   : > { %v7887_v25 = vadd.f32 %v17491_v22, %v7838_v14  ;;  %v17464_v17 = vpop.f32.mrb[96].mxu1  ;;  %v17492_v30 = vpop.f32.mrb[100].mxu0 }
 0xe9c   : > { %v17465_v32 = vpop.f32.mrb[97].mxu1  ;;  %v17493_v50 = vpop.f32.mrb[101].mxu0 }
 0xe9d   : > { %v8261_v37 = vpack.c.bf16 %v7887_v25, %v7884_v13  ;;  %v17466_v41 = vadd.f32 %v17465_v32, %v17464_v17  ;;  %v17467_v21 = vpop.f32.mrb[98].mxu1  ;;  %v17494_v49 = vadd.f32 %v17493_v50, %v17492_v30  ;;  %v17495_v24 = vpop.f32.mrb[102].mxu0 }
 0xe9e   : > { %v17468_v51 = vpop.f32.mrb[99].mxu1  ;;  %v17496_v19 = vpop.f32.mrb[103].mxu0 }
 0xe9f   : > { %17814 = vmatprep.subr.bf16.mxu1 %v8261_v37  ;;  %v7843_v1 = vadd.f32 %v17466_v41, %v15828_v45  ;;  %v17469_v46 = vadd.f32 %v17468_v51, %v17467_v21  ;;  %v17497_v18 = vadd.f32 %v17496_v19, %v17495_v24 }
 0xea0   : > { %17815 = vmatpush3.bf16.xpose.msra.mxu1 %v8261_v37 }
 0xea1   : > { %v7846_v28 = vadd.f32 %v17469_v46, %v15828_v45  ;;  %v7892_v6 = vadd.f32 %v17494_v49, %v7843_v1 }
 0xea3   : > { %v7895_v20 = vadd.f32 %v17497_v18, %v7846_v28 }
 0xea5   : > { %v8262_v29 = vpack.c.bf16 %v7895_v20, %v7892_v6 }
 0xea7   : > { %17816 = vmatprep.subr.bf16.mxu1 %v8262_v29 }
 0xea8   : > { %17817 = vmatpush3.bf16.xpose.msra.mxu1 %v8262_v29 }
 0xea9   : > { %8441 = vmatprep.subr.bf16.mxu1 %v22761_v11 }
 0xeb3   : > { %v17514_v15 = vpop.f32.mrb[100].mxu1  ;;  %v17542_v33 = vpop.f32.mrb[104].mxu0 }
 0xeb4   : > { %v17515_v34 = vpop.f32.mrb[101].mxu1  ;;  %v17543_v38 = vpop.f32.mrb[105].mxu0 }
 0xeb5   : > { %v17516_v60 = vadd.f32 %v17515_v34, %v17514_v15  ;;  %v17544_v48 = vadd.f32 %v17543_v38, %v17542_v33  ;;  %v17517_v39 = vpop.f32.mrb[102].mxu1  ;;  %v17545_v61 = vpop.f32.mrb[106].mxu0 }
 0xeb6   : > { %v17518_v45 = vpop.f32.mrb[103].mxu1  ;;  %v17546_v62 = vpop.f32.mrb[107].mxu0 }
 0xeb7   : > { %v8196_v63 = vadd.f32 %v17516_v60, %v15861_v36  ;;  %v17519_v0 = vadd.f32 %v17518_v45, %v17517_v39  ;;  %v17547_v40 = vadd.f32 %v17546_v62, %v17545_v61 }
 0xeb9   : > { %v8245_v27 = vadd.f32 %v17544_v48, %v8196_v63  ;;  %v8199_v47 = vadd.f32 %v17519_v0, %v15861_v36 }
 0xebb   : > { %v8248_v22 = vadd.f32 %v17547_v40, %v8199_v47  ;;  %v17520_v13 = vpop.f32.mrb[104].mxu1  ;;  %v17548_v14 = vpop.f32.mrb[108].mxu0 }
 0xebc   : > { %v17521_v25 = vpop.f32.mrb[105].mxu1  ;;  %v17549_v17 = vpop.f32.mrb[109].mxu0 }
 0xebd   : > { %v17522_v30 = vadd.f32 %v17521_v25, %v17520_v13  ;;  %v17550_v32 = vadd.f32 %v17549_v17, %v17548_v14  ;;  %v17523_v50 = vpop.f32.mrb[106].mxu1  ;;  %v17551_v37 = vpop.f32.mrb[110].mxu0  ;;  %v8259_v41 = vpack.c.bf16 %v8248_v22, %v8245_v27 }
 0xebe   : > { %v17524_v21 = vpop.f32.mrb[107].mxu1  ;;  %v17552_v49 = vpop.f32.mrb[111].mxu0 }
 0xebf   : > { %v8204_v24 = vadd.f32 %v17522_v30, %v15861_v36  ;;  %v17525_v51 = vadd.f32 %v17524_v21, %v17523_v50  ;;  %v17553_v19 = vadd.f32 %v17552_v49, %v17551_v37  ;;  %17818 = vmatprep.mubr.bf16.mxu1 %v8259_v41 }
 0xec1   : > { %v8253_v1 = vadd.f32 %v17550_v32, %v8204_v24  ;;  %v8207_v46 = vadd.f32 %v17525_v51, %v15861_v36  ;;  %v23090_v51 = vand.u32 %v22863_v9, %v20441_v16 }
 0xec3   : > { %v8256_v18 = vadd.f32 %v17553_v19, %v8207_v46  ;;  %v23094_v19 = vand.u32 %v22865_v52, %v20441_v16  ;;  %v23102_v46 = vand.u32 %v22889_v3, %v20441_v16  ;;  %8390 = vmatprep.subr.bf16.mxu0 %v23090_v51 }
 0xec5   : > { %v8260_v28 = vpack.c.bf16 %v8256_v18, %v8253_v1  ;;  %v23098_v1 = vand.u32 %v22887_v35, %v20441_v16  ;;  %v19064_v18 = vld [vmem:[%s25401_s2 + $0x140] sm:$0xff]  }
 0xec7   : > { %17819 = vmatmul.mubr.bf16.vlgmr.msra.gmra.mrb[108].mxu1 %v8260_v28  ;;  %8391 = vmatpush1.bf16.msra.mxu0 %v23098_v1  ;;  %v19065_v28 = vld [vmem:[%s25401_s2 + $0x1c0] sm:$0xff]  }
 0xec8   : > { %8442 = vmatpush1.bf16.msra.mxu1 %v22846_v31  ;;  %8473 = vmatprep.mubr.bf16.mxu1 %v20097_v23 }
 0xec9   : > { %8443 = vmatprep.subr.bf16.mxu1 %v23094_v19  ;;  %17558 = vmatprep.subr.bf16.mxu0 %v19064_v18  ;;  %v19077_v18 = vld [vmem:[%s25401_s2 + $0x1d8] sm:$0xff]  }
 0xecc   : > { %8444 = vmatpush1.bf16.msra.mxu1 %v23102_v46 }
 0xecd   : > { %17586 = vmatprep.subr.bf16.mxu1 %v19065_v28  ;;  %v19078_v28 = vld [vmem:[%s25401_s2 + $0x118] sm:$0xff]  }
 0xf9a   : > { %v17820_v6 = vpop.f32.mrb[108].mxu1 }
 0xf9b   : > { %v8297_v20 = vpop.f32.mrb[109].mxu1  ;;  %v8314_v34 = vmul.f32 0.0078125, %v17820_v6 }
 0xf9c   : > { %v8312_v29 = vmul.f32 0.0078125, %v8297_v20  ;;  %v17821_v15 = vpop.f32.mrb[110].mxu1 }
 0xf9d   : > { %v8300_v33 = vpop.f32.mrb[111].mxu1  ;;  %v8315_v48 = vmul.f32 0.0078125, %v17821_v15  ;;  %v8322_v39 = vsel %vm1230_vm0, %v8314_v34, -inf }
 0xf9e   : > { %v8313_v38 = vmul.f32 0.0078125, %v8300_v33  ;;  %v8316_v60 = vsel %vm1230_vm0, %v8312_v29, -inf }
 0xf9f   : > { %8317 = vmax.xlane.f32.xlu0 %v8316_v60  ;;  %v8325_v61 = vsel %vm1240_vm1, %v8315_v48, -inf  ;;  %v8361_v60 = vld [vmem:[%s25400_s1 + $0x8] sm:$0xff] }
 0xfa0   : > { %v8319_v36 = vsel %vm1230_vm0, %v8313_v38, -inf }
 0xfa1   : > { %8320 = vmax.xlane.f32.xlu1 %v8319_v36 }
 0xfa3   : > { %8323 = vmax.xlane.f32.xlu0 %v8322_v39 }
 0xfa5   : > { %8326 = vmax.xlane.f32.xlu1 %v8325_v61 }
0x102c   : > { %v8318_v45 = vpop.xlane.xlu0 %8317 }
0x102d   : > { %v8328_v62 = vsub.f32 %v8312_v29, %v8318_v45 }
0x102e   : > { %v8321_v63 = vpop.xlane.xlu1 %8320 }
0x102f   : > { %v8332_v0 = vmul.f32 1.442695, %v8328_v62  ;;  %v8329_v40 = vsub.f32 %v8313_v38, %v8321_v63  ;;  %v8360_v38 = vld [vmem:[%s25400_s1] sm:$0xff] }
0x1030   : > { %v8324_v27 = vpop.xlane.xlu0 %8323  ;;  %v19066_v62 = vld [vmem:[%s25401_s2 + $0x100] sm:$0xff]  }
0x1031   : > { %20008 = vpow2.f32 %v8332_v0  ;;  %v8334_v47 = vmul.f32 1.442695, %v8329_v40  ;;  %v8330_v22 = vsub.f32 %v8314_v34, %v8324_v27  ;;  %v19067_v63 = vld [vmem:[%s25401_s2 + $0x180] sm:$0xff]   ;;  %v19068_v40 = vld [vmem:[%s25401_s2 + $0x148] sm:$0xff]  }
0x1032   : > { %v8327_v13 = vpop.xlane.xlu1 %8326  ;;  %v19069_v27 = vld [vmem:[%s25401_s2 + $0x1c8] sm:$0xff]  }
0x1033   : > { %20010 = vpow2.f32 %v8334_v47  ;;  %v8336_v14 = vmul.f32 1.442695, %v8330_v22  ;;  %v8331_v25 = vsub.f32 %v8315_v48, %v8327_v13  ;;  %v8363_v22 = vld [vmem:[%s25400_s1 + $0x18] sm:$0x1] }
0x1035   : > { %20012 = vpow2.f32 %v8336_v14  ;;  %v8338_v17 = vmul.f32 1.442695, %v8331_v25  ;;  %v19070_v14 = vld [vmem:[%s25401_s2 + $0x108] sm:$0xff]  }
0x1036   : > { %v19071_v25 = vld [vmem:[%s25401_s2 + $0x188] sm:$0xff]  }
0x1037   : > { %20014 = vpow2.f32 %v8338_v17  ;;  %v8362_v17 = vld [vmem:[%s25400_s1 + $0x10] sm:$0xff] }
0x103b   : > { %v20009_v30 = vpop.eup %20008 }
0x103c   : > { %v8340_v32 = vsel %vm1230_vm0, %v20009_v30, 0.0 }
0x103d   : > { %v20011_v50 = vpop.eup %20010  ;;  %8341 = vadd.xlane.f32.xlu0 %v8340_v32  ;;  %v19073_v32 = vld [vmem:[%s25401_s2 + $0x1d0] sm:$0xff]  }
0x103e   : > { %v8343_v37 = vsel %vm1230_vm0, %v20011_v50, 0.0 }
0x103f   : > { %v20013_v41 = vpop.eup %20012  ;;  %8344 = vadd.xlane.f32.xlu1 %v8343_v37 }
0x1040   : > { %v8346_v21 = vsel %vm1230_vm0, %v20013_v41, 0.0 }
0x1041   : > { %v20015_v49 = vpop.eup %20014  ;;  %8347 = vadd.xlane.f32.xlu0 %v8346_v21  ;;  %v19075_v21 = vld [vmem:[%s25401_s2 + $0x190] sm:$0xff]  }
0x1042   : > { %v8349_v24 = vsel %vm1240_vm1, %v20015_v49, 0.0 }
0x1043   : > { %8350 = vadd.xlane.f32.xlu1 %v8349_v24  ;;  %v19076_v24 = vld [vmem:[%s25401_s2 + $0x158] sm:$0xff]  }
0x10ca   : > { %v8342_v16 = vpop.xlane.xlu0 %8341 }
0x10cb   : > { %20016 = vrcp.f32 %v8342_v16  ;;  %v19079_v16 = vld [vmem:[%s25401_s2 + $0x198] sm:$0xff]  }
0x10cc   : > { %v8345_v6 = vpop.xlane.xlu1 %8344 }
0x10cd   : > { %20018 = vrcp.f32 %v8345_v6  ;;  %v19080_v6 = vld [vmem:[%s25401_s2 + $0x160] sm:$0xff]  }
0x10ce   : > { %v8348_v20 = vpop.xlane.xlu0 %8347 }
0x10cf   : > { %20020 = vrcp.f32 %v8348_v20  ;;  %v19081_v20 = vld [vmem:[%s25401_s2 + $0x1e0] sm:$0xff]  }
0x10d0   : > { %v8351_v29 = vpop.xlane.xlu1 %8350 }
0x10d1   : > { %20022 = vrcp.f32 %v8351_v29  ;;  %v19082_v29 = vld [vmem:[%s25401_s2 + $0x120] sm:$0xff]  }
0x10d5   : > { %v20017_v15 = vpop.eup %20016 }
0x10d6   : > { %v8356_v33 = vmul.f32 %v20017_v15, %v20009_v30  ;;  %v19072_v30 = vld [vmem:[%s25401_s2 + $0x150] sm:$0xff]   ;;  %v19083_v15 = vld [vmem:[%s25401_s2 + $0x1a0] sm:$0xff]  }
0x10d7   : > { %v20019_v34 = vpop.eup %20018 }
0x10d8   : > { %v8357_v48 = vmul.f32 %v20019_v34, %v20011_v50  ;;  %v8364_v39 = vadd.f32 %v8360_v38, %v8356_v33  ;;  %v19084_v33 = vld [vmem:[%s25401_s2 + $0x168] sm:$0xff]  }
0x10d9   : > { %v20021_v36 = vpop.eup %20020  ;;  %v19085_v34 = vld [vmem:[%s25401_s2 + $0x1e8] sm:$0xff]  }
0x10da   : > { %v8365_v61 = vadd.f32 %v8361_v60, %v8357_v48  ;;  %v8358_v13 = vmul.f32 %v20021_v36, %v20013_v41  ;;  %v19074_v41 = vld [vmem:[%s25401_s2 + $0x110] sm:$0xff]   ;;  %v19086_v38 = vld [vmem:[%s25401_s2 + $0x128] sm:$0xff]  }
0x10db   : > { %v20023_v45 = vpop.eup %20022  ;;  %v19087_v60 = vld [vmem:[%s25401_s2 + $0x1a8] sm:$0xff]   ;;  %v19088_v48 = vld [vmem:[%s25401_s2 + $0x170] sm:$0xff]  }
0x10dc   : > { %v8368_v0 = vpack.c.bf16 %v8365_v61, %v8364_v39  ;;  %v8359_v47 = vmul.f32 %v20023_v45, %v20015_v49  ;;  %v8366_v37 = vadd.f32 %v8362_v17, %v8358_v13  ;;  %v19089_v36 = vld [vmem:[%s25401_s2 + $0x1f0] sm:$0xff]   ;;  %v19092_v45 = vld [vmem:[%s25401_s2 + $0x178] sm:$0xff]   ;;  %v19100_v13 = vld [vmem:[%s25403_s4 + $0x148] sm:$0xff]  }
0x10dd   : > { %v19090_v39 = vld [vmem:[%s25401_s2 + $0x130] sm:$0xff]   ;;  %v19103_v17 = vld [vmem:[%s25403_s4 + $0x188] sm:$0xff]  }
0x10de   : > { %15894 = vmatmul.mubr.msk.bf16.vlgmr.msra.gmra.mrb[112].mxu0 %vm1230_vm0, %v8368_v0  ;;  %15896 = vmatmul.mubr.msk.bf16.vlgmr.msra.gmra.mrb[112].mxu1 %vm1230_vm0, %v8368_v0  ;;  %v8367_v50 = vadd.f32 %v8363_v22, %v8359_v47  ;;  %v19091_v61 = vld [vmem:[%s25401_s2 + $0x1b0] sm:$0xff]   ;;  %v19095_v0 = vld [vmem:[%s25401_s2 + $0x1b8] sm:$0xff]   ;;  %v19098_v47 = vld [vmem:[%s25403_s4 + $0x100] sm:$0xff]  }
0x10df   : > { %17559 = vmatpush3.bf16.msra.mxu0 %v19066_v62  ;;  %17587 = vmatpush3.bf16.msra.mxu1 %v19067_v63  ;;  %v19093_v62 = vld [vmem:[%s25401_s2 + $0x1f8] sm:$0xff]   ;;  %v19099_v22 = vld [vmem:[%s25403_s4 + $0x180] sm:$0xff]  }
0x10e0   : > { %17560 = vmatprep.subr.bf16.mxu0 %v19068_v40  ;;  %17588 = vmatprep.subr.bf16.mxu1 %v19069_v27  ;;  %v8369_v49 = vpack.c.bf16 %v8367_v50, %v8366_v37  ;;  %v19094_v63 = vld [vmem:[%s25401_s2 + $0x138] sm:$0xff]   ;;  %v19096_v40 = vld [vmem:[%s25403_s4 + $0x140] sm:$0xff]   ;;  %v19106_v50 = vld [vmem:[%s25403_s4 + $0x110] sm:$0xff]  }
0x10e1   : > { %8430 = vmatprep.mubr.bf16.mxu0 %v20097_v23  ;;  %8483 = vmatprep.mubr.bf16.mxu1 %v20097_v23  ;;  %v19097_v27 = vld [vmem:[%s25403_s4 + $0x1c0] sm:$0xff]   ;;  %v19107_v37 = vld [vmem:[%s25403_s4 + $0x190] sm:$0xff]  }
0x10e3   : > { %17561 = vmatpush3.bf16.msra.mxu0 %v19070_v14  ;;  %17589 = vmatpush3.bf16.msra.mxu1 %v19071_v25  ;;  %v19101_v14 = vld [vmem:[%s25403_s4 + $0x1c8] sm:$0xff]  }
0x10e4   : > { %17562 = vmatprep.subr.bf16.mxu0 %v19072_v30  ;;  %17590 = vmatprep.subr.bf16.mxu1 %v19073_v32  ;;  %v19102_v25 = vld [vmem:[%s25403_s4 + $0x108] sm:$0xff]   ;;  %v19104_v30 = vld [vmem:[%s25403_s4 + $0x150] sm:$0xff]  }
0x10e5   : > { %v19105_v32 = vld [vmem:[%s25403_s4 + $0x1d0] sm:$0xff]  }
0x10e6   : > { %15895 = vmatmul.mubr.msk.bf16.gmra.mrb[116].mxu0 %vm1230_vm0, %v8369_v49  ;;  %15897 = vmatmul.mubr.msk.bf16.gmra.mrb[116].mxu1 %vm1230_vm0, %v8369_v49  ;;  %v19110_v49 = vld [vmem:[%s25403_s4 + $0x118] sm:$0xff]  }
0x10e7   : > { %17563 = vmatpush3.bf16.msra.mxu0 %v19074_v41  ;;  %17591 = vmatpush3.bf16.msra.mxu1 %v19075_v21  ;;  %v19108_v41 = vld [vmem:[%s25403_s4 + $0x158] sm:$0xff]  }
0x10e8   : > { %17564 = vmatprep.subr.bf16.mxu0 %v19076_v24  ;;  %17592 = vmatprep.subr.bf16.mxu1 %v19077_v18  ;;  %v19109_v21 = vld [vmem:[%s25403_s4 + $0x1d8] sm:$0xff]   ;;  %v19112_v18 = vld [vmem:[%s25403_s4 + $0x160] sm:$0xff]  }
0x10e9   : > { %8925 = vmatprep.mubr.bf16.mxu0 %v22759_v42  ;;  %8974 = vmatprep.mubr.bf16.mxu1 %v22761_v11  ;;  %v19111_v24 = vld [vmem:[%s25403_s4 + $0x198] sm:$0xff]  }
0x10eb   : > { %17565 = vmatpush3.bf16.msra.mxu0 %v19078_v28  ;;  %17593 = vmatpush3.bf16.msra.mxu1 %v19079_v16  ;;  %v19113_v28 = vld [vmem:[%s25403_s4 + $0x1e0] sm:$0xff]  }
0x10ec   : > { %17566 = vmatprep.subr.bf16.mxu0 %v19080_v6  ;;  %17594 = vmatprep.subr.bf16.mxu1 %v19081_v20  ;;  %v19114_v16 = vld [vmem:[%s25403_s4 + $0x120] sm:$0xff]   ;;  %v19116_v20 = vld [vmem:[%s25403_s4 + $0x168] sm:$0xff]  }
0x10ed   : > { %v19115_v6 = vld [vmem:[%s25403_s4 + $0x1a0] sm:$0xff]  }
0x10ef   : > { %17567 = vmatpush3.bf16.msra.mxu0 %v19082_v29  ;;  %17595 = vmatpush3.bf16.msra.mxu1 %v19083_v15  ;;  %v19117_v29 = vld [vmem:[%s25403_s4 + $0x1e8] sm:$0xff]  }
0x10f0   : > { %17568 = vmatprep.subr.bf16.mxu0 %v19084_v33  ;;  %17596 = vmatprep.subr.bf16.mxu1 %v19085_v34  ;;  %v19118_v15 = vld [vmem:[%s25403_s4 + $0x128] sm:$0xff]   ;;  %v19120_v34 = vld [vmem:[%s25403_s4 + $0x170] sm:$0xff]  }
0x10f1   : > { %v19119_v33 = vld [vmem:[%s25403_s4 + $0x1a8] sm:$0xff]  }
0x10f3   : > { %17569 = vmatpush3.bf16.msra.mxu0 %v19086_v38  ;;  %17597 = vmatpush3.bf16.msra.mxu1 %v19087_v60  ;;  %v19121_v38 = vld [vmem:[%s25403_s4 + $0x1f0] sm:$0xff]  }
0x10f4   : > { %17570 = vmatprep.subr.bf16.mxu0 %v19088_v48  ;;  %17598 = vmatprep.subr.bf16.mxu1 %v19089_v36  ;;  %v19122_v60 = vld [vmem:[%s25403_s4 + $0x130] sm:$0xff]   ;;  %v19124_v36 = vld [vmem:[%s25403_s4 + $0x178] sm:$0xff]  }
0x10f5   : > { %v19123_v48 = vld [vmem:[%s25403_s4 + $0x1b0] sm:$0xff]  }
0x10f7   : > { %17571 = vmatpush3.bf16.msra.mxu0 %v19090_v39  ;;  %17599 = vmatpush3.bf16.msra.mxu1 %v19091_v61  ;;  %v19125_v39 = vld [vmem:[%s25403_s4 + $0x1f8] sm:$0xff]  }
0x10f8   : > { %17572 = vmatprep.subr.bf16.mxu0 %v19092_v45  ;;  %17600 = vmatprep.subr.bf16.mxu1 %v19093_v62  ;;  %v19126_v61 = vld [vmem:[%s25403_s4 + $0x138] sm:$0xff]  }
0x10f9   : > { %v19127_v45 = vld [vmem:[%s25403_s4 + $0x1b8] sm:$0xff]  }
0x10fb   : > { %17573 = vmatpush3.bf16.msra.mxu0 %v19094_v63  ;;  %17601 = vmatpush3.bf16.msra.mxu1 %v19095_v0 }
0x10fc   : > { %17614 = vmatprep.subr.bf16.mxu0 %v19096_v40  ;;  %17642 = vmatprep.subr.bf16.mxu1 %v19097_v27 }
0x10fe   : > { %8926 = vmatmul.mubr.bf16.vlgmr.msra.gmra.mrb[120].mxu0 %v22844_v43  ;;  %8975 = vmatmul.mubr.bf16.vlgmr.msra.gmra.mrb[120].mxu1 %v22846_v31 }
0x10ff   : > { %17615 = vmatpush3.bf16.msra.mxu0 %v19098_v47  ;;  %17643 = vmatpush3.bf16.msra.mxu1 %v19099_v22 }
0x1100   : > { %17616 = vmatprep.subr.bf16.mxu0 %v19100_v13  ;;  %17644 = vmatprep.subr.bf16.mxu1 %v19101_v14 }
0x1101   : > { %8933 = vmatprep.mubr.bf16.mxu0 %v22863_v9  ;;  %8982 = vmatprep.mubr.bf16.mxu1 %v22865_v52 }
0x1103   : > { %17617 = vmatpush3.bf16.msra.mxu0 %v19102_v25  ;;  %17645 = vmatpush3.bf16.msra.mxu1 %v19103_v17 }
0x1104   : > { %17618 = vmatprep.subr.bf16.mxu0 %v19104_v30  ;;  %17646 = vmatprep.subr.bf16.mxu1 %v19105_v32 }
0x1106   : > { %8934 = vmatmul.mubr.bf16.gmra.mrb[124].mxu0 %v22887_v35  ;;  %8983 = vmatmul.mubr.bf16.gmra.mrb[124].mxu1 %v22889_v3 }
0x1107   : > { %17619 = vmatpush3.bf16.msra.mxu0 %v19106_v50  ;;  %17647 = vmatpush3.bf16.msra.mxu1 %v19107_v37 }
0x1108   : > { %17620 = vmatprep.subr.bf16.mxu0 %v19108_v41  ;;  %17648 = vmatprep.subr.bf16.mxu1 %v19109_v21 }
0x1109   : > { %9286 = vmatprep.mubr.bf16.mxu0 %v22759_v42  ;;  %9335 = vmatprep.mubr.bf16.mxu1 %v22761_v11 }
0x110b   : > { %17621 = vmatpush3.bf16.msra.mxu0 %v19110_v49  ;;  %17649 = vmatpush3.bf16.msra.mxu1 %v19111_v24 }
0x110c   : > { %17622 = vmatprep.subr.bf16.mxu0 %v19112_v18  ;;  %17650 = vmatprep.subr.bf16.mxu1 %v19113_v28 }
0x110f   : > { %17623 = vmatpush3.bf16.msra.mxu0 %v19114_v16  ;;  %17651 = vmatpush3.bf16.msra.mxu1 %v19115_v6 }
0x1110   : > { %17624 = vmatprep.subr.bf16.mxu0 %v19116_v20  ;;  %17652 = vmatprep.subr.bf16.mxu1 %v19117_v29 }
0x1113   : > { %17625 = vmatpush3.bf16.msra.mxu0 %v19118_v15  ;;  %17653 = vmatpush3.bf16.msra.mxu1 %v19119_v33  ;;  %v15963_v33 = vld [vmem:[%s25402_s3 + $0x1] ss:$0 sm:$0xff] }
0x1114   : > { %17626 = vmatprep.subr.bf16.mxu0 %v19120_v34  ;;  %17654 = vmatprep.subr.bf16.mxu1 %v19121_v38 }
0x1117   : > { %17627 = vmatpush3.bf16.msra.mxu0 %v19122_v60  ;;  %17655 = vmatpush3.bf16.msra.mxu1 %v19123_v48 }
0x1118   : > { %17628 = vmatprep.subr.bf16.mxu0 %v19124_v36  ;;  %17656 = vmatprep.subr.bf16.mxu1 %v19125_v39 }
0x111b   : > { %17629 = vmatpush3.bf16.msra.mxu0 %v19126_v61  ;;  %17657 = vmatpush3.bf16.msra.mxu1 %v19127_v45 }
0x111c   : > { %9469 = vmatprep.subr.bf16.mxu1 %v22759_v42 }
0x111e   : > { %9287 = vmatmul.mubr.bf16.vlgmr.msra.gmra.mrb[128].mxu0 %v22844_v43  ;;  %9336 = vmatmul.mubr.bf16.vlgmr.msra.gmra.mrb[128].mxu1 %v22846_v31 }
0x111f   : > { %9294 = vmatprep.mubr.bf16.mxu0 %v22863_v9  ;;  %9343 = vmatprep.mubr.bf16.mxu1 %v22865_v52 }
0x1120   : > { %9470 = vmatpush1.bf16.msra.mxu1 %v22844_v43 }
0x1121   : > { %9471 = vmatprep.subr.bf16.mxu1 %v23090_v51 }
0x1124   : > { %9472 = vmatpush1.bf16.msra.mxu1 %v23098_v1 }
0x1126   : > { %9295 = vmatmul.mubr.bf16.gmra.mrb[132].mxu0 %v22887_v35  ;;  %9344 = vmatmul.mubr.bf16.gmra.mrb[132].mxu1 %v22889_v3 }
0x1127   : > { %9501 = vmatprep.mubr.bf16.mxu1 %v20097_v23 }
0x11b1   : > { %v8422_v62 = vpop.f32.mrb[112].mxu0  ;;  %v8475_v63 = vpop.f32.mrb[112].mxu1 }
0x11b2   : > { %v8424_v0 = vpop.f32.mrb[113].mxu0  ;;  %v8477_v40 = vpop.f32.mrb[113].mxu1 }
0x11b3   : > { %v8426_v27 = vpop.f32.mrb[114].mxu0  ;;  %v8479_v47 = vpop.f32.mrb[114].mxu1 }
0x11b4   : > { %v23339_v22 = vpack.c.bf16 %v8426_v27, %v8422_v62  ;;  %v23341_v13 = vpack.c.bf16 %v8479_v47, %v8475_v63  ;;  %v8428_v14 = vpop.f32.mrb[115].mxu0  ;;  %v8481_v25 = vpop.f32.mrb[115].mxu1 }
0x11b5   : > { %v23343_v17 = vpack.c.bf16 %v8428_v14, %v8424_v0  ;;  %v23345_v30 = vpack.c.bf16 %v8481_v25, %v8477_v40 }
0x11b9   : > { %v8432_v32 = vpop.f32.mrb[116].mxu0  ;;  %v8485_v50 = vpop.f32.mrb[116].mxu1 }
0x11ba   : > { %v8434_v37 = vpop.f32.mrb[117].mxu0  ;;  %v8487_v41 = vpop.f32.mrb[117].mxu1 }
0x11bb   : > { %v8436_v21 = vpop.f32.mrb[118].mxu0  ;;  %v8489_v49 = vpop.f32.mrb[118].mxu1 }
0x11bc   : > { %v23347_v24 = vpack.c.bf16 %v8436_v21, %v8432_v32  ;;  %v23349_v18 = vpack.c.bf16 %v8489_v49, %v8485_v50  ;;  %v8438_v28 = vpop.f32.mrb[119].mxu0  ;;  %v8491_v16 = vpop.f32.mrb[119].mxu1 }
0x11bd   : > { %v23351_v6 = vpack.c.bf16 %v8438_v28, %v8434_v37  ;;  %v23353_v20 = vpack.c.bf16 %v8491_v16, %v8487_v41 }
0x11d1   : > { %v17574_v29 = vpop.f32.mrb[120].mxu0  ;;  %v17602_v15 = vpop.f32.mrb[120].mxu1 }
0x11d2   : > { %v17575_v34 = vpop.f32.mrb[121].mxu0  ;;  %v17603_v38 = vpop.f32.mrb[121].mxu1 }
0x11d3   : > { %v17576_v60 = vadd.f32 %v17575_v34, %v17574_v29  ;;  %v17604_v48 = vadd.f32 %v17603_v38, %v17602_v15  ;;  %v17577_v36 = vpop.f32.mrb[122].mxu0  ;;  %v17605_v39 = vpop.f32.mrb[122].mxu1 }
0x11d4   : > { %v17578_v61 = vpop.f32.mrb[123].mxu0  ;;  %v17606_v45 = vpop.f32.mrb[123].mxu1 }
0x11d5   : > { %v8928_v62 = vadd.f32 %v17576_v60, %v15963_v33  ;;  %v17579_v63 = vadd.f32 %v17578_v61, %v17577_v36  ;;  %v17607_v0 = vadd.f32 %v17606_v45, %v17605_v39 }
0x11d7   : > { %v8977_v40 = vadd.f32 %v17604_v48, %v8928_v62  ;;  %v8931_v27 = vadd.f32 %v17579_v63, %v15963_v33  ;;  %v16061_v62 = vld [vmem:[%s25404_s5 + $0x1] ss:$0 sm:$0xff] }
0x11d9   : > { %v8980_v47 = vadd.f32 %v17607_v0, %v8931_v27  ;;  %v17580_v14 = vpop.f32.mrb[124].mxu0  ;;  %v17608_v25 = vpop.f32.mrb[124].mxu1 }
0x11da   : > { %v17581_v32 = vpop.f32.mrb[125].mxu0  ;;  %v17609_v50 = vpop.f32.mrb[125].mxu1 }
0x11db   : > { %v9354_v37 = vpack.c.bf16 %v8980_v47, %v8977_v40  ;;  %v17582_v41 = vadd.f32 %v17581_v32, %v17580_v14  ;;  %v17583_v21 = vpop.f32.mrb[126].mxu0  ;;  %v17610_v49 = vadd.f32 %v17609_v50, %v17608_v25  ;;  %v17611_v28 = vpop.f32.mrb[126].mxu1 }
0x11dc   : > { %v17584_v16 = vpop.f32.mrb[127].mxu0  ;;  %v17612_v29 = vpop.f32.mrb[127].mxu1 }
0x11dd   : > { %17822 = vmatprep.subr.bf16.mxu0 %v9354_v37  ;;  %v8936_v15 = vadd.f32 %v17582_v41, %v15963_v33  ;;  %v17585_v34 = vadd.f32 %v17584_v16, %v17583_v21  ;;  %v17613_v38 = vadd.f32 %v17612_v29, %v17611_v28 }
0x11de   : > { %17823 = vmatpush3.bf16.xpose.msra.mxu0 %v9354_v37 }
0x11df   : > { %v8939_v60 = vadd.f32 %v17585_v34, %v15963_v33  ;;  %v8985_v48 = vadd.f32 %v17610_v49, %v8936_v15 }
0x11e1   : > { %v8988_v36 = vadd.f32 %v17613_v38, %v8939_v60 }
0x11e3   : > { %v9355_v39 = vpack.c.bf16 %v8988_v36, %v8985_v48 }
0x11e5   : > { %17824 = vmatprep.subr.bf16.mxu0 %v9355_v39 }
0x11e6   : > { %17825 = vmatpush3.bf16.xpose.msra.mxu0 %v9355_v39 }
0x11e7   : > { %9522 = vmatprep.subr.bf16.mxu0 %v22761_v11 }
0x11f1   : > { %v17630_v61 = vpop.f32.mrb[128].mxu0  ;;  %v17658_v45 = vpop.f32.mrb[128].mxu1 }
0x11f2   : > { %v17631_v63 = vpop.f32.mrb[129].mxu0  ;;  %v17659_v0 = vpop.f32.mrb[129].mxu1 }
0x11f3   : > { %v17632_v40 = vadd.f32 %v17631_v63, %v17630_v61  ;;  %v17660_v27 = vadd.f32 %v17659_v0, %v17658_v45  ;;  %v17633_v47 = vpop.f32.mrb[130].mxu0  ;;  %v17661_v14 = vpop.f32.mrb[130].mxu1 }
0x11f4   : > { %v17634_v33 = vpop.f32.mrb[131].mxu0  ;;  %v17662_v25 = vpop.f32.mrb[131].mxu1 }
0x11f5   : > { %v9289_v32 = vadd.f32 %v17632_v40, %v16061_v62  ;;  %v17635_v50 = vadd.f32 %v17634_v33, %v17633_v47  ;;  %v17663_v37 = vadd.f32 %v17662_v25, %v17661_v14 }
0x11f7   : > { %v9338_v41 = vadd.f32 %v17660_v27, %v9289_v32  ;;  %v9292_v21 = vadd.f32 %v17635_v50, %v16061_v62 }
0x11f9   : > { %v9341_v49 = vadd.f32 %v17663_v37, %v9292_v21  ;;  %v17636_v28 = vpop.f32.mrb[132].mxu0  ;;  %v17664_v16 = vpop.f32.mrb[132].mxu1 }
0x11fa   : > { %v17637_v29 = vpop.f32.mrb[133].mxu0  ;;  %v17665_v15 = vpop.f32.mrb[133].mxu1 }
0x11fb   : > { %v17638_v34 = vadd.f32 %v17637_v29, %v17636_v28  ;;  %v17666_v38 = vadd.f32 %v17665_v15, %v17664_v16  ;;  %v17639_v60 = vpop.f32.mrb[134].mxu0  ;;  %v17667_v48 = vpop.f32.mrb[134].mxu1  ;;  %v9352_v36 = vpack.c.bf16 %v9341_v49, %v9338_v41 }
0x11fc   : > { %v17640_v39 = vpop.f32.mrb[135].mxu0  ;;  %v17668_v61 = vpop.f32.mrb[135].mxu1 }
0x11fd   : > { %v9297_v45 = vadd.f32 %v17638_v34, %v16061_v62  ;;  %v17641_v63 = vadd.f32 %v17640_v39, %v17639_v60  ;;  %v17669_v0 = vadd.f32 %v17668_v61, %v17667_v48  ;;  %17826 = vmatprep.mubr.bf16.mxu0 %v9352_v36 }
0x11ff   : > { %v9346_v40 = vadd.f32 %v17666_v38, %v9297_v45  ;;  %v9300_v47 = vadd.f32 %v17641_v63, %v16061_v62 }
0x1201   : > { %v9349_v27 = vadd.f32 %v17669_v0, %v9300_v47 }
0x1203   : > { %v9353_v14 = vpack.c.bf16 %v9349_v27, %v9346_v40 }
0x1205   : > { %17827 = vmatmul.mubr.bf16.vlgmr.msra.gmra.mrb[136].mxu0 %v9353_v14 }
0x1206   : > { %9523 = vmatpush1.bf16.msra.mxu0 %v22846_v31  ;;  %9554 = vmatprep.mubr.bf16.mxu0 %v20097_v23 }
0x1207   : > { %9524 = vmatprep.subr.bf16.mxu0 %v23094_v19 }
0x120a   : > { %9525 = vmatpush1.bf16.msra.mxu0 %v23102_v46 }
0x12d8   : > { %v17828_v33 = vpop.f32.mrb[136].mxu0 }
0x12d9   : > { %v9390_v25 = vpop.f32.mrb[137].mxu0  ;;  %v9407_v41 = vmul.f32 0.0078125, %v17828_v33 }
0x12da   : > { %v9405_v32 = vmul.f32 0.0078125, %v9390_v25  ;;  %v17829_v50 = vpop.f32.mrb[138].mxu0 }
0x12db   : > { %v9393_v37 = vpop.f32.mrb[139].mxu0  ;;  %v9408_v49 = vmul.f32 0.0078125, %v17829_v50  ;;  %v9415_v16 = vsel %vm1230_vm0, %v9407_v41, -inf }
0x12dc   : > { %v9406_v21 = vmul.f32 0.0078125, %v9393_v37  ;;  %v9409_v62 = vsel %vm1230_vm0, %v9405_v32, -inf }
0x12dd   : > { %9410 = vmax.xlane.f32.xlu0 %v9409_v62  ;;  %v9418_v29 = vsel %vm1240_vm1, %v9408_v49, -inf }
0x12de   : > { %v9412_v28 = vsel %vm1230_vm0, %v9406_v21, -inf }
0x12df   : > { %9413 = vmax.xlane.f32.xlu1 %v9412_v28 }
0x12e1   : > { %9416 = vmax.xlane.f32.xlu0 %v9415_v16 }
0x12e3   : > { %9419 = vmax.xlane.f32.xlu1 %v9418_v29 }
0x136a   : > { %v9411_v15 = vpop.xlane.xlu0 %9410 }
0x136b   : > { %v9421_v34 = vsub.f32 %v9405_v32, %v9411_v15 }
0x136c   : > { %v9414_v38 = vpop.xlane.xlu1 %9413 }
0x136d   : > { %v9425_v60 = vmul.f32 1.442695, %v9421_v34  ;;  %v9422_v48 = vsub.f32 %v9406_v21, %v9414_v38  ;;  %v19133_v21 = vld [vmem:[%s25405_s6 + $0x40c] ss:$16 sps:$4 sm:$0xff]   ;;  %v16094_v38 = vld [vmem:[%s25400_s1 + $0x20] sm:$0xff] }
0x136e   : > { %v9417_v36 = vpop.xlane.xlu0 %9416  ;;  %10457 = vmatprep.subr.bf16.mxu0 %v19133_v21  ;;  %v19137_v21 = vld [vmem:[%s25405_s6 + $0x428] ss:$16 sps:$4 sm:$0xff]  }
0x136f   : > { %20024 = vpow2.f32 %v9425_v60  ;;  %v9427_v39 = vmul.f32 1.442695, %v9422_v48  ;;  %v9423_v61 = vsub.f32 %v9407_v41, %v9417_v36  ;;  %v19130_v41 = vld [vmem:[%s25405_s6 + $0x404] ss:$16 sps:$4 sm:$0xff]   ;;  %v16095_v60 = vld [vmem:[%s25400_s1 + $0x28] sm:$0xff] }
0x1370   : > { %v9420_v45 = vpop.xlane.xlu1 %9419  ;;  %10351 = vmatprep.subr.bf16.mxu1 %v19130_v41  ;;  %v19134_v41 = vld [vmem:[%s25405_s6 + $0x420] ss:$16 sps:$4 sm:$0xff]  }
0x1371   : > { %20026 = vpow2.f32 %v9427_v39  ;;  %v9429_v63 = vmul.f32 1.442695, %v9423_v61  ;;  %v9424_v0 = vsub.f32 %v9408_v49, %v9420_v45 }
0x1373   : > { %20028 = vpow2.f32 %v9429_v63  ;;  %v9431_v40 = vmul.f32 1.442695, %v9424_v0 }
0x1375   : > { %20030 = vpow2.f32 %v9431_v40  ;;  %v19128_v40 = vld [vmem:[%s25405_s6 + $0x400] ss:$16 sps:$4 sm:$0xff]  }
0x1379   : > { %v20025_v47 = vpop.eup %20024 }
0x137a   : > { %v9433_v27 = vsel %vm1230_vm0, %v20025_v47, 0.0 }
0x137b   : > { %v20027_v14 = vpop.eup %20026  ;;  %9434 = vadd.xlane.f32.xlu0 %v9433_v27  ;;  %v16097_v27 = vld [vmem:[%s25400_s1 + $0x38] sm:$0x1] }
0x137c   : > { %v9436_v33 = vsel %vm1230_vm0, %v20027_v14, 0.0 }
0x137d   : > { %v20029_v25 = vpop.eup %20028  ;;  %9437 = vadd.xlane.f32.xlu1 %v9436_v33  ;;  %v19139_v33 = vld [vmem:[%s25405_s6 + $0x42c] ss:$16 sps:$4 sm:$0xff]  }
0x137e   : > { %v9439_v32 = vsel %vm1230_vm0, %v20029_v25, 0.0 }
0x137f   : > { %v20031_v50 = vpop.eup %20030  ;;  %9440 = vadd.xlane.f32.xlu0 %v9439_v32 }
0x1380   : > { %v9442_v37 = vsel %vm1240_vm1, %v20031_v50, 0.0 }
0x1381   : > { %9443 = vadd.xlane.f32.xlu1 %v9442_v37 }
0x1408   : > { %v9435_v62 = vpop.xlane.xlu0 %9434 }
0x1409   : > { %20032 = vrcp.f32 %v9435_v62  ;;  %v19145_v62 = vld [vmem:[%s25405_s6 + $0x44c] ss:$16 sps:$4 sm:$0xff]  }
0x140a   : > { %v9438_v49 = vpop.xlane.xlu1 %9437 }
0x140b   : > { %20034 = vrcp.f32 %v9438_v49 }
0x140c   : > { %v9441_v28 = vpop.xlane.xlu0 %9440 }
0x140d   : > { %20036 = vrcp.f32 %v9441_v28 }
0x140e   : > { %v9444_v16 = vpop.xlane.xlu1 %9443 }
0x140f   : > { %20038 = vrcp.f32 %v9444_v16  ;;  %v19140_v16 = vld [vmem:[%s25405_s6 + $0x440] ss:$16 sps:$4 sm:$0xff]  }
0x1413   : > { %v20033_v29 = vpop.eup %20032 }
0x1414   : > { %v9449_v15 = vmul.f32 %v20033_v29, %v20025_v47  ;;  %v19131_v47 = vld [vmem:[%s25405_s6 + $0x408] ss:$16 sps:$4 sm:$0xff]  }
0x1415   : > { %v20035_v34 = vpop.eup %20034  ;;  %v19143_v29 = vld [vmem:[%s25405_s6 + $0x448] ss:$16 sps:$4 sm:$0xff]  }
0x1416   : > { %v9450_v48 = vmul.f32 %v20035_v34, %v20027_v14  ;;  %v9457_v39 = vadd.f32 %v16094_v38, %v9449_v15  ;;  %v19136_v14 = vld [vmem:[%s25405_s6 + $0x424] ss:$16 sps:$4 sm:$0xff]   ;;  %v19151_v34 = vld [vmem:[%s25405_s6 + $0x46c] ss:$16 sps:$4 sm:$0xff]   ;;  %v19146_v38 = vld [vmem:[%s25405_s6 + $0x460] ss:$16 sps:$4 sm:$0xff]  }
0x1417   : > { %v20037_v36 = vpop.eup %20036  ;;  %v19148_v15 = vld [vmem:[%s25405_s6 + $0x464] ss:$16 sps:$4 sm:$0xff]  }
0x1418   : > { %v9458_v61 = vadd.f32 %v16095_v60, %v9450_v48  ;;  %v9451_v32 = vmul.f32 %v20037_v36, %v20029_v25  ;;  %v19142_v25 = vld [vmem:[%s25405_s6 + $0x444] ss:$16 sps:$4 sm:$0xff]   ;;  %v19149_v60 = vld [vmem:[%s25405_s6 + $0x468] ss:$16 sps:$4 sm:$0xff]   ;;  %v19157_v36 = vld [vmem:[%s25405_s6 + $0x48c] ss:$16 sps:$4 sm:$0xff]  }
0x1419   : > { %v20039_v45 = vpop.eup %20038  ;;  %v19154_v48 = vld [vmem:[%s25405_s6 + $0x484] ss:$16 sps:$4 sm:$0xff]  }
0x141a   : > { %v9461_v63 = vpack.c.bf16 %v9458_v61, %v9457_v39  ;;  %v9452_v0 = vmul.f32 %v20039_v45, %v20031_v50  ;;  %v16096_v50 = vld [vmem:[%s25400_s1 + $0x30] sm:$0xff]  ;;  %v19155_v61 = vld [vmem:[%s25405_s6 + $0x488] ss:$16 sps:$4 sm:$0xff]  }
0x141b   : > { %v9459_v49 = vadd.f32 %v16096_v50, %v9451_v32  ;;  %v19152_v39 = vld [vmem:[%s25405_s6 + $0x480] ss:$16 sps:$4 sm:$0xff]   ;;  %v19160_v45 = vld [vmem:[%s25405_s6 + $0x4a4] ss:$16 sps:$4 sm:$0xff]   ;;  %v19175_v50 = vld [vmem:[%s25405_s6 + $0x4ec] ss:$16 sps:$4 sm:$0xff]  }
0x141c   : > { %16098 = vmatmul.mubr.msk.bf16.vlgmr.msra.gmra.mrb[136].mxu1 %vm1230_vm0, %v9461_v63  ;;  %16100 = vmatmul.mubr.msk.bf16.vlgmr.msra.gmra.mrb[140].mxu0 %vm1230_vm0, %v9461_v63  ;;  %v9460_v37 = vadd.f32 %v16097_v27, %v9452_v0  ;;  %v19163_v63 = vld [vmem:[%s25405_s6 + $0x4ac] ss:$16 sps:$4 sm:$0xff]   ;;  %v19158_v0 = vld [vmem:[%s25405_s6 + $0x4a0] ss:$16 sps:$4 sm:$0xff]   ;;  %v19172_v32 = vld [vmem:[%s25405_s6 + $0x4e4] ss:$16 sps:$4 sm:$0xff]  }
0x141d   : > { %9511 = vmatprep.mubr.bf16.mxu1 %v20097_v23  ;;  %9564 = vmatprep.mubr.bf16.mxu0 %v20097_v23  ;;  %v19169_v27 = vld [vmem:[%s25405_s6 + $0x4cc] ss:$16 sps:$4 sm:$0xff]  }
0x141e   : > { %10352 = vmatpush1.bf16.msra.mxu1 %v19128_v40  ;;  %10458 = vmatpush1.bf16.msra.mxu0 %v19131_v47  ;;  %v9462_v28 = vpack.c.bf16 %v9460_v37, %v9459_v49  ;;  %v19161_v40 = vld [vmem:[%s25405_s6 + $0x4a8] ss:$16 sps:$4 sm:$0xff]   ;;  %v19166_v47 = vld [vmem:[%s25405_s6 + $0x4c4] ss:$16 sps:$4 sm:$0xff]   ;;  %v19170_v37 = vld [vmem:[%s25405_s6 + $0x4e0] ss:$16 sps:$4 sm:$0xff]  }
0x141f   : > { %10353 = vmatprep.subr.bf16.mxu1 %v19136_v14  ;;  %10459 = vmatprep.subr.bf16.mxu0 %v19139_v33  ;;  %v19164_v14 = vld [vmem:[%s25405_s6 + $0x4c0] ss:$16 sps:$4 sm:$0xff]   ;;  %v19167_v33 = vld [vmem:[%s25405_s6 + $0x4c8] ss:$16 sps:$4 sm:$0xff]  }
0x1420   : > { %v19179_v49 = vld [vmem:[%s25405_s6 + $0x508] ss:$16 sps:$4 sm:$0xff]  }
0x1422   : > { %10354 = vmatpush1.bf16.msra.mxu1 %v19134_v41  ;;  %10460 = vmatpush1.bf16.msra.mxu0 %v19137_v21  ;;  %v19173_v41 = vld [vmem:[%s25405_s6 + $0x4e8] ss:$16 sps:$4 sm:$0xff]   ;;  %v19178_v21 = vld [vmem:[%s25405_s6 + $0x504] ss:$16 sps:$4 sm:$0xff]  }
0x1423   : > { %10355 = vmatprep.subr.bf16.mxu1 %v19142_v25  ;;  %10461 = vmatprep.subr.bf16.mxu0 %v19145_v62  ;;  %v19181_v25 = vld [vmem:[%s25405_s6 + $0x50c] ss:$16 sps:$4 sm:$0xff]   ;;  %v19176_v62 = vld [vmem:[%s25405_s6 + $0x500] ss:$16 sps:$4 sm:$0xff]  }
0x1424   : > { %16099 = vmatmul.mubr.msk.bf16.gmra.mrb[140].mxu1 %vm1230_vm0, %v9462_v28  ;;  %16101 = vmatmul.mubr.msk.bf16.gmra.mrb[144].mxu0 %vm1230_vm0, %v9462_v28  ;;  %v19184_v28 = vld [vmem:[%s25405_s6 + $0x524] ss:$16 sps:$4 sm:$0xff]  }
0x1426   : > { %10356 = vmatpush1.bf16.msra.mxu1 %v19140_v16  ;;  %10462 = vmatpush1.bf16.msra.mxu0 %v19143_v29  ;;  %v19187_v16 = vld [vmem:[%s25405_s6 + $0x52c] ss:$16 sps:$4 sm:$0xff]   ;;  %v19182_v29 = vld [vmem:[%s25405_s6 + $0x520] ss:$16 sps:$4 sm:$0xff]  }
0x1427   : > { %10357 = vmatprep.subr.bf16.mxu1 %v19148_v15  ;;  %10463 = vmatprep.subr.bf16.mxu0 %v19151_v34  ;;  %v19185_v15 = vld [vmem:[%s25405_s6 + $0x528] ss:$16 sps:$4 sm:$0xff]   ;;  %v19190_v34 = vld [vmem:[%s25405_s6 + $0x544] ss:$16 sps:$4 sm:$0xff]  }
0x142a   : > { %10358 = vmatpush1.bf16.msra.mxu1 %v19146_v38  ;;  %10464 = vmatpush1.bf16.msra.mxu0 %v19149_v60  ;;  %v19193_v38 = vld [vmem:[%s25405_s6 + $0x54c] ss:$16 sps:$4 sm:$0xff]   ;;  %v19188_v60 = vld [vmem:[%s25405_s6 + $0x540] ss:$16 sps:$4 sm:$0xff]  }
0x142b   : > { %10359 = vmatprep.subr.bf16.mxu1 %v19154_v48  ;;  %10465 = vmatprep.subr.bf16.mxu0 %v19157_v36  ;;  %v19191_v48 = vld [vmem:[%s25405_s6 + $0x548] ss:$16 sps:$4 sm:$0xff]   ;;  %v19196_v36 = vld [vmem:[%s25405_s6 + $0x564] ss:$16 sps:$4 sm:$0xff]  }
0x142e   : > { %10360 = vmatpush1.bf16.msra.mxu1 %v19152_v39  ;;  %10466 = vmatpush1.bf16.msra.mxu0 %v19155_v61  ;;  %v19199_v39 = vld [vmem:[%s25405_s6 + $0x56c] ss:$16 sps:$4 sm:$0xff]   ;;  %v19194_v61 = vld [vmem:[%s25405_s6 + $0x560] ss:$16 sps:$4 sm:$0xff]  }
0x142f   : > { %10361 = vmatprep.subr.bf16.mxu1 %v19160_v45  ;;  %10467 = vmatprep.subr.bf16.mxu0 %v19163_v63  ;;  %v19197_v45 = vld [vmem:[%s25405_s6 + $0x568] ss:$16 sps:$4 sm:$0xff]   ;;  %v19202_v63 = vld [vmem:[%s25405_s6 + $0x584] ss:$16 sps:$4 sm:$0xff]  }
0x1432   : > { %10362 = vmatpush1.bf16.msra.mxu1 %v19158_v0  ;;  %10468 = vmatpush1.bf16.msra.mxu0 %v19161_v40  ;;  %v19205_v0 = vld [vmem:[%s25405_s6 + $0x58c] ss:$16 sps:$4 sm:$0xff]   ;;  %v19200_v40 = vld [vmem:[%s25405_s6 + $0x580] ss:$16 sps:$4 sm:$0xff]  }
0x1433   : > { %10363 = vmatprep.subr.bf16.mxu1 %v19166_v47  ;;  %10469 = vmatprep.subr.bf16.mxu0 %v19169_v27  ;;  %v19203_v47 = vld [vmem:[%s25405_s6 + $0x588] ss:$16 sps:$4 sm:$0xff]   ;;  %v19208_v27 = vld [vmem:[%s25405_s6 + $0x5a4] ss:$16 sps:$4 sm:$0xff]  }
0x1436   : > { %10364 = vmatpush1.bf16.msra.mxu1 %v19164_v14  ;;  %10470 = vmatpush1.bf16.msra.mxu0 %v19167_v33  ;;  %v19211_v14 = vld [vmem:[%s25405_s6 + $0x5ac] ss:$16 sps:$4 sm:$0xff]   ;;  %v19206_v33 = vld [vmem:[%s25405_s6 + $0x5a0] ss:$16 sps:$4 sm:$0xff]  }
0x1437   : > { %10365 = vmatprep.subr.bf16.mxu1 %v19172_v32  ;;  %10471 = vmatprep.subr.bf16.mxu0 %v19175_v50  ;;  %v19209_v32 = vld [vmem:[%s25405_s6 + $0x5a8] ss:$16 sps:$4 sm:$0xff]   ;;  %v19214_v50 = vld [vmem:[%s25405_s6 + $0x5c4] ss:$16 sps:$4 sm:$0xff]  }
0x143a   : > { %10366 = vmatpush1.bf16.msra.mxu1 %v19170_v37  ;;  %10472 = vmatpush1.bf16.msra.mxu0 %v19173_v41  ;;  %v19217_v37 = vld [vmem:[%s25405_s6 + $0x5cc] ss:$16 sps:$4 sm:$0xff]   ;;  %v19212_v41 = vld [vmem:[%s25405_s6 + $0x5c0] ss:$16 sps:$4 sm:$0xff]  }
0x143b   : > { %10367 = vmatprep.subr.bf16.mxu1 %v19178_v21  ;;  %10473 = vmatprep.subr.bf16.mxu0 %v19181_v25  ;;  %v19215_v21 = vld [vmem:[%s25405_s6 + $0x5c8] ss:$16 sps:$4 sm:$0xff]   ;;  %v19220_v25 = vld [vmem:[%s25405_s6 + $0x5e4] ss:$16 sps:$4 sm:$0xff]  }
0x143e   : > { %10368 = vmatpush1.bf16.msra.mxu1 %v19176_v62  ;;  %10474 = vmatpush1.bf16.msra.mxu0 %v19179_v49  ;;  %v19223_v62 = vld [vmem:[%s25405_s6 + $0x5ec] ss:$16 sps:$4 sm:$0xff]   ;;  %v19218_v49 = vld [vmem:[%s25405_s6 + $0x5e0] ss:$16 sps:$4 sm:$0xff]  }
0x143f   : > { %10369 = vmatprep.subr.bf16.mxu1 %v19184_v28  ;;  %10475 = vmatprep.subr.bf16.mxu0 %v19187_v16  ;;  %v19221_v28 = vld [vmem:[%s25405_s6 + $0x5e8] ss:$16 sps:$4 sm:$0xff]   ;;  %v19226_v16 = vld [vmem:[%s25405_s6 + $0x604] ss:$16 sps:$4 sm:$0xff]  }
0x1442   : > { %10370 = vmatpush1.bf16.msra.mxu1 %v19182_v29  ;;  %10476 = vmatpush1.bf16.msra.mxu0 %v19185_v15  ;;  %v19229_v29 = vld [vmem:[%s25405_s6 + $0x60c] ss:$16 sps:$4 sm:$0xff]  }
0x1443   : > { %10371 = vmatprep.subr.bf16.mxu1 %v19190_v34  ;;  %10477 = vmatprep.subr.bf16.mxu0 %v19193_v38 }
0x1446   : > { %10372 = vmatpush1.bf16.msra.mxu1 %v19188_v60  ;;  %10478 = vmatpush1.bf16.msra.mxu0 %v19191_v48 }
0x1447   : > { %10373 = vmatprep.subr.bf16.mxu1 %v19196_v36  ;;  %10479 = vmatprep.subr.bf16.mxu0 %v19199_v39 }
0x144a   : > { %10374 = vmatpush1.bf16.msra.mxu1 %v19194_v61  ;;  %10480 = vmatpush1.bf16.msra.mxu0 %v19197_v45 }
0x144b   : > { %10375 = vmatprep.subr.bf16.mxu1 %v19202_v63  ;;  %10481 = vmatprep.subr.bf16.mxu0 %v19205_v0 }
0x144e   : > { %10376 = vmatpush1.bf16.msra.mxu1 %v19200_v40  ;;  %10482 = vmatpush1.bf16.msra.mxu0 %v19203_v47  ;;  %v19224_v47 = vld [vmem:[%s25405_s6 + $0x600] ss:$16 sps:$4 sm:$0xff]  }
0x144f   : > { %10377 = vmatprep.subr.bf16.mxu1 %v19208_v27  ;;  %10483 = vmatprep.subr.bf16.mxu0 %v19211_v14  ;;  %v19227_v27 = vld [vmem:[%s25405_s6 + $0x608] ss:$16 sps:$4 sm:$0xff]   ;;  %v19232_v14 = vld [vmem:[%s25405_s6 + $0x624] ss:$16 sps:$4 sm:$0xff]  }
0x1452   : > { %10378 = vmatpush1.bf16.msra.mxu1 %v19206_v33  ;;  %10484 = vmatpush1.bf16.msra.mxu0 %v19209_v32  ;;  %v19235_v33 = vld [vmem:[%s25405_s6 + $0x62c] ss:$16 sps:$4 sm:$0xff]  }
0x1453   : > { %10379 = vmatprep.subr.bf16.mxu1 %v19214_v50  ;;  %10485 = vmatprep.subr.bf16.mxu0 %v19217_v37  ;;  %v19230_v37 = vld [vmem:[%s25405_s6 + $0x620] ss:$16 sps:$4 sm:$0xff]  }
0x1456   : > { %10380 = vmatpush1.bf16.msra.mxu1 %v19212_v41  ;;  %10486 = vmatpush1.bf16.msra.mxu0 %v19215_v21  ;;  %v19233_v41 = vld [vmem:[%s25405_s6 + $0x628] ss:$16 sps:$4 sm:$0xff]  }
0x1457   : > { %10381 = vmatprep.subr.bf16.mxu1 %v19220_v25  ;;  %10487 = vmatprep.subr.bf16.mxu0 %v19223_v62  ;;  %v19238_v62 = vld [vmem:[%s25405_s6 + $0x644] ss:$16 sps:$4 sm:$0xff]  }
0x145a   : > { %10382 = vmatpush1.bf16.msra.mxu1 %v19218_v49  ;;  %10488 = vmatpush1.bf16.msra.mxu0 %v19221_v28  ;;  %v19241_v49 = vld [vmem:[%s25405_s6 + $0x64c] ss:$16 sps:$4 sm:$0xff]  }
0x145b   : > { %10404 = vmatprep.subr.bf16.mxu1 %v19226_v16  ;;  %10510 = vmatprep.subr.bf16.mxu0 %v19229_v29 }
0x14ef   : > { %v9503_v15 = vpop.f32.mrb[136].mxu1  ;;  %v9556_v34 = vpop.f32.mrb[140].mxu0 }
0x14f0   : > { %v9505_v38 = vpop.f32.mrb[137].mxu1  ;;  %v9558_v60 = vpop.f32.mrb[141].mxu0 }
0x14f1   : > { %v9507_v48 = vpop.f32.mrb[138].mxu1  ;;  %v9560_v36 = vpop.f32.mrb[142].mxu0 }
0x14f2   : > { %v9575_v39 = vpack.c.bf16 %v9507_v48, %v9503_v15  ;;  %v23590_v61 = vpack.c.bf16 %v9560_v36, %v9556_v34  ;;  %v9509_v45 = vpop.f32.mrb[139].mxu1  ;;  %v9562_v63 = vpop.f32.mrb[143].mxu0  ;;  %v19236_v36 = vld [vmem:[%s25405_s6 + $0x640] ss:$16 sps:$4 sm:$0xff]  }
0x14f3   : > { %v9576_v0 = vpack.c.bf16 %v9509_v45, %v9505_v38  ;;  %v9578_v40 = vpack.c.bf16 %v9562_v63, %v9558_v60  ;;  %v19244_v45 = vld [vmem:[%s25405_s6 + $0x664] ss:$16 sps:$4 sm:$0xff]   ;;  %v19247_v63 = vld [vmem:[%s25405_s6 + $0x66c] ss:$16 sps:$4 sm:$0xff]  }
0x14f5   : > { %10383 = vmatprep.mubr.bf16.mxu1 %v9576_v0  ;;  %10489 = vmatprep.mubr.bf16.mxu0 %v9576_v0  ;;  %v19242_v0 = vld [vmem:[%s25405_s6 + $0x660] ss:$16 sps:$4 sm:$0xff]  }
0x14f6   : > { %10384 = vmatmul.mubr.bf16.vlgmr.msra.gmra.mrb[144].mxu1 %v9575_v39  ;;  %10490 = vmatmul.mubr.bf16.vlgmr.msra.gmra.mrb[148].mxu0 %v9575_v39  ;;  %v19239_v39 = vld [vmem:[%s25405_s6 + $0x648] ss:$16 sps:$4 sm:$0xff]  }
0x14f7   : > { %10405 = vmatpush1.bf16.msra.mxu1 %v19224_v47  ;;  %10511 = vmatpush1.bf16.msra.mxu0 %v19227_v27  ;;  %v9513_v32 = vpop.f32.mrb[140].mxu1  ;;  %v9566_v50 = vpop.f32.mrb[144].mxu0  ;;  %v19245_v47 = vld [vmem:[%s25405_s6 + $0x668] ss:$16 sps:$4 sm:$0xff]   ;;  %v19250_v27 = vld [vmem:[%s25405_s6 + $0x684] ss:$16 sps:$4 sm:$0xff]  }
0x14f8   : > { %v9515_v21 = vpop.f32.mrb[141].mxu1  ;;  %v9568_v25 = vpop.f32.mrb[145].mxu0  ;;  %10406 = vmatprep.subr.bf16.mxu1 %v19232_v14  ;;  %10512 = vmatprep.subr.bf16.mxu0 %v19235_v33  ;;  %v19253_v14 = vld [vmem:[%s25405_s6 + $0x68c] ss:$16 sps:$4 sm:$0xff]   ;;  %v19248_v33 = vld [vmem:[%s25405_s6 + $0x680] ss:$16 sps:$4 sm:$0xff]  }
0x14f9   : > { %v9517_v28 = vpop.f32.mrb[142].mxu1  ;;  %v9570_v16 = vpop.f32.mrb[146].mxu0 }
0x14fa   : > { %v9579_v29 = vpack.c.bf16 %v9517_v28, %v9513_v32  ;;  %v23616_v15 = vpack.c.bf16 %v9570_v16, %v9566_v50  ;;  %v9519_v34 = vpop.f32.mrb[143].mxu1  ;;  %v9572_v38 = vpop.f32.mrb[147].mxu0  ;;  %v19256_v32 = vld [vmem:[%s25405_s6 + $0x6a4] ss:$16 sps:$4 sm:$0xff]   ;;  %v19259_v50 = vld [vmem:[%s25405_s6 + $0x6ac] ss:$16 sps:$4 sm:$0xff]  }
0x14fb   : > { %v9580_v60 = vpack.c.bf16 %v9519_v34, %v9515_v21  ;;  %v23618_v48 = vpack.c.bf16 %v9572_v38, %v9568_v25  ;;  %10407 = vmatpush1.bf16.msra.mxu1 %v19230_v37  ;;  %10513 = vmatpush1.bf16.msra.mxu0 %v19233_v41  ;;  %v19254_v37 = vld [vmem:[%s25405_s6 + $0x6a0] ss:$16 sps:$4 sm:$0xff]   ;;  %v19257_v41 = vld [vmem:[%s25405_s6 + $0x6a8] ss:$16 sps:$4 sm:$0xff]   ;;  %v19262_v21 = vld [vmem:[%s25405_s6 + $0x6c4] ss:$16 sps:$4 sm:$0xff]  }
0x14fc   : > { %10408 = vmatprep.subr.bf16.mxu1 %v19238_v62  ;;  %10514 = vmatprep.subr.bf16.mxu0 %v19241_v49  ;;  %v19265_v25 = vld [vmem:[%s25405_s6 + $0x6cc] ss:$16 sps:$4 sm:$0xff]   ;;  %v19260_v62 = vld [vmem:[%s25405_s6 + $0x6c0] ss:$16 sps:$4 sm:$0xff]   ;;  %v19263_v49 = vld [vmem:[%s25405_s6 + $0x6c8] ss:$16 sps:$4 sm:$0xff]  }
0x14fd   : > { %10393 = vmatprep.mubr.bf16.mxu1 %v9580_v60  ;;  %10499 = vmatprep.mubr.bf16.mxu0 %v9580_v60  ;;  %v19268_v28 = vld [vmem:[%s25405_s6 + $0x6e4] ss:$16 sps:$4 sm:$0xff]   ;;  %v19271_v16 = vld [vmem:[%s25405_s6 + $0x6ec] ss:$16 sps:$4 sm:$0xff]   ;;  %v19269_v34 = vld [vmem:[%s25405_s6 + $0x6e8] ss:$16 sps:$4 sm:$0xff]  }
0x14fe   : > { %10394 = vmatmul.mubr.bf16.gmra.mrb[148].mxu1 %v9579_v29  ;;  %10500 = vmatmul.mubr.bf16.gmra.mrb[152].mxu0 %v9579_v29  ;;  %v19266_v29 = vld [vmem:[%s25405_s6 + $0x6e0] ss:$16 sps:$4 sm:$0xff]   ;;  %v19274_v38 = vld [vmem:[%s25405_s6 + $0x704] ss:$16 sps:$4 sm:$0xff]   ;;  %v19277_v60 = vld [vmem:[%s25405_s6 + $0x70c] ss:$16 sps:$4 sm:$0xff]  }
0x14ff   : > { %10409 = vmatpush1.bf16.msra.mxu1 %v19236_v36  ;;  %10515 = vmatpush1.bf16.msra.mxu0 %v19239_v39  ;;  %v19272_v36 = vld [vmem:[%s25405_s6 + $0x700] ss:$16 sps:$4 sm:$0xff]   ;;  %v19275_v39 = vld [vmem:[%s25405_s6 + $0x708] ss:$16 sps:$4 sm:$0xff]  }
0x1500   : > { %10436 = vmatprep.mubr.bf16.mxu1 %v9578_v40  ;;  %10542 = vmatprep.mubr.bf16.mxu0 %v9578_v40  ;;  %v19251_v40 = vld [vmem:[%s25405_s6 + $0x688] ss:$16 sps:$4 sm:$0xff]  }
0x1501   : > { %10410 = vmatprep.subr.bf16.mxu1 %v19244_v45  ;;  %10516 = vmatprep.subr.bf16.mxu0 %v19247_v63  ;;  %v19280_v45 = vld [vmem:[%s25405_s6 + $0x724] ss:$16 sps:$4 sm:$0xff]   ;;  %v19283_v63 = vld [vmem:[%s25405_s6 + $0x72c] ss:$16 sps:$4 sm:$0xff]  }
0x1503   : > { %10411 = vmatpush1.bf16.msra.mxu1 %v19242_v0  ;;  %10517 = vmatpush1.bf16.msra.mxu0 %v19245_v47  ;;  %v19278_v0 = vld [vmem:[%s25405_s6 + $0x720] ss:$16 sps:$4 sm:$0xff]   ;;  %v19281_v47 = vld [vmem:[%s25405_s6 + $0x728] ss:$16 sps:$4 sm:$0xff]  }
0x1504   : > { %10412 = vmatprep.subr.bf16.mxu1 %v19250_v27  ;;  %10518 = vmatprep.subr.bf16.mxu0 %v19253_v14  ;;  %v19286_v27 = vld [vmem:[%s25405_s6 + $0x744] ss:$16 sps:$4 sm:$0xff]   ;;  %v19289_v14 = vld [vmem:[%s25405_s6 + $0x74c] ss:$16 sps:$4 sm:$0xff]  }
0x1507   : > { %10413 = vmatpush1.bf16.msra.mxu1 %v19248_v33  ;;  %10519 = vmatpush1.bf16.msra.mxu0 %v19251_v40  ;;  %v19284_v33 = vld [vmem:[%s25405_s6 + $0x740] ss:$16 sps:$4 sm:$0xff]   ;;  %v19287_v40 = vld [vmem:[%s25405_s6 + $0x748] ss:$16 sps:$4 sm:$0xff]  }
0x1508   : > { %10414 = vmatprep.subr.bf16.mxu1 %v19256_v32  ;;  %10520 = vmatprep.subr.bf16.mxu0 %v19259_v50  ;;  %v19292_v32 = vld [vmem:[%s25405_s6 + $0x764] ss:$16 sps:$4 sm:$0xff]   ;;  %v19295_v50 = vld [vmem:[%s25405_s6 + $0x76c] ss:$16 sps:$4 sm:$0xff]  }
0x150b   : > { %10415 = vmatpush1.bf16.msra.mxu1 %v19254_v37  ;;  %10521 = vmatpush1.bf16.msra.mxu0 %v19257_v41  ;;  %v19290_v37 = vld [vmem:[%s25405_s6 + $0x760] ss:$16 sps:$4 sm:$0xff]   ;;  %v19293_v41 = vld [vmem:[%s25405_s6 + $0x768] ss:$16 sps:$4 sm:$0xff]  }
0x150c   : > { %10416 = vmatprep.subr.bf16.mxu1 %v19262_v21  ;;  %10522 = vmatprep.subr.bf16.mxu0 %v19265_v25  ;;  %v19298_v21 = vld [vmem:[%s25405_s6 + $0x784] ss:$16 sps:$4 sm:$0xff]   ;;  %v19301_v25 = vld [vmem:[%s25405_s6 + $0x78c] ss:$16 sps:$4 sm:$0xff]  }
0x150f   : > { %10417 = vmatpush1.bf16.msra.mxu1 %v19260_v62  ;;  %10523 = vmatpush1.bf16.msra.mxu0 %v19263_v49  ;;  %v19296_v62 = vld [vmem:[%s25405_s6 + $0x780] ss:$16 sps:$4 sm:$0xff]   ;;  %v19299_v49 = vld [vmem:[%s25405_s6 + $0x788] ss:$16 sps:$4 sm:$0xff]  }
0x1510   : > { %10418 = vmatprep.subr.bf16.mxu1 %v19268_v28  ;;  %10524 = vmatprep.subr.bf16.mxu0 %v19271_v16  ;;  %v19304_v28 = vld [vmem:[%s25405_s6 + $0x7a4] ss:$16 sps:$4 sm:$0xff]   ;;  %v19307_v16 = vld [vmem:[%s25405_s6 + $0x7ac] ss:$16 sps:$4 sm:$0xff]  }
0x1513   : > { %10419 = vmatpush1.bf16.msra.mxu1 %v19266_v29  ;;  %10525 = vmatpush1.bf16.msra.mxu0 %v19269_v34  ;;  %v19302_v29 = vld [vmem:[%s25405_s6 + $0x7a0] ss:$16 sps:$4 sm:$0xff]   ;;  %v19305_v34 = vld [vmem:[%s25405_s6 + $0x7a8] ss:$16 sps:$4 sm:$0xff]  }
0x1514   : > { %10420 = vmatprep.subr.bf16.mxu1 %v19274_v38  ;;  %10526 = vmatprep.subr.bf16.mxu0 %v19277_v60  ;;  %v19310_v38 = vld [vmem:[%s25405_s6 + $0x7c4] ss:$16 sps:$4 sm:$0xff]   ;;  %v19313_v60 = vld [vmem:[%s25405_s6 + $0x7cc] ss:$16 sps:$4 sm:$0xff]  }
0x1517   : > { %10421 = vmatpush1.bf16.msra.mxu1 %v19272_v36  ;;  %10527 = vmatpush1.bf16.msra.mxu0 %v19275_v39  ;;  %v19308_v36 = vld [vmem:[%s25405_s6 + $0x7c0] ss:$16 sps:$4 sm:$0xff]   ;;  %v19311_v39 = vld [vmem:[%s25405_s6 + $0x7c8] ss:$16 sps:$4 sm:$0xff]  }
0x1518   : > { %10422 = vmatprep.subr.bf16.mxu1 %v19280_v45  ;;  %10528 = vmatprep.subr.bf16.mxu0 %v19283_v63  ;;  %v19316_v45 = vld [vmem:[%s25405_s6 + $0x7e4] ss:$16 sps:$4 sm:$0xff]   ;;  %v19319_v63 = vld [vmem:[%s25405_s6 + $0x7ec] ss:$16 sps:$4 sm:$0xff]  }
0x151b   : > { %10423 = vmatpush1.bf16.msra.mxu1 %v19278_v0  ;;  %10529 = vmatpush1.bf16.msra.mxu0 %v19281_v47  ;;  %v19314_v0 = vld [vmem:[%s25405_s6 + $0x7e0] ss:$16 sps:$4 sm:$0xff]   ;;  %v19317_v47 = vld [vmem:[%s25405_s6 + $0x7e8] ss:$16 sps:$4 sm:$0xff]  }
0x151c   : > { %10424 = vmatprep.subr.bf16.mxu1 %v19286_v27  ;;  %10530 = vmatprep.subr.bf16.mxu0 %v19289_v14  ;;  %v19322_v27 = vld [vmem:[%s25405_s6 + $0x4] ss:$16 sps:$4 sm:$0xff]   ;;  %v19325_v14 = vld [vmem:[%s25405_s6 + $0xc] ss:$16 sps:$4 sm:$0xff]  }
0x151f   : > { %10425 = vmatpush1.bf16.msra.mxu1 %v19284_v33  ;;  %10531 = vmatpush1.bf16.msra.mxu0 %v19287_v40  ;;  %v19320_v33 = vld [vmem:[%s25405_s6] ss:$16 sps:$4 sm:$0xff]   ;;  %v19323_v40 = vld [vmem:[%s25405_s6 + $0x8] ss:$16 sps:$4 sm:$0xff]  }
0x1520   : > { %10426 = vmatprep.subr.bf16.mxu1 %v19292_v32  ;;  %10532 = vmatprep.subr.bf16.mxu0 %v19295_v50  ;;  %v19328_v32 = vld [vmem:[%s25405_s6 + $0x24] ss:$16 sps:$4 sm:$0xff]   ;;  %v19331_v50 = vld [vmem:[%s25405_s6 + $0x2c] ss:$16 sps:$4 sm:$0xff]  }
0x1523   : > { %10427 = vmatpush1.bf16.msra.mxu1 %v19290_v37  ;;  %10533 = vmatpush1.bf16.msra.mxu0 %v19293_v41  ;;  %v19326_v37 = vld [vmem:[%s25405_s6 + $0x20] ss:$16 sps:$4 sm:$0xff]   ;;  %v19329_v41 = vld [vmem:[%s25405_s6 + $0x28] ss:$16 sps:$4 sm:$0xff]  }
0x1524   : > { %10428 = vmatprep.subr.bf16.mxu1 %v19298_v21  ;;  %10534 = vmatprep.subr.bf16.mxu0 %v19301_v25  ;;  %v19332_v21 = vld [vmem:[%s25405_s6 + $0x40] ss:$16 sps:$4 sm:$0xff]   ;;  %v19335_v25 = vld [vmem:[%s25405_s6 + $0x48] ss:$16 sps:$4 sm:$0xff]  }
0x1527   : > { %10429 = vmatpush1.bf16.msra.mxu1 %v19296_v62  ;;  %10535 = vmatpush1.bf16.msra.mxu0 %v19299_v49  ;;  %v19340_v62 = vld [vmem:[%s25405_s6 + $0x64] ss:$16 sps:$4 sm:$0xff]   ;;  %v19343_v49 = vld [vmem:[%s25405_s6 + $0x6c] ss:$16 sps:$4 sm:$0xff]  }
0x1528   : > { %10430 = vmatprep.subr.bf16.mxu1 %v19304_v28  ;;  %10536 = vmatprep.subr.bf16.mxu0 %v19307_v16  ;;  %v19338_v28 = vld [vmem:[%s25405_s6 + $0x60] ss:$16 sps:$4 sm:$0xff]   ;;  %v19341_v16 = vld [vmem:[%s25405_s6 + $0x68] ss:$16 sps:$4 sm:$0xff]  }
0x152b   : > { %10431 = vmatpush1.bf16.msra.mxu1 %v19302_v29  ;;  %10537 = vmatpush1.bf16.msra.mxu0 %v19305_v34  ;;  %v19344_v29 = vld [vmem:[%s25405_s6 + $0x80] ss:$16 sps:$4 sm:$0xff]   ;;  %v19347_v34 = vld [vmem:[%s25405_s6 + $0x88] ss:$16 sps:$4 sm:$0xff]  }
0x152c   : > { %10432 = vmatprep.subr.bf16.mxu1 %v19310_v38  ;;  %10538 = vmatprep.subr.bf16.mxu0 %v19313_v60  ;;  %v19352_v38 = vld [vmem:[%s25405_s6 + $0xa4] ss:$16 sps:$4 sm:$0xff]   ;;  %v19355_v60 = vld [vmem:[%s25405_s6 + $0xac] ss:$16 sps:$4 sm:$0xff]  }
0x152f   : > { %10433 = vmatpush1.bf16.msra.mxu1 %v19308_v36  ;;  %10539 = vmatpush1.bf16.msra.mxu0 %v19311_v39  ;;  %v19350_v36 = vld [vmem:[%s25405_s6 + $0xa0] ss:$16 sps:$4 sm:$0xff]   ;;  %v19353_v39 = vld [vmem:[%s25405_s6 + $0xa8] ss:$16 sps:$4 sm:$0xff]  }
0x1530   : > { %10434 = vmatprep.subr.bf16.mxu1 %v19316_v45  ;;  %10540 = vmatprep.subr.bf16.mxu0 %v19319_v63  ;;  %v19358_v45 = vld [vmem:[%s25405_s6 + $0xc4] ss:$16 sps:$4 sm:$0xff]   ;;  %v19361_v63 = vld [vmem:[%s25405_s6 + $0xcc] ss:$16 sps:$4 sm:$0xff]  }
0x1533   : > { %10435 = vmatpush1.bf16.msra.mxu1 %v19314_v0  ;;  %10541 = vmatpush1.bf16.msra.mxu0 %v19317_v47  ;;  %v19356_v0 = vld [vmem:[%s25405_s6 + $0xc0] ss:$16 sps:$4 sm:$0xff]   ;;  %v19359_v47 = vld [vmem:[%s25405_s6 + $0xc8] ss:$16 sps:$4 sm:$0xff]  }
0x1534   : > { %11203 = vmatprep.subr.bf16.mxu1 %v19322_v27  ;;  %11309 = vmatprep.subr.bf16.mxu0 %v19325_v14  ;;  %v19364_v27 = vld [vmem:[%s25405_s6 + $0xe4] ss:$16 sps:$4 sm:$0xff]   ;;  %v19367_v14 = vld [vmem:[%s25405_s6 + $0xec] ss:$16 sps:$4 sm:$0xff]  }
0x1536   : > { %10437 = vmatmul.mubr.bf16.vlgmr.msra.gmra.mrb[144].mxu1 %v23590_v61  ;;  %10543 = vmatmul.mubr.bf16.vlgmr.msra.gmra.mrb[148].mxu0 %v23590_v61  ;;  %v19334_v61 = vld [vmem:[%s25405_s6 + $0x44] ss:$16 sps:$4 sm:$0xff]  }
0x1537   : > { %10446 = vmatprep.mubr.bf16.mxu1 %v23618_v48  ;;  %10552 = vmatprep.mubr.bf16.mxu0 %v23618_v48  ;;  %v19337_v48 = vld [vmem:[%s25405_s6 + $0x4c] ss:$16 sps:$4 sm:$0xff]  }
0x1538   : > { %11204 = vmatpush1.bf16.msra.mxu1 %v19320_v33  ;;  %11310 = vmatpush1.bf16.msra.mxu0 %v19323_v40  ;;  %v19362_v33 = vld [vmem:[%s25405_s6 + $0xe0] ss:$16 sps:$4 sm:$0xff]   ;;  %v19365_v40 = vld [vmem:[%s25405_s6 + $0xe8] ss:$16 sps:$4 sm:$0xff]  }
0x1539   : > { %11205 = vmatprep.subr.bf16.mxu1 %v19328_v32  ;;  %11311 = vmatprep.subr.bf16.mxu0 %v19331_v50  ;;  %v19370_v32 = vld [vmem:[%s25405_s6 + $0x104] ss:$16 sps:$4 sm:$0xff]   ;;  %v19373_v50 = vld [vmem:[%s25405_s6 + $0x10c] ss:$16 sps:$4 sm:$0xff]  }
0x153c   : > { %11206 = vmatpush1.bf16.msra.mxu1 %v19326_v37  ;;  %11312 = vmatpush1.bf16.msra.mxu0 %v19329_v41  ;;  %v19368_v37 = vld [vmem:[%s25405_s6 + $0x100] ss:$16 sps:$4 sm:$0xff]   ;;  %v19371_v41 = vld [vmem:[%s25405_s6 + $0x108] ss:$16 sps:$4 sm:$0xff]  }
0x153d   : > { %11207 = vmatprep.subr.bf16.mxu1 %v19334_v61  ;;  %11313 = vmatprep.subr.bf16.mxu0 %v19337_v48  ;;  %v19376_v61 = vld [vmem:[%s25405_s6 + $0x124] ss:$16 sps:$4 sm:$0xff]   ;;  %v19379_v48 = vld [vmem:[%s25405_s6 + $0x12c] ss:$16 sps:$4 sm:$0xff]  }
0x153e   : > { %10447 = vmatmul.mubr.bf16.gmra.mrb[148].mxu1 %v23616_v15  ;;  %10553 = vmatmul.mubr.bf16.gmra.mrb[152].mxu0 %v23616_v15  ;;  %v19346_v15 = vld [vmem:[%s25405_s6 + $0x84] ss:$16 sps:$4 sm:$0xff]  }
0x153f   : > { %11235 = vmatprep.mubr.bf16.mxu1 %v23343_v17  ;;  %11341 = vmatprep.mubr.bf16.mxu0 %v23343_v17  ;;  %v19349_v17 = vld [vmem:[%s25405_s6 + $0x8c] ss:$16 sps:$4 sm:$0xff]  }
0x1540   : > { %11208 = vmatpush1.bf16.msra.mxu1 %v19332_v21  ;;  %11314 = vmatpush1.bf16.msra.mxu0 %v19335_v25  ;;  %v19374_v21 = vld [vmem:[%s25405_s6 + $0x120] ss:$16 sps:$4 sm:$0xff]   ;;  %v19377_v25 = vld [vmem:[%s25405_s6 + $0x128] ss:$16 sps:$4 sm:$0xff]  }
0x1541   : > { %11209 = vmatprep.subr.bf16.mxu1 %v19340_v62  ;;  %11315 = vmatprep.subr.bf16.mxu0 %v19343_v49  ;;  %v19382_v62 = vld [vmem:[%s25405_s6 + $0x144] ss:$16 sps:$4 sm:$0xff]   ;;  %v19385_v49 = vld [vmem:[%s25405_s6 + $0x14c] ss:$16 sps:$4 sm:$0xff]  }
0x1544   : > { %11210 = vmatpush1.bf16.msra.mxu1 %v19338_v28  ;;  %11316 = vmatpush1.bf16.msra.mxu0 %v19341_v16  ;;  %v19380_v28 = vld [vmem:[%s25405_s6 + $0x140] ss:$16 sps:$4 sm:$0xff]   ;;  %v19383_v16 = vld [vmem:[%s25405_s6 + $0x148] ss:$16 sps:$4 sm:$0xff]  }
0x1545   : > { %11211 = vmatprep.subr.bf16.mxu1 %v19346_v15  ;;  %11317 = vmatprep.subr.bf16.mxu0 %v19349_v17  ;;  %v19388_v15 = vld [vmem:[%s25405_s6 + $0x164] ss:$16 sps:$4 sm:$0xff]   ;;  %v19391_v17 = vld [vmem:[%s25405_s6 + $0x16c] ss:$16 sps:$4 sm:$0xff]  }
0x1548   : > { %11212 = vmatpush1.bf16.msra.mxu1 %v19344_v29  ;;  %11318 = vmatpush1.bf16.msra.mxu0 %v19347_v34  ;;  %v19386_v29 = vld [vmem:[%s25405_s6 + $0x160] ss:$16 sps:$4 sm:$0xff]   ;;  %v19389_v34 = vld [vmem:[%s25405_s6 + $0x168] ss:$16 sps:$4 sm:$0xff]  }
0x1549   : > { %11213 = vmatprep.subr.bf16.mxu1 %v19352_v38  ;;  %11319 = vmatprep.subr.bf16.mxu0 %v19355_v60  ;;  %v19394_v38 = vld [vmem:[%s25405_s6 + $0x184] ss:$16 sps:$4 sm:$0xff]   ;;  %v19397_v60 = vld [vmem:[%s25405_s6 + $0x18c] ss:$16 sps:$4 sm:$0xff]  }
0x154c   : > { %11214 = vmatpush1.bf16.msra.mxu1 %v19350_v36  ;;  %11320 = vmatpush1.bf16.msra.mxu0 %v19353_v39  ;;  %v19392_v36 = vld [vmem:[%s25405_s6 + $0x180] ss:$16 sps:$4 sm:$0xff]   ;;  %v19395_v39 = vld [vmem:[%s25405_s6 + $0x188] ss:$16 sps:$4 sm:$0xff]  }
0x154d   : > { %11215 = vmatprep.subr.bf16.mxu1 %v19358_v45  ;;  %11321 = vmatprep.subr.bf16.mxu0 %v19361_v63  ;;  %v19400_v45 = vld [vmem:[%s25405_s6 + $0x1a4] ss:$16 sps:$4 sm:$0xff]   ;;  %v19403_v63 = vld [vmem:[%s25405_s6 + $0x1ac] ss:$16 sps:$4 sm:$0xff]  }
0x1550   : > { %11216 = vmatpush1.bf16.msra.mxu1 %v19356_v0  ;;  %11322 = vmatpush1.bf16.msra.mxu0 %v19359_v47  ;;  %v19398_v0 = vld [vmem:[%s25405_s6 + $0x1a0] ss:$16 sps:$4 sm:$0xff]   ;;  %v19401_v47 = vld [vmem:[%s25405_s6 + $0x1a8] ss:$16 sps:$4 sm:$0xff]  }
0x1551   : > { %11217 = vmatprep.subr.bf16.mxu1 %v19364_v27  ;;  %11323 = vmatprep.subr.bf16.mxu0 %v19367_v14  ;;  %v19406_v27 = vld [vmem:[%s25405_s6 + $0x1c4] ss:$16 sps:$4 sm:$0xff]   ;;  %v19409_v14 = vld [vmem:[%s25405_s6 + $0x1cc] ss:$16 sps:$4 sm:$0xff]  }
0x1554   : > { %11218 = vmatpush1.bf16.msra.mxu1 %v19362_v33  ;;  %11324 = vmatpush1.bf16.msra.mxu0 %v19365_v40  ;;  %v19404_v33 = vld [vmem:[%s25405_s6 + $0x1c0] ss:$16 sps:$4 sm:$0xff]   ;;  %v19407_v40 = vld [vmem:[%s25405_s6 + $0x1c8] ss:$16 sps:$4 sm:$0xff]  }
0x1555   : > { %11219 = vmatprep.subr.bf16.mxu1 %v19370_v32  ;;  %11325 = vmatprep.subr.bf16.mxu0 %v19373_v50  ;;  %v19412_v32 = vld [vmem:[%s25405_s6 + $0x1e4] ss:$16 sps:$4 sm:$0xff]   ;;  %v19415_v50 = vld [vmem:[%s25405_s6 + $0x1ec] ss:$16 sps:$4 sm:$0xff]  }
0x1558   : > { %11220 = vmatpush1.bf16.msra.mxu1 %v19368_v37  ;;  %11326 = vmatpush1.bf16.msra.mxu0 %v19371_v41  ;;  %v19410_v37 = vld [vmem:[%s25405_s6 + $0x1e0] ss:$16 sps:$4 sm:$0xff]   ;;  %v19413_v41 = vld [vmem:[%s25405_s6 + $0x1e8] ss:$16 sps:$4 sm:$0xff]  }
0x1559   : > { %11221 = vmatprep.subr.bf16.mxu1 %v19376_v61  ;;  %11327 = vmatprep.subr.bf16.mxu0 %v19379_v48  ;;  %v19418_v61 = vld [vmem:[%s25405_s6 + $0x204] ss:$16 sps:$4 sm:$0xff]   ;;  %v19421_v48 = vld [vmem:[%s25405_s6 + $0x20c] ss:$16 sps:$4 sm:$0xff]  }
0x155c   : > { %11222 = vmatpush1.bf16.msra.mxu1 %v19374_v21  ;;  %11328 = vmatpush1.bf16.msra.mxu0 %v19377_v25  ;;  %v19416_v21 = vld [vmem:[%s25405_s6 + $0x200] ss:$16 sps:$4 sm:$0xff]   ;;  %v19419_v25 = vld [vmem:[%s25405_s6 + $0x208] ss:$16 sps:$4 sm:$0xff]  }
0x155d   : > { %11223 = vmatprep.subr.bf16.mxu1 %v19382_v62  ;;  %11329 = vmatprep.subr.bf16.mxu0 %v19385_v49  ;;  %v19424_v62 = vld [vmem:[%s25405_s6 + $0x224] ss:$16 sps:$4 sm:$0xff]   ;;  %v19427_v49 = vld [vmem:[%s25405_s6 + $0x22c] ss:$16 sps:$4 sm:$0xff]  }
0x1560   : > { %11224 = vmatpush1.bf16.msra.mxu1 %v19380_v28  ;;  %11330 = vmatpush1.bf16.msra.mxu0 %v19383_v16  ;;  %v19422_v28 = vld [vmem:[%s25405_s6 + $0x220] ss:$16 sps:$4 sm:$0xff]   ;;  %v19425_v16 = vld [vmem:[%s25405_s6 + $0x228] ss:$16 sps:$4 sm:$0xff]  }
0x1561   : > { %11225 = vmatprep.subr.bf16.mxu1 %v19388_v15  ;;  %11331 = vmatprep.subr.bf16.mxu0 %v19391_v17  ;;  %v19430_v15 = vld [vmem:[%s25405_s6 + $0x244] ss:$16 sps:$4 sm:$0xff]   ;;  %v19431_v17 = vld [vmem:[%s25405_s6 + $0x248] ss:$16 sps:$4 sm:$0xff]  }
0x1564   : > { %11226 = vmatpush1.bf16.msra.mxu1 %v19386_v29  ;;  %11332 = vmatpush1.bf16.msra.mxu0 %v19389_v34  ;;  %v19436_v29 = vld [vmem:[%s25405_s6 + $0x264] ss:$16 sps:$4 sm:$0xff]   ;;  %v19439_v34 = vld [vmem:[%s25405_s6 + $0x26c] ss:$16 sps:$4 sm:$0xff]  }
0x1565   : > { %11227 = vmatprep.subr.bf16.mxu1 %v19394_v38  ;;  %11333 = vmatprep.subr.bf16.mxu0 %v19397_v60  ;;  %v19434_v38 = vld [vmem:[%s25405_s6 + $0x260] ss:$16 sps:$4 sm:$0xff]   ;;  %v19437_v60 = vld [vmem:[%s25405_s6 + $0x268] ss:$16 sps:$4 sm:$0xff]  }
0x1568   : > { %11228 = vmatpush1.bf16.msra.mxu1 %v19392_v36  ;;  %11334 = vmatpush1.bf16.msra.mxu0 %v19395_v39  ;;  %v19442_v36 = vld [vmem:[%s25405_s6 + $0x284] ss:$16 sps:$4 sm:$0xff]   ;;  %v19440_v39 = vld [vmem:[%s25405_s6 + $0x280] ss:$16 sps:$4 sm:$0xff]  }
0x1569   : > { %11229 = vmatprep.subr.bf16.mxu1 %v19400_v45  ;;  %11335 = vmatprep.subr.bf16.mxu0 %v19403_v63  ;;  %v19448_v45 = vld [vmem:[%s25405_s6 + $0x2a4] ss:$16 sps:$4 sm:$0xff]   ;;  %v19451_v63 = vld [vmem:[%s25405_s6 + $0x2ac] ss:$16 sps:$4 sm:$0xff]  }
0x156c   : > { %11230 = vmatpush1.bf16.msra.mxu1 %v19398_v0  ;;  %11336 = vmatpush1.bf16.msra.mxu0 %v19401_v47  ;;  %v19446_v0 = vld [vmem:[%s25405_s6 + $0x2a0] ss:$16 sps:$4 sm:$0xff]   ;;  %v19449_v47 = vld [vmem:[%s25405_s6 + $0x2a8] ss:$16 sps:$4 sm:$0xff]  }
0x156d   : > { %11231 = vmatprep.subr.bf16.mxu1 %v19406_v27  ;;  %11337 = vmatprep.subr.bf16.mxu0 %v19409_v14  ;;  %v19454_v27 = vld [vmem:[%s25405_s6 + $0x2c4] ss:$16 sps:$4 sm:$0xff]   ;;  %v19457_v14 = vld [vmem:[%s25405_s6 + $0x2cc] ss:$16 sps:$4 sm:$0xff]  }
0x1570   : > { %11232 = vmatpush1.bf16.msra.mxu1 %v19404_v33  ;;  %11338 = vmatpush1.bf16.msra.mxu0 %v19407_v40  ;;  %v19452_v33 = vld [vmem:[%s25405_s6 + $0x2c0] ss:$16 sps:$4 sm:$0xff]   ;;  %v19455_v40 = vld [vmem:[%s25405_s6 + $0x2c8] ss:$16 sps:$4 sm:$0xff]  }
0x1571   : > { %11233 = vmatprep.subr.bf16.mxu1 %v19412_v32  ;;  %11339 = vmatprep.subr.bf16.mxu0 %v19415_v50  ;;  %v19460_v32 = vld [vmem:[%s25405_s6 + $0x2e4] ss:$16 sps:$4 sm:$0xff]   ;;  %v19463_v50 = vld [vmem:[%s25405_s6 + $0x2ec] ss:$16 sps:$4 sm:$0xff]  }
0x1574   : > { %11234 = vmatpush1.bf16.msra.mxu1 %v19410_v37  ;;  %11340 = vmatpush1.bf16.msra.mxu0 %v19413_v41  ;;  %v19458_v37 = vld [vmem:[%s25405_s6 + $0x2e0] ss:$16 sps:$4 sm:$0xff]   ;;  %v19461_v41 = vld [vmem:[%s25405_s6 + $0x2e8] ss:$16 sps:$4 sm:$0xff]  }
0x1575   : > { %11256 = vmatprep.subr.bf16.mxu1 %v19418_v61  ;;  %11362 = vmatprep.subr.bf16.mxu0 %v19421_v48  ;;  %v19466_v61 = vld [vmem:[%s25405_s6 + $0x304] ss:$16 sps:$4 sm:$0xff]   ;;  %v19469_v48 = vld [vmem:[%s25405_s6 + $0x30c] ss:$16 sps:$4 sm:$0xff]  }
0x1577   : > { %11236 = vmatmul.mubr.bf16.vlgmr.msra.gmra.mrb[144].mxu1 %v23339_v22  ;;  %11342 = vmatmul.mubr.bf16.vlgmr.msra.gmra.mrb[148].mxu0 %v23339_v22  ;;  %v19433_v22 = vld [vmem:[%s25405_s6 + $0x24c] ss:$16 sps:$4 sm:$0xff]  }
0x1578   : > { %11245 = vmatprep.mubr.bf16.mxu1 %v23351_v6  ;;  %11257 = vmatpush1.bf16.msra.mxu1 %v19416_v21  ;;  %v19464_v21 = vld [vmem:[%s25405_s6 + $0x300] ss:$16 sps:$4 sm:$0xff]  }
0x1579   : > { %11351 = vmatprep.mubr.bf16.mxu0 %v23351_v6  ;;  %11363 = vmatpush1.bf16.msra.mxu0 %v19419_v25  ;;  %v19428_v6 = vld [vmem:[%s25405_s6 + $0x240] ss:$16 sps:$4 sm:$0xff]   ;;  %v19467_v25 = vld [vmem:[%s25405_s6 + $0x308] ss:$16 sps:$4 sm:$0xff]  }
0x157a   : > { %11258 = vmatprep.subr.bf16.mxu1 %v19424_v62  ;;  %11364 = vmatprep.subr.bf16.mxu0 %v19427_v49  ;;  %v19472_v62 = vld [vmem:[%s25405_s6 + $0x324] ss:$16 sps:$4 sm:$0xff]   ;;  %v19475_v49 = vld [vmem:[%s25405_s6 + $0x32c] ss:$16 sps:$4 sm:$0xff]  }
0x157c   : > { %11259 = vmatpush1.bf16.msra.mxu1 %v19422_v28  ;;  %v19470_v28 = vld [vmem:[%s25405_s6 + $0x320] ss:$16 sps:$4 sm:$0xff]  }
0x157d   : > { %11365 = vmatpush1.bf16.msra.mxu0 %v19425_v16  ;;  %11260 = vmatprep.subr.bf16.mxu1 %v19430_v15  ;;  %v19473_v16 = vld [vmem:[%s25405_s6 + $0x328] ss:$16 sps:$4 sm:$0xff]   ;;  %v19478_v15 = vld [vmem:[%s25405_s6 + $0x344] ss:$16 sps:$4 sm:$0xff]  }
0x157e   : > { %11366 = vmatprep.subr.bf16.mxu0 %v19433_v22  ;;  %v19481_v22 = vld [vmem:[%s25405_s6 + $0x34c] ss:$16 sps:$4 sm:$0xff]  }
0x157f   : > { %11246 = vmatmul.mubr.bf16.gmra.mrb[148].mxu1 %v23347_v24  ;;  %11352 = vmatmul.mubr.bf16.gmra.mrb[152].mxu0 %v23347_v24  ;;  %v19445_v24 = vld [vmem:[%s25405_s6 + $0x28c] ss:$16 sps:$4 sm:$0xff]  }
0x1580   : > { %11261 = vmatpush1.bf16.msra.mxu1 %v19428_v6  ;;  %11288 = vmatprep.mubr.bf16.mxu1 %v23345_v30  ;;  %v19476_v6 = vld [vmem:[%s25405_s6 + $0x340] ss:$16 sps:$4 sm:$0xff]  }
0x1581   : > { %11367 = vmatpush1.bf16.msra.mxu0 %v19431_v17  ;;  %11394 = vmatprep.mubr.bf16.mxu0 %v23345_v30  ;;  %v19443_v30 = vld [vmem:[%s25405_s6 + $0x288] ss:$16 sps:$4 sm:$0xff]  }
0x1582   : > { %11262 = vmatprep.subr.bf16.mxu1 %v19436_v29  ;;  %11368 = vmatprep.subr.bf16.mxu0 %v19439_v34  ;;  %v19479_v17 = vld [vmem:[%s25405_s6 + $0x348] ss:$16 sps:$4 sm:$0xff]   ;;  %v19484_v29 = vld [vmem:[%s25405_s6 + $0x364] ss:$16 sps:$4 sm:$0xff]   ;;  %v19487_v34 = vld [vmem:[%s25405_s6 + $0x36c] ss:$16 sps:$4 sm:$0xff]  }
0x1584   : > { %11263 = vmatpush1.bf16.msra.mxu1 %v19434_v38  ;;  %v19482_v38 = vld [vmem:[%s25405_s6 + $0x360] ss:$16 sps:$4 sm:$0xff]  }
0x1585   : > { %11369 = vmatpush1.bf16.msra.mxu0 %v19437_v60  ;;  %11264 = vmatprep.subr.bf16.mxu1 %v19442_v36  ;;  %v19485_v60 = vld [vmem:[%s25405_s6 + $0x368] ss:$16 sps:$4 sm:$0xff]   ;;  %v19490_v36 = vld [vmem:[%s25405_s6 + $0x384] ss:$16 sps:$4 sm:$0xff]  }
0x1586   : > { %11370 = vmatprep.subr.bf16.mxu0 %v19445_v24  ;;  %v19493_v24 = vld [vmem:[%s25405_s6 + $0x38c] ss:$16 sps:$4 sm:$0xff]  }
0x1588   : > { %11265 = vmatpush1.bf16.msra.mxu1 %v19440_v39  ;;  %v19488_v39 = vld [vmem:[%s25405_s6 + $0x380] ss:$16 sps:$4 sm:$0xff]  }
0x1589   : > { %11371 = vmatpush1.bf16.msra.mxu0 %v19443_v30  ;;  %11266 = vmatprep.subr.bf16.mxu1 %v19448_v45  ;;  %v19491_v30 = vld [vmem:[%s25405_s6 + $0x388] ss:$16 sps:$4 sm:$0xff]   ;;  %v19496_v45 = vld [vmem:[%s25405_s6 + $0x3a4] ss:$16 sps:$4 sm:$0xff]  }
0x158a   : > { %11372 = vmatprep.subr.bf16.mxu0 %v19451_v63  ;;  %v19499_v63 = vld [vmem:[%s25405_s6 + $0x3ac] ss:$16 sps:$4 sm:$0xff]  }
0x158c   : > { %11267 = vmatpush1.bf16.msra.mxu1 %v19446_v0  ;;  %v19494_v0 = vld [vmem:[%s25405_s6 + $0x3a0] ss:$16 sps:$4 sm:$0xff]  }
0x158d   : > { %11373 = vmatpush1.bf16.msra.mxu0 %v19449_v47  ;;  %11268 = vmatprep.subr.bf16.mxu1 %v19454_v27  ;;  %v19497_v47 = vld [vmem:[%s25405_s6 + $0x3a8] ss:$16 sps:$4 sm:$0xff]   ;;  %v19502_v27 = vld [vmem:[%s25405_s6 + $0x3c4] ss:$16 sps:$4 sm:$0xff]  }
0x158e   : > { %11374 = vmatprep.subr.bf16.mxu0 %v19457_v14  ;;  %v19505_v14 = vld [vmem:[%s25405_s6 + $0x3cc] ss:$16 sps:$4 sm:$0xff]  }
0x1590   : > { %11269 = vmatpush1.bf16.msra.mxu1 %v19452_v33  ;;  %v19500_v33 = vld [vmem:[%s25405_s6 + $0x3c0] ss:$16 sps:$4 sm:$0xff]  }
0x1591   : > { %11375 = vmatpush1.bf16.msra.mxu0 %v19455_v40  ;;  %11270 = vmatprep.subr.bf16.mxu1 %v19460_v32  ;;  %v19503_v40 = vld [vmem:[%s25405_s6 + $0x3c8] ss:$16 sps:$4 sm:$0xff]   ;;  %v19508_v32 = vld [vmem:[%s25405_s6 + $0x3e4] ss:$16 sps:$4 sm:$0xff]  }
0x1592   : > { %11376 = vmatprep.subr.bf16.mxu0 %v19463_v50  ;;  %v19511_v50 = vld [vmem:[%s25405_s6 + $0x3ec] ss:$16 sps:$4 sm:$0xff]  }
0x1594   : > { %11271 = vmatpush1.bf16.msra.mxu1 %v19458_v37  ;;  %v19506_v37 = vld [vmem:[%s25405_s6 + $0x3e0] ss:$16 sps:$4 sm:$0xff]  }
0x1595   : > { %11377 = vmatpush1.bf16.msra.mxu0 %v19461_v41  ;;  %11272 = vmatprep.subr.bf16.mxu1 %v19466_v61  ;;  %v19509_v41 = vld [vmem:[%s25405_s6 + $0x3e8] ss:$16 sps:$4 sm:$0xff]   ;;  %v19512_v61 = vld [vmem:[%s25401_s2 + $0x240] sm:$0xff]  }
0x1596   : > { %11378 = vmatprep.subr.bf16.mxu0 %v19469_v48  ;;  %v19513_v48 = vld [vmem:[%s25401_s2 + $0x2c0] sm:$0xff]  }
0x1598   : > { %11273 = vmatpush1.bf16.msra.mxu1 %v19464_v21  ;;  %v19514_v21 = vld [vmem:[%s25401_s2 + $0x200] sm:$0xff]  }
0x1599   : > { %11379 = vmatpush1.bf16.msra.mxu0 %v19467_v25  ;;  %11274 = vmatprep.subr.bf16.mxu1 %v19472_v62  ;;  %v19515_v25 = vld [vmem:[%s25401_s2 + $0x280] sm:$0xff]   ;;  %v19516_v62 = vld [vmem:[%s25401_s2 + $0x248] sm:$0xff]  }
0x159a   : > { %11380 = vmatprep.subr.bf16.mxu0 %v19475_v49  ;;  %v19517_v49 = vld [vmem:[%s25401_s2 + $0x2c8] sm:$0xff]  }
0x159c   : > { %11275 = vmatpush1.bf16.msra.mxu1 %v19470_v28  ;;  %v19518_v28 = vld [vmem:[%s25401_s2 + $0x208] sm:$0xff]  }
0x159d   : > { %11381 = vmatpush1.bf16.msra.mxu0 %v19473_v16  ;;  %11276 = vmatprep.subr.bf16.mxu1 %v19478_v15  ;;  %v19519_v16 = vld [vmem:[%s25401_s2 + $0x288] sm:$0xff]   ;;  %v19520_v15 = vld [vmem:[%s25401_s2 + $0x250] sm:$0xff]  }
0x159e   : > { %11382 = vmatprep.subr.bf16.mxu0 %v19481_v22  ;;  %v19523_v22 = vld [vmem:[%s25401_s2 + $0x290] sm:$0xff]  }
0x15a0   : > { %11277 = vmatpush1.bf16.msra.mxu1 %v19476_v6  ;;  %v19524_v6 = vld [vmem:[%s25401_s2 + $0x258] sm:$0xff]  }
0x15a1   : > { %11383 = vmatpush1.bf16.msra.mxu0 %v19479_v17  ;;  %11278 = vmatprep.subr.bf16.mxu1 %v19484_v29  ;;  %v19525_v17 = vld [vmem:[%s25401_s2 + $0x2d8] sm:$0xff]  }
0x15a2   : > { %11384 = vmatprep.subr.bf16.mxu0 %v19487_v34  ;;  %v19526_v29 = vld [vmem:[%s25401_s2 + $0x218] sm:$0xff]  }
0x15a3   : > { %v19527_v34 = vld [vmem:[%s25401_s2 + $0x298] sm:$0xff]  }
0x15a4   : > { %11279 = vmatpush1.bf16.msra.mxu1 %v19482_v38  ;;  %v19528_v38 = vld [vmem:[%s25401_s2 + $0x260] sm:$0xff]  }
0x15a5   : > { %11385 = vmatpush1.bf16.msra.mxu0 %v19485_v60  ;;  %11280 = vmatprep.subr.bf16.mxu1 %v19490_v36  ;;  %v19530_v60 = vld [vmem:[%s25401_s2 + $0x220] sm:$0xff]  }
0x15a6   : > { %11386 = vmatprep.subr.bf16.mxu0 %v19493_v24  ;;  %v19531_v36 = vld [vmem:[%s25401_s2 + $0x2a0] sm:$0xff]   ;;  %v19532_v24 = vld [vmem:[%s25401_s2 + $0x268] sm:$0xff]  }
0x15a8   : > { %11281 = vmatpush1.bf16.msra.mxu1 %v19488_v39  ;;  %v19533_v39 = vld [vmem:[%s25401_s2 + $0x2e8] sm:$0xff]  }
0x15a9   : > { %11387 = vmatpush1.bf16.msra.mxu0 %v19491_v30  ;;  %11282 = vmatprep.subr.bf16.mxu1 %v19496_v45  ;;  %v19534_v30 = vld [vmem:[%s25401_s2 + $0x228] sm:$0xff]  }
0x15aa   : > { %11388 = vmatprep.subr.bf16.mxu0 %v19499_v63  ;;  %v19535_v45 = vld [vmem:[%s25401_s2 + $0x2a8] sm:$0xff]   ;;  %v19536_v63 = vld [vmem:[%s25401_s2 + $0x270] sm:$0xff]  }
0x15ac   : > { %11283 = vmatpush1.bf16.msra.mxu1 %v19494_v0  ;;  %v19537_v0 = vld [vmem:[%s25401_s2 + $0x2f0] sm:$0xff]  }
0x15ad   : > { %11389 = vmatpush1.bf16.msra.mxu0 %v19497_v47  ;;  %11284 = vmatprep.subr.bf16.mxu1 %v19502_v27  ;;  %v19538_v47 = vld [vmem:[%s25401_s2 + $0x230] sm:$0xff]  }
0x15ae   : > { %11390 = vmatprep.subr.bf16.mxu0 %v19505_v14  ;;  %v19539_v27 = vld [vmem:[%s25401_s2 + $0x2b0] sm:$0xff]   ;;  %v19540_v14 = vld [vmem:[%s25401_s2 + $0x278] sm:$0xff]  }
0x15b0   : > { %11285 = vmatpush1.bf16.msra.mxu1 %v19500_v33  ;;  %v19541_v33 = vld [vmem:[%s25401_s2 + $0x2f8] sm:$0xff]  }
0x15b1   : > { %11391 = vmatpush1.bf16.msra.mxu0 %v19503_v40  ;;  %11286 = vmatprep.subr.bf16.mxu1 %v19508_v32  ;;  %v19542_v40 = vld [vmem:[%s25401_s2 + $0x238] sm:$0xff]  }
0x15b2   : > { %11392 = vmatprep.subr.bf16.mxu0 %v19511_v50  ;;  %v19543_v32 = vld [vmem:[%s25401_s2 + $0x2b8] sm:$0xff]   ;;  %v19544_v50 = vld [vmem:[%s25403_s4 + $0x240] sm:$0xff]  }
0x15b4   : > { %11287 = vmatpush1.bf16.msra.mxu1 %v19506_v37  ;;  %v19545_v37 = vld [vmem:[%s25403_s4 + $0x2c0] sm:$0xff]  }
0x15b5   : > { %11393 = vmatpush1.bf16.msra.mxu0 %v19509_v41  ;;  %17674 = vmatprep.subr.bf16.mxu1 %v19512_v61  ;;  %v19546_v41 = vld [vmem:[%s25403_s4 + $0x200] sm:$0xff]  }
0x15b6   : > { %17702 = vmatprep.subr.bf16.mxu0 %v19513_v48  ;;  %v19547_v61 = vld [vmem:[%s25403_s4 + $0x280] sm:$0xff]   ;;  %v19548_v48 = vld [vmem:[%s25403_s4 + $0x248] sm:$0xff]  }
0x15b7   : > { %11289 = vmatmul.mubr.bf16.vlgmr.msra.gmra.mrb[144].mxu1 %v23341_v13 }
0x15b8   : > { %11395 = vmatmul.mubr.bf16.vlgmr.msra.gmra.mrb[148].mxu0 %v23341_v13  ;;  %11298 = vmatprep.mubr.bf16.mxu1 %v23353_v20  ;;  %v19521_v13 = vld [vmem:[%s25401_s2 + $0x2d0] sm:$0xff]  }
0x15b9   : > { %11404 = vmatprep.mubr.bf16.mxu0 %v23353_v20  ;;  %17675 = vmatpush3.bf16.msra.mxu1 %v19514_v21  ;;  %v19522_v20 = vld [vmem:[%s25401_s2 + $0x210] sm:$0xff]   ;;  %v19549_v21 = vld [vmem:[%s25403_s4 + $0x2c8] sm:$0xff]  }
0x15ba   : > { %17703 = vmatpush3.bf16.msra.mxu0 %v19515_v25  ;;  %17676 = vmatprep.subr.bf16.mxu1 %v19516_v62  ;;  %v19550_v25 = vld [vmem:[%s25403_s4 + $0x208] sm:$0xff]  }
0x15bb   : > { %17704 = vmatprep.subr.bf16.mxu0 %v19517_v49  ;;  %v19551_v62 = vld [vmem:[%s25403_s4 + $0x288] sm:$0xff]   ;;  %v19552_v49 = vld [vmem:[%s25403_s4 + $0x250] sm:$0xff]  }
0x15bd   : > { %17677 = vmatpush3.bf16.msra.mxu1 %v19518_v28  ;;  %v19553_v28 = vld [vmem:[%s25403_s4 + $0x2d0] sm:$0xff]  }
0x15be   : > { %17705 = vmatpush3.bf16.msra.mxu0 %v19519_v16  ;;  %17678 = vmatprep.subr.bf16.mxu1 %v19520_v15  ;;  %v19554_v16 = vld [vmem:[%s25403_s4 + $0x210] sm:$0xff]  }
0x15bf   : > { %11299 = vmatmul.mubr.bf16.gmra.mrb[148].mxu1 %v23349_v18  ;;  %17706 = vmatprep.subr.bf16.mxu0 %v19521_v13  ;;  %v19555_v15 = vld [vmem:[%s25403_s4 + $0x290] sm:$0xff]   ;;  %v19556_v13 = vld [vmem:[%s25403_s4 + $0x258] sm:$0xff]  }
0x15c0   : > { %11405 = vmatmul.mubr.bf16.gmra.mrb[152].mxu0 %v23349_v18  ;;  %11710 = vmatprep.mubr.bf16.mxu1 %v22759_v42  ;;  %v19529_v18 = vld [vmem:[%s25401_s2 + $0x2e0] sm:$0xff]  }
0x15c1   : > { %17679 = vmatpush3.bf16.msra.mxu1 %v19522_v20  ;;  %11759 = vmatprep.mubr.bf16.mxu0 %v22761_v11  ;;  %v19557_v20 = vld [vmem:[%s25403_s4 + $0x2d8] sm:$0xff]  }
0x15c2   : > { %17707 = vmatpush3.bf16.msra.mxu0 %v19523_v22  ;;  %17680 = vmatprep.subr.bf16.mxu1 %v19524_v6  ;;  %v19558_v22 = vld [vmem:[%s25403_s4 + $0x218] sm:$0xff]  }
0x15c3   : > { %17708 = vmatprep.subr.bf16.mxu0 %v19525_v17  ;;  %v19559_v6 = vld [vmem:[%s25403_s4 + $0x298] sm:$0xff]   ;;  %v19560_v17 = vld [vmem:[%s25403_s4 + $0x260] sm:$0xff]  }
0x15c5   : > { %17681 = vmatpush3.bf16.msra.mxu1 %v19526_v29  ;;  %v19561_v29 = vld [vmem:[%s25403_s4 + $0x2e0] sm:$0xff]  }
0x15c6   : > { %17709 = vmatpush3.bf16.msra.mxu0 %v19527_v34  ;;  %17682 = vmatprep.subr.bf16.mxu1 %v19528_v38  ;;  %v19562_v34 = vld [vmem:[%s25403_s4 + $0x220] sm:$0xff]  }
0x15c7   : > { %17710 = vmatprep.subr.bf16.mxu0 %v19529_v18  ;;  %v19563_v38 = vld [vmem:[%s25403_s4 + $0x2a0] sm:$0xff]   ;;  %v19564_v18 = vld [vmem:[%s25403_s4 + $0x268] sm:$0xff]  }
0x15c9   : > { %17683 = vmatpush3.bf16.msra.mxu1 %v19530_v60  ;;  %v19565_v60 = vld [vmem:[%s25403_s4 + $0x2e8] sm:$0xff]  }
0x15ca   : > { %17711 = vmatpush3.bf16.msra.mxu0 %v19531_v36  ;;  %17684 = vmatprep.subr.bf16.mxu1 %v19532_v24  ;;  %v19566_v36 = vld [vmem:[%s25403_s4 + $0x228] sm:$0xff]  }
0x15cb   : > { %17712 = vmatprep.subr.bf16.mxu0 %v19533_v39  ;;  %v19567_v24 = vld [vmem:[%s25403_s4 + $0x2a8] sm:$0xff]   ;;  %v19568_v39 = vld [vmem:[%s25403_s4 + $0x270] sm:$0xff]  }
0x15cd   : > { %17685 = vmatpush3.bf16.msra.mxu1 %v19534_v30  ;;  %v19569_v30 = vld [vmem:[%s25403_s4 + $0x2f0] sm:$0xff]  }
0x15ce   : > { %17713 = vmatpush3.bf16.msra.mxu0 %v19535_v45  ;;  %17686 = vmatprep.subr.bf16.mxu1 %v19536_v63  ;;  %v19570_v45 = vld [vmem:[%s25403_s4 + $0x230] sm:$0xff]  }
0x15cf   : > { %17714 = vmatprep.subr.bf16.mxu0 %v19537_v0  ;;  %v19571_v63 = vld [vmem:[%s25403_s4 + $0x2b0] sm:$0xff]   ;;  %v19572_v0 = vld [vmem:[%s25403_s4 + $0x278] sm:$0xff]  }
0x15d1   : > { %17687 = vmatpush3.bf16.msra.mxu1 %v19538_v47  ;;  %v19573_v47 = vld [vmem:[%s25403_s4 + $0x2f8] sm:$0xff]  }
0x15d2   : > { %17715 = vmatpush3.bf16.msra.mxu0 %v19539_v27  ;;  %17688 = vmatprep.subr.bf16.mxu1 %v19540_v14  ;;  %v19574_v27 = vld [vmem:[%s25403_s4 + $0x238] sm:$0xff]  }
0x15d3   : > { %17716 = vmatprep.subr.bf16.mxu0 %v19541_v33  ;;  %v19575_v14 = vld [vmem:[%s25403_s4 + $0x2b8] sm:$0xff]  }
0x15d5   : > { %17689 = vmatpush3.bf16.msra.mxu1 %v19542_v40 }
0x15d6   : > { %17717 = vmatpush3.bf16.msra.mxu0 %v19543_v32  ;;  %17730 = vmatprep.subr.bf16.mxu1 %v19544_v50 }
0x15d7   : > { %17758 = vmatprep.subr.bf16.mxu0 %v19545_v37 }
0x15d8   : > { %11711 = vmatmul.mubr.bf16.vlgmr.msra.gmra.mrb[152].mxu1 %v22844_v43 }
0x15d9   : > { %11760 = vmatmul.mubr.bf16.vlgmr.msra.gmra.mrb[156].mxu0 %v22846_v31  ;;  %17731 = vmatpush3.bf16.msra.mxu1 %v19546_v41 }
0x15da   : > { %17759 = vmatpush3.bf16.msra.mxu0 %v19547_v61  ;;  %17732 = vmatprep.subr.bf16.mxu1 %v19548_v48 }
0x15db   : > { %17760 = vmatprep.subr.bf16.mxu0 %v19549_v21  ;;  %11718 = vmatprep.mubr.bf16.mxu1 %v22863_v9 }
0x15dc   : > { %11767 = vmatprep.mubr.bf16.mxu0 %v22865_v52 }
0x15dd   : > { %17733 = vmatpush3.bf16.msra.mxu1 %v19550_v25 }
0x15de   : > { %17761 = vmatpush3.bf16.msra.mxu0 %v19551_v62  ;;  %17734 = vmatprep.subr.bf16.mxu1 %v19552_v49 }
0x15df   : > { %17762 = vmatprep.subr.bf16.mxu0 %v19553_v28 }
0x15e0   : > { %11719 = vmatmul.mubr.bf16.gmra.mrb[156].mxu1 %v22887_v35 }
0x15e1   : > { %17735 = vmatpush3.bf16.msra.mxu1 %v19554_v16  ;;  %11768 = vmatmul.mubr.bf16.gmra.mrb[160].mxu0 %v22889_v3 }
0x15e2   : > { %17763 = vmatpush3.bf16.msra.mxu0 %v19555_v15  ;;  %17736 = vmatprep.subr.bf16.mxu1 %v19556_v13 }
0x15e3   : > { %17764 = vmatprep.subr.bf16.mxu0 %v19557_v20  ;;  %12071 = vmatprep.mubr.bf16.mxu1 %v22759_v42 }
0x15e4   : > { %12120 = vmatprep.mubr.bf16.mxu0 %v22761_v11 }
0x15e5   : > { %17737 = vmatpush3.bf16.msra.mxu1 %v19558_v22 }
0x15e6   : > { %17765 = vmatpush3.bf16.msra.mxu0 %v19559_v6  ;;  %17738 = vmatprep.subr.bf16.mxu1 %v19560_v17 }
0x15e7   : > { %17766 = vmatprep.subr.bf16.mxu0 %v19561_v29 }
0x15e9   : > { %17739 = vmatpush3.bf16.msra.mxu1 %v19562_v34 }
0x15ea   : > { %17767 = vmatpush3.bf16.msra.mxu0 %v19563_v38  ;;  %17740 = vmatprep.subr.bf16.mxu1 %v19564_v18 }
0x15eb   : > { %17768 = vmatprep.subr.bf16.mxu0 %v19565_v60 }
0x15ed   : > { %17741 = vmatpush3.bf16.msra.mxu1 %v19566_v36 }
0x15ee   : > { %17769 = vmatpush3.bf16.msra.mxu0 %v19567_v24  ;;  %17742 = vmatprep.subr.bf16.mxu1 %v19568_v39 }
0x15ef   : > { %17770 = vmatprep.subr.bf16.mxu0 %v19569_v30 }
0x15f1   : > { %17743 = vmatpush3.bf16.msra.mxu1 %v19570_v45  ;;  %v16649_v45 = vld [vmem:[%s25404_s5 + $0x2] ss:$0 sm:$0xff] }
0x15f2   : > { %17771 = vmatpush3.bf16.msra.mxu0 %v19571_v63  ;;  %17744 = vmatprep.subr.bf16.mxu1 %v19572_v0 }
0x15f3   : > { %17772 = vmatprep.subr.bf16.mxu0 %v19573_v47 }
0x15f5   : > { %17745 = vmatpush3.bf16.msra.mxu1 %v19574_v27 }
0x15f6   : > { %17773 = vmatpush3.bf16.msra.mxu0 %v19575_v14 }
0x15f7   : > { %12254 = vmatprep.subr.bf16.mxu0 %v22759_v42 }
0x15f8   : > { %12072 = vmatmul.mubr.bf16.vlgmr.msra.gmra.mrb[160].mxu1 %v22844_v43 }
0x15f9   : > { %12121 = vmatmul.mubr.bf16.vlgmr.msra.gmra.mrb[164].mxu0 %v22846_v31  ;;  %12079 = vmatprep.mubr.bf16.mxu1 %v22863_v9  ;;  %v16551_v9 = vld [vmem:[%s25402_s3 + $0x2] ss:$0 sm:$0xff] }
0x15fa   : > { %12128 = vmatprep.mubr.bf16.mxu0 %v22865_v52  ;;  %12255 = vmatpush1.bf16.msra.mxu0 %v22844_v43 }
0x15fb   : > { %12256 = vmatprep.subr.bf16.mxu0 %v23090_v51 }
0x15fe   : > { %12257 = vmatpush1.bf16.msra.mxu0 %v23098_v1 }
0x1600   : > { %12080 = vmatmul.mubr.bf16.gmra.mrb[164].mxu1 %v22887_v35 }
0x1601   : > { %12129 = vmatmul.mubr.bf16.gmra.mrb[168].mxu0 %v22889_v3 }
0x1602   : > { %12286 = vmatprep.mubr.bf16.mxu0 %v20097_v23 }
0x16ab   : > { %v17690_v42 = vpop.f32.mrb[152].mxu1 }
0x16ac   : > { %v17718_v33 = vpop.f32.mrb[156].mxu0  ;;  %v17691_v40 = vpop.f32.mrb[153].mxu1 }
0x16ad   : > { %v17692_v52 = vadd.f32 %v17691_v40, %v17690_v42  ;;  %v17719_v32 = vpop.f32.mrb[157].mxu0  ;;  %v17693_v43 = vpop.f32.mrb[154].mxu1 }
0x16ae   : > { %v17720_v50 = vadd.f32 %v17719_v32, %v17718_v33  ;;  %v17721_v51 = vpop.f32.mrb[158].mxu0  ;;  %v17694_v37 = vpop.f32.mrb[155].mxu1 }
0x16af   : > { %v11713_v1 = vadd.f32 %v17692_v52, %v16551_v9  ;;  %v17695_v41 = vadd.f32 %v17694_v37, %v17693_v43  ;;  %v17722_v35 = vpop.f32.mrb[159].mxu0 }
0x16b0   : > { %v17723_v61 = vadd.f32 %v17722_v35, %v17721_v51 }
0x16b1   : > { %v11762_v3 = vadd.f32 %v17720_v50, %v11713_v1  ;;  %v11716_v48 = vadd.f32 %v17695_v41, %v16551_v9 }
0x16b3   : > { %v11765_v21 = vadd.f32 %v17723_v61, %v11716_v48  ;;  %v17696_v25 = vpop.f32.mrb[156].mxu1 }
0x16b4   : > { %v17697_v62 = vpop.f32.mrb[157].mxu1  ;;  %v17724_v49 = vpop.f32.mrb[160].mxu0 }
0x16b5   : > { %v12139_v28 = vpack.c.bf16 %v11765_v21, %v11762_v3  ;;  %v17698_v16 = vadd.f32 %v17697_v62, %v17696_v25  ;;  %v17699_v15 = vpop.f32.mrb[158].mxu1  ;;  %v17725_v13 = vpop.f32.mrb[161].mxu0 }
0x16b6   : > { %v17700_v20 = vpop.f32.mrb[159].mxu1  ;;  %v17726_v22 = vadd.f32 %v17725_v13, %v17724_v49  ;;  %v17727_v6 = vpop.f32.mrb[162].mxu0 }
0x16b7   : > { %17830 = vmatprep.subr.bf16.mxu1 %v12139_v28  ;;  %v11721_v17 = vadd.f32 %v17698_v16, %v16551_v9  ;;  %v17701_v29 = vadd.f32 %v17700_v20, %v17699_v15  ;;  %v17728_v34 = vpop.f32.mrb[163].mxu0 }
0x16b8   : > { %17831 = vmatpush3.bf16.xpose.msra.mxu1 %v12139_v28  ;;  %v17729_v38 = vadd.f32 %v17728_v34, %v17727_v6 }
0x16b9   : > { %v11724_v18 = vadd.f32 %v17701_v29, %v16551_v9  ;;  %v11770_v60 = vadd.f32 %v17726_v22, %v11721_v17 }
0x16bb   : > { %v11773_v36 = vadd.f32 %v17729_v38, %v11724_v18 }
0x16bd   : > { %v12140_v24 = vpack.c.bf16 %v11773_v36, %v11770_v60 }
0x16bf   : > { %17832 = vmatprep.subr.bf16.mxu1 %v12140_v24 }
0x16c0   : > { %17833 = vmatpush3.bf16.xpose.msra.mxu1 %v12140_v24 }
0x16c1   : > { %12307 = vmatprep.subr.bf16.mxu1 %v22761_v11 }
0x16cb   : > { %v17746_v39 = vpop.f32.mrb[160].mxu1 }
0x16cc   : > { %v17774_v30 = vpop.f32.mrb[164].mxu0  ;;  %v17747_v63 = vpop.f32.mrb[161].mxu1 }
0x16cd   : > { %v17748_v0 = vadd.f32 %v17747_v63, %v17746_v39  ;;  %v17775_v47 = vpop.f32.mrb[165].mxu0  ;;  %v17749_v27 = vpop.f32.mrb[162].mxu1 }
0x16ce   : > { %v17776_v14 = vadd.f32 %v17775_v47, %v17774_v30  ;;  %v17777_v42 = vpop.f32.mrb[166].mxu0  ;;  %v17750_v33 = vpop.f32.mrb[163].mxu1 }
0x16cf   : > { %v12074_v9 = vadd.f32 %v17748_v0, %v16649_v45  ;;  %v17751_v40 = vadd.f32 %v17750_v33, %v17749_v27  ;;  %v17778_v52 = vpop.f32.mrb[167].mxu0 }
0x16d0   : > { %v17779_v32 = vadd.f32 %v17778_v52, %v17777_v42 }
0x16d1   : > { %v12123_v43 = vadd.f32 %v17776_v14, %v12074_v9  ;;  %v12077_v50 = vadd.f32 %v17751_v40, %v16649_v45 }
0x16d3   : > { %v12126_v11 = vadd.f32 %v17779_v32, %v12077_v50  ;;  %v17752_v51 = vpop.f32.mrb[164].mxu1 }
0x16d4   : > { %v17780_v37 = vpop.f32.mrb[168].mxu0  ;;  %v17753_v1 = vpop.f32.mrb[165].mxu1 }
0x16d5   : > { %v17754_v41 = vadd.f32 %v17753_v1, %v17752_v51  ;;  %v17781_v35 = vpop.f32.mrb[169].mxu0  ;;  %v17755_v61 = vpop.f32.mrb[166].mxu1  ;;  %v12137_v3 = vpack.c.bf16 %v12126_v11, %v12123_v43 }
0x16d6   : > { %v17782_v48 = vadd.f32 %v17781_v35, %v17780_v37  ;;  %v17783_v21 = vpop.f32.mrb[170].mxu0  ;;  %v17756_v25 = vpop.f32.mrb[167].mxu1  ;;  %v19581_v35 = vld [vmem:[%s25405_s6 + $0x80c] ss:$16 sps:$4 sm:$0xff]  }
0x16d7   : > { %v12082_v62 = vadd.f32 %v17754_v41, %v16649_v45  ;;  %v17757_v49 = vadd.f32 %v17756_v25, %v17755_v61  ;;  %v17784_v28 = vpop.f32.mrb[171].mxu0  ;;  %17834 = vmatprep.mubr.bf16.mxu1 %v12137_v3  ;;  %v19578_v41 = vld [vmem:[%s25405_s6 + $0x804] ss:$16 sps:$4 sm:$0xff]   ;;  %13242 = vmatprep.subr.bf16.mxu0 %v19581_v35  ;;  %v19615_v35 = vld [vmem:[%s25405_s6 + $0x8c8] ss:$16 sps:$4 sm:$0xff]  }
0x16d8   : > { %v17785_v16 = vadd.f32 %v17784_v28, %v17783_v21  ;;  %v16682_v28 = vld [vmem:[%s25400_s1 + $0x40] sm:$0xff] }
0x16d9   : > { %v12131_v15 = vadd.f32 %v17782_v48, %v12082_v62  ;;  %v12085_v13 = vadd.f32 %v17757_v49, %v16649_v45 }
0x16db   : > { %v12134_v20 = vadd.f32 %v17785_v16, %v12085_v13  ;;  %v16683_v16 = vld [vmem:[%s25400_s1 + $0x48] sm:$0xff] }
0x16dd   : > { %v12138_v22 = vpack.c.bf16 %v12134_v20, %v12131_v15 }
0x16df   : > { %17835 = vmatmul.mubr.bf16.vlgmr.msra.gmra.mrb[168].mxu1 %v12138_v22 }
0x16e0   : > { %12308 = vmatpush1.bf16.msra.mxu1 %v22846_v31  ;;  %12339 = vmatprep.mubr.bf16.mxu1 %v20097_v23 }
0x16e1   : > { %12309 = vmatprep.subr.bf16.mxu1 %v23094_v19 }
0x16e4   : > { %12310 = vmatpush1.bf16.msra.mxu1 %v23102_v46 }
0x16e5   : > { %13136 = vmatprep.subr.bf16.mxu1 %v19578_v41  ;;  %v19612_v41 = vld [vmem:[%s25405_s6 + $0x8c0] ss:$16 sps:$4 sm:$0xff]  }
0x17b2   : > { %v17836_v6 = vpop.f32.mrb[168].mxu1 }
0x17b3   : > { %v12175_v17 = vpop.f32.mrb[169].mxu1  ;;  %v12192_v18 = vmul.f32 0.0078125, %v17836_v6 }
0x17b4   : > { %v12190_v29 = vmul.f32 0.0078125, %v12175_v17  ;;  %v17837_v34 = vpop.f32.mrb[170].mxu1 }
0x17b5   : > { %v12178_v38 = vpop.f32.mrb[171].mxu1  ;;  %v12193_v24 = vmul.f32 0.0078125, %v17837_v34  ;;  %v12200_v31 = vsel %vm1230_vm0, %v12192_v18, -inf  ;;  %v19576_v34 = vld [vmem:[%s25405_s6 + $0x800] ss:$16 sps:$4 sm:$0xff]  }
0x17b6   : > { %v12191_v60 = vmul.f32 0.0078125, %v12178_v38  ;;  %v12194_v36 = vsel %vm1230_vm0, %v12190_v29, -inf  ;;  %v19579_v38 = vld [vmem:[%s25405_s6 + $0x808] ss:$16 sps:$4 sm:$0xff]  }
0x17b7   : > { %12195 = vmax.xlane.f32.xlu0 %v12194_v36  ;;  %v12203_v19 = vsel %vm1240_vm1, %v12193_v24, -inf  ;;  %v19587_v36 = vld [vmem:[%s25405_s6 + $0x82c] ss:$16 sps:$4 sm:$0xff]  }
0x17b8   : > { %v12197_v39 = vsel %vm1230_vm0, %v12191_v60, -inf }
0x17b9   : > { %12198 = vmax.xlane.f32.xlu1 %v12197_v39  ;;  %v16684_v39 = vld [vmem:[%s25400_s1 + $0x50] sm:$0xff] }
0x17bb   : > { %12201 = vmax.xlane.f32.xlu0 %v12200_v31 }
0x17bd   : > { %12204 = vmax.xlane.f32.xlu1 %v12203_v19  ;;  %v19582_v19 = vld [vmem:[%s25405_s6 + $0x820] ss:$16 sps:$4 sm:$0xff]  }
0x1844   : > { %v12196_v46 = vpop.xlane.xlu0 %12195 }
0x1845   : > { %v12206_v30 = vsub.f32 %v12190_v29, %v12196_v46  ;;  %v19585_v46 = vld [vmem:[%s25405_s6 + $0x828] ss:$16 sps:$4 sm:$0xff]  }
0x1846   : > { %v12199_v45 = vpop.xlane.xlu1 %12198 }
0x1847   : > { %v12210_v63 = vmul.f32 1.442695, %v12206_v30  ;;  %v12207_v0 = vsub.f32 %v12191_v60, %v12199_v45  ;;  %v19584_v60 = vld [vmem:[%s25405_s6 + $0x824] ss:$16 sps:$4 sm:$0xff]   ;;  %v19593_v30 = vld [vmem:[%s25405_s6 + $0x84c] ss:$16 sps:$4 sm:$0xff]  }
0x1848   : > { %v12202_v47 = vpop.xlane.xlu0 %12201 }
0x1849   : > { %20040 = vpow2.f32 %v12210_v63  ;;  %v12212_v27 = vmul.f32 1.442695, %v12207_v0  ;;  %v12208_v14 = vsub.f32 %v12192_v18, %v12202_v47  ;;  %v16685_v18 = vld [vmem:[%s25400_s1 + $0x58] sm:$0x1]  ;;  %v19588_v0 = vld [vmem:[%s25405_s6 + $0x840] ss:$16 sps:$4 sm:$0xff]  }
0x184a   : > { %v12205_v42 = vpop.xlane.xlu1 %12204  ;;  %v19591_v47 = vld [vmem:[%s25405_s6 + $0x848] ss:$16 sps:$4 sm:$0xff]  }
0x184b   : > { %20042 = vpow2.f32 %v12212_v27  ;;  %v12214_v33 = vmul.f32 1.442695, %v12208_v14  ;;  %v12209_v9 = vsub.f32 %v12193_v24, %v12205_v42  ;;  %v19596_v27 = vld [vmem:[%s25405_s6 + $0x864] ss:$16 sps:$4 sm:$0xff]   ;;  %v19599_v14 = vld [vmem:[%s25405_s6 + $0x86c] ss:$16 sps:$4 sm:$0xff]  }
0x184c   : > { %v19594_v42 = vld [vmem:[%s25405_s6 + $0x860] ss:$16 sps:$4 sm:$0xff]  }
0x184d   : > { %20044 = vpow2.f32 %v12214_v33  ;;  %v12216_v40 = vmul.f32 1.442695, %v12209_v9  ;;  %v19597_v33 = vld [vmem:[%s25405_s6 + $0x868] ss:$16 sps:$4 sm:$0xff]   ;;  %v19602_v9 = vld [vmem:[%s25405_s6 + $0x884] ss:$16 sps:$4 sm:$0xff]  }
0x184f   : > { %20046 = vpow2.f32 %v12216_v40  ;;  %v19605_v40 = vld [vmem:[%s25405_s6 + $0x88c] ss:$16 sps:$4 sm:$0xff]  }
0x1853   : > { %v20041_v52 = vpop.eup %20040 }
0x1854   : > { %v12218_v32 = vsel %vm1230_vm0, %v20041_v52, 0.0 }
0x1855   : > { %v20043_v43 = vpop.eup %20042  ;;  %12219 = vadd.xlane.f32.xlu0 %v12218_v32  ;;  %v19603_v32 = vld [vmem:[%s25405_s6 + $0x888] ss:$16 sps:$4 sm:$0xff]  }
0x1856   : > { %v12221_v50 = vsel %vm1230_vm0, %v20043_v43, 0.0 }
0x1857   : > { %v20045_v11 = vpop.eup %20044  ;;  %12222 = vadd.xlane.f32.xlu1 %v12221_v50  ;;  %v19611_v50 = vld [vmem:[%s25405_s6 + $0x8ac] ss:$16 sps:$4 sm:$0xff]  }
0x1858   : > { %v12224_v51 = vsel %vm1230_vm0, %v20045_v11, 0.0 }
0x1859   : > { %v20047_v37 = vpop.eup %20046  ;;  %12225 = vadd.xlane.f32.xlu0 %v12224_v51  ;;  %v19609_v51 = vld [vmem:[%s25405_s6 + $0x8a8] ss:$16 sps:$4 sm:$0xff]  }
0x185a   : > { %v12227_v1 = vsel %vm1240_vm1, %v20047_v37, 0.0 }
0x185b   : > { %12228 = vadd.xlane.f32.xlu1 %v12227_v1  ;;  %v19617_v1 = vld [vmem:[%s25405_s6 + $0x8cc] ss:$16 sps:$4 sm:$0xff]  }
0x18e2   : > { %v12220_v61 = vpop.xlane.xlu0 %12219 }
0x18e3   : > { %20048 = vrcp.f32 %v12220_v61  ;;  %v19620_v61 = vld [vmem:[%s25405_s6 + $0x8e4] ss:$16 sps:$4 sm:$0xff]  }
0x18e4   : > { %v12223_v3 = vpop.xlane.xlu1 %12222 }
0x18e5   : > { %20050 = vrcp.f32 %v12223_v3  ;;  %v19623_v3 = vld [vmem:[%s25405_s6 + $0x8ec] ss:$16 sps:$4 sm:$0xff]  }
0x18e6   : > { %v12226_v48 = vpop.xlane.xlu0 %12225 }
0x18e7   : > { %20052 = vrcp.f32 %v12226_v48  ;;  %v19618_v48 = vld [vmem:[%s25405_s6 + $0x8e0] ss:$16 sps:$4 sm:$0xff]  }
0x18e8   : > { %v12229_v21 = vpop.xlane.xlu1 %12228 }
0x18e9   : > { %20054 = vrcp.f32 %v12229_v21  ;;  %v19621_v21 = vld [vmem:[%s25405_s6 + $0x8e8] ss:$16 sps:$4 sm:$0xff]  }
0x18ed   : > { %v20049_v25 = vpop.eup %20048 }
0x18ee   : > { %v12234_v62 = vmul.f32 %v20049_v25, %v20041_v52  ;;  %v19600_v52 = vld [vmem:[%s25405_s6 + $0x880] ss:$16 sps:$4 sm:$0xff]   ;;  %v19626_v25 = vld [vmem:[%s25405_s6 + $0x904] ss:$16 sps:$4 sm:$0xff]  }
0x18ef   : > { %v20051_v49 = vpop.eup %20050 }
0x18f0   : > { %v12235_v15 = vmul.f32 %v20051_v49, %v20043_v43  ;;  %v12242_v20 = vadd.f32 %v16682_v28, %v12234_v62  ;;  %v19608_v43 = vld [vmem:[%s25405_s6 + $0x8a4] ss:$16 sps:$4 sm:$0xff]   ;;  %v19629_v62 = vld [vmem:[%s25405_s6 + $0x90c] ss:$16 sps:$4 sm:$0xff]   ;;  %v19624_v49 = vld [vmem:[%s25405_s6 + $0x900] ss:$16 sps:$4 sm:$0xff]  }
0x18f1   : > { %v20053_v13 = vpop.eup %20052  ;;  %v19627_v28 = vld [vmem:[%s25405_s6 + $0x908] ss:$16 sps:$4 sm:$0xff]  }
0x18f2   : > { %v12243_v22 = vadd.f32 %v16683_v16, %v12235_v15  ;;  %v12236_v24 = vmul.f32 %v20053_v13, %v20045_v11  ;;  %v19606_v11 = vld [vmem:[%s25405_s6 + $0x8a0] ss:$16 sps:$4 sm:$0xff]   ;;  %v19632_v16 = vld [vmem:[%s25405_s6 + $0x924] ss:$16 sps:$4 sm:$0xff]   ;;  %v19635_v15 = vld [vmem:[%s25405_s6 + $0x92c] ss:$16 sps:$4 sm:$0xff]  }
0x18f3   : > { %v20055_v6 = vpop.eup %20054  ;;  %v19630_v13 = vld [vmem:[%s25405_s6 + $0x920] ss:$16 sps:$4 sm:$0xff]  }
0x18f4   : > { %v12246_v17 = vpack.c.bf16 %v12243_v22, %v12242_v20  ;;  %v12237_v29 = vmul.f32 %v20055_v6, %v20047_v37  ;;  %v12244_v45 = vadd.f32 %v16684_v39, %v12236_v24  ;;  %v19614_v37 = vld [vmem:[%s25405_s6 + $0x8c4] ss:$16 sps:$4 sm:$0xff]   ;;  %v19633_v20 = vld [vmem:[%s25405_s6 + $0x928] ss:$16 sps:$4 sm:$0xff]   ;;  %v19641_v6 = vld [vmem:[%s25405_s6 + $0x94c] ss:$16 sps:$4 sm:$0xff]  }
0x18f5   : > { %v19638_v22 = vld [vmem:[%s25405_s6 + $0x944] ss:$16 sps:$4 sm:$0xff]   ;;  %v19653_v24 = vld [vmem:[%s25405_s6 + $0x98c] ss:$16 sps:$4 sm:$0xff]   ;;  %v19648_v39 = vld [vmem:[%s25405_s6 + $0x980] ss:$16 sps:$4 sm:$0xff]  }
0x18f6   : > { %16686 = vmatmul.mubr.msk.bf16.vlgmr.msra.gmra.mrb[172].mxu0 %vm1230_vm0, %v12246_v17  ;;  %16688 = vmatmul.mubr.msk.bf16.vlgmr.msra.gmra.mrb[172].mxu1 %vm1230_vm0, %v12246_v17  ;;  %v12245_v31 = vadd.f32 %v16685_v18, %v12237_v29  ;;  %v19636_v17 = vld [vmem:[%s25405_s6 + $0x940] ss:$16 sps:$4 sm:$0xff]   ;;  %v19639_v29 = vld [vmem:[%s25405_s6 + $0x948] ss:$16 sps:$4 sm:$0xff]  }
0x18f7   : > { %12296 = vmatprep.mubr.bf16.mxu0 %v20097_v23  ;;  %12349 = vmatprep.mubr.bf16.mxu1 %v20097_v23  ;;  %v19590_v23 = vld [vmem:[%s25405_s6 + $0x844] ss:$16 sps:$4 sm:$0xff]   ;;  %v19642_v18 = vld [vmem:[%s25405_s6 + $0x960] ss:$16 sps:$4 sm:$0xff]  }
0x18f8   : > { %13137 = vmatpush1.bf16.msra.mxu1 %v19576_v34  ;;  %13243 = vmatpush1.bf16.msra.mxu0 %v19579_v38  ;;  %v12247_v63 = vpack.c.bf16 %v12245_v31, %v12244_v45  ;;  %v19644_v34 = vld [vmem:[%s25405_s6 + $0x964] ss:$16 sps:$4 sm:$0xff]   ;;  %v19647_v38 = vld [vmem:[%s25405_s6 + $0x96c] ss:$16 sps:$4 sm:$0xff]   ;;  %v19651_v31 = vld [vmem:[%s25405_s6 + $0x988] ss:$16 sps:$4 sm:$0xff]  }
0x18f9   : > { %13138 = vmatprep.subr.bf16.mxu1 %v19584_v60  ;;  %13244 = vmatprep.subr.bf16.mxu0 %v19587_v36  ;;  %v19645_v60 = vld [vmem:[%s25405_s6 + $0x968] ss:$16 sps:$4 sm:$0xff]   ;;  %v19650_v36 = vld [vmem:[%s25405_s6 + $0x984] ss:$16 sps:$4 sm:$0xff]  }
0x18fa   : > { %v19662_v45 = vld [vmem:[%s25405_s6 + $0x9c4] ss:$16 sps:$4 sm:$0xff]  }
0x18fc   : > { %13139 = vmatpush1.bf16.msra.mxu1 %v19582_v19  ;;  %13245 = vmatpush1.bf16.msra.mxu0 %v19585_v46  ;;  %v19656_v19 = vld [vmem:[%s25405_s6 + $0x9a4] ss:$16 sps:$4 sm:$0xff]   ;;  %v19659_v46 = vld [vmem:[%s25405_s6 + $0x9ac] ss:$16 sps:$4 sm:$0xff]  }
0x18fd   : > { %13140 = vmatprep.subr.bf16.mxu1 %v19590_v23  ;;  %13246 = vmatprep.subr.bf16.mxu0 %v19593_v30  ;;  %v19654_v23 = vld [vmem:[%s25405_s6 + $0x9a0] ss:$16 sps:$4 sm:$0xff]   ;;  %v19657_v30 = vld [vmem:[%s25405_s6 + $0x9a8] ss:$16 sps:$4 sm:$0xff]  }
0x18fe   : > { %16687 = vmatmul.mubr.msk.bf16.gmra.mrb[176].mxu0 %vm1230_vm0, %v12247_v63  ;;  %16689 = vmatmul.mubr.msk.bf16.gmra.mrb[176].mxu1 %vm1230_vm0, %v12247_v63  ;;  %v19665_v63 = vld [vmem:[%s25405_s6 + $0x9cc] ss:$16 sps:$4 sm:$0xff]  }
0x1900   : > { %13141 = vmatpush1.bf16.msra.mxu1 %v19588_v0  ;;  %13247 = vmatpush1.bf16.msra.mxu0 %v19591_v47  ;;  %v19660_v0 = vld [vmem:[%s25405_s6 + $0x9c0] ss:$16 sps:$4 sm:$0xff]   ;;  %v19663_v47 = vld [vmem:[%s25405_s6 + $0x9c8] ss:$16 sps:$4 sm:$0xff]  }
0x1901   : > { %13142 = vmatprep.subr.bf16.mxu1 %v19596_v27  ;;  %13248 = vmatprep.subr.bf16.mxu0 %v19599_v14  ;;  %v19668_v27 = vld [vmem:[%s25405_s6 + $0x9e4] ss:$16 sps:$4 sm:$0xff]   ;;  %v19671_v14 = vld [vmem:[%s25405_s6 + $0x9ec] ss:$16 sps:$4 sm:$0xff]  }
0x1904   : > { %13143 = vmatpush1.bf16.msra.mxu1 %v19594_v42  ;;  %13249 = vmatpush1.bf16.msra.mxu0 %v19597_v33  ;;  %v19666_v42 = vld [vmem:[%s25405_s6 + $0x9e0] ss:$16 sps:$4 sm:$0xff]   ;;  %v19669_v33 = vld [vmem:[%s25405_s6 + $0x9e8] ss:$16 sps:$4 sm:$0xff]  }
0x1905   : > { %13144 = vmatprep.subr.bf16.mxu1 %v19602_v9  ;;  %13250 = vmatprep.subr.bf16.mxu0 %v19605_v40  ;;  %v19674_v9 = vld [vmem:[%s25405_s6 + $0xa04] ss:$16 sps:$4 sm:$0xff]   ;;  %v19677_v40 = vld [vmem:[%s25405_s6 + $0xa0c] ss:$16 sps:$4 sm:$0xff]  }
0x1908   : > { %13145 = vmatpush1.bf16.msra.mxu1 %v19600_v52  ;;  %13251 = vmatpush1.bf16.msra.mxu0 %v19603_v32 }
0x1909   : > { %13146 = vmatprep.subr.bf16.mxu1 %v19608_v43  ;;  %13252 = vmatprep.subr.bf16.mxu0 %v19611_v50 }
0x190c   : > { %13147 = vmatpush1.bf16.msra.mxu1 %v19606_v11  ;;  %13253 = vmatpush1.bf16.msra.mxu0 %v19609_v51 }
0x190d   : > { %13148 = vmatprep.subr.bf16.mxu1 %v19614_v37  ;;  %13254 = vmatprep.subr.bf16.mxu0 %v19617_v1 }
0x1910   : > { %13149 = vmatpush1.bf16.msra.mxu1 %v19612_v41  ;;  %13255 = vmatpush1.bf16.msra.mxu0 %v19615_v35 }
0x1911   : > { %13150 = vmatprep.subr.bf16.mxu1 %v19620_v61  ;;  %13256 = vmatprep.subr.bf16.mxu0 %v19623_v3 }
0x1914   : > { %13151 = vmatpush1.bf16.msra.mxu1 %v19618_v48  ;;  %13257 = vmatpush1.bf16.msra.mxu0 %v19621_v21  ;;  %v19672_v48 = vld [vmem:[%s25405_s6 + $0xa00] ss:$16 sps:$4 sm:$0xff]   ;;  %v19675_v21 = vld [vmem:[%s25405_s6 + $0xa08] ss:$16 sps:$4 sm:$0xff]  }
0x1915   : > { %13152 = vmatprep.subr.bf16.mxu1 %v19626_v25  ;;  %13258 = vmatprep.subr.bf16.mxu0 %v19629_v62  ;;  %v19680_v25 = vld [vmem:[%s25405_s6 + $0xa24] ss:$16 sps:$4 sm:$0xff]   ;;  %v19683_v62 = vld [vmem:[%s25405_s6 + $0xa2c] ss:$16 sps:$4 sm:$0xff]  }
0x1918   : > { %13153 = vmatpush1.bf16.msra.mxu1 %v19624_v49  ;;  %13259 = vmatpush1.bf16.msra.mxu0 %v19627_v28 }
0x1919   : > { %13154 = vmatprep.subr.bf16.mxu1 %v19632_v16  ;;  %13260 = vmatprep.subr.bf16.mxu0 %v19635_v15  ;;  %v19678_v16 = vld [vmem:[%s25405_s6 + $0xa20] ss:$16 sps:$4 sm:$0xff]   ;;  %v19681_v15 = vld [vmem:[%s25405_s6 + $0xa28] ss:$16 sps:$4 sm:$0xff]  }
0x191c   : > { %13155 = vmatpush1.bf16.msra.mxu1 %v19630_v13  ;;  %13261 = vmatpush1.bf16.msra.mxu0 %v19633_v20 }
0x191d   : > { %13156 = vmatprep.subr.bf16.mxu1 %v19638_v22  ;;  %13262 = vmatprep.subr.bf16.mxu0 %v19641_v6  ;;  %v19686_v22 = vld [vmem:[%s25405_s6 + $0xa44] ss:$16 sps:$4 sm:$0xff]   ;;  %v19689_v6 = vld [vmem:[%s25405_s6 + $0xa4c] ss:$16 sps:$4 sm:$0xff]  }
0x1920   : > { %13157 = vmatpush1.bf16.msra.mxu1 %v19636_v17  ;;  %13263 = vmatpush1.bf16.msra.mxu0 %v19639_v29 }
0x1921   : > { %13158 = vmatprep.subr.bf16.mxu1 %v19644_v34  ;;  %13264 = vmatprep.subr.bf16.mxu0 %v19647_v38 }
0x1924   : > { %13159 = vmatpush1.bf16.msra.mxu1 %v19642_v18  ;;  %13265 = vmatpush1.bf16.msra.mxu0 %v19645_v60 }
0x1925   : > { %13160 = vmatprep.subr.bf16.mxu1 %v19650_v36  ;;  %13266 = vmatprep.subr.bf16.mxu0 %v19653_v24 }
0x1928   : > { %13161 = vmatpush1.bf16.msra.mxu1 %v19648_v39  ;;  %13267 = vmatpush1.bf16.msra.mxu0 %v19651_v31  ;;  %v19684_v39 = vld [vmem:[%s25405_s6 + $0xa40] ss:$16 sps:$4 sm:$0xff]   ;;  %v19687_v31 = vld [vmem:[%s25405_s6 + $0xa48] ss:$16 sps:$4 sm:$0xff]  }
0x1929   : > { %13162 = vmatprep.subr.bf16.mxu1 %v19656_v19  ;;  %13268 = vmatprep.subr.bf16.mxu0 %v19659_v46  ;;  %v19692_v19 = vld [vmem:[%s25405_s6 + $0xa64] ss:$16 sps:$4 sm:$0xff]   ;;  %v19695_v46 = vld [vmem:[%s25405_s6 + $0xa6c] ss:$16 sps:$4 sm:$0xff]  }
0x192c   : > { %13163 = vmatpush1.bf16.msra.mxu1 %v19654_v23  ;;  %13269 = vmatpush1.bf16.msra.mxu0 %v19657_v30  ;;  %v19690_v23 = vld [vmem:[%s25405_s6 + $0xa60] ss:$16 sps:$4 sm:$0xff]   ;;  %v19693_v30 = vld [vmem:[%s25405_s6 + $0xa68] ss:$16 sps:$4 sm:$0xff]  }
0x192d   : > { %13164 = vmatprep.subr.bf16.mxu1 %v19662_v45  ;;  %13270 = vmatprep.subr.bf16.mxu0 %v19665_v63  ;;  %v19698_v45 = vld [vmem:[%s25405_s6 + $0xa84] ss:$16 sps:$4 sm:$0xff]   ;;  %v19701_v63 = vld [vmem:[%s25405_s6 + $0xa8c] ss:$16 sps:$4 sm:$0xff]  }
0x1930   : > { %13165 = vmatpush1.bf16.msra.mxu1 %v19660_v0  ;;  %13271 = vmatpush1.bf16.msra.mxu0 %v19663_v47  ;;  %v19696_v0 = vld [vmem:[%s25405_s6 + $0xa80] ss:$16 sps:$4 sm:$0xff]   ;;  %v19699_v47 = vld [vmem:[%s25405_s6 + $0xa88] ss:$16 sps:$4 sm:$0xff]  }
0x1931   : > { %13166 = vmatprep.subr.bf16.mxu1 %v19668_v27  ;;  %13272 = vmatprep.subr.bf16.mxu0 %v19671_v14  ;;  %v19704_v27 = vld [vmem:[%s25405_s6 + $0xaa4] ss:$16 sps:$4 sm:$0xff]   ;;  %v19707_v14 = vld [vmem:[%s25405_s6 + $0xaac] ss:$16 sps:$4 sm:$0xff]  }
0x1934   : > { %13167 = vmatpush1.bf16.msra.mxu1 %v19666_v42  ;;  %13273 = vmatpush1.bf16.msra.mxu0 %v19669_v33  ;;  %v19702_v42 = vld [vmem:[%s25405_s6 + $0xaa0] ss:$16 sps:$4 sm:$0xff]   ;;  %v19705_v33 = vld [vmem:[%s25405_s6 + $0xaa8] ss:$16 sps:$4 sm:$0xff]  }
0x1935   : > { %13189 = vmatprep.subr.bf16.mxu1 %v19674_v9  ;;  %13295 = vmatprep.subr.bf16.mxu0 %v19677_v40  ;;  %v19710_v9 = vld [vmem:[%s25405_s6 + $0xac4] ss:$16 sps:$4 sm:$0xff]   ;;  %v19713_v40 = vld [vmem:[%s25405_s6 + $0xacc] ss:$16 sps:$4 sm:$0xff]  }
0x19c9   : > { %v12288_v52 = vpop.f32.mrb[172].mxu0  ;;  %v12341_v32 = vpop.f32.mrb[172].mxu1 }
0x19ca   : > { %v12290_v43 = vpop.f32.mrb[173].mxu0  ;;  %v12343_v50 = vpop.f32.mrb[173].mxu1 }
0x19cb   : > { %v12292_v11 = vpop.f32.mrb[174].mxu0  ;;  %v12345_v51 = vpop.f32.mrb[174].mxu1 }
0x19cc   : > { %v12360_v37 = vpack.c.bf16 %v12292_v11, %v12288_v52  ;;  %v24636_v1 = vpack.c.bf16 %v12345_v51, %v12341_v32  ;;  %v12294_v41 = vpop.f32.mrb[175].mxu0  ;;  %v12347_v35 = vpop.f32.mrb[175].mxu1  ;;  %v19708_v52 = vld [vmem:[%s25405_s6 + $0xac0] ss:$16 sps:$4 sm:$0xff]   ;;  %v19711_v32 = vld [vmem:[%s25405_s6 + $0xac8] ss:$16 sps:$4 sm:$0xff]  }
0x19cd   : > { %v12361_v61 = vpack.c.bf16 %v12294_v41, %v12290_v43  ;;  %v12363_v3 = vpack.c.bf16 %v12347_v35, %v12343_v50  ;;  %v19716_v43 = vld [vmem:[%s25405_s6 + $0xae4] ss:$16 sps:$4 sm:$0xff]   ;;  %v19719_v50 = vld [vmem:[%s25405_s6 + $0xaec] ss:$16 sps:$4 sm:$0xff]   ;;  %v19714_v11 = vld [vmem:[%s25405_s6 + $0xae0] ss:$16 sps:$4 sm:$0xff]  }
0x19ce   : > { %v19717_v51 = vld [vmem:[%s25405_s6 + $0xae8] ss:$16 sps:$4 sm:$0xff]   ;;  %v19725_v41 = vld [vmem:[%s25405_s6 + $0xb0c] ss:$16 sps:$4 sm:$0xff]   ;;  %v19720_v35 = vld [vmem:[%s25405_s6 + $0xb00] ss:$16 sps:$4 sm:$0xff]  }
0x19cf   : > { %13168 = vmatprep.mubr.bf16.mxu1 %v12361_v61  ;;  %13274 = vmatprep.mubr.bf16.mxu0 %v12361_v61  ;;  %v19723_v61 = vld [vmem:[%s25405_s6 + $0xb08] ss:$16 sps:$4 sm:$0xff]  }
0x19d0   : > { %13169 = vmatmul.mubr.bf16.vlgmr.msra.gmra.mrb[144].mxu1 %v12360_v37  ;;  %13275 = vmatmul.mubr.bf16.vlgmr.msra.gmra.mrb[148].mxu0 %v12360_v37  ;;  %v19722_v37 = vld [vmem:[%s25405_s6 + $0xb04] ss:$16 sps:$4 sm:$0xff]  }
0x19d1   : > { %13190 = vmatpush1.bf16.msra.mxu1 %v19672_v48  ;;  %13296 = vmatpush1.bf16.msra.mxu0 %v19675_v21  ;;  %v12298_v49 = vpop.f32.mrb[176].mxu0  ;;  %v12351_v28 = vpop.f32.mrb[176].mxu1  ;;  %v19731_v48 = vld [vmem:[%s25405_s6 + $0xb2c] ss:$16 sps:$4 sm:$0xff]   ;;  %v19726_v21 = vld [vmem:[%s25405_s6 + $0xb20] ss:$16 sps:$4 sm:$0xff]  }
0x19d2   : > { %v12300_v13 = vpop.f32.mrb[177].mxu0  ;;  %v12353_v20 = vpop.f32.mrb[177].mxu1  ;;  %13191 = vmatprep.subr.bf16.mxu1 %v19680_v25  ;;  %13297 = vmatprep.subr.bf16.mxu0 %v19683_v62  ;;  %v19729_v25 = vld [vmem:[%s25405_s6 + $0xb28] ss:$16 sps:$4 sm:$0xff]   ;;  %v19734_v62 = vld [vmem:[%s25405_s6 + $0xb44] ss:$16 sps:$4 sm:$0xff]  }
0x19d3   : > { %v12302_v17 = vpop.f32.mrb[178].mxu0  ;;  %v12355_v29 = vpop.f32.mrb[178].mxu1 }
0x19d4   : > { %v12364_v34 = vpack.c.bf16 %v12302_v17, %v12298_v49  ;;  %v24662_v38 = vpack.c.bf16 %v12355_v29, %v12351_v28  ;;  %v12304_v18 = vpop.f32.mrb[179].mxu0  ;;  %v12357_v60 = vpop.f32.mrb[179].mxu1  ;;  %v19737_v49 = vld [vmem:[%s25405_s6 + $0xb4c] ss:$16 sps:$4 sm:$0xff]   ;;  %v19732_v28 = vld [vmem:[%s25405_s6 + $0xb40] ss:$16 sps:$4 sm:$0xff]  }
0x19d5   : > { %v12365_v36 = vpack.c.bf16 %v12304_v18, %v12300_v13  ;;  %v24664_v24 = vpack.c.bf16 %v12357_v60, %v12353_v20  ;;  %13192 = vmatpush1.bf16.msra.mxu1 %v19678_v16  ;;  %13298 = vmatpush1.bf16.msra.mxu0 %v19681_v15  ;;  %v19735_v16 = vld [vmem:[%s25405_s6 + $0xb48] ss:$16 sps:$4 sm:$0xff]   ;;  %v19740_v15 = vld [vmem:[%s25405_s6 + $0xb64] ss:$16 sps:$4 sm:$0xff]   ;;  %v19743_v13 = vld [vmem:[%s25405_s6 + $0xb6c] ss:$16 sps:$4 sm:$0xff]  }
0x19d6   : > { %13193 = vmatprep.subr.bf16.mxu1 %v19686_v22  ;;  %13299 = vmatprep.subr.bf16.mxu0 %v19689_v6  ;;  %v19738_v20 = vld [vmem:[%s25405_s6 + $0xb60] ss:$16 sps:$4 sm:$0xff]   ;;  %v19741_v22 = vld [vmem:[%s25405_s6 + $0xb68] ss:$16 sps:$4 sm:$0xff]   ;;  %v19746_v6 = vld [vmem:[%s25405_s6 + $0xb84] ss:$16 sps:$4 sm:$0xff]  }
0x19d7   : > { %13178 = vmatprep.mubr.bf16.mxu1 %v12365_v36  ;;  %13284 = vmatprep.mubr.bf16.mxu0 %v12365_v36  ;;  %v19749_v17 = vld [vmem:[%s25405_s6 + $0xb8c] ss:$16 sps:$4 sm:$0xff]   ;;  %v19744_v29 = vld [vmem:[%s25405_s6 + $0xb80] ss:$16 sps:$4 sm:$0xff]   ;;  %v19752_v18 = vld [vmem:[%s25405_s6 + $0xba4] ss:$16 sps:$4 sm:$0xff]  }
0x19d8   : > { %13179 = vmatmul.mubr.bf16.gmra.mrb[148].mxu1 %v12364_v34  ;;  %13285 = vmatmul.mubr.bf16.gmra.mrb[152].mxu0 %v12364_v34  ;;  %v19747_v34 = vld [vmem:[%s25405_s6 + $0xb88] ss:$16 sps:$4 sm:$0xff]   ;;  %v19755_v60 = vld [vmem:[%s25405_s6 + $0xbac] ss:$16 sps:$4 sm:$0xff]   ;;  %v19750_v36 = vld [vmem:[%s25405_s6 + $0xba0] ss:$16 sps:$4 sm:$0xff]  }
0x19d9   : > { %13194 = vmatpush1.bf16.msra.mxu1 %v19684_v39  ;;  %13300 = vmatpush1.bf16.msra.mxu0 %v19687_v31  ;;  %v19753_v39 = vld [vmem:[%s25405_s6 + $0xba8] ss:$16 sps:$4 sm:$0xff]   ;;  %v19758_v31 = vld [vmem:[%s25405_s6 + $0xbc4] ss:$16 sps:$4 sm:$0xff]  }
0x19da   : > { %13221 = vmatprep.mubr.bf16.mxu1 %v12363_v3  ;;  %13327 = vmatprep.mubr.bf16.mxu0 %v12363_v3  ;;  %v19728_v3 = vld [vmem:[%s25405_s6 + $0xb24] ss:$16 sps:$4 sm:$0xff]  }
0x19db   : > { %13195 = vmatprep.subr.bf16.mxu1 %v19692_v19  ;;  %13301 = vmatprep.subr.bf16.mxu0 %v19695_v46  ;;  %v19761_v19 = vld [vmem:[%s25405_s6 + $0xbcc] ss:$16 sps:$4 sm:$0xff]   ;;  %v19756_v46 = vld [vmem:[%s25405_s6 + $0xbc0] ss:$16 sps:$4 sm:$0xff]  }
0x19dd   : > { %13196 = vmatpush1.bf16.msra.mxu1 %v19690_v23  ;;  %13302 = vmatpush1.bf16.msra.mxu0 %v19693_v30  ;;  %v19759_v23 = vld [vmem:[%s25405_s6 + $0xbc8] ss:$16 sps:$4 sm:$0xff]   ;;  %v19764_v30 = vld [vmem:[%s25405_s6 + $0xbe4] ss:$16 sps:$4 sm:$0xff]  }
0x19de   : > { %13197 = vmatprep.subr.bf16.mxu1 %v19698_v45  ;;  %13303 = vmatprep.subr.bf16.mxu0 %v19701_v63  ;;  %v19767_v45 = vld [vmem:[%s25405_s6 + $0xbec] ss:$16 sps:$4 sm:$0xff]   ;;  %v19762_v63 = vld [vmem:[%s25405_s6 + $0xbe0] ss:$16 sps:$4 sm:$0xff]  }
0x19e1   : > { %13198 = vmatpush1.bf16.msra.mxu1 %v19696_v0  ;;  %13304 = vmatpush1.bf16.msra.mxu0 %v19699_v47  ;;  %v19765_v0 = vld [vmem:[%s25405_s6 + $0xbe8] ss:$16 sps:$4 sm:$0xff]   ;;  %v19770_v47 = vld [vmem:[%s25408_s9 + $0x4] ss:$16 sps:$4 sm:$0xff]  }
0x19e2   : > { %13199 = vmatprep.subr.bf16.mxu1 %v19704_v27  ;;  %13305 = vmatprep.subr.bf16.mxu0 %v19707_v14  ;;  %v19773_v27 = vld [vmem:[%s25408_s9 + $0xc] ss:$16 sps:$4 sm:$0xff]   ;;  %v19768_v14 = vld [vmem:[%s25408_s9] ss:$16 sps:$4 sm:$0xff]  }
0x19e5   : > { %13200 = vmatpush1.bf16.msra.mxu1 %v19702_v42  ;;  %13306 = vmatpush1.bf16.msra.mxu0 %v19705_v33  ;;  %v19771_v42 = vld [vmem:[%s25408_s9 + $0x8] ss:$16 sps:$4 sm:$0xff]   ;;  %v19776_v33 = vld [vmem:[%s25408_s9 + $0x24] ss:$16 sps:$4 sm:$0xff]  }
0x19e6   : > { %13201 = vmatprep.subr.bf16.mxu1 %v19710_v9  ;;  %13307 = vmatprep.subr.bf16.mxu0 %v19713_v40  ;;  %v19779_v9 = vld [vmem:[%s25408_s9 + $0x2c] ss:$16 sps:$4 sm:$0xff]   ;;  %v19774_v40 = vld [vmem:[%s25408_s9 + $0x20] ss:$16 sps:$4 sm:$0xff]  }
0x19e9   : > { %13202 = vmatpush1.bf16.msra.mxu1 %v19708_v52  ;;  %13308 = vmatpush1.bf16.msra.mxu0 %v19711_v32  ;;  %v19777_v52 = vld [vmem:[%s25408_s9 + $0x28] ss:$16 sps:$4 sm:$0xff]   ;;  %v19780_v32 = vld [vmem:[%s25408_s9 + $0x40] ss:$16 sps:$4 sm:$0xff]  }
0x19ea   : > { %13203 = vmatprep.subr.bf16.mxu1 %v19716_v43  ;;  %13309 = vmatprep.subr.bf16.mxu0 %v19719_v50  ;;  %v19783_v43 = vld [vmem:[%s25408_s9 + $0x48] ss:$16 sps:$4 sm:$0xff]   ;;  %v19788_v50 = vld [vmem:[%s25408_s9 + $0x64] ss:$16 sps:$4 sm:$0xff]  }
0x19ed   : > { %13204 = vmatpush1.bf16.msra.mxu1 %v19714_v11  ;;  %13310 = vmatpush1.bf16.msra.mxu0 %v19717_v51  ;;  %v19791_v11 = vld [vmem:[%s25408_s9 + $0x6c] ss:$16 sps:$4 sm:$0xff]   ;;  %v19786_v51 = vld [vmem:[%s25408_s9 + $0x60] ss:$16 sps:$4 sm:$0xff]  }
0x19ee   : > { %13205 = vmatprep.subr.bf16.mxu1 %v19722_v37  ;;  %13311 = vmatprep.subr.bf16.mxu0 %v19725_v41  ;;  %v19789_v37 = vld [vmem:[%s25408_s9 + $0x68] ss:$16 sps:$4 sm:$0xff]   ;;  %v19794_v41 = vld [vmem:[%s25408_s9 + $0x84] ss:$16 sps:$4 sm:$0xff]  }
0x19f1   : > { %13206 = vmatpush1.bf16.msra.mxu1 %v19720_v35  ;;  %13312 = vmatpush1.bf16.msra.mxu0 %v19723_v61  ;;  %v19792_v35 = vld [vmem:[%s25408_s9 + $0x80] ss:$16 sps:$4 sm:$0xff]   ;;  %v19795_v61 = vld [vmem:[%s25408_s9 + $0x88] ss:$16 sps:$4 sm:$0xff]  }
0x19f2   : > { %13207 = vmatprep.subr.bf16.mxu1 %v19728_v3  ;;  %13313 = vmatprep.subr.bf16.mxu0 %v19731_v48  ;;  %v19800_v3 = vld [vmem:[%s25408_s9 + $0xa4] ss:$16 sps:$4 sm:$0xff]   ;;  %v19803_v48 = vld [vmem:[%s25408_s9 + $0xac] ss:$16 sps:$4 sm:$0xff]  }
0x19f5   : > { %13208 = vmatpush1.bf16.msra.mxu1 %v19726_v21  ;;  %13314 = vmatpush1.bf16.msra.mxu0 %v19729_v25  ;;  %v19798_v21 = vld [vmem:[%s25408_s9 + $0xa0] ss:$16 sps:$4 sm:$0xff]   ;;  %v19801_v25 = vld [vmem:[%s25408_s9 + $0xa8] ss:$16 sps:$4 sm:$0xff]  }
0x19f6   : > { %13209 = vmatprep.subr.bf16.mxu1 %v19734_v62  ;;  %13315 = vmatprep.subr.bf16.mxu0 %v19737_v49  ;;  %v19806_v62 = vld [vmem:[%s25408_s9 + $0xc4] ss:$16 sps:$4 sm:$0xff]   ;;  %v19809_v49 = vld [vmem:[%s25408_s9 + $0xcc] ss:$16 sps:$4 sm:$0xff]  }
0x19f9   : > { %13210 = vmatpush1.bf16.msra.mxu1 %v19732_v28  ;;  %13316 = vmatpush1.bf16.msra.mxu0 %v19735_v16  ;;  %v19804_v28 = vld [vmem:[%s25408_s9 + $0xc0] ss:$16 sps:$4 sm:$0xff]   ;;  %v19807_v16 = vld [vmem:[%s25408_s9 + $0xc8] ss:$16 sps:$4 sm:$0xff]  }
0x19fa   : > { %13211 = vmatprep.subr.bf16.mxu1 %v19740_v15  ;;  %13317 = vmatprep.subr.bf16.mxu0 %v19743_v13  ;;  %v19812_v15 = vld [vmem:[%s25408_s9 + $0xe4] ss:$16 sps:$4 sm:$0xff]   ;;  %v19815_v13 = vld [vmem:[%s25408_s9 + $0xec] ss:$16 sps:$4 sm:$0xff]  }
0x19fd   : > { %13212 = vmatpush1.bf16.msra.mxu1 %v19738_v20  ;;  %13318 = vmatpush1.bf16.msra.mxu0 %v19741_v22  ;;  %v19810_v20 = vld [vmem:[%s25408_s9 + $0xe0] ss:$16 sps:$4 sm:$0xff]   ;;  %v19813_v22 = vld [vmem:[%s25408_s9 + $0xe8] ss:$16 sps:$4 sm:$0xff]  }
0x19fe   : > { %13213 = vmatprep.subr.bf16.mxu1 %v19746_v6  ;;  %13319 = vmatprep.subr.bf16.mxu0 %v19749_v17  ;;  %v19818_v6 = vld [vmem:[%s25408_s9 + $0x104] ss:$16 sps:$4 sm:$0xff]   ;;  %v19821_v17 = vld [vmem:[%s25408_s9 + $0x10c] ss:$16 sps:$4 sm:$0xff]  }
0x1a01   : > { %13214 = vmatpush1.bf16.msra.mxu1 %v19744_v29  ;;  %13320 = vmatpush1.bf16.msra.mxu0 %v19747_v34  ;;  %v19816_v29 = vld [vmem:[%s25408_s9 + $0x100] ss:$16 sps:$4 sm:$0xff]   ;;  %v19819_v34 = vld [vmem:[%s25408_s9 + $0x108] ss:$16 sps:$4 sm:$0xff]  }
0x1a02   : > { %13215 = vmatprep.subr.bf16.mxu1 %v19752_v18  ;;  %13321 = vmatprep.subr.bf16.mxu0 %v19755_v60  ;;  %v19824_v18 = vld [vmem:[%s25408_s9 + $0x124] ss:$16 sps:$4 sm:$0xff]   ;;  %v19827_v60 = vld [vmem:[%s25408_s9 + $0x12c] ss:$16 sps:$4 sm:$0xff]  }
0x1a05   : > { %13216 = vmatpush1.bf16.msra.mxu1 %v19750_v36  ;;  %13322 = vmatpush1.bf16.msra.mxu0 %v19753_v39  ;;  %v19822_v36 = vld [vmem:[%s25408_s9 + $0x120] ss:$16 sps:$4 sm:$0xff]   ;;  %v19825_v39 = vld [vmem:[%s25408_s9 + $0x128] ss:$16 sps:$4 sm:$0xff]  }
0x1a06   : > { %13217 = vmatprep.subr.bf16.mxu1 %v19758_v31  ;;  %13323 = vmatprep.subr.bf16.mxu0 %v19761_v19  ;;  %v19830_v31 = vld [vmem:[%s25408_s9 + $0x144] ss:$16 sps:$4 sm:$0xff]   ;;  %v19833_v19 = vld [vmem:[%s25408_s9 + $0x14c] ss:$16 sps:$4 sm:$0xff]  }
0x1a09   : > { %13218 = vmatpush1.bf16.msra.mxu1 %v19756_v46  ;;  %13324 = vmatpush1.bf16.msra.mxu0 %v19759_v23  ;;  %v19828_v46 = vld [vmem:[%s25408_s9 + $0x140] ss:$16 sps:$4 sm:$0xff]   ;;  %v19831_v23 = vld [vmem:[%s25408_s9 + $0x148] ss:$16 sps:$4 sm:$0xff]  }
0x1a0a   : > { %13219 = vmatprep.subr.bf16.mxu1 %v19764_v30  ;;  %13325 = vmatprep.subr.bf16.mxu0 %v19767_v45  ;;  %v19836_v30 = vld [vmem:[%s25408_s9 + $0x164] ss:$16 sps:$4 sm:$0xff]   ;;  %v19839_v45 = vld [vmem:[%s25408_s9 + $0x16c] ss:$16 sps:$4 sm:$0xff]  }
0x1a0d   : > { %13220 = vmatpush1.bf16.msra.mxu1 %v19762_v63  ;;  %13326 = vmatpush1.bf16.msra.mxu0 %v19765_v0  ;;  %v19834_v63 = vld [vmem:[%s25408_s9 + $0x160] ss:$16 sps:$4 sm:$0xff]   ;;  %v19837_v0 = vld [vmem:[%s25408_s9 + $0x168] ss:$16 sps:$4 sm:$0xff]  }
0x1a0e   : > { %14204 = vmatprep.subr.bf16.mxu0 %v19770_v47  ;;  %14310 = vmatprep.subr.bf16.mxu1 %v19773_v27  ;;  %v19842_v47 = vld [vmem:[%s25408_s9 + $0x184] ss:$16 sps:$4 sm:$0xff]   ;;  %v19845_v27 = vld [vmem:[%s25408_s9 + $0x18c] ss:$16 sps:$4 sm:$0xff]  }
0x1a10   : > { %13222 = vmatmul.mubr.bf16.vlgmr.msra.gmra.mrb[144].mxu1 %v24636_v1  ;;  %13328 = vmatmul.mubr.bf16.vlgmr.msra.gmra.mrb[148].mxu0 %v24636_v1  ;;  %v19782_v1 = vld [vmem:[%s25408_s9 + $0x44] ss:$16 sps:$4 sm:$0xff]  }
0x1a11   : > { %13231 = vmatprep.mubr.bf16.mxu1 %v24664_v24  ;;  %13337 = vmatprep.mubr.bf16.mxu0 %v24664_v24  ;;  %v19785_v24 = vld [vmem:[%s25408_s9 + $0x4c] ss:$16 sps:$4 sm:$0xff]  }
0x1a12   : > { %14205 = vmatpush1.bf16.msra.mxu0 %v19768_v14  ;;  %14311 = vmatpush1.bf16.msra.mxu1 %v19771_v42  ;;  %v19840_v14 = vld [vmem:[%s25408_s9 + $0x180] ss:$16 sps:$4 sm:$0xff]   ;;  %v19843_v42 = vld [vmem:[%s25408_s9 + $0x188] ss:$16 sps:$4 sm:$0xff]  }
0x1a13   : > { %14206 = vmatprep.subr.bf16.mxu0 %v19776_v33  ;;  %14312 = vmatprep.subr.bf16.mxu1 %v19779_v9  ;;  %v19848_v33 = vld [vmem:[%s25408_s9 + $0x1a4] ss:$16 sps:$4 sm:$0xff]   ;;  %v19851_v9 = vld [vmem:[%s25408_s9 + $0x1ac] ss:$16 sps:$4 sm:$0xff]  }
0x1a16   : > { %14207 = vmatpush1.bf16.msra.mxu0 %v19774_v40  ;;  %14313 = vmatpush1.bf16.msra.mxu1 %v19777_v52  ;;  %v19846_v40 = vld [vmem:[%s25408_s9 + $0x1a0] ss:$16 sps:$4 sm:$0xff]   ;;  %v19849_v52 = vld [vmem:[%s25408_s9 + $0x1a8] ss:$16 sps:$4 sm:$0xff]  }
0x1a17   : > { %14208 = vmatprep.subr.bf16.mxu0 %v19782_v1  ;;  %14314 = vmatprep.subr.bf16.mxu1 %v19785_v24  ;;  %v19854_v1 = vld [vmem:[%s25408_s9 + $0x1c4] ss:$16 sps:$4 sm:$0xff]   ;;  %v19857_v24 = vld [vmem:[%s25408_s9 + $0x1cc] ss:$16 sps:$4 sm:$0xff]  }
0x1a18   : > { %13232 = vmatmul.mubr.bf16.gmra.mrb[148].mxu1 %v24662_v38  ;;  %13338 = vmatmul.mubr.bf16.gmra.mrb[152].mxu0 %v24662_v38  ;;  %v19797_v38 = vld [vmem:[%s25408_s9 + $0x8c] ss:$16 sps:$4 sm:$0xff]  }
0x1a1a   : > { %14209 = vmatpush1.bf16.msra.mxu0 %v19780_v32  ;;  %14315 = vmatpush1.bf16.msra.mxu1 %v19783_v43  ;;  %v19852_v32 = vld [vmem:[%s25408_s9 + $0x1c0] ss:$16 sps:$4 sm:$0xff]   ;;  %v19855_v43 = vld [vmem:[%s25408_s9 + $0x1c8] ss:$16 sps:$4 sm:$0xff]  }
0x1a1b   : > { %14210 = vmatprep.subr.bf16.mxu0 %v19788_v50  ;;  %14316 = vmatprep.subr.bf16.mxu1 %v19791_v11  ;;  %v19860_v50 = vld [vmem:[%s25408_s9 + $0x1e4] ss:$16 sps:$4 sm:$0xff]   ;;  %v19863_v11 = vld [vmem:[%s25408_s9 + $0x1ec] ss:$16 sps:$4 sm:$0xff]  }
0x1a1e   : > { %14211 = vmatpush1.bf16.msra.mxu0 %v19786_v51  ;;  %14317 = vmatpush1.bf16.msra.mxu1 %v19789_v37  ;;  %v19858_v51 = vld [vmem:[%s25408_s9 + $0x1e0] ss:$16 sps:$4 sm:$0xff]   ;;  %v19861_v37 = vld [vmem:[%s25408_s9 + $0x1e8] ss:$16 sps:$4 sm:$0xff]  }
0x1a1f   : > { %14212 = vmatprep.subr.bf16.mxu0 %v19794_v41  ;;  %14318 = vmatprep.subr.bf16.mxu1 %v19797_v38  ;;  %v19866_v41 = vld [vmem:[%s25408_s9 + $0x204] ss:$16 sps:$4 sm:$0xff]   ;;  %v19869_v38 = vld [vmem:[%s25408_s9 + $0x20c] ss:$16 sps:$4 sm:$0xff]  }
0x1a22   : > { %14213 = vmatpush1.bf16.msra.mxu0 %v19792_v35  ;;  %14319 = vmatpush1.bf16.msra.mxu1 %v19795_v61 }
0x1a23   : > { %14214 = vmatprep.subr.bf16.mxu0 %v19800_v3  ;;  %14320 = vmatprep.subr.bf16.mxu1 %v19803_v48 }
0x1a26   : > { %14215 = vmatpush1.bf16.msra.mxu0 %v19798_v21  ;;  %14321 = vmatpush1.bf16.msra.mxu1 %v19801_v25 }
0x1a27   : > { %14216 = vmatprep.subr.bf16.mxu0 %v19806_v62  ;;  %14322 = vmatprep.subr.bf16.mxu1 %v19809_v49 }
0x1a2a   : > { %14217 = vmatpush1.bf16.msra.mxu0 %v19804_v28  ;;  %14323 = vmatpush1.bf16.msra.mxu1 %v19807_v16 }
0x1a2b   : > { %14218 = vmatprep.subr.bf16.mxu0 %v19812_v15  ;;  %14324 = vmatprep.subr.bf16.mxu1 %v19815_v13 }
0x1a2e   : > { %14219 = vmatpush1.bf16.msra.mxu0 %v19810_v20  ;;  %14325 = vmatpush1.bf16.msra.mxu1 %v19813_v22 }
0x1a2f   : > { %14220 = vmatprep.subr.bf16.mxu0 %v19818_v6  ;;  %14326 = vmatprep.subr.bf16.mxu1 %v19821_v17 }
0x1a32   : > { %14221 = vmatpush1.bf16.msra.mxu0 %v19816_v29  ;;  %14327 = vmatpush1.bf16.msra.mxu1 %v19819_v34 }
0x1a33   : > { %14222 = vmatprep.subr.bf16.mxu0 %v19824_v18  ;;  %14328 = vmatprep.subr.bf16.mxu1 %v19827_v60 }
0x1a36   : > { %14223 = vmatpush1.bf16.msra.mxu0 %v19822_v36  ;;  %14329 = vmatpush1.bf16.msra.mxu1 %v19825_v39  ;;  %v25045_v36 = vld [vmem:[%s20271_s20 + $0x80] sm:$0xff] }
0x1a37   : > { %14224 = vmatprep.subr.bf16.mxu0 %v19830_v31  ;;  %14330 = vmatprep.subr.bf16.mxu1 %v19833_v19  ;;  %v25049_v31 = vld [vmem:[%s20271_s20 + $0x90] sm:$0xff] }
0x1a3a   : > { %14225 = vmatpush1.bf16.msra.mxu0 %v19828_v46  ;;  %14331 = vmatpush1.bf16.msra.mxu1 %v19831_v23 }
0x1a3b   : > { %14226 = vmatprep.subr.bf16.mxu0 %v19836_v30  ;;  %14332 = vmatprep.subr.bf16.mxu1 %v19839_v45  ;;  %v25055_v30 = vld [vmem:[%s20271_s20 + $0x88] sm:$0xff] }
0x1a3e   : > { %14227 = vmatpush1.bf16.msra.mxu0 %v19834_v63  ;;  %14333 = vmatpush1.bf16.msra.mxu1 %v19837_v0  ;;  %v25061_v63 = vld [vmem:[%s20271_s20 + $0x98] sm:$0xff] }
0x1a3f   : > { %14228 = vmatprep.subr.bf16.mxu0 %v19842_v47  ;;  %14334 = vmatprep.subr.bf16.mxu1 %v19845_v27 }
0x1a42   : > { %14229 = vmatpush1.bf16.msra.mxu0 %v19840_v14  ;;  %14335 = vmatpush1.bf16.msra.mxu1 %v19843_v42  ;;  %v25069_v14 = vld [vmem:[%s20271_s20 + $0xa0] sm:$0xff] }
0x1a43   : > { %14230 = vmatprep.subr.bf16.mxu0 %v19848_v33  ;;  %14336 = vmatprep.subr.bf16.mxu1 %v19851_v9  ;;  %v25073_v33 = vld [vmem:[%s20271_s20 + $0xb0] sm:$0xff] }
0x1a46   : > { %14231 = vmatpush1.bf16.msra.mxu0 %v19846_v40  ;;  %14337 = vmatpush1.bf16.msra.mxu1 %v19849_v52 }
0x1a47   : > { %14232 = vmatprep.subr.bf16.mxu0 %v19854_v1  ;;  %14338 = vmatprep.subr.bf16.mxu1 %v19857_v24  ;;  %v25077_v1 = vld [vmem:[%s20271_s20 + $0xa8] sm:$0xff] }
0x1a4a   : > { %14233 = vmatpush1.bf16.msra.mxu0 %v19852_v32  ;;  %14339 = vmatpush1.bf16.msra.mxu1 %v19855_v43  ;;  %v25081_v32 = vld [vmem:[%s20271_s20 + $0xb8] sm:$0xff] }
0x1a4b   : > { %14234 = vmatprep.subr.bf16.mxu0 %v19860_v50  ;;  %14340 = vmatprep.subr.bf16.mxu1 %v19863_v11 }
0x1a4e   : > { %14235 = vmatpush1.bf16.msra.mxu0 %v19858_v51  ;;  %14341 = vmatpush1.bf16.msra.mxu1 %v19861_v37 }
0x1a4f   : > { %14257 = vmatprep.subr.bf16.mxu0 %v19866_v41  ;;  %14363 = vmatprep.subr.bf16.mxu1 %v19869_v38 }
0x1ae3   : > { %v13223_v35 = vpop.f32.mrb[144].mxu1  ;;  %v13329_v61 = vpop.f32.mrb[148].mxu0 }
0x1ae4   : > { %v13364_v3 = vmul.f32 %v13223_v35, %v22404_v53  ;;  %v13366_v48 = vmul.f32 %v13329_v61, %v22407_v54  ;;  %v13225_v21 = vpop.f32.mrb[145].mxu1  ;;  %v13331_v25 = vpop.f32.mrb[149].mxu0 }
0x1ae5   : > { %v13365_v62 = vmul.f32 %v13225_v21, %v22410_v55  ;;  %v13367_v49 = vmul.f32 %v13331_v25, %v22413_v26  ;;  %v13227_v28 = vpop.f32.mrb[146].mxu1  ;;  %v13333_v16 = vpop.f32.mrb[150].mxu0 }
0x1ae6   : > { %v13380_v15 = vadd.f32 %v13364_v3, %v22416_v56  ;;  %v13382_v13 = vadd.f32 %v13366_v48, %v22419_v44  ;;  %v13368_v20 = vmul.f32 %v13227_v28, %v22404_v53  ;;  %v13370_v22 = vmul.f32 %v13333_v16, %v22407_v54  ;;  %v13229_v6 = vpop.f32.mrb[147].mxu1  ;;  %v13335_v17 = vpop.f32.mrb[151].mxu0 }
0x1ae7   : > { %v13381_v29 = vadd.f32 %v13365_v62, %v22422_v58  ;;  %v13383_v34 = vadd.f32 %v13367_v49, %v22425_v59  ;;  %v13369_v18 = vmul.f32 %v13229_v6, %v22410_v55  ;;  %v13371_v60 = vmul.f32 %v13335_v17, %v22413_v26 }
0x1ae8   : > { %v13396_v39 = vadd.f32 %v25045_v36, %v13380_v15  ;;  %v13398_v19 = vadd.f32 %v25049_v31, %v13382_v13  ;;  %v13384_v46 = vadd.f32 %v13368_v20, %v22416_v56  ;;  %v13386_v23 = vadd.f32 %v13370_v22, %v22419_v44 }
0x1ae9   : > { %v25058_v45 = vadd.f32 %v25055_v30, %v13381_v29  ;;  %v25064_v0 = vadd.f32 %v25061_v63, %v13383_v34  ;;  %v13385_v47 = vadd.f32 %v13369_v18, %v22422_v58  ;;  %v13387_v27 = vadd.f32 %v13371_v60, %v22425_v59 }
0x1aea   : > { %v13400_v42 = vadd.f32 %v25069_v14, %v13384_v46  ;;  %v13402_v9 = vadd.f32 %v25073_v33, %v13386_v23  ;;  %v13412_v40 = vmax.f32 %v13396_v39, 0.0  ;;  %v13414_v52 = vmax.f32 %v13398_v19, 0.0  ;;  %v25101_v46 = vld [vmem:[%s20271_s20 + $0xc0] sm:$0xff] }
0x1aeb   : > { %v13401_v24 = vadd.f32 %v25077_v1, %v13385_v47  ;;  %v13403_v43 = vadd.f32 %v25081_v32, %v13387_v27  ;;  %v13233_v50 = vpop.f32.mrb[148].mxu1  ;;  %v13339_v11 = vpop.f32.mrb[152].mxu0  ;;  %v13413_v3 = vmax.f32 %v25058_v45, 0.0  ;;  %v13415_v48 = vmax.f32 %v25064_v0, 0.0  ;;  %v25105_v45 = vld [vmem:[%s20271_s20 + $0xd0] sm:$0xff]  ;;  %v25111_v47 = vld [vmem:[%s20271_s20 + $0xc8] sm:$0xff] }
0x1aec   : > { %v13416_v51 = vmax.f32 %v13400_v42, 0.0  ;;  %v13418_v37 = vmax.f32 %v13402_v9, 0.0  ;;  %v13372_v41 = vmul.f32 %v13233_v50, %v22404_v53  ;;  %v13374_v38 = vmul.f32 %v13339_v11, %v22407_v54  ;;  %v13235_v35 = vpop.f32.mrb[149].mxu1  ;;  %v13341_v61 = vpop.f32.mrb[153].mxu0  ;;  %v25115_v27 = vld [vmem:[%s20271_s20 + $0xd8] sm:$0xff] }
0x1aed   : > { %v13373_v21 = vmul.f32 %v13235_v35, %v22410_v55  ;;  %v13375_v25 = vmul.f32 %v13341_v61, %v22413_v26  ;;  %v13237_v62 = vpop.f32.mrb[150].mxu1  ;;  %v13343_v49 = vpop.f32.mrb[154].mxu0  ;;  %v13417_v18 = vmax.f32 %v13401_v24, 0.0  ;;  %v13419_v60 = vmax.f32 %v13403_v43, 0.0  ;;  %v25125_v24 = vld [vmem:[%s20271_s20 + $0xf0] sm:$0x1] }
0x1aee   : > { %v13428_v28 = vpack.c.bf16 %v13416_v51, %v13412_v40  ;;  %v25090_v16 = vpack.c.bf16 %v13418_v37, %v13414_v52  ;;  %v13388_v15 = vadd.f32 %v13372_v41, %v22416_v56  ;;  %v13390_v13 = vadd.f32 %v13374_v38, %v22419_v44  ;;  %v13239_v20 = vpop.f32.mrb[151].mxu1  ;;  %v13345_v22 = vpop.f32.mrb[155].mxu0  ;;  %v25121_v40 = vld [vmem:[%s20271_s20 + $0xe0] sm:$0x1]  ;;  %v25133_v50 = vld [vmem:[%s20271_s20 + $0xf8] sm:$0x1] }
0x1aef   : > { %v13389_v6 = vadd.f32 %v13373_v21, %v22422_v58  ;;  %v13391_v17 = vadd.f32 %v13375_v25, %v22425_v59  ;;  %v13376_v29 = vmul.f32 %v13237_v62, %v22404_v53  ;;  %v13378_v34 = vmul.f32 %v13343_v49, %v22407_v54  ;;  %v19872_v37 = vld [vmem:[%s25408_s9 + $0x224] ss:$16 sps:$4 sm:$0xff]  }
0x1af0   : > { %v13377_v39 = vmul.f32 %v13239_v20, %v22410_v55  ;;  %v13379_v19 = vmul.f32 %v13345_v22, %v22413_v26  ;;  %v13404_v23 = vadd.f32 %v25101_v46, %v13388_v15  ;;  %v13406_v53 = vadd.f32 %v25105_v45, %v13390_v13  ;;  %v19873_v22 = vld [vmem:[%s25408_s9 + $0x228] ss:$16 sps:$4 sm:$0xff]  }
0x1af1   : > { %v13392_v54 = vadd.f32 %v13376_v29, %v22416_v56  ;;  %v13394_v0 = vadd.f32 %v13378_v34, %v22419_v44  ;;  %v13405_v55 = vadd.f32 %v25111_v47, %v13389_v6  ;;  %v13407_v26 = vadd.f32 %v25115_v27, %v13391_v17  ;;  %v25129_v44 = vld [vmem:[%s20271_s20 + $0xe8] sm:$0x1]  ;;  %v19881_v29 = vld [vmem:[%s25408_s9 + $0x24c] ss:$16 sps:$4 sm:$0xff]   ;;  %v19876_v34 = vld [vmem:[%s25408_s9 + $0x240] ss:$16 sps:$4 sm:$0xff]  }
0x1af2   : > { %v13393_v42 = vadd.f32 %v13377_v39, %v22422_v58  ;;  %v13395_v9 = vadd.f32 %v13379_v19, %v22425_v59  ;;  %v13429_v51 = vpack.c.bf16 %v13417_v18, %v13413_v3  ;;  %v19864_v58 = vld [vmem:[%s25408_s9 + $0x200] ss:$16 sps:$4 sm:$0xff]   ;;  %v19867_v59 = vld [vmem:[%s25408_s9 + $0x208] ss:$16 sps:$4 sm:$0xff]   ;;  %v13431_v41 = vpack.c.bf16 %v13419_v60, %v13415_v48  ;;  %v19875_v3 = vld [vmem:[%s25408_s9 + $0x22c] ss:$16 sps:$4 sm:$0xff]  }
0x1af3   : > { %v13408_v52 = vadd.f32 %v25121_v40, %v13392_v54  ;;  %v13410_v56 = vadd.f32 %v25125_v24, %v13394_v0  ;;  %v13420_v38 = vmax.f32 %v13404_v23, 0.0  ;;  %v13422_v35 = vmax.f32 %v13406_v53, 0.0  ;;  %v19870_v48 = vld [vmem:[%s25408_s9 + $0x220] ss:$16 sps:$4 sm:$0xff]   ;;  %v19879_v18 = vld [vmem:[%s25408_s9 + $0x248] ss:$16 sps:$4 sm:$0xff]  }
0x1af4   : > { %v13409_v43 = vadd.f32 %v25129_v44, %v13393_v42  ;;  %v13411_v11 = vadd.f32 %v25133_v50, %v13395_v9  ;;  %v13421_v25 = vmax.f32 %v13405_v55, 0.0  ;;  %v13423_v62 = vmax.f32 %v13407_v26, 0.0  ;;  %14236 = vmatprep.mubr.bf16.mxu0 %v13429_v51  ;;  %14342 = vmatprep.mubr.bf16.mxu1 %v13429_v51  ;;  %v19884_v60 = vld [vmem:[%s25408_s9 + $0x264] ss:$16 sps:$4 sm:$0xff]   ;;  %v19887_v39 = vld [vmem:[%s25408_s9 + $0x26c] ss:$16 sps:$4 sm:$0xff]  }
0x1af5   : > { %v13424_v61 = vmax.f32 %v13408_v52, 0.0  ;;  %v13426_v21 = vmax.f32 %v13410_v56, 0.0  ;;  %14237 = vmatmul.mubr.bf16.vlgmr.msra.gmra.mrb[180].mxu0 %v13428_v28  ;;  %14343 = vmatmul.mubr.bf16.vlgmr.msra.gmra.mrb[180].mxu1 %v13428_v28  ;;  %v19878_v28 = vld [vmem:[%s25408_s9 + $0x244] ss:$16 sps:$4 sm:$0xff]   ;;  %v19882_v19 = vld [vmem:[%s25408_s9 + $0x260] ss:$16 sps:$4 sm:$0xff]  }
0x1af6   : > { %v13425_v49 = vmax.f32 %v13409_v43, 0.0  ;;  %v13427_v15 = vmax.f32 %v13411_v11, 0.0  ;;  %14258 = vmatpush1.bf16.msra.mxu0 %v19864_v58  ;;  %14364 = vmatpush1.bf16.msra.mxu1 %v19867_v59  ;;  %v19885_v23 = vld [vmem:[%s25408_s9 + $0x268] ss:$16 sps:$4 sm:$0xff]   ;;  %v19890_v53 = vld [vmem:[%s25408_s9 + $0x284] ss:$16 sps:$4 sm:$0xff]  }
0x1af7   : > { %v13432_v13 = vpack.c.bf16 %v13424_v61, %v13420_v38  ;;  %v25148_v20 = vpack.c.bf16 %v13426_v21, %v13422_v35  ;;  %14259 = vmatprep.subr.bf16.mxu0 %v19872_v37  ;;  %14365 = vmatprep.subr.bf16.mxu1 %v19875_v3  ;;  %v19893_v54 = vld [vmem:[%s25408_s9 + $0x28c] ss:$16 sps:$4 sm:$0xff]   ;;  %v19888_v0 = vld [vmem:[%s25408_s9 + $0x280] ss:$16 sps:$4 sm:$0xff]   ;;  %v19891_v55 = vld [vmem:[%s25408_s9 + $0x288] ss:$16 sps:$4 sm:$0xff]  }
0x1af8   : > { %v13433_v6 = vpack.c.bf16 %v13425_v49, %v13421_v25  ;;  %v25156_v17 = vpack.c.bf16 %v13427_v15, %v13423_v62  ;;  %v19896_v26 = vld [vmem:[%s25408_s9 + $0x2a4] ss:$16 sps:$4 sm:$0xff]   ;;  %v19899_v42 = vld [vmem:[%s25408_s9 + $0x2ac] ss:$16 sps:$4 sm:$0xff]   ;;  %v19894_v9 = vld [vmem:[%s25408_s9 + $0x2a0] ss:$16 sps:$4 sm:$0xff]  }
0x1af9   : > { %v19897_v52 = vld [vmem:[%s25408_s9 + $0x2a8] ss:$16 sps:$4 sm:$0xff]   ;;  %v19902_v56 = vld [vmem:[%s25408_s9 + $0x2c4] ss:$16 sps:$4 sm:$0xff]   ;;  %v19905_v43 = vld [vmem:[%s25408_s9 + $0x2cc] ss:$16 sps:$4 sm:$0xff]  }
0x1afa   : > { %14246 = vmatprep.mubr.bf16.mxu0 %v13433_v6  ;;  %14352 = vmatprep.mubr.bf16.mxu1 %v13433_v6  ;;  %v19900_v11 = vld [vmem:[%s25408_s9 + $0x2c0] ss:$16 sps:$4 sm:$0xff]   ;;  %v19903_v51 = vld [vmem:[%s25408_s9 + $0x2c8] ss:$16 sps:$4 sm:$0xff]   ;;  %v19908_v58 = vld [vmem:[%s25408_s9 + $0x2e4] ss:$16 sps:$4 sm:$0xff]  }
0x1afb   : > { %14260 = vmatpush1.bf16.msra.mxu0 %v19870_v48  ;;  %14366 = vmatpush1.bf16.msra.mxu1 %v19873_v22  ;;  %v19911_v59 = vld [vmem:[%s25408_s9 + $0x2ec] ss:$16 sps:$4 sm:$0xff]   ;;  %v19906_v37 = vld [vmem:[%s25408_s9 + $0x2e0] ss:$16 sps:$4 sm:$0xff]   ;;  %v19914_v38 = vld [vmem:[%s25408_s9 + $0x304] ss:$16 sps:$4 sm:$0xff]  }
0x1afc   : > { %14261 = vmatprep.subr.bf16.mxu0 %v19878_v28  ;;  %14367 = vmatprep.subr.bf16.mxu1 %v19881_v29  ;;  %v19917_v35 = vld [vmem:[%s25408_s9 + $0x30c] ss:$16 sps:$4 sm:$0xff]   ;;  %v19912_v61 = vld [vmem:[%s25408_s9 + $0x300] ss:$16 sps:$4 sm:$0xff]   ;;  %v19915_v21 = vld [vmem:[%s25408_s9 + $0x308] ss:$16 sps:$4 sm:$0xff]  }
0x1afd   : > { %14247 = vmatmul.mubr.bf16.gmra.mrb[184].mxu0 %v13432_v13  ;;  %14353 = vmatmul.mubr.bf16.gmra.mrb[184].mxu1 %v13432_v13  ;;  %v19920_v3 = vld [vmem:[%s25408_s9 + $0x324] ss:$16 sps:$4 sm:$0xff]   ;;  %v19923_v25 = vld [vmem:[%s25408_s9 + $0x32c] ss:$16 sps:$4 sm:$0xff]   ;;  %v19918_v62 = vld [vmem:[%s25408_s9 + $0x320] ss:$16 sps:$4 sm:$0xff]  }
0x1afe   : > { %14289 = vmatprep.mubr.bf16.mxu0 %v13431_v41  ;;  %14395 = vmatprep.mubr.bf16.mxu1 %v13431_v41  ;;  %v19909_v41 = vld [vmem:[%s25408_s9 + $0x2e8] ss:$16 sps:$4 sm:$0xff]   ;;  %v19926_v15 = vld [vmem:[%s25408_s9 + $0x344] ss:$16 sps:$4 sm:$0xff]   ;;  %v19929_v13 = vld [vmem:[%s25408_s9 + $0x34c] ss:$16 sps:$4 sm:$0xff]  }
0x1aff   : > { %14262 = vmatpush1.bf16.msra.mxu0 %v19876_v34  ;;  %14368 = vmatpush1.bf16.msra.mxu1 %v19879_v18  ;;  %v19921_v49 = vld [vmem:[%s25408_s9 + $0x328] ss:$16 sps:$4 sm:$0xff]   ;;  %v19924_v48 = vld [vmem:[%s25408_s9 + $0x340] ss:$16 sps:$4 sm:$0xff]   ;;  %v19932_v6 = vld [vmem:[%s25408_s9 + $0x364] ss:$16 sps:$4 sm:$0xff]  }
0x1b00   : > { %14263 = vmatprep.subr.bf16.mxu0 %v19884_v60  ;;  %14369 = vmatprep.subr.bf16.mxu1 %v19887_v39  ;;  %v19927_v22 = vld [vmem:[%s25408_s9 + $0x348] ss:$16 sps:$4 sm:$0xff]   ;;  %v19935_v28 = vld [vmem:[%s25408_s9 + $0x36c] ss:$16 sps:$4 sm:$0xff]   ;;  %v19930_v29 = vld [vmem:[%s25408_s9 + $0x360] ss:$16 sps:$4 sm:$0xff]  }
0x1b01   : > { %v19933_v34 = vld [vmem:[%s25408_s9 + $0x368] ss:$16 sps:$4 sm:$0xff]   ;;  %v19938_v18 = vld [vmem:[%s25408_s9 + $0x384] ss:$16 sps:$4 sm:$0xff]   ;;  %v19941_v60 = vld [vmem:[%s25408_s9 + $0x38c] ss:$16 sps:$4 sm:$0xff]  }
0x1b02   : > { %v19936_v39 = vld [vmem:[%s25408_s9 + $0x380] ss:$16 sps:$4 sm:$0xff]  }
0x1b03   : > { %14264 = vmatpush1.bf16.msra.mxu0 %v19882_v19  ;;  %14370 = vmatpush1.bf16.msra.mxu1 %v19885_v23  ;;  %v19939_v19 = vld [vmem:[%s25408_s9 + $0x388] ss:$16 sps:$4 sm:$0xff]   ;;  %v19944_v23 = vld [vmem:[%s25408_s9 + $0x3a4] ss:$16 sps:$4 sm:$0xff]  }
0x1b04   : > { %14265 = vmatprep.subr.bf16.mxu0 %v19890_v53  ;;  %14371 = vmatprep.subr.bf16.mxu1 %v19893_v54  ;;  %v19947_v53 = vld [vmem:[%s25408_s9 + $0x3ac] ss:$16 sps:$4 sm:$0xff]   ;;  %v19942_v54 = vld [vmem:[%s25408_s9 + $0x3a0] ss:$16 sps:$4 sm:$0xff]  }
0x1b07   : > { %14266 = vmatpush1.bf16.msra.mxu0 %v19888_v0  ;;  %14372 = vmatpush1.bf16.msra.mxu1 %v19891_v55  ;;  %v19945_v0 = vld [vmem:[%s25408_s9 + $0x3a8] ss:$16 sps:$4 sm:$0xff]   ;;  %v19950_v55 = vld [vmem:[%s25408_s9 + $0x3c4] ss:$16 sps:$4 sm:$0xff]  }
0x1b08   : > { %14267 = vmatprep.subr.bf16.mxu0 %v19896_v26  ;;  %14373 = vmatprep.subr.bf16.mxu1 %v19899_v42  ;;  %v19953_v26 = vld [vmem:[%s25408_s9 + $0x3cc] ss:$16 sps:$4 sm:$0xff]   ;;  %v19948_v42 = vld [vmem:[%s25408_s9 + $0x3c0] ss:$16 sps:$4 sm:$0xff]  }
0x1b0b   : > { %14268 = vmatpush1.bf16.msra.mxu0 %v19894_v9  ;;  %14374 = vmatpush1.bf16.msra.mxu1 %v19897_v52  ;;  %v19951_v9 = vld [vmem:[%s25408_s9 + $0x3c8] ss:$16 sps:$4 sm:$0xff]   ;;  %v19956_v52 = vld [vmem:[%s25408_s9 + $0x3e4] ss:$16 sps:$4 sm:$0xff]  }
0x1b0c   : > { %14269 = vmatprep.subr.bf16.mxu0 %v19902_v56  ;;  %14375 = vmatprep.subr.bf16.mxu1 %v19905_v43  ;;  %v19959_v56 = vld [vmem:[%s25408_s9 + $0x3ec] ss:$16 sps:$4 sm:$0xff]   ;;  %v19954_v43 = vld [vmem:[%s25408_s9 + $0x3e0] ss:$16 sps:$4 sm:$0xff]  }
0x1b0f   : > { %14270 = vmatpush1.bf16.msra.mxu0 %v19900_v11  ;;  %14376 = vmatpush1.bf16.msra.mxu1 %v19903_v51  ;;  %v19957_v11 = vld [vmem:[%s25408_s9 + $0x3e8] ss:$16 sps:$4 sm:$0xff]  }
0x1b10   : > { %14271 = vmatprep.subr.bf16.mxu0 %v19908_v58  ;;  %14377 = vmatprep.subr.bf16.mxu1 %v19911_v59 }
0x1b13   : > { %14272 = vmatpush1.bf16.msra.mxu0 %v19906_v37  ;;  %14378 = vmatpush1.bf16.msra.mxu1 %v19909_v41 }
0x1b14   : > { %14273 = vmatprep.subr.bf16.mxu0 %v19914_v38  ;;  %14379 = vmatprep.subr.bf16.mxu1 %v19917_v35 }
0x1b17   : > { %14274 = vmatpush1.bf16.msra.mxu0 %v19912_v61  ;;  %14380 = vmatpush1.bf16.msra.mxu1 %v19915_v21 }
0x1b18   : > { %14275 = vmatprep.subr.bf16.mxu0 %v19920_v3  ;;  %14381 = vmatprep.subr.bf16.mxu1 %v19923_v25 }
0x1b1b   : > { %14276 = vmatpush1.bf16.msra.mxu0 %v19918_v62  ;;  %14382 = vmatpush1.bf16.msra.mxu1 %v19921_v49 }
0x1b1c   : > { %14277 = vmatprep.subr.bf16.mxu0 %v19926_v15  ;;  %14383 = vmatprep.subr.bf16.mxu1 %v19929_v13 }
0x1b1f   : > { %14278 = vmatpush1.bf16.msra.mxu0 %v19924_v48  ;;  %14384 = vmatpush1.bf16.msra.mxu1 %v19927_v22 }
0x1b20   : > { %14279 = vmatprep.subr.bf16.mxu0 %v19932_v6  ;;  %14385 = vmatprep.subr.bf16.mxu1 %v19935_v28 }
0x1b23   : > { %14280 = vmatpush1.bf16.msra.mxu0 %v19930_v29  ;;  %14386 = vmatpush1.bf16.msra.mxu1 %v19933_v34 }
0x1b24   : > { %14281 = vmatprep.subr.bf16.mxu0 %v19938_v18  ;;  %14387 = vmatprep.subr.bf16.mxu1 %v19941_v60 }
0x1b27   : > { %14282 = vmatpush1.bf16.msra.mxu0 %v19936_v39  ;;  %14388 = vmatpush1.bf16.msra.mxu1 %v19939_v19 }
0x1b28   : > { %14283 = vmatprep.subr.bf16.mxu0 %v19944_v23  ;;  %14389 = vmatprep.subr.bf16.mxu1 %v19947_v53 }
0x1b2b   : > { %14284 = vmatpush1.bf16.msra.mxu0 %v19942_v54  ;;  %14390 = vmatpush1.bf16.msra.mxu1 %v19945_v0 }
0x1b2c   : > { %14285 = vmatprep.subr.bf16.mxu0 %v19950_v55  ;;  %14391 = vmatprep.subr.bf16.mxu1 %v19953_v26 }
0x1b2f   : > { %14286 = vmatpush1.bf16.msra.mxu0 %v19948_v42  ;;  %14392 = vmatpush1.bf16.msra.mxu1 %v19951_v9 }
0x1b30   : > { %14287 = vmatprep.subr.bf16.mxu0 %v19956_v52  ;;  %14393 = vmatprep.subr.bf16.mxu1 %v19959_v56 }
0x1b33   : > { %14288 = vmatpush1.bf16.msra.mxu0 %v19954_v43  ;;  %14394 = vmatpush1.bf16.msra.mxu1 %v19957_v11 }
0x1b36   : > { %14290 = vmatmul.mubr.bf16.vlgmr.msra.gmra.mrb[180].mxu0 %v25090_v16  ;;  %14396 = vmatmul.mubr.bf16.vlgmr.msra.gmra.mrb[180].mxu1 %v25090_v16 }
0x1b37   : > { %14299 = vmatprep.mubr.bf16.mxu0 %v25156_v17  ;;  %14405 = vmatprep.mubr.bf16.mxu1 %v25156_v17 }
0x1b3e   : > { %14300 = vmatmul.mubr.bf16.gmra.mrb[184].mxu0 %v25148_v20  ;;  %14406 = vmatmul.mubr.bf16.gmra.mrb[184].mxu1 %v25148_v20 }
0x1c09   : > { %v14291_v51 = vpop.f32.mrb[180].mxu0  ;;  %v14397_v58 = vpop.f32.mrb[180].mxu1 }
0x1c0a   : > { %v14416_v59 = vmul.f32 %v14291_v51, %v22977_v2  ;;  %v14418_v37 = vmul.f32 %v14397_v58, %v22980_v12  ;;  %v14293_v41 = vpop.f32.mrb[181].mxu0  ;;  %v14399_v38 = vpop.f32.mrb[181].mxu1 }
0x1c0b   : > { %v14417_v35 = vmul.f32 %v14293_v41, %v22983_v4  ;;  %v14419_v16 = vmul.f32 %v14399_v38, %v22986_v8  ;;  %v14295_v61 = vpop.f32.mrb[182].mxu0  ;;  %v14401_v21 = vpop.f32.mrb[182].mxu1 }
0x1c0c   : > { %v14432_v17 = vadd.f32 %v14416_v59, %v22989_v10  ;;  %v14434_v3 = vadd.f32 %v14418_v37, %v22992_v57  ;;  %v14420_v20 = vmul.f32 %v14295_v61, %v22977_v2  ;;  %v14422_v25 = vmul.f32 %v14401_v21, %v22980_v12  ;;  %v14297_v62 = vpop.f32.mrb[183].mxu0  ;;  %v14403_v49 = vpop.f32.mrb[183].mxu1 }
0x1c0d   : > { %v14433_v15 = vadd.f32 %v14417_v35, %v22995_v7  ;;  %v14435_v13 = vadd.f32 %v14419_v16, %v22998_v5  ;;  %v14421_v48 = vmul.f32 %v14297_v62, %v22983_v4  ;;  %v14423_v22 = vmul.f32 %v14403_v49, %v22986_v8 }
0x1c0e   : > { %v14448_v6 = vadd.f32 %v25045_v36, %v14432_v17  ;;  %v14450_v28 = vadd.f32 %v25049_v31, %v14434_v3  ;;  %v14436_v29 = vadd.f32 %v14420_v20, %v22989_v10  ;;  %v14438_v34 = vadd.f32 %v14422_v25, %v22992_v57 }
0x1c0f   : > { %v14449_v18 = vadd.f32 %v25055_v30, %v14433_v15  ;;  %v14451_v60 = vadd.f32 %v25061_v63, %v14435_v13  ;;  %v14437_v39 = vadd.f32 %v14421_v48, %v22995_v7  ;;  %v14439_v19 = vadd.f32 %v14423_v22, %v22998_v5 }
0x1c10   : > { %v14464_v23 = vmax.f32 %v14448_v6, 0.0  ;;  %v14466_v53 = vmax.f32 %v14450_v28, 0.0  ;;  %v14452_v36 = vadd.f32 %v25069_v14, %v14436_v29  ;;  %v14454_v31 = vadd.f32 %v25073_v33, %v14438_v34 }
0x1c11   : > { %v14465_v54 = vmax.f32 %v14449_v18, 0.0  ;;  %v14467_v0 = vmax.f32 %v14451_v60, 0.0  ;;  %v14453_v55 = vadd.f32 %v25077_v1, %v14437_v39  ;;  %v14455_v30 = vadd.f32 %v25081_v32, %v14439_v19  ;;  %v14301_v26 = vpop.f32.mrb[184].mxu0  ;;  %v14407_v63 = vpop.f32.mrb[184].mxu1 }
0x1c12   : > { %17074 = vst [vmem:[%s23021_s16 + $0x80] sm:$0xff] %v14464_v23  ;;  %17076 = vst [vmem:[%s23021_s16 + $0x90] sm:$0xff] %v14466_v53  ;;  %v14468_v42 = vmax.f32 %v14452_v36, 0.0  ;;  %v14470_v9 = vmax.f32 %v14454_v31, 0.0  ;;  %v14424_v14 = vmul.f32 %v14301_v26, %v22977_v2  ;;  %v14426_v52 = vmul.f32 %v14407_v63, %v22980_v12  ;;  %v14303_v33 = vpop.f32.mrb[185].mxu0  ;;  %v14409_v56 = vpop.f32.mrb[185].mxu1 }
0x1c13   : > { %17075 = vst [vmem:[%s23021_s16 + $0x88] sm:$0xff] %v14465_v54  ;;  %17077 = vst [vmem:[%s23021_s16 + $0x98] sm:$0xff] %v14467_v0  ;;  %v14469_v1 = vmax.f32 %v14453_v55, 0.0  ;;  %v14471_v32 = vmax.f32 %v14455_v30, 0.0  ;;  %v14425_v43 = vmul.f32 %v14303_v33, %v22983_v4  ;;  %v14427_v11 = vmul.f32 %v14409_v56, %v22986_v8  ;;  %v14305_v51 = vpop.f32.mrb[186].mxu0  ;;  %v14411_v58 = vpop.f32.mrb[186].mxu1 }
0x1c14   : > { %17078 = vst [vmem:[%s23021_s16 + $0xa0] sm:$0xff] %v14468_v42  ;;  %17080 = vst [vmem:[%s23021_s16 + $0xb0] sm:$0xff] %v14470_v9  ;;  %v14440_v59 = vadd.f32 %v14424_v14, %v22989_v10  ;;  %v14442_v37 = vadd.f32 %v14426_v52, %v22992_v57  ;;  %v14428_v41 = vmul.f32 %v14305_v51, %v22977_v2  ;;  %v14307_v35 = vpop.f32.mrb[187].mxu0  ;;  %v14413_v16 = vpop.f32.mrb[187].mxu1 }
0x1c15   : > { %v14430_v38 = vmul.f32 %v14411_v58, %v22980_v12  ;;  %17079 = vst [vmem:[%s23021_s16 + $0xa8] sm:$0xff] %v14469_v1  ;;  %17081 = vst [vmem:[%s23021_s16 + $0xb8] sm:$0xff] %v14471_v32  ;;  %v14441_v61 = vadd.f32 %v14425_v43, %v22995_v7  ;;  %v14443_v21 = vadd.f32 %v14427_v11, %v22998_v5 }
0x1c16   : > { %v14429_v17 = vmul.f32 %v14307_v35, %v22983_v4  ;;  %v14431_v3 = vmul.f32 %v14413_v16, %v22986_v8  ;;  %v14456_v20 = vadd.f32 %v25101_v46, %v14440_v59  ;;  %v14458_v25 = vadd.f32 %v25105_v45, %v14442_v37 }
0x1c17   : > { %v14444_v2 = vadd.f32 %v14428_v41, %v22989_v10  ;;  %v14446_v12 = vadd.f32 %v14430_v38, %v22992_v57  ;;  %v14457_v62 = vadd.f32 %v25111_v47, %v14441_v61  ;;  %v14459_v49 = vadd.f32 %v25115_v27, %v14443_v21 }
0x1c18   : > { %v14445_v4 = vadd.f32 %v14429_v17, %v22995_v7  ;;  %v14447_v8 = vadd.f32 %v14431_v3, %v22998_v5  ;;  %v14472_v15 = vmax.f32 %v14456_v20, 0.0  ;;  %v14474_v46 = vmax.f32 %v14458_v25, 0.0 }
0x1c19   : > { %v14460_v45 = vadd.f32 %v25121_v40, %v14444_v2  ;;  %v14462_v10 = vadd.f32 %v25125_v24, %v14446_v12  ;;  %v14473_v57 = vmax.f32 %v14457_v62, 0.0  ;;  %v14475_v47 = vmax.f32 %v14459_v49, 0.0 }
0x1c1a   : > { %v14461_v13 = vadd.f32 %v25129_v44, %v14445_v4  ;;  %v14463_v27 = vadd.f32 %v25133_v50, %v14447_v8  ;;  %17082 = vst [vmem:[%s23021_s16 + $0xc0] sm:$0xff] %v14472_v15  ;;  %17084 = vst [vmem:[%s23021_s16 + $0xd0] sm:$0xff] %v14474_v46 }
0x1c1b   : > { %v14476_v7 = vmax.f32 %v14460_v45, 0.0  ;;  %v14478_v5 = vmax.f32 %v14462_v10, 0.0  ;;  %17083 = vst [vmem:[%s23021_s16 + $0xc8] sm:$0xff] %v14473_v57  ;;  %17085 = vst [vmem:[%s23021_s16 + $0xd8] sm:$0xff] %v14475_v47 }
0x1c1c   : > { %v14477_v48 = vmax.f32 %v14461_v13, 0.0  ;;  %v14479_v22 = vmax.f32 %v14463_v27, 0.0 }
0x1c1d   : > { %17086 = vst [vmem:[%s23021_s16 + $0xe0] sm:$0x1] %v14476_v7  ;;  %17088 = vst [vmem:[%s23021_s16 + $0xf0] sm:$0x1] %v14478_v5 }
0x1c1e   : > { %17087 = vst [vmem:[%s23021_s16 + $0xe8] sm:$0x1] %v14477_v48  ;;  %17089 = vst [vmem:[%s23021_s16 + $0xf8] sm:$0x1] %v14479_v22 }
0x1c1f PF: > { %s22_s21 = sadd.s32 1, %s20094_s21  }
0x1c20   : > { %p19_p4 = scmp.ge.s32.totalorder %s22_s21, 4  }
0x1c22   :  { %21 = sbr.rel (!%p19_p4) target bundleno = 1 (0x1), region = 112 }

</bundles_post_ra>
